<compile_context>
chip_gen: v7x
topology: tpu7x:2x2x1
jax: 0.10.0
libtpu: 0.0.40
codegen_flags: <defaults>
</compile_context>

<pallas_src>
import functools

import numpy as np

import jax
import jax.numpy as jnp
from jax.experimental import pallas as pl
from jax.experimental.pallas import tpu as pltpu


_NEG_INF = -1e30  # pad value for b2 columns -> padded logits never win the CE softmax


def _round_up(x, m):
    return (x + m - 1) // m * m


def _default_vmem_limit():
    """Generation-aware VMEM request: ~80% of physical capacity, never more
    than ~112 MiB (leaves Mosaic internal-scratch headroom on every gen:
    ~51 MiB on v7x, ~102 MiB on v5e/v6e)."""
    cap = 64 * 1024 * 1024  # conservative fallback = v7x per-TC physical VMEM
    try:
        info = pltpu.get_tpu_info()
        cap = int(getattr(info, "vmem_capacity_bytes", cap) or cap)
    except Exception:
        pass
    return min(int(0.8 * cap), 112 * 1024 * 1024)


# ----------------------------------------------------------------------------
# Pallas kernels: fused wsd_head (BatchNorm pre-folded into W1/b1 on host)
#   grid = (row tiles [parallel], vocab tiles [arbitrary, innermost])
#   h = swish(x @ W1 + b1) is computed once per row tile (vocab step 0) into a
#   VMEM scratch and reused for every vocab tile of the second matmul.
#   NOTE: this h-scratch reuse is only correct because the vocab axis is the
#   LAST (sequentially executed, "arbitrary") grid axis.  Do not reorder the
#   grid axes or mark the vocab axis "parallel".
# ----------------------------------------------------------------------------
def _wsd_head_logits_kernel(x_ref, w1_ref, b1_ref, w2_ref, b2_ref,
                            out_ref, h_ref):
    @pl.when(pl.program_id(1) == 0)
    def _():
        # Linear(E, E): bf16 operands on the MXU, f32 accumulation.
        h = jnp.dot(x_ref[...], w1_ref[...], preferred_element_type=jnp.float32)
        h = h + b1_ref[...]
        # Swish in f32 (sigmoid on the EUP), cached as bf16 for the 2nd matmul.
        h_ref[...] = (h * jax.nn.sigmoid(h)).astype(h_ref.dtype)

    # Linear(E, tile_v) for this vocab tile; logits stored bf16 (lane dense).
    logits = jnp.dot(h_ref[...], w2_ref[...], preferred_element_type=jnp.float32)
    out_ref[...] = (logits + b2_ref[...]).astype(out_ref.dtype)


def _wsd_head_ce_kernel(x_ref, w1_ref, b1_ref, w2_ref, b2_ref, labels_ref,
                        out_ref, loss_ref, h_ref, m_ref, s_ref, p_ref):
    j = pl.program_id(1)

    @pl.when(j == 0)
    def _():
        h = jnp.dot(x_ref[...], w1_ref[...], preferred_element_type=jnp.float32)
        h = h + b1_ref[...]
        h_ref[...] = (h * jax.nn.sigmoid(h)).astype(h_ref.dtype)
        m_ref[...] = jnp.full(m_ref.shape, -jnp.inf, jnp.float32)
        s_ref[...] = jnp.zeros(s_ref.shape, jnp.float32)
        p_ref[...] = jnp.zeros(p_ref.shape, jnp.float32)

    logits = jnp.dot(h_ref[...], w2_ref[...], preferred_element_type=jnp.float32)
    logits = logits + b2_ref[...]
    out_ref[...] = logits.astype(out_ref.dtype)

    tn, tv = logits.shape

    # Online logsumexp over the vocab axis.  Padded vocab columns carry a
    # b2 of -1e30, so exp(pad - m) underflows to 0 and they never set the max.
    m_new = jnp.maximum(m_ref[...], jnp.max(logits, axis=-1, keepdims=True))
    alpha = jnp.exp(m_ref[...] - m_new)
    s_ref[...] = alpha * s_ref[...] + jnp.sum(jnp.exp(logits - m_new),
                                              axis=-1, keepdims=True)
    m_ref[...] = m_new

    # Picked logit (label gather) via lane compare: labels are global vocab ids.
    lane = jax.lax.broadcasted_iota(jnp.int32, (tn, tv), 1) + j * tv
    hit = lane == labels_ref[...]
    p_ref[...] += jnp.sum(jnp.where(hit, logits, 0.0), axis=-1, keepdims=True)

    @pl.when(j == pl.num_programs(1) - 1)
    def _():
        # per-row CE contribution: logsumexp - picked_logit
        loss_ref[...] = m_ref[...] + jnp.log(s_ref[...]) - p_ref[...]


# ----------------------------------------------------------------------------
# Host-side (load-time) parameter preparation — hoisted out of the hot path
# ----------------------------------------------------------------------------
def fold_batchnorm_into_linear(gamma, beta, mean, var, w1, b1, eps=1e-5):
    """xn = (x - mean)/sqrt(var+eps)*gamma + beta ; y = xn @ W1 + b1
       => y = x @ (scale[:,None] * W1) + (shift @ W1 + b1)   (eval-mode BN)."""
    scale = gamma.reshape(-1) * jax.lax.rsqrt(var.reshape(-1) + eps)   # (E,)
    shift = beta.reshape(-1) - mean.reshape(-1) * scale                # (E,)
    w1_f = w1 * scale[:, None]
    b1_f = b1 + shift[None, :] @ w1
    return w1_f, b1_f


def prepare_wsd_head_params(bn_gamma, bn_beta, bn_mean, bn_var, w1, b1, w2, b2,
                            *, tile_v=2048, eps=1e-5):
    """One-time prep:
       - fold eval-mode BatchNorm1d into Linear1 (Dropout is identity in eval)
       - cast matmul weights to bf16 (f32 MXU accumulation in-kernel)
       - pad W2/b2 to a lane-dense multiple of the (power-of-two >=256) vocab
         tile; padded b2 columns get -1e30 so fused CE ignores them.
    Returns (arrays, meta) with meta = {"out_vocab", "tile_v"} (static ints)."""
    e, v = w2.shape
    w1f, b1f = fold_batchnorm_into_linear(bn_gamma, bn_beta, bn_mean, bn_var,
                                          w1, b1, eps)
    tv = max(256, pl.next_power_of_2(int(min(int(tile_v), max(v, 256)))))
    v_pad = _round_up(v, tv)
    if v_pad != v:
        w2 = jnp.pad(w2, ((0, 0), (0, v_pad - v)))
        b2 = jnp.pad(b2, ((0, 0), (0, v_pad - v)), constant_values=_NEG_INF)
    arrays = {
        "w1": w1f.astype(jnp.bfloat16),
        "b1": b1f.astype(jnp.float32),
        "w2": w2.astype(jnp.bfloat16),
        "b2": b2.astype(jnp.float32),
    }
    meta = {"out_vocab": int(v), "tile_v": int(tv)}
    return arrays, meta


# ----------------------------------------------------------------------------
# Pallas wrapper
# ----------------------------------------------------------------------------
def wsd_head_pallas(x, w1, b1, w2, b2, out_vocab, labels=None, *,
                    tile_n=256, tile_v=2048, logits_dtype=jnp.bfloat16,
                    vmem_limit_bytes=None):
    """Fused wsd_head: Linear(BN-folded) -> Swish -> Linear [-> fused CE].

    x:  (N, E)      selected embeddings (any float dtype; cast to bf16 here)
    w1: (E, E)      bf16, BN already folded in (from prepare_wsd_head_params)
    b1: (1, E)      f32
    w2: (E, Vpad)   bf16, pre-padded to a multiple of 256 lanes
    b2: (1, Vpad)   f32, padded columns = -1e30
    out_vocab:      real vocab size (static int)
    labels:         optional (N,) int32 targets -> fused CE loss
    Returns (loss_or_None, logits[N, out_vocab] in `logits_dtype`).
    """
    n, e = x.shape
    v_pad = w2.shape[1]
    v = int(out_vocab)
    assert v_pad % 256 == 0 and v <= v_pad, "w2/b2 must be pre-padded (prepare_wsd_head_params)"
    with_ce = labels is not None

    # ---- tiling --------------------------------------------------------------
    # Rows: multiple of 16 (bf16 sublane packing); prefer all rows in one tile.
    tn = min(_round_up(int(tile_n), 16), _round_up(n, 16))
    # Vocab: power-of-two multiple of 256, dividing v_pad.
    tv = min(max(256, pl.next_power_of_2(int(tile_v))), v_pad)
    while v_pad % tv != 0:
        tv //= 2
    assert tv >= 256 and v_pad % tv == 0

    # ---- generation-aware VMEM budget ----------------------------------------
    if vmem_limit_bytes is None:
        vmem_limit_bytes = _default_vmem_limit()
    budget = int(0.85 * vmem_limit_bytes)
    out_isz = np.dtype(logits_dtype).itemsize

    def vmem_bytes(tn_, tv_, w2_bufs_):
        small = 128 * 4                                  # (tn,1) lane-padded cols
        bts = 2 * tn_ * e * 2                            # x tile, double-buffered bf16
        bts += e * e * 2 + 8 * e * 4                     # W1 (1 buf) + b1
        bts += w2_bufs_ * (e * tv_ * 2 + 8 * tv_ * 4)    # W2 / b2 stream
        bts += 2 * tn_ * tv_ * out_isz                   # logits out (dbl-buffered)
        bts += tn_ * e * 2                               # h scratch
        if with_ce:
            bts += 7 * tn_ * small                       # labels-in, loss-out, m/s/p
        return bts

    n_vocab_tiles = v_pad // tv
    w2_bufs = 2
    # Deeper W2 pipelining only on big-VMEM parts (v5e/v6e) with a long vocab grid.
    if (vmem_limit_bytes >= 100 * 1024 * 1024 and n_vocab_tiles >= 4
            and vmem_bytes(tn, tv, 3) <= budget):
        w2_bufs = 3

    while vmem_bytes(tn, tv, w2_bufs) > budget:
        if tv > 256:
            tv //= 2
        elif w2_bufs > 2:
            w2_bufs -= 1
        elif tn > 16:
            tn = max(16, _round_up(tn // 2, 16))
        else:
            break

    n_pad = _round_up(n, tn)

    # ---- per-call input prep (only x / labels vary per call) -----------------
    x = x.astype(jnp.bfloat16)
    if n_pad != n:
        x = jnp.pad(x, ((0, n_pad - n), (0, 0)))
    if with_ce:
        lab = labels.reshape(-1).astype(jnp.int32)
        if n_pad != n:
            lab = jnp.pad(lab, (0, n_pad - n))
        lab = lab.reshape(n_pad, 1)

    grid = (n_pad // tn, v_pad // tv)
    const = lambda i, j: (0, 0)

    def w2_spec(shape, idx):
        if w2_bufs == 2:
            return pl.BlockSpec(shape, idx)
        return pl.BlockSpec(shape, idx, pipeline_mode=pl.Buffered(w2_bufs))

    in_specs = [
        pl.BlockSpec((tn, e), lambda i, j: (i, 0)),                       # x row tile
        pl.BlockSpec((e, e), const, pipeline_mode=pl.Buffered(1)),        # W1 (constant)
        pl.BlockSpec((1, e), const, pipeline_mode=pl.Buffered(1)),        # b1 (constant)
        w2_spec((e, tv), lambda i, j: (0, j)),                            # W2 vocab tile
        w2_spec((1, tv), lambda i, j: (0, j)),                            # b2 vocab tile
    ]
    args = [x, w1, b1, w2, b2]
    scratch = [pltpu.VMEM((tn, e), jnp.bfloat16)]                         # cached h

    if with_ce:
        in_specs.append(pl.BlockSpec((tn, 1), lambda i, j: (i, 0)))       # labels
        args.append(lab)
        out_shape = (jax.ShapeDtypeStruct((n_pad, v_pad), logits_dtype),
                     jax.ShapeDtypeStruct((n_pad, 1), jnp.float32))
        out_specs = [pl.BlockSpec((tn, tv), lambda i, j: (i, j)),
                     pl.BlockSpec((tn, 1), lambda i, j: (i, 0))]
        scratch += [pltpu.VMEM((tn, 1), jnp.float32)] * 3                 # m, s, picked
        kernel = _wsd_head_ce_kernel
    else:
        out_shape = jax.ShapeDtypeStruct((n_pad, v_pad), logits_dtype)
        out_specs = pl.BlockSpec((tn, tv), lambda i, j: (i, j))
        kernel = _wsd_head_logits_kernel

    # h-scratch reuse requires the vocab axis to be the last, sequential axis.
    dims = ("parallel", "arbitrary")
    assert dims[-1] == "arbitrary"

    n_row_tiles = n_pad // tn
    flops = 2 * n_pad * e * e + 2 * n_pad * e * v_pad
    transcendentals = n_pad * e + (n_pad * v_pad if with_ce else 0)
    bytes_accessed = (n_pad * e * 2 + e * e * 2 + e * 4
                      + n_row_tiles * (e * v_pad * 2 + v_pad * 4)
                      + n_pad * v_pad * out_isz
                      + (n_pad * 8 if with_ce else 0))
    cost = pl.CostEstimate(flops=flops, transcendentals=transcendentals,
                           bytes_accessed=bytes_accessed)

    outs = pl.pallas_call(
        kernel,
        out_shape=out_shape,
        grid_spec=pltpu.PrefetchScalarGridSpec(
            num_scalar_prefetch=0,
            grid=grid,
            in_specs=in_specs,
            out_specs=out_specs,
            scratch_shapes=scratch),
        compiler_params=pltpu.CompilerParams(
            dimension_semantics=dims,
            vmem_limit_bytes=int(vmem_limit_bytes)),
        cost_estimate=cost,
    )(*args)

    if with_ce:
        logits_pad, loss_rows = outs
        loss = jnp.mean(loss_rows[:n, 0])          # mean over the real rows
        return loss, logits_pad[:n, :v]
    return None, outs[:n, :v]


# ----------------------------------------------------------------------------
# Plain-JAX glue reproducing the module's forward semantics
# ----------------------------------------------------------------------------
def get_relevant_embeddings(embeddings, labels_mask, n_sel):
    """masked_select(labels_mask).view(-1, E) with a static selected count.

    The caller must guarantee the mask has exactly n_sel True entries (static
    shape contract): fewer -> jnp.nonzero pads with index 0, more -> rows are
    dropped, both diverging from torch.masked_select."""
    e = embeddings.shape[-1]
    flat = embeddings.reshape(-1, e)
    idx = jnp.nonzero(labels_mask.reshape(-1), size=n_sel)[0]
    return jnp.take(flat, idx, axis=0)


def cross_entropy(logits, labels):
    """nn.CrossEntropyLoss() (mean reduction) — used only as a reference."""
    logits = logits.astype(jnp.float32)
    lse = jax.nn.logsumexp(logits, axis=-1)
    picked = jnp.take_along_axis(logits, labels[:, None], axis=-1)[:, 0]
    return jnp.mean(lse - picked)


def transformer_wsd_forward(params, head, input_ids, labels_mask, labels, *,
                            n_sel, out_vocab, tile_n=256, tile_v=2048):
    # --- stand-in encoder: deterministic embedding lookup --------------------
    # TODO(synk): real HuggingFace encoder not translated; lookup stands in for
    #             encoder(...).last_hidden_state.
    last_hidden_state = params["embed_table"][input_ids]          # (B, S, E)

    # --- get_relevant_embeddings ----------------------------------------------
    encoded = get_relevant_embeddings(last_hidden_state, labels_mask, n_sel)

    # --- wsd_head (+ optionally fused CE loss) --------------------------------
    loss, logits = wsd_head_pallas(
        encoded, head["w1"], head["b1"], head["w2"], head["b2"], out_vocab,
        labels=None if labels is None else labels.reshape(-1),
        tile_n=tile_n, tile_v=tile_v)
    return loss, logits


# ----------------------------------------------------------------------------
# Deterministic parameter init + example run
# ----------------------------------------------------------------------------
def init_params(key, vocab_in, embed_size, out_vocab):
    ks = jax.random.split(key, 8)
    scale1 = 1.0 / jnp.sqrt(embed_size)
    params = {
        # stand-in encoder embedding table
        "embed_table": jax.random.normal(ks[0], (vocab_in, embed_size),
                                         jnp.float32) * 0.02,
        # BatchNorm1d(embed_size) — eval-mode running stats
        "bn_gamma": jax.random.uniform(ks[1], (1, embed_size), jnp.float32,
                                       0.8, 1.2),
        "bn_beta": jax.random.normal(ks[2], (1, embed_size), jnp.float32) * 0.1,
        "bn_mean": jax.random.normal(ks[3], (1, embed_size), jnp.float32) * 0.1,
        "bn_var": jax.random.uniform(ks[4], (1, embed_size), jnp.float32,
                                     0.5, 1.5),
        # Linear(embed_size, embed_size): stored as (in, out) = W.T
        "w1": jax.random.uniform(ks[5], (embed_size, embed_size), jnp.float32,
                                 -scale1, scale1),
        "b1": jnp.zeros((1, embed_size), jnp.float32),
        # Linear(embed_size, out_vocab): stored as (in, out) = W.T
        "w2": jax.random.uniform(ks[6], (embed_size, out_vocab), jnp.float32,
                                 -scale1, scale1),
        "b2": jax.random.normal(ks[7], (1, out_vocab), jnp.float32) * 0.01,
    }
    return params


if __name__ == "__main__":
    key = jax.random.PRNGKey(0)

    B, S = 2, 160              # batch, sequence length
    E = 256                    # encoder hidden size (embedding_size)
    V_IN = 64                  # stand-in encoder token vocab
    OUT_VOCAB = 2000           # wsd output vocab (not a multiple of 128 -> pad path)
    SEL_PER_SEQ = 144
    N_SEL = B * SEL_PER_SEQ    # 288 selected tokens -> 2 row tiles at tn=256

    k_p, k_ids, k_lab = jax.random.split(key, 3)
    params = init_params(k_p, V_IN, E, OUT_VOCAB)

    # One-time load-time prep (BN fold, bf16 cast, lane-dense pad) — hoisted
    # out of the per-call hot path.
    head, meta = prepare_wsd_head_params(
        params["bn_gamma"], params["bn_beta"], params["bn_mean"],
        params["bn_var"], params["w1"], params["b1"],
        params["w2"], params["b2"], tile_v=1024)

    input_ids = jax.random.randint(k_ids, (B, S), 0, V_IN, jnp.int32)
    # labels_mask with exactly N_SEL ones (SEL_PER_SEQ per sequence)
    labels_mask = jnp.zeros((B, S), dtype=bool).at[:, :SEL_PER_SEQ].set(True)
    labels = jax.random.randint(k_lab, (N_SEL,), 0, OUT_VOCAB, jnp.int32)

    fwd = jax.jit(functools.partial(
        transformer_wsd_forward, n_sel=N_SEL, out_vocab=meta["out_vocab"],
        tile_n=256, tile_v=meta["tile_v"]))

    # Fused-CE path (labels given): grid (2 row tiles, 2 vocab tiles).
    loss, logits = fwd(params, head, input_ids, labels_mask, labels)
    loss = jax.block_until_ready(loss)
    logits = jax.block_until_ready(logits)
    assert logits.shape == (N_SEL, OUT_VOCAB)

    # Logits-only path (labels=None).
    _, logits_nl = fwd(params, head, input_ids, labels_mask, None)
    logits_nl = jax.block_until_ready(logits_nl)

    # --- pure-JAX f32 reference: BN(eval) -> Dropout(eval) -> Linear -> Swish -> Linear
    hp = jax.lax.Precision.HIGHEST
    flat = params["embed_table"][input_ids].reshape(-1, E)
    idx = jnp.nonzero(labels_mask.reshape(-1), size=N_SEL)[0]
    x_sel = flat[idx]
    xn = ((x_sel - params["bn_mean"]) / jnp.sqrt(params["bn_var"] + 1e-5)
          * params["bn_gamma"] + params["bn_beta"])
    h = jnp.dot(xn, params["w1"], precision=hp) + params["b1"]
    h = h * jax.nn.sigmoid(h)
    ref_logits = jnp.dot(h, params["w2"], precision=hp) + params["b2"]
    ref_loss = cross_entropy(ref_logits, labels)

    err = float(jnp.max(jnp.abs(logits.astype(jnp.float32) - ref_logits)))
    err_nl = float(jnp.max(jnp.abs(logits_nl.astype(jnp.float32) - ref_logits)))
    loss_err = abs(float(loss) - float(ref_loss))
    assert err < 2e-2 and err_nl < 2e-2, ("logits mismatch", err, err_nl)
    assert loss_err < 1e-2, ("loss mismatch", loss_err)
    assert bool(jnp.isfinite(loss))

    print("KERNEL_OK")
</pallas_src>

<mosaic_0001>
module attributes {stable_mosaic.version = 11 : i64} {
  func.func private @main(%arg0: i32) attributes {dimension_semantics = [#tpu.dimension_semantics<core_parallel>], iteration_bounds = array<i64: 2>, tpu.core_type = #tpu.core_type<sc_scalar_subcore>, window_params = []} {
    return
  }
}

module attributes {stable_mosaic.version = 11 : i64} {
  func.func private @main(%arg0: i32) attributes {dimension_semantics = [#tpu.dimension_semantics<core_parallel>], iteration_bounds = array<i64: 2>, tpu.core_type = #tpu.core_type<sc_scalar_subcore>, window_params = []} {
    return
  }
}

module attributes {stable_mosaic.version = 11 : i64} {
  func.func @_wsd_head_ce_kernel(%arg0: i32, %arg1: i32, %arg2: memref<256x256xbf16, #tpu.memory_space<vmem>>, %arg3: memref<256x256xbf16, #tpu.memory_space<vmem>>, %arg4: memref<1x256xf32, #tpu.memory_space<vmem>>, %arg5: memref<256x1024xbf16, #tpu.memory_space<vmem>>, %arg6: memref<1x1024xf32, #tpu.memory_space<vmem>>, %arg7: memref<256x1xi32, #tpu.memory_space<vmem>>, %arg8: memref<256x1024xbf16, #tpu.memory_space<vmem>>, %arg9: memref<256x1xf32, #tpu.memory_space<vmem>>, %arg10: memref<256x256xbf16, #tpu.memory_space<vmem>>, %arg11: memref<256x1xf32, #tpu.memory_space<vmem>>, %arg12: memref<256x1xf32, #tpu.memory_space<vmem>>, %arg13: memref<256x1xf32, #tpu.memory_space<vmem>>) attributes {dimension_semantics = [#tpu.dimension_semantics<parallel>, #tpu.dimension_semantics<arbitrary>], iteration_bounds = array<i64: 2, 2>, scalar_prefetch = 0 : i64, scratch_operands = 4 : i64, tpu.core_type = #tpu.core_type<tc>, window_params = [{transform_indices = @transform_0, window_bounds = array<i64: 256, 256>}, {pipeline_mode = #tpu.pipeline_mode<synchronous>, transform_indices = @transform_1, window_bounds = array<i64: 256, 256>}, {pipeline_mode = #tpu.pipeline_mode<synchronous>, transform_indices = @transform_2, window_bounds = array<i64: 1, 256>}, {transform_indices = @transform_3, window_bounds = array<i64: 256, 1024>}, {transform_indices = @transform_4, window_bounds = array<i64: 1, 1024>}, {transform_indices = @transform_5, window_bounds = array<i64: 256, 1>}, {transform_indices = @transform_6, window_bounds = array<i64: 256, 1024>}, {transform_indices = @transform_7, window_bounds = array<i64: 256, 1>}]} {
    %c0_i32 = arith.constant 0 : i32
    %0 = arith.cmpi eq, %arg1, %c0_i32 : i32
    %1 = arith.extui %0 : i1 to i32
    %c0_i32_0 = arith.constant 0 : i32
    %2 = arith.cmpi ne, %1, %c0_i32_0 : i32
    scf.if %2 {
      %c0_29 = arith.constant 0 : index
      %c0_30 = arith.constant 0 : index
      %45 = vector.load %arg2[%c0_29, %c0_30] : memref<256x256xbf16, #tpu.memory_space<vmem>>, vector<256x256xbf16>
      %c0_31 = arith.constant 0 : index
      %c0_32 = arith.constant 0 : index
      %46 = vector.load %arg3[%c0_31, %c0_32] : memref<256x256xbf16, #tpu.memory_space<vmem>>, vector<256x256xbf16>
      %cst_33 = arith.constant dense<0.000000e+00> : vector<256x256xf32>
      %47 = tpu.matmul %45, %46, %cst_33 {dimension_numbers = #tpu.dot_dimension_numbers<[1], [0], [0], [1], [0, 0, 1, 1], [], []>} : vector<256x256xbf16>, vector<256x256xbf16>, vector<256x256xf32> -> vector<256x256xf32>
      %c0_34 = arith.constant 0 : index
      %c0_35 = arith.constant 0 : index
      %48 = vector.load %arg4[%c0_34, %c0_35] : memref<1x256xf32, #tpu.memory_space<vmem>>, vector<1x256xf32>
      %49 = vector.broadcast %48 : vector<1x256xf32> to vector<256x256xf32>
      %50 = arith.addf %47, %49 : vector<256x256xf32>
      %51 = arith.negf %50 : vector<256x256xf32>
      %52 = math.exp %51 : vector<256x256xf32>
      %cst_36 = arith.constant 1.000000e+00 : f32
      %53 = vector.broadcast %cst_36 : f32 to vector<256x256xf32>
      %54 = arith.addf %53, %52 : vector<256x256xf32>
      %55 = arith.divf %53, %54 : vector<256x256xf32>
      %56 = arith.mulf %50, %55 : vector<256x256xf32>
      %57 = arith.truncf %56 : vector<256x256xf32> to vector<256x256xbf16>
      %c0_37 = arith.constant 0 : index
      %c0_38 = arith.constant 0 : index
      %58 = vector.load %arg10[%c0_37, %c0_38] : memref<256x256xbf16, #tpu.memory_space<vmem>>, vector<256x256xbf16>
      tpu.vector_store %arg10[%c0_37, %c0_38], %57 {strides = array<i32>} : memref<256x256xbf16, #tpu.memory_space<vmem>>, vector<256x256xbf16>,
      %cst_39 = arith.constant 0xFF800000 : f32
      %59 = vector.broadcast %cst_39 : f32 to vector<256x1xf32>
      %c0_40 = arith.constant 0 : index
      %c0_41 = arith.constant 0 : index
      %60 = vector.load %arg11[%c0_40, %c0_41] : memref<256x1xf32, #tpu.memory_space<vmem>>, vector<256x1xf32>
      tpu.vector_store %arg11[%c0_40, %c0_41], %59 {strides = array<i32>} : memref<256x1xf32, #tpu.memory_space<vmem>>, vector<256x1xf32>,
      %cst_42 = arith.constant 0.000000e+00 : f32
      %61 = vector.broadcast %cst_42 : f32 to vector<256x1xf32>
      %c0_43 = arith.constant 0 : index
      %c0_44 = arith.constant 0 : index
      %62 = vector.load %arg12[%c0_43, %c0_44] : memref<256x1xf32, #tpu.memory_space<vmem>>, vector<256x1xf32>
      tpu.vector_store %arg12[%c0_43, %c0_44], %61 {strides = array<i32>} : memref<256x1xf32, #tpu.memory_space<vmem>>, vector<256x1xf32>,
      %cst_45 = arith.constant 0.000000e+00 : f32
      %63 = vector.broadcast %cst_45 : f32 to vector<256x1xf32>
      %c0_46 = arith.constant 0 : index
      %c0_47 = arith.constant 0 : index
      %64 = vector.load %arg13[%c0_46, %c0_47] : memref<256x1xf32, #tpu.memory_space<vmem>>, vector<256x1xf32>
      tpu.vector_store %arg13[%c0_46, %c0_47], %63 {strides = array<i32>} : memref<256x1xf32, #tpu.memory_space<vmem>>, vector<256x1xf32>,
    } else {
    }
    %c0 = arith.constant 0 : index
    %c0_1 = arith.constant 0 : index
    %3 = vector.load %arg10[%c0, %c0_1] : memref<256x256xbf16, #tpu.memory_space<vmem>>, vector<256x256xbf16>
    %c0_2 = arith.constant 0 : index
    %c0_3 = arith.constant 0 : index
    %4 = vector.load %arg5[%c0_2, %c0_3] : memref<256x1024xbf16, #tpu.memory_space<vmem>>, vector<256x1024xbf16>
    %cst = arith.constant dense<0.000000e+00> : vector<256x1024xf32>
    %5 = tpu.matmul %3, %4, %cst {dimension_numbers = #tpu.dot_dimension_numbers<[1], [0], [0], [1], [0, 0, 1, 1], [], []>} : vector<256x256xbf16>, vector<256x1024xbf16>, vector<256x1024xf32> -> vector<256x1024xf32>
    %c0_4 = arith.constant 0 : index
    %c0_5 = arith.constant 0 : index
    %6 = vector.load %arg6[%c0_4, %c0_5] : memref<1x1024xf32, #tpu.memory_space<vmem>>, vector<1x1024xf32>
    %7 = vector.broadcast %6 : vector<1x1024xf32> to vector<256x1024xf32>
    %8 = arith.addf %5, %7 : vector<256x1024xf32>
    %9 = arith.truncf %8 : vector<256x1024xf32> to vector<256x1024xbf16>
    %c0_6 = arith.constant 0 : index
    %c0_7 = arith.constant 0 : index
    %10 = vector.load %arg8[%c0_6, %c0_7] : memref<256x1024xbf16, #tpu.memory_space<vmem>>, vector<256x1024xbf16>
    tpu.vector_store %arg8[%c0_6, %c0_7], %9 {strides = array<i32>} : memref<256x1024xbf16, #tpu.memory_space<vmem>>, vector<256x1024xbf16>,
    %c0_8 = arith.constant 0 : index
    %c0_9 = arith.constant 0 : index
    %11 = vector.load %arg11[%c0_8, %c0_9] : memref<256x1xf32, #tpu.memory_space<vmem>>, vector<256x1xf32>
    %cst_10 = arith.constant dense<0xFF800000> : vector<256xf32>
    %12 = vector.multi_reduction <maximumf>, %8, %cst_10 [1] : vector<256x1024xf32> to vector<256xf32>
    %13 = vector.shape_cast %12 : vector<256xf32> to vector<256x1xf32>
    %14 = arith.maximumf %11, %13 : vector<256x1xf32>
    %c0_11 = arith.constant 0 : index
    %c0_12 = arith.constant 0 : index
    %15 = vector.load %arg11[%c0_11, %c0_12] : memref<256x1xf32, #tpu.memory_space<vmem>>, vector<256x1xf32>
    %16 = arith.subf %15, %14 : vector<256x1xf32>
    %17 = math.exp %16 : vector<256x1xf32>
    %c0_13 = arith.constant 0 : index
    %c0_14 = arith.constant 0 : index
    %18 = vector.load %arg12[%c0_13, %c0_14] : memref<256x1xf32, #tpu.memory_space<vmem>>, vector<256x1xf32>
    %19 = arith.mulf %17, %18 : vector<256x1xf32>
    %20 = vector.broadcast %14 : vector<256x1xf32> to vector<256x1024xf32>
    %21 = arith.subf %8, %20 : vector<256x1024xf32>
    %22 = math.exp %21 : vector<256x1024xf32>
    %cst_15 = arith.constant dense<0.000000e+00> : vector<256xf32>
    %23 = vector.multi_reduction <add>, %22, %cst_15 [1] : vector<256x1024xf32> to vector<256xf32>
    %24 = vector.shape_cast %23 : vector<256xf32> to vector<256x1xf32>
    %25 = arith.addf %19, %24 : vector<256x1xf32>
    %c0_16 = arith.constant 0 : index
    %c0_17 = arith.constant 0 : index
    %26 = vector.load %arg12[%c0_16, %c0_17] : memref<256x1xf32, #tpu.memory_space<vmem>>, vector<256x1xf32>
    tpu.vector_store %arg12[%c0_16, %c0_17], %25 {strides = array<i32>} : memref<256x1xf32, #tpu.memory_space<vmem>>, vector<256x1xf32>,
    %c0_18 = arith.constant 0 : index
    %c0_19 = arith.constant 0 : index
    %27 = vector.load %arg11[%c0_18, %c0_19] : memref<256x1xf32, #tpu.memory_space<vmem>>, vector<256x1xf32>
    tpu.vector_store %arg11[%c0_18, %c0_19], %14 {strides = array<i32>} : memref<256x1xf32, #tpu.memory_space<vmem>>, vector<256x1xf32>,
    %28 = tpu.iota {dimensions = array<i32: 1>} : vector<256x1024xi32>
    %c1024_i32 = arith.constant 1024 : i32
    %29 = arith.muli %arg1, %c1024_i32 : i32
    %30 = vector.broadcast %29 : i32 to vector<256x1024xi32>
    %31 = arith.addi %28, %30 : vector<256x1024xi32>
    %c0_20 = arith.constant 0 : index
    %c0_21 = arith.constant 0 : index
    %32 = vector.load %arg7[%c0_20, %c0_21] : memref<256x1xi32, #tpu.memory_space<vmem>>, vector<256x1xi32>
    %33 = vector.broadcast %32 : vector<256x1xi32> to vector<256x1024xi32>
    %34 = arith.cmpi eq, %31, %33 : vector<256x1024xi32>
    %c0_22 = arith.constant 0 : index
    %c0_23 = arith.constant 0 : index
    %35 = vector.load %arg13[%c0_22, %c0_23] : memref<256x1xf32, #tpu.memory_space<vmem>>, vector<256x1xf32>
    %cst_24 = arith.constant 0.000000e+00 : f32
    %36 = vector.broadcast %cst_24 : f32 to vector<256x1024xf32>
    %37 = arith.select %34, %8, %36 : vector<256x1024xi1>, vector<256x1024xf32>
    %cst_25 = arith.constant dense<0.000000e+00> : vector<256xf32>
    %38 = vector.multi_reduction <add>, %37, %cst_25 [1] : vector<256x1024xf32> to vector<256xf32>
    %39 = vector.shape_cast %38 : vector<256xf32> to vector<256x1xf32>
    %40 = arith.addf %35, %39 : vector<256x1xf32>
    %c0_26 = arith.constant 0 : index
    %c0_27 = arith.constant 0 : index
    %41 = vector.load %arg13[%c0_26, %c0_27] : memref<256x1xf32, #tpu.memory_space<vmem>>, vector<256x1xf32>
    tpu.vector_store %arg13[%c0_26, %c0_27], %40 {strides = array<i32>} : memref<256x1xf32, #tpu.memory_space<vmem>>, vector<256x1xf32>,
    %c1_i32 = arith.constant 1 : i32
    %42 = arith.cmpi eq, %arg1, %c1_i32 : i32
    %43 = arith.extui %42 : i1 to i32
    %c0_i32_28 = arith.constant 0 : i32
    %44 = arith.cmpi ne, %43, %c0_i32_28 : i32
    scf.if %44 {
      %c0_29 = arith.constant 0 : index
      %c0_30 = arith.constant 0 : index
      %45 = vector.load %arg11[%c0_29, %c0_30] : memref<256x1xf32, #tpu.memory_space<vmem>>, vector<256x1xf32>
      %c0_31 = arith.constant 0 : index
      %c0_32 = arith.constant 0 : index
      %46 = vector.load %arg12[%c0_31, %c0_32] : memref<256x1xf32, #tpu.memory_space<vmem>>, vector<256x1xf32>
      %47 = math.log %46 : vector<256x1xf32>
      %48 = arith.addf %45, %47 : vector<256x1xf32>
      %c0_33 = arith.constant 0 : index
      %c0_34 = arith.constant 0 : index
      %49 = vector.load %arg13[%c0_33, %c0_34] : memref<256x1xf32, #tpu.memory_space<vmem>>, vector<256x1xf32>
      %50 = arith.subf %48, %49 : vector<256x1xf32>
      %c0_35 = arith.constant 0 : index
      %c0_36 = arith.constant 0 : index
      %51 = vector.load %arg9[%c0_35, %c0_36] : memref<256x1xf32, #tpu.memory_space<vmem>>, vector<256x1xf32>
      tpu.vector_store %arg9[%c0_35, %c0_36], %50 {strides = array<i32>} : memref<256x1xf32, #tpu.memory_space<vmem>>, vector<256x1xf32>,
    } else {
    }
    return
  }
  func.func @transform_0(%arg0: i32, %arg1: i32) -> (i32, i32) {
    %c0_i32 = arith.constant 0 : i32
    %c0_i32_0 = arith.constant 0 : i32
    return %arg0, %c0_i32 : i32, i32
  }
  func.func @transform_1(%arg0: i32, %arg1: i32) -> (i32, i32) {
    %c0_i32 = arith.constant 0 : i32
    %c0_i32_0 = arith.constant 0 : i32
    %c0_i32_1 = arith.constant 0 : i32
    return %c0_i32, %c0_i32_0 : i32, i32
  }
  func.func @transform_2(%arg0: i32, %arg1: i32) -> (i32, i32) {
    %c0_i32 = arith.constant 0 : i32
    %c0_i32_0 = arith.constant 0 : i32
    %c0_i32_1 = arith.constant 0 : i32
    return %c0_i32, %c0_i32_0 : i32, i32
  }
  func.func @transform_3(%arg0: i32, %arg1: i32) -> (i32, i32) {
    %c0_i32 = arith.constant 0 : i32
    %c0_i32_0 = arith.constant 0 : i32
    return %c0_i32, %arg1 : i32, i32
  }
  func.func @transform_4(%arg0: i32, %arg1: i32) -> (i32, i32) {
    %c0_i32 = arith.constant 0 : i32
    %c0_i32_0 = arith.constant 0 : i32
    return %c0_i32, %arg1 : i32, i32
  }
  func.func @transform_5(%arg0: i32, %arg1: i32) -> (i32, i32) {
    %c0_i32 = arith.constant 0 : i32
    %c0_i32_0 = arith.constant 0 : i32
    return %arg0, %c0_i32 : i32, i32
  }
  func.func @transform_6(%arg0: i32, %arg1: i32) -> (i32, i32) {
    %c0_i32 = arith.constant 0 : i32
    return %arg0, %arg1 : i32, i32
  }
  func.func @transform_7(%arg0: i32, %arg1: i32) -> (i32, i32) {
    %c0_i32 = arith.constant 0 : i32
    %c0_i32_0 = arith.constant 0 : i32
    return %arg0, %c0_i32 : i32, i32
  }
}

</mosaic_0001>

<bundles_post_ra>
// kernel: transformer_wsd_forward.1
= control target key start
LH: loop header
LB: loop body
LE: loop exit
PB: predicated region body
PF: predicated region fallthrough
CT: control target
= control target key end

     0   :  { %s16781_s0 = inlined_call_operand.vmem [shape: bf16[512,256], index: 0, kind: input, shape index: {}]   ;;  %s16782_s1 = inlined_call_operand.vmem [shape: bf16[256,256], index: 1, kind: input, shape index: {}]   ;;  %s16783_s2 = inlined_call_operand.vmem [shape: f32[1,256], index: 2, kind: input, shape index: {}]   ;;  %s16784_s3 = inlined_call_operand.vmem [shape: bf16[256,2048], index: 3, kind: input, shape index: {}]   ;;  %s16785_s4 = inlined_call_operand.vmem [shape: f32[1,2048], index: 4, kind: input, shape index: {}]   ;;  %s16786_s5 = inlined_call_operand.vmem [shape: s32[512,1], index: 5, kind: input, shape index: {}]   ;;  %s16787_s6 = inlined_call_operand.vmem [shape: bf16[512,2048], index: 6, kind: output, shape index: {0}]   ;;  %s16788_s7 = inlined_call_operand.vmem [shape: f32[512,1], index: 7, kind: output, shape index: {1}]  }
   0x1   :  { %17418 = sst [smem:[#allocation348_spill]] %s16784_s3 }
   0x2   :  { %s9665_s24 = smov 0   ;;  %s9667_s25 = smov 0  }
   0x3   :  { %s9669_s26 = smov 0   ;;  %s9671_s27 = smov 0  }
   0x4   :  { %s9673_s28 = smov 0   ;;  %s9675_s29 = smov 0  }
   0x5   :  { %s9677_s30 = smov 0   ;;  %s9679_s8 = smov 0  }
   0x6   :  { %s9681_s9 = smov 0  }
   0x7 LB: > { %17419 = sst [smem:[#allocation8_spill]] %s9600_s27  ;;  %s7906_s10 = sadd.s32 4294967295, %s9620_s9   ;;  %s9620_s9 = sphi %s9681_s9, %s18_s9   ;;  %s9616_s8 = sphi %s9679_s8, %s18785_s8   ;;  %s9612_s30 = sphi %s9677_s30, %s18784_s30   ;;  %s9608_s29 = sphi %s9675_s29, %s18788_s29   ;;  %s9604_s28 = sphi %s9673_s28, %s18782_s28   ;;  %s9600_s27 = sphi %s9671_s27, %s18781_s27   ;;  %s9596_s26 = sphi %s9669_s26, %s18780_s26   ;;  %s9592_s25 = sphi %s9667_s25, %s18787_s25   ;;  %s9588_s24 = sphi %s9665_s24, %s18786_s24  }
   0x8   : > { %17420 = sst [smem:[#allocation9_spill]] %s9612_s30  ;;  %s27_s11 = sadd.s32 1, %s9612_s30 }
   0x9   : > { %17421 = sst [smem:[#allocation10_spill]] %s9616_s8  ;;  %p28_p0 = scmp.ge.s32.totalorder %s27_s11, 2 }
   0xa   : > { %s30_s12 = sadd.s32 1, %s9616_s8  ;;  %s105_s13 = sadd.s32 1, %s9600_s27 }
   0xb   : > { %p112_p1 = scmp.ne.s32.totalorder %s9600_s27, %s9596_s26  ;;  %s18790_s11 = smov (%p28_p0, %s27_s11), 0 }
   0xc   : > { %17422 = sst [smem:[#allocation11_spill]] %s18790_s11  ;;  %s18792_s12 = smov (!%p28_p0, %s30_s12), %s9616_s8 }
   0xd   : > { %s102_s14 = ssub.s32 %s9612_s30, %s18790_s11  ;;  %p113_p2 = scmp.eq.s32.totalorder %s9620_s9, 0 }
   0xe   : > { %p32_p3 = scmp.ge.s32.totalorder %s18792_s12, 2  ;;  %p103_p4 = scmp.eq.s32.totalorder %s102_s14, 0 }
   0xf   : > { %p114_p5 = por %p113_p2, %p112_p1  ;;  %s185_s15 = sadd.s32 1, %s9592_s25 }
  0x10   : > { %s18794_s12 = smov (%p32_p3, %s18792_s12), 0  ;;  %p195_p6 = scmp.ne.s32.totalorder %s9592_s25, %s9588_s24 }
  0x11   : > { %17423 = sst [smem:[#allocation12_spill]] %s18794_s12  ;;  %s180_s17 = ssub.s32 %s9616_s8, %s18794_s12 }
  0x12   : > { %s9726_s16 = scalar_select %p103_p4, %s9600_s27, %s105_s13  }
  0x13   : > { %s182_s18 = sor.u32 %s180_s17, %s102_s14  ;;  %p196_p7 = scmp.eq.s32.totalorder %s7906_s10, 3 }
  0x14   : > { %17424 = sst [smem:[#allocation13_spill]] %s9726_s16  ;;  %p183_p8 = scmp.eq.s32.totalorder %s182_s18, 0 }
  0x15   : > { %p9732_p9 = por %p196_p7, %p195_p6  ;;  %p7909_p10 = scmp.ge.s32.totalorder %s9620_s9, 4 }
  0x16   : > { %s9737_s20 = scalar_select %p183_p8, %s9592_s25, %s185_s15  }
  0x17   : > { %250 = sbr.rel (%p7909_p10) target bundleno = 104 (0x68), region = 24 }
  0x18   : > { %17426 = sst [smem:[#allocation14_spill]] %s9737_s20 }
  0x1e   : > { %263 = sbr.rel (!%p114_p5) target bundleno = 104 (0x68), region = 32  ;;  %s265_s21 = sand.u32 (%p114_p5), 1, %s9600_s27  }
  0x1f   : > { %s8318_s22 = sshll.u32 (%p114_p5), %s9612_s30, 5  ;;  %s7910_s23 = sshll.u32 (%p114_p5), %s265_s21, 10 }
  0x20   : > { %s17427_s3 = sld [smem:[#allocation348_spill]] (%p114_p5)  ;;  %s9750_s14 = scalar_lea.vmem (%p114_p5), [#allocation6], %s7910_s23 }
  0x26   : > { %s9745_s10 = scalar_lea.vmem %s17427_s3, %s8318_s22 }
  0x27   : > { %v283_v0 = vld [vmem:[%s9745_s10] sm:$0xff]  ;;  %v285_v1 = vld [vmem:[%s9745_s10 + $0x8] sm:$0xff]  ;;  %v287_v2 = vld [vmem:[%s9745_s10 + $0x10] sm:$0xff] }
  0x28   : > { %284 = vst [vmem:[%s9750_s14] sm:$0xff] %v283_v0  ;;  %286 = vst [vmem:[%s9750_s14 + $0x8] sm:$0xff] %v285_v1  ;;  %v289_v3 = vld [vmem:[%s9745_s10 + $0x18] sm:$0xff]  ;;  %v291_v4 = vld [vmem:[%s9745_s10 + $0x40] sm:$0xff] }
  0x29   : > { %288 = vst [vmem:[%s9750_s14 + $0x10] sm:$0xff] %v287_v2  ;;  %v293_v5 = vld [vmem:[%s9745_s10 + $0x48] sm:$0xff]  ;;  %290 = vst [vmem:[%s9750_s14 + $0x18] sm:$0xff] %v289_v3  ;;  %v295_v6 = vld [vmem:[%s9745_s10 + $0x50] sm:$0xff] }
  0x2a   : > { %292 = vst [vmem:[%s9750_s14 + $0x20] sm:$0xff] %v291_v4  ;;  %294 = vst [vmem:[%s9750_s14 + $0x28] sm:$0xff] %v293_v5  ;;  %v297_v7 = vld [vmem:[%s9745_s10 + $0x58] sm:$0xff]  ;;  %v299_v8 = vld [vmem:[%s9745_s10 + $0x80] sm:$0xff] }
  0x2b   : > { %296 = vst [vmem:[%s9750_s14 + $0x30] sm:$0xff] %v295_v6  ;;  %298 = vst [vmem:[%s9750_s14 + $0x38] sm:$0xff] %v297_v7  ;;  %v301_v9 = vld [vmem:[%s9745_s10 + $0x88] sm:$0xff]  ;;  %v303_v10 = vld [vmem:[%s9745_s10 + $0x90] sm:$0xff] }
  0x2c   : > { %300 = vst [vmem:[%s9750_s14 + $0x40] sm:$0xff] %v299_v8  ;;  %v305_v11 = vld [vmem:[%s9745_s10 + $0x98] sm:$0xff]  ;;  %302 = vst [vmem:[%s9750_s14 + $0x48] sm:$0xff] %v301_v9  ;;  %v307_v12 = vld [vmem:[%s9745_s10 + $0xc0] sm:$0xff] }
  0x2d   : > { %304 = vst [vmem:[%s9750_s14 + $0x50] sm:$0xff] %v303_v10  ;;  %306 = vst [vmem:[%s9750_s14 + $0x58] sm:$0xff] %v305_v11  ;;  %v309_v13 = vld [vmem:[%s9745_s10 + $0xc8] sm:$0xff]  ;;  %v311_v14 = vld [vmem:[%s9745_s10 + $0xd0] sm:$0xff] }
  0x2e   : > { %308 = vst [vmem:[%s9750_s14 + $0x60] sm:$0xff] %v307_v12  ;;  %310 = vst [vmem:[%s9750_s14 + $0x68] sm:$0xff] %v309_v13  ;;  %v313_v15 = vld [vmem:[%s9745_s10 + $0xd8] sm:$0xff]  ;;  %v315_v16 = vld [vmem:[%s9745_s10 + $0x100] sm:$0xff] }
  0x2f   : > { %312 = vst [vmem:[%s9750_s14 + $0x70] sm:$0xff] %v311_v14  ;;  %v317_v17 = vld [vmem:[%s9745_s10 + $0x108] sm:$0xff]  ;;  %314 = vst [vmem:[%s9750_s14 + $0x78] sm:$0xff] %v313_v15  ;;  %v319_v18 = vld [vmem:[%s9745_s10 + $0x110] sm:$0xff] }
  0x30   : > { %316 = vst [vmem:[%s9750_s14 + $0x80] sm:$0xff] %v315_v16  ;;  %318 = vst [vmem:[%s9750_s14 + $0x88] sm:$0xff] %v317_v17  ;;  %v321_v19 = vld [vmem:[%s9745_s10 + $0x118] sm:$0xff]  ;;  %v323_v20 = vld [vmem:[%s9745_s10 + $0x140] sm:$0xff] }
  0x31   : > { %320 = vst [vmem:[%s9750_s14 + $0x90] sm:$0xff] %v319_v18  ;;  %322 = vst [vmem:[%s9750_s14 + $0x98] sm:$0xff] %v321_v19  ;;  %v325_v21 = vld [vmem:[%s9745_s10 + $0x148] sm:$0xff]  ;;  %v327_v22 = vld [vmem:[%s9745_s10 + $0x150] sm:$0xff] }
  0x32   : > { %324 = vst [vmem:[%s9750_s14 + $0xa0] sm:$0xff] %v323_v20  ;;  %v329_v23 = vld [vmem:[%s9745_s10 + $0x158] sm:$0xff]  ;;  %326 = vst [vmem:[%s9750_s14 + $0xa8] sm:$0xff] %v325_v21  ;;  %v331_v24 = vld [vmem:[%s9745_s10 + $0x180] sm:$0xff] }
  0x33   : > { %328 = vst [vmem:[%s9750_s14 + $0xb0] sm:$0xff] %v327_v22  ;;  %330 = vst [vmem:[%s9750_s14 + $0xb8] sm:$0xff] %v329_v23  ;;  %v333_v25 = vld [vmem:[%s9745_s10 + $0x188] sm:$0xff]  ;;  %v335_v26 = vld [vmem:[%s9745_s10 + $0x190] sm:$0xff] }
  0x34   : > { %332 = vst [vmem:[%s9750_s14 + $0xc0] sm:$0xff] %v331_v24  ;;  %334 = vst [vmem:[%s9750_s14 + $0xc8] sm:$0xff] %v333_v25  ;;  %v337_v27 = vld [vmem:[%s9745_s10 + $0x198] sm:$0xff]  ;;  %v339_v28 = vld [vmem:[%s9745_s10 + $0x1c0] sm:$0xff] }
  0x35   : > { %336 = vst [vmem:[%s9750_s14 + $0xd0] sm:$0xff] %v335_v26  ;;  %v341_v29 = vld [vmem:[%s9745_s10 + $0x1c8] sm:$0xff]  ;;  %338 = vst [vmem:[%s9750_s14 + $0xd8] sm:$0xff] %v337_v27  ;;  %v343_v30 = vld [vmem:[%s9745_s10 + $0x1d0] sm:$0xff] }
  0x36   : > { %340 = vst [vmem:[%s9750_s14 + $0xe0] sm:$0xff] %v339_v28  ;;  %342 = vst [vmem:[%s9750_s14 + $0xe8] sm:$0xff] %v341_v29  ;;  %v345_v31 = vld [vmem:[%s9745_s10 + $0x1d8] sm:$0xff]  ;;  %v347_v32 = vld [vmem:[%s9745_s10 + $0x200] sm:$0xff] }
  0x37   : > { %344 = vst [vmem:[%s9750_s14 + $0xf0] sm:$0xff] %v343_v30  ;;  %346 = vst [vmem:[%s9750_s14 + $0xf8] sm:$0xff] %v345_v31  ;;  %v349_v33 = vld [vmem:[%s9745_s10 + $0x208] sm:$0xff]  ;;  %v351_v34 = vld [vmem:[%s9745_s10 + $0x210] sm:$0xff] }
  0x38   : > { %348 = vst [vmem:[%s9750_s14 + $0x100] sm:$0xff] %v347_v32  ;;  %v353_v35 = vld [vmem:[%s9745_s10 + $0x218] sm:$0xff]  ;;  %350 = vst [vmem:[%s9750_s14 + $0x108] sm:$0xff] %v349_v33  ;;  %v355_v36 = vld [vmem:[%s9745_s10 + $0x240] sm:$0xff] }
  0x39   : > { %352 = vst [vmem:[%s9750_s14 + $0x110] sm:$0xff] %v351_v34  ;;  %354 = vst [vmem:[%s9750_s14 + $0x118] sm:$0xff] %v353_v35  ;;  %v357_v37 = vld [vmem:[%s9745_s10 + $0x248] sm:$0xff]  ;;  %v359_v38 = vld [vmem:[%s9745_s10 + $0x250] sm:$0xff] }
  0x3a   : > { %356 = vst [vmem:[%s9750_s14 + $0x120] sm:$0xff] %v355_v36  ;;  %358 = vst [vmem:[%s9750_s14 + $0x128] sm:$0xff] %v357_v37  ;;  %v361_v39 = vld [vmem:[%s9745_s10 + $0x258] sm:$0xff]  ;;  %v363_v40 = vld [vmem:[%s9745_s10 + $0x280] sm:$0xff] }
  0x3b   : > { %360 = vst [vmem:[%s9750_s14 + $0x130] sm:$0xff] %v359_v38  ;;  %v365_v41 = vld [vmem:[%s9745_s10 + $0x288] sm:$0xff]  ;;  %362 = vst [vmem:[%s9750_s14 + $0x138] sm:$0xff] %v361_v39  ;;  %v367_v42 = vld [vmem:[%s9745_s10 + $0x290] sm:$0xff] }
  0x3c   : > { %364 = vst [vmem:[%s9750_s14 + $0x140] sm:$0xff] %v363_v40  ;;  %366 = vst [vmem:[%s9750_s14 + $0x148] sm:$0xff] %v365_v41  ;;  %v369_v43 = vld [vmem:[%s9745_s10 + $0x298] sm:$0xff]  ;;  %v371_v44 = vld [vmem:[%s9745_s10 + $0x2c0] sm:$0xff] }
  0x3d   : > { %368 = vst [vmem:[%s9750_s14 + $0x150] sm:$0xff] %v367_v42  ;;  %370 = vst [vmem:[%s9750_s14 + $0x158] sm:$0xff] %v369_v43  ;;  %v373_v45 = vld [vmem:[%s9745_s10 + $0x2c8] sm:$0xff]  ;;  %v375_v46 = vld [vmem:[%s9745_s10 + $0x2d0] sm:$0xff] }
  0x3e   : > { %372 = vst [vmem:[%s9750_s14 + $0x160] sm:$0xff] %v371_v44  ;;  %v377_v47 = vld [vmem:[%s9745_s10 + $0x2d8] sm:$0xff]  ;;  %374 = vst [vmem:[%s9750_s14 + $0x168] sm:$0xff] %v373_v45  ;;  %v379_v48 = vld [vmem:[%s9745_s10 + $0x300] sm:$0xff] }
  0x3f   : > { %376 = vst [vmem:[%s9750_s14 + $0x170] sm:$0xff] %v375_v46  ;;  %378 = vst [vmem:[%s9750_s14 + $0x178] sm:$0xff] %v377_v47  ;;  %v381_v49 = vld [vmem:[%s9745_s10 + $0x308] sm:$0xff]  ;;  %v383_v50 = vld [vmem:[%s9745_s10 + $0x310] sm:$0xff] }
  0x40   : > { %380 = vst [vmem:[%s9750_s14 + $0x180] sm:$0xff] %v379_v48  ;;  %382 = vst [vmem:[%s9750_s14 + $0x188] sm:$0xff] %v381_v49  ;;  %v385_v51 = vld [vmem:[%s9745_s10 + $0x318] sm:$0xff]  ;;  %v387_v52 = vld [vmem:[%s9745_s10 + $0x340] sm:$0xff] }
  0x41   : > { %384 = vst [vmem:[%s9750_s14 + $0x190] sm:$0xff] %v383_v50  ;;  %v389_v53 = vld [vmem:[%s9745_s10 + $0x348] sm:$0xff]  ;;  %386 = vst [vmem:[%s9750_s14 + $0x198] sm:$0xff] %v385_v51  ;;  %v391_v54 = vld [vmem:[%s9745_s10 + $0x350] sm:$0xff] }
  0x42   : > { %388 = vst [vmem:[%s9750_s14 + $0x1a0] sm:$0xff] %v387_v52  ;;  %390 = vst [vmem:[%s9750_s14 + $0x1a8] sm:$0xff] %v389_v53  ;;  %v393_v55 = vld [vmem:[%s9745_s10 + $0x358] sm:$0xff]  ;;  %v395_v56 = vld [vmem:[%s9745_s10 + $0x380] sm:$0xff] }
  0x43   : > { %392 = vst [vmem:[%s9750_s14 + $0x1b0] sm:$0xff] %v391_v54  ;;  %394 = vst [vmem:[%s9750_s14 + $0x1b8] sm:$0xff] %v393_v55  ;;  %v397_v57 = vld [vmem:[%s9745_s10 + $0x388] sm:$0xff]  ;;  %v399_v58 = vld [vmem:[%s9745_s10 + $0x390] sm:$0xff] }
  0x44   : > { %396 = vst [vmem:[%s9750_s14 + $0x1c0] sm:$0xff] %v395_v56  ;;  %v401_v59 = vld [vmem:[%s9745_s10 + $0x398] sm:$0xff]  ;;  %398 = vst [vmem:[%s9750_s14 + $0x1c8] sm:$0xff] %v397_v57  ;;  %v403_v60 = vld [vmem:[%s9745_s10 + $0x3c0] sm:$0xff] }
  0x45   : > { %400 = vst [vmem:[%s9750_s14 + $0x1d0] sm:$0xff] %v399_v58  ;;  %402 = vst [vmem:[%s9750_s14 + $0x1d8] sm:$0xff] %v401_v59  ;;  %v405_v61 = vld [vmem:[%s9745_s10 + $0x3c8] sm:$0xff]  ;;  %v407_v62 = vld [vmem:[%s9745_s10 + $0x3d0] sm:$0xff] }
  0x46   : > { %404 = vst [vmem:[%s9750_s14 + $0x1e0] sm:$0xff] %v403_v60  ;;  %406 = vst [vmem:[%s9750_s14 + $0x1e8] sm:$0xff] %v405_v61  ;;  %v409_v63 = vld [vmem:[%s9745_s10 + $0x3d8] sm:$0xff]  ;;  %v411_v0 = vld [vmem:[%s9745_s10 + $0x400] sm:$0xff] }
  0x47   : > { %408 = vst [vmem:[%s9750_s14 + $0x1f0] sm:$0xff] %v407_v62  ;;  %v413_v1 = vld [vmem:[%s9745_s10 + $0x408] sm:$0xff]  ;;  %410 = vst [vmem:[%s9750_s14 + $0x1f8] sm:$0xff] %v409_v63  ;;  %v415_v2 = vld [vmem:[%s9745_s10 + $0x410] sm:$0xff] }
  0x48   : > { %412 = vst [vmem:[%s9750_s14 + $0x200] sm:$0xff] %v411_v0  ;;  %414 = vst [vmem:[%s9750_s14 + $0x208] sm:$0xff] %v413_v1  ;;  %v417_v3 = vld [vmem:[%s9745_s10 + $0x418] sm:$0xff]  ;;  %v419_v4 = vld [vmem:[%s9745_s10 + $0x440] sm:$0xff] }
  0x49   : > { %416 = vst [vmem:[%s9750_s14 + $0x210] sm:$0xff] %v415_v2  ;;  %418 = vst [vmem:[%s9750_s14 + $0x218] sm:$0xff] %v417_v3  ;;  %v421_v5 = vld [vmem:[%s9745_s10 + $0x448] sm:$0xff]  ;;  %v423_v6 = vld [vmem:[%s9745_s10 + $0x450] sm:$0xff] }
  0x4a   : > { %420 = vst [vmem:[%s9750_s14 + $0x220] sm:$0xff] %v419_v4  ;;  %v425_v7 = vld [vmem:[%s9745_s10 + $0x458] sm:$0xff]  ;;  %422 = vst [vmem:[%s9750_s14 + $0x228] sm:$0xff] %v421_v5  ;;  %v427_v8 = vld [vmem:[%s9745_s10 + $0x480] sm:$0xff] }
  0x4b   : > { %424 = vst [vmem:[%s9750_s14 + $0x230] sm:$0xff] %v423_v6  ;;  %426 = vst [vmem:[%s9750_s14 + $0x238] sm:$0xff] %v425_v7  ;;  %v429_v9 = vld [vmem:[%s9745_s10 + $0x488] sm:$0xff]  ;;  %v431_v10 = vld [vmem:[%s9745_s10 + $0x490] sm:$0xff] }
  0x4c   : > { %428 = vst [vmem:[%s9750_s14 + $0x240] sm:$0xff] %v427_v8  ;;  %430 = vst [vmem:[%s9750_s14 + $0x248] sm:$0xff] %v429_v9  ;;  %v433_v11 = vld [vmem:[%s9745_s10 + $0x498] sm:$0xff]  ;;  %v435_v12 = vld [vmem:[%s9745_s10 + $0x4c0] sm:$0xff] }
  0x4d   : > { %432 = vst [vmem:[%s9750_s14 + $0x250] sm:$0xff] %v431_v10  ;;  %v437_v13 = vld [vmem:[%s9745_s10 + $0x4c8] sm:$0xff]  ;;  %434 = vst [vmem:[%s9750_s14 + $0x258] sm:$0xff] %v433_v11  ;;  %v439_v14 = vld [vmem:[%s9745_s10 + $0x4d0] sm:$0xff] }
  0x4e   : > { %436 = vst [vmem:[%s9750_s14 + $0x260] sm:$0xff] %v435_v12  ;;  %438 = vst [vmem:[%s9750_s14 + $0x268] sm:$0xff] %v437_v13  ;;  %v441_v15 = vld [vmem:[%s9745_s10 + $0x4d8] sm:$0xff]  ;;  %v443_v16 = vld [vmem:[%s9745_s10 + $0x500] sm:$0xff] }
  0x4f   : > { %440 = vst [vmem:[%s9750_s14 + $0x270] sm:$0xff] %v439_v14  ;;  %442 = vst [vmem:[%s9750_s14 + $0x278] sm:$0xff] %v441_v15  ;;  %v445_v17 = vld [vmem:[%s9745_s10 + $0x508] sm:$0xff]  ;;  %v447_v18 = vld [vmem:[%s9745_s10 + $0x510] sm:$0xff] }
  0x50   : > { %444 = vst [vmem:[%s9750_s14 + $0x280] sm:$0xff] %v443_v16  ;;  %v449_v19 = vld [vmem:[%s9745_s10 + $0x518] sm:$0xff]  ;;  %446 = vst [vmem:[%s9750_s14 + $0x288] sm:$0xff] %v445_v17  ;;  %v451_v20 = vld [vmem:[%s9745_s10 + $0x540] sm:$0xff] }
  0x51   : > { %448 = vst [vmem:[%s9750_s14 + $0x290] sm:$0xff] %v447_v18  ;;  %450 = vst [vmem:[%s9750_s14 + $0x298] sm:$0xff] %v449_v19  ;;  %v453_v21 = vld [vmem:[%s9745_s10 + $0x548] sm:$0xff]  ;;  %v455_v22 = vld [vmem:[%s9745_s10 + $0x550] sm:$0xff] }
  0x52   : > { %452 = vst [vmem:[%s9750_s14 + $0x2a0] sm:$0xff] %v451_v20  ;;  %454 = vst [vmem:[%s9750_s14 + $0x2a8] sm:$0xff] %v453_v21  ;;  %v457_v23 = vld [vmem:[%s9745_s10 + $0x558] sm:$0xff]  ;;  %v459_v24 = vld [vmem:[%s9745_s10 + $0x580] sm:$0xff] }
  0x53   : > { %456 = vst [vmem:[%s9750_s14 + $0x2b0] sm:$0xff] %v455_v22  ;;  %v461_v25 = vld [vmem:[%s9745_s10 + $0x588] sm:$0xff]  ;;  %458 = vst [vmem:[%s9750_s14 + $0x2b8] sm:$0xff] %v457_v23  ;;  %v463_v26 = vld [vmem:[%s9745_s10 + $0x590] sm:$0xff] }
  0x54   : > { %460 = vst [vmem:[%s9750_s14 + $0x2c0] sm:$0xff] %v459_v24  ;;  %462 = vst [vmem:[%s9750_s14 + $0x2c8] sm:$0xff] %v461_v25  ;;  %v465_v27 = vld [vmem:[%s9745_s10 + $0x598] sm:$0xff]  ;;  %v467_v28 = vld [vmem:[%s9745_s10 + $0x5c0] sm:$0xff] }
  0x55   : > { %464 = vst [vmem:[%s9750_s14 + $0x2d0] sm:$0xff] %v463_v26  ;;  %466 = vst [vmem:[%s9750_s14 + $0x2d8] sm:$0xff] %v465_v27  ;;  %v469_v29 = vld [vmem:[%s9745_s10 + $0x5c8] sm:$0xff]  ;;  %v471_v30 = vld [vmem:[%s9745_s10 + $0x5d0] sm:$0xff] }
  0x56   : > { %468 = vst [vmem:[%s9750_s14 + $0x2e0] sm:$0xff] %v467_v28  ;;  %v473_v31 = vld [vmem:[%s9745_s10 + $0x5d8] sm:$0xff]  ;;  %470 = vst [vmem:[%s9750_s14 + $0x2e8] sm:$0xff] %v469_v29  ;;  %v475_v32 = vld [vmem:[%s9745_s10 + $0x600] sm:$0xff] }
  0x57   : > { %472 = vst [vmem:[%s9750_s14 + $0x2f0] sm:$0xff] %v471_v30  ;;  %474 = vst [vmem:[%s9750_s14 + $0x2f8] sm:$0xff] %v473_v31  ;;  %v477_v33 = vld [vmem:[%s9745_s10 + $0x608] sm:$0xff]  ;;  %v479_v34 = vld [vmem:[%s9745_s10 + $0x610] sm:$0xff] }
  0x58   : > { %476 = vst [vmem:[%s9750_s14 + $0x300] sm:$0xff] %v475_v32  ;;  %478 = vst [vmem:[%s9750_s14 + $0x308] sm:$0xff] %v477_v33  ;;  %v481_v35 = vld [vmem:[%s9745_s10 + $0x618] sm:$0xff]  ;;  %v483_v36 = vld [vmem:[%s9745_s10 + $0x640] sm:$0xff] }
  0x59   : > { %480 = vst [vmem:[%s9750_s14 + $0x310] sm:$0xff] %v479_v34  ;;  %v485_v37 = vld [vmem:[%s9745_s10 + $0x648] sm:$0xff]  ;;  %482 = vst [vmem:[%s9750_s14 + $0x318] sm:$0xff] %v481_v35  ;;  %v487_v38 = vld [vmem:[%s9745_s10 + $0x650] sm:$0xff] }
  0x5a   : > { %484 = vst [vmem:[%s9750_s14 + $0x320] sm:$0xff] %v483_v36  ;;  %486 = vst [vmem:[%s9750_s14 + $0x328] sm:$0xff] %v485_v37  ;;  %v489_v39 = vld [vmem:[%s9745_s10 + $0x658] sm:$0xff]  ;;  %v491_v40 = vld [vmem:[%s9745_s10 + $0x680] sm:$0xff] }
  0x5b   : > { %488 = vst [vmem:[%s9750_s14 + $0x330] sm:$0xff] %v487_v38  ;;  %490 = vst [vmem:[%s9750_s14 + $0x338] sm:$0xff] %v489_v39  ;;  %v493_v41 = vld [vmem:[%s9745_s10 + $0x688] sm:$0xff]  ;;  %v495_v42 = vld [vmem:[%s9745_s10 + $0x690] sm:$0xff] }
  0x5c   : > { %492 = vst [vmem:[%s9750_s14 + $0x340] sm:$0xff] %v491_v40  ;;  %v497_v43 = vld [vmem:[%s9745_s10 + $0x698] sm:$0xff]  ;;  %494 = vst [vmem:[%s9750_s14 + $0x348] sm:$0xff] %v493_v41  ;;  %v499_v44 = vld [vmem:[%s9745_s10 + $0x6c0] sm:$0xff] }
  0x5d   : > { %496 = vst [vmem:[%s9750_s14 + $0x350] sm:$0xff] %v495_v42  ;;  %498 = vst [vmem:[%s9750_s14 + $0x358] sm:$0xff] %v497_v43  ;;  %v501_v45 = vld [vmem:[%s9745_s10 + $0x6c8] sm:$0xff]  ;;  %v503_v46 = vld [vmem:[%s9745_s10 + $0x6d0] sm:$0xff] }
  0x5e   : > { %500 = vst [vmem:[%s9750_s14 + $0x360] sm:$0xff] %v499_v44  ;;  %502 = vst [vmem:[%s9750_s14 + $0x368] sm:$0xff] %v501_v45  ;;  %v505_v47 = vld [vmem:[%s9745_s10 + $0x6d8] sm:$0xff]  ;;  %v507_v48 = vld [vmem:[%s9745_s10 + $0x700] sm:$0xff] }
  0x5f   : > { %504 = vst [vmem:[%s9750_s14 + $0x370] sm:$0xff] %v503_v46  ;;  %v509_v49 = vld [vmem:[%s9745_s10 + $0x708] sm:$0xff]  ;;  %506 = vst [vmem:[%s9750_s14 + $0x378] sm:$0xff] %v505_v47  ;;  %v511_v50 = vld [vmem:[%s9745_s10 + $0x710] sm:$0xff] }
  0x60   : > { %508 = vst [vmem:[%s9750_s14 + $0x380] sm:$0xff] %v507_v48  ;;  %510 = vst [vmem:[%s9750_s14 + $0x388] sm:$0xff] %v509_v49  ;;  %v513_v51 = vld [vmem:[%s9745_s10 + $0x718] sm:$0xff]  ;;  %v515_v52 = vld [vmem:[%s9745_s10 + $0x740] sm:$0xff] }
  0x61   : > { %512 = vst [vmem:[%s9750_s14 + $0x390] sm:$0xff] %v511_v50  ;;  %514 = vst [vmem:[%s9750_s14 + $0x398] sm:$0xff] %v513_v51  ;;  %v517_v53 = vld [vmem:[%s9745_s10 + $0x748] sm:$0xff]  ;;  %v519_v54 = vld [vmem:[%s9745_s10 + $0x750] sm:$0xff] }
  0x62   : > { %516 = vst [vmem:[%s9750_s14 + $0x3a0] sm:$0xff] %v515_v52  ;;  %v521_v55 = vld [vmem:[%s9745_s10 + $0x758] sm:$0xff]  ;;  %518 = vst [vmem:[%s9750_s14 + $0x3a8] sm:$0xff] %v517_v53  ;;  %v523_v56 = vld [vmem:[%s9745_s10 + $0x780] sm:$0xff] }
  0x63   : > { %520 = vst [vmem:[%s9750_s14 + $0x3b0] sm:$0xff] %v519_v54  ;;  %522 = vst [vmem:[%s9750_s14 + $0x3b8] sm:$0xff] %v521_v55  ;;  %v525_v57 = vld [vmem:[%s9745_s10 + $0x788] sm:$0xff]  ;;  %v527_v58 = vld [vmem:[%s9745_s10 + $0x790] sm:$0xff] }
  0x64   : > { %524 = vst [vmem:[%s9750_s14 + $0x3c0] sm:$0xff] %v523_v56  ;;  %526 = vst [vmem:[%s9750_s14 + $0x3c8] sm:$0xff] %v525_v57  ;;  %v529_v59 = vld [vmem:[%s9745_s10 + $0x798] sm:$0xff]  ;;  %v531_v60 = vld [vmem:[%s9745_s10 + $0x7c0] sm:$0xff] }
  0x65   : > { %528 = vst [vmem:[%s9750_s14 + $0x3d0] sm:$0xff] %v527_v58  ;;  %v533_v61 = vld [vmem:[%s9745_s10 + $0x7c8] sm:$0xff]  ;;  %530 = vst [vmem:[%s9750_s14 + $0x3d8] sm:$0xff] %v529_v59  ;;  %v535_v62 = vld [vmem:[%s9745_s10 + $0x7d0] sm:$0xff] }
  0x66   : > { %532 = vst [vmem:[%s9750_s14 + $0x3e0] sm:$0xff] %v531_v60  ;;  %534 = vst [vmem:[%s9750_s14 + $0x3e8] sm:$0xff] %v533_v61  ;;  %v537_v63 = vld [vmem:[%s9745_s10 + $0x7d8] sm:$0xff] }
  0x67   : > { %536 = vst [vmem:[%s9750_s14 + $0x3f0] sm:$0xff] %v535_v62  ;;  %538 = vst [vmem:[%s9750_s14 + $0x3f8] sm:$0xff] %v537_v63 }
  0x68 PF: > { %p7913_p11 = scmp.ge.s32.totalorder %s9620_s9, 1  ;;  %p560_p12 = scmp.lt.s32.totalorder %s9620_s9, 5 }
  0x6a   : > { %p561_p13 = pnand %p7913_p11, %p560_p12 }
  0x6c   : > { %564 = sbr.rel (%p561_p13) target bundleno = 1877 (0x755), region = 63 }
  0x73   : > { %s567_s12 = sand.u32 1, %s9596_s26   ;;  %s607_s15 = sand.u32 1, %s9588_s24  }
  0x74   : > { %s7914_s17 = sshll.u32 %s567_s12, 10  ;;  %s7915_s18 = sshll.u32 %s607_s15, 10 }
  0x75   : > { %s7916_s21 = sshll.u32 %s9608_s29, 5  ;;  %s10011_s22 = sshll.u32 %s9604_s28, 3 }
  0x76   : > { %p618_p0 = scmp.lt.s32.totalorder %s7916_s21, 63  ;;  %p626_p1 = scmp.lt.s32.totalorder %s10011_s22, 15 }
  0x77   : > { %s10038_s20 = scalar_lea.vmem [#allocation7], %s7915_s18  ;;  %p7924_p2 = scmp.ne.s32.totalorder %s9604_s28, 0 }
  0x78   : > { %s18796_s21 = smov (!%p618_p0, %s7916_s21), 63 }
  0x79   : > { %s10015_s23 = scalar_select %p626_p1, %s10011_s22, 15 }
  0x7a   : > { %s8319_s13 = sshll.u32 %s18796_s21, 3  ;;  %s10036_s21 = scalar_lea.vmem [#allocation6], %s7914_s17 }
  0x7b   : > { %s10020_s3 = scalar_lea.vmem %s16781_s0, %s8319_s13  ;;  %s628_s12 = scalar_lea.vmem %s16785_s4, %s10015_s23 }
  0x7c   : > { %s10029_s8 = scalar_lea.vmem %s16786_s5, %s8319_s13  ;;  %s10034_s27 = scalar_lea.vmem %s16788_s7, %s8319_s13 }
  0x7d   : > { %647 = sbr.rel (%p7924_p2) target bundleno = 576 (0x240), region = 71 }
  0x84   : > { %v8556_v0 = vld [vmem:[%s16782_s1 + $0x4] ss:$8 sps:$4 sm:$0xff]   ;;  %v8558_v1 = vld [vmem:[%s16782_s1] ss:$8 sps:$4 sm:$0xff]   ;;  %v8559_v2 = vld [vmem:[%s16782_s1 + $0x14] ss:$8 sps:$4 sm:$0xff]  }
  0x85   : > { %1044 = vmatprep.subr.bf16.mxu0 %v8556_v0  ;;  %8449 = vmatprep.subr.bf16.mxu1 %v8556_v0  ;;  %v8561_v3 = vld [vmem:[%s16782_s1 + $0x10] ss:$8 sps:$4 sm:$0xff]   ;;  %v8562_v4 = vld [vmem:[%s16782_s1 + $0x24] ss:$8 sps:$4 sm:$0xff]   ;;  %v8564_v5 = vld [vmem:[%s16782_s1 + $0x20] ss:$8 sps:$4 sm:$0xff]   ;;  %v714_v0 = vlaneseq }
  0x86   : > { %1045 = vmatpush1.bf16.msra.mxu0 %v8558_v1  ;;  %8465 = vmatpush1.bf16.msra.mxu1 %v8558_v1  ;;  %v8565_v6 = vld [vmem:[%s16782_s1 + $0x34] ss:$8 sps:$4 sm:$0xff]   ;;  %v8567_v7 = vld [vmem:[%s16782_s1 + $0x30] ss:$8 sps:$4 sm:$0xff]   ;;  %v8568_v8 = vld [vmem:[%s16782_s1 + $0x44] ss:$8 sps:$4 sm:$0xff]  }
  0x87   : > { %1046 = vmatprep.subr.bf16.mxu0 %v8559_v2  ;;  %8450 = vmatprep.subr.bf16.mxu1 %v8559_v2  ;;  %v8570_v9 = vld [vmem:[%s16782_s1 + $0x40] ss:$8 sps:$4 sm:$0xff]   ;;  %v8571_v10 = vld [vmem:[%s16782_s1 + $0x54] ss:$8 sps:$4 sm:$0xff]   ;;  %v8573_v11 = vld [vmem:[%s16782_s1 + $0x50] ss:$8 sps:$4 sm:$0xff]  }
  0x88   : > { %v8574_v12 = vld [vmem:[%s16782_s1 + $0x64] ss:$8 sps:$4 sm:$0xff]   ;;  %v8576_v14 = vld [vmem:[%s16782_s1 + $0x60] ss:$8 sps:$4 sm:$0xff]   ;;  %v8577_v16 = vld [vmem:[%s16782_s1 + $0x74] ss:$8 sps:$4 sm:$0xff]  }
  0x89   : > { %v8606_v13 = vld [vmem:[%s10020_s3 + $0x4] ss:$8 sps:$4 sm:$0xff]   ;;  %v8579_v17 = vld [vmem:[%s16782_s1 + $0x70] ss:$8 sps:$4 sm:$0xff]   ;;  %v8582_v19 = vld [vmem:[%s16782_s1 + $0x80] ss:$8 sps:$4 sm:$0xff]  }
  0x8a   : > { %1047 = vmatpush1.bf16.msra.mxu0 %v8561_v3  ;;  %8466 = vmatpush1.bf16.msra.mxu1 %v8561_v3  ;;  %v8609_v15 = vld [vmem:[%s10020_s3 + $0x84] ss:$8 sps:$4 sm:$0xff]   ;;  %v8583_v20 = vld [vmem:[%s16782_s1 + $0x94] ss:$8 sps:$4 sm:$0xff]   ;;  %v8585_v21 = vld [vmem:[%s16782_s1 + $0x90] ss:$8 sps:$4 sm:$0xff]  }
  0x8b   : > { %1048 = vmatprep.subr.bf16.mxu0 %v8562_v4  ;;  %8451 = vmatprep.subr.bf16.mxu1 %v8562_v4  ;;  %v8580_v18 = vld [vmem:[%s16782_s1 + $0x84] ss:$8 sps:$4 sm:$0xff]   ;;  %v8588_v23 = vld [vmem:[%s16782_s1 + $0xa0] ss:$8 sps:$4 sm:$0xff]   ;;  %v8589_v24 = vld [vmem:[%s16782_s1 + $0xb4] ss:$8 sps:$4 sm:$0xff]  }
  0x8c   : > { %1076 = vmatprep.mubr.bf16.mxu0 %v8606_v13  ;;  %1156 = vmatprep.mubr.bf16.mxu1 %v8609_v15  ;;  %v8586_v22 = vld [vmem:[%s16782_s1 + $0xa4] ss:$8 sps:$4 sm:$0xff]   ;;  %v8591_v25 = vld [vmem:[%s16782_s1 + $0xb0] ss:$8 sps:$4 sm:$0xff]   ;;  %v8594_v27 = vld [vmem:[%s16782_s1 + $0xc0] ss:$8 sps:$4 sm:$0xff]  }
  0x8d   : > { %v8592_v26 = vld [vmem:[%s16782_s1 + $0xc4] ss:$8 sps:$4 sm:$0xff]   ;;  %v8595_v28 = vld [vmem:[%s16782_s1 + $0xd4] ss:$8 sps:$4 sm:$0xff]   ;;  %v8597_v29 = vld [vmem:[%s16782_s1 + $0xd0] ss:$8 sps:$4 sm:$0xff]  }
  0x8e   : > { %1049 = vmatpush1.bf16.msra.mxu0 %v8564_v5  ;;  %8467 = vmatpush1.bf16.msra.mxu1 %v8564_v5  ;;  %v8598_v30 = vld [vmem:[%s16782_s1 + $0xe4] ss:$8 sps:$4 sm:$0xff]   ;;  %v8600_v31 = vld [vmem:[%s16782_s1 + $0xe0] ss:$8 sps:$4 sm:$0xff]   ;;  %v8601_v32 = vld [vmem:[%s16782_s1 + $0xf4] ss:$8 sps:$4 sm:$0xff]  }
  0x8f   : > { %1050 = vmatprep.subr.bf16.mxu0 %v8565_v6  ;;  %8452 = vmatprep.subr.bf16.mxu1 %v8565_v6  ;;  %v8603_v33 = vld [vmem:[%s16782_s1 + $0xf0] ss:$8 sps:$4 sm:$0xff]   ;;  %v8604_v34 = vld [vmem:[%s10020_s3] ss:$8 sps:$4 sm:$0xff]   ;;  %v8610_v36 = vld [vmem:[%s10020_s3 + $0x14] ss:$8 sps:$4 sm:$0xff]  }
  0x90   : > { %v8607_v35 = vld [vmem:[%s10020_s3 + $0x80] ss:$8 sps:$4 sm:$0xff]   ;;  %v8612_v37 = vld [vmem:[%s10020_s3 + $0x94] ss:$8 sps:$4 sm:$0xff]   ;;  %v8614_v38 = vld [vmem:[%s10020_s3 + $0x10] ss:$8 sps:$4 sm:$0xff]  }
  0x91   : > { %v8615_v39 = vld [vmem:[%s10020_s3 + $0x90] ss:$8 sps:$4 sm:$0xff]   ;;  %v8616_v40 = vld [vmem:[%s10020_s3 + $0x24] ss:$8 sps:$4 sm:$0xff]   ;;  %v8620_v42 = vld [vmem:[%s10020_s3 + $0x20] ss:$8 sps:$4 sm:$0xff]  }
  0x92   : > { %1051 = vmatpush1.bf16.msra.mxu0 %v8567_v7  ;;  %8468 = vmatpush1.bf16.msra.mxu1 %v8567_v7  ;;  %v8618_v41 = vld [vmem:[%s10020_s3 + $0xa4] ss:$8 sps:$4 sm:$0xff]   ;;  %v8621_v43 = vld [vmem:[%s10020_s3 + $0xa0] ss:$8 sps:$4 sm:$0xff]   ;;  %v8622_v44 = vld [vmem:[%s10020_s3 + $0x34] ss:$8 sps:$4 sm:$0xff]  }
  0x93   : > { %1052 = vmatprep.subr.bf16.mxu0 %v8568_v8  ;;  %8453 = vmatprep.subr.bf16.mxu1 %v8568_v8  ;;  %v8624_v45 = vld [vmem:[%s10020_s3 + $0xb4] ss:$8 sps:$4 sm:$0xff]   ;;  %v8626_v46 = vld [vmem:[%s10020_s3 + $0x30] ss:$8 sps:$4 sm:$0xff]   ;;  %v8628_v48 = vld [vmem:[%s10020_s3 + $0x44] ss:$8 sps:$4 sm:$0xff]  }
  0x94   : > { %v8627_v47 = vld [vmem:[%s10020_s3 + $0xb0] ss:$8 sps:$4 sm:$0xff]   ;;  %v8630_v49 = vld [vmem:[%s10020_s3 + $0xc4] ss:$8 sps:$4 sm:$0xff]   ;;  %v8632_v50 = vld [vmem:[%s10020_s3 + $0x40] ss:$8 sps:$4 sm:$0xff]  }
  0x95   : > { %v8633_v51 = vld [vmem:[%s10020_s3 + $0xc0] ss:$8 sps:$4 sm:$0xff]   ;;  %v8634_v52 = vld [vmem:[%s10020_s3 + $0x54] ss:$8 sps:$4 sm:$0xff]   ;;  %v8638_v54 = vld [vmem:[%s10020_s3 + $0x50] ss:$8 sps:$4 sm:$0xff]  }
  0x96   : > { %1053 = vmatpush1.bf16.msra.mxu0 %v8570_v9  ;;  %8469 = vmatpush1.bf16.msra.mxu1 %v8570_v9  ;;  %v8636_v53 = vld [vmem:[%s10020_s3 + $0xd4] ss:$8 sps:$4 sm:$0xff]   ;;  %v8639_v55 = vld [vmem:[%s10020_s3 + $0xd0] ss:$8 sps:$4 sm:$0xff]   ;;  %v8640_v56 = vld [vmem:[%s10020_s3 + $0x64] ss:$8 sps:$4 sm:$0xff]  }
  0x97   : > { %1054 = vmatprep.subr.bf16.mxu0 %v8571_v10  ;;  %8454 = vmatprep.subr.bf16.mxu1 %v8571_v10  ;;  %v8642_v57 = vld [vmem:[%s10020_s3 + $0xe4] ss:$8 sps:$4 sm:$0xff]   ;;  %v8644_v58 = vld [vmem:[%s10020_s3 + $0x60] ss:$8 sps:$4 sm:$0xff]   ;;  %v8646_v60 = vld [vmem:[%s10020_s3 + $0x74] ss:$8 sps:$4 sm:$0xff]  }
  0x98   : > { %v8645_v59 = vld [vmem:[%s10020_s3 + $0xe0] ss:$8 sps:$4 sm:$0xff]   ;;  %v8648_v61 = vld [vmem:[%s10020_s3 + $0xf4] ss:$8 sps:$4 sm:$0xff]   ;;  %v8650_v62 = vld [vmem:[%s10020_s3 + $0x70] ss:$8 sps:$4 sm:$0xff]  }
  0x99   : > { %v8651_v63 = vld [vmem:[%s10020_s3 + $0xf0] ss:$8 sps:$4 sm:$0xff]   ;;  %v715_v1 = vshrl.u32 %v714_v0, 7  ;;  %v712_v3 = vld [vmem:[%s16783_s2] sm:$0x3]  ;;  %vm1749_vm0 = vcmask 7168  }
  0x9a   : > { %1055 = vmatpush1.bf16.msra.mxu0 %v8573_v11  ;;  %8470 = vmatpush1.bf16.msra.mxu1 %v8573_v11 }
  0x9b   : > { %1056 = vmatprep.subr.bf16.mxu0 %v8574_v12  ;;  %8455 = vmatprep.subr.bf16.mxu1 %v8574_v12  ;;  %v716_v2 = vsub.s32 0, %v715_v1  ;;  %v720_v4 = vsub.s32 1, %v715_v1 }
  0x9d   : > { %v10172_v5 = vrot.slane %v712_v3, %v716_v2  ;;  %v10174_v6 = vrot.slane %v712_v3, %v720_v4 }
  0x9e   : > { %1057 = vmatpush1.bf16.msra.mxu0 %v8576_v14  ;;  %8471 = vmatpush1.bf16.msra.mxu1 %v8576_v14 }
  0x9f   : > { %1058 = vmatprep.subr.bf16.mxu0 %v8577_v16  ;;  %8456 = vmatprep.subr.bf16.mxu1 %v8577_v16 }
  0xa2   : > { %1059 = vmatpush1.bf16.msra.mxu0 %v8579_v17  ;;  %8472 = vmatpush1.bf16.msra.mxu1 %v8579_v17 }
  0xa3   : > { %1060 = vmatprep.subr.bf16.mxu0 %v8580_v18  ;;  %8457 = vmatprep.subr.bf16.mxu1 %v8580_v18 }
  0xa6   : > { %1061 = vmatpush1.bf16.msra.mxu0 %v8582_v19  ;;  %8473 = vmatpush1.bf16.msra.mxu1 %v8582_v19 }
  0xa7   : > { %1062 = vmatprep.subr.bf16.mxu0 %v8583_v20  ;;  %8458 = vmatprep.subr.bf16.mxu1 %v8583_v20 }
  0xaa   : > { %1063 = vmatpush1.bf16.msra.mxu0 %v8585_v21  ;;  %8474 = vmatpush1.bf16.msra.mxu1 %v8585_v21 }
  0xab   : > { %1064 = vmatprep.subr.bf16.mxu0 %v8586_v22  ;;  %8459 = vmatprep.subr.bf16.mxu1 %v8586_v22 }
  0xae   : > { %1065 = vmatpush1.bf16.msra.mxu0 %v8588_v23  ;;  %8475 = vmatpush1.bf16.msra.mxu1 %v8588_v23 }
  0xaf   : > { %1066 = vmatprep.subr.bf16.mxu0 %v8589_v24  ;;  %8460 = vmatprep.subr.bf16.mxu1 %v8589_v24 }
  0xb2   : > { %1067 = vmatpush1.bf16.msra.mxu0 %v8591_v25  ;;  %8476 = vmatpush1.bf16.msra.mxu1 %v8591_v25 }
  0xb3   : > { %1068 = vmatprep.subr.bf16.mxu0 %v8592_v26  ;;  %8461 = vmatprep.subr.bf16.mxu1 %v8592_v26 }
  0xb6   : > { %1069 = vmatpush1.bf16.msra.mxu0 %v8594_v27  ;;  %8477 = vmatpush1.bf16.msra.mxu1 %v8594_v27 }
  0xb7   : > { %1070 = vmatprep.subr.bf16.mxu0 %v8595_v28  ;;  %8462 = vmatprep.subr.bf16.mxu1 %v8595_v28 }
  0xba   : > { %1071 = vmatpush1.bf16.msra.mxu0 %v8597_v29  ;;  %8478 = vmatpush1.bf16.msra.mxu1 %v8597_v29 }
  0xbb   : > { %1072 = vmatprep.subr.bf16.mxu0 %v8598_v30  ;;  %8463 = vmatprep.subr.bf16.mxu1 %v8598_v30 }
  0xbe   : > { %1073 = vmatpush1.bf16.msra.mxu0 %v8600_v31  ;;  %8479 = vmatpush1.bf16.msra.mxu1 %v8600_v31 }
  0xbf   : > { %1074 = vmatprep.subr.bf16.mxu0 %v8601_v32  ;;  %8464 = vmatprep.subr.bf16.mxu1 %v8601_v32 }
  0xc2   : > { %1075 = vmatpush1.bf16.msra.mxu0 %v8603_v33  ;;  %8480 = vmatpush1.bf16.msra.mxu1 %v8603_v33 }
  0xc5   : > { %1077 = vmatmul.mubr.bf16.vlgmr.msra.gmra.mrb[0].mxu0 %v8604_v34  ;;  %1157 = vmatmul.mubr.bf16.vlgmr.msra.gmra.mrb[0].mxu1 %v8607_v35 }
  0xc6   : > { %1086 = vmatprep.mubr.bf16.mxu0 %v8610_v36  ;;  %1166 = vmatprep.mubr.bf16.mxu1 %v8612_v37 }
  0xcd   : > { %1087 = vmatmul.mubr.bf16.gmra.mrb[4].mxu0 %v8614_v38  ;;  %1167 = vmatmul.mubr.bf16.gmra.mrb[4].mxu1 %v8615_v39 }
  0xce   : > { %1096 = vmatprep.mubr.bf16.mxu0 %v8616_v40  ;;  %1176 = vmatprep.mubr.bf16.mxu1 %v8618_v41 }
  0xd5   : > { %1097 = vmatmul.mubr.bf16.gmra.mrb[8].mxu0 %v8620_v42  ;;  %1177 = vmatmul.mubr.bf16.gmra.mrb[8].mxu1 %v8621_v43 }
  0xd6   : > { %1106 = vmatprep.mubr.bf16.mxu0 %v8622_v44  ;;  %1186 = vmatprep.mubr.bf16.mxu1 %v8624_v45 }
  0xdd   : > { %1107 = vmatmul.mubr.bf16.gmra.mrb[12].mxu0 %v8626_v46  ;;  %1187 = vmatmul.mubr.bf16.gmra.mrb[12].mxu1 %v8627_v47 }
  0xde   : > { %1116 = vmatprep.mubr.bf16.mxu0 %v8628_v48  ;;  %1196 = vmatprep.mubr.bf16.mxu1 %v8630_v49 }
  0xe5   : > { %1117 = vmatmul.mubr.bf16.gmra.mrb[16].mxu0 %v8632_v50  ;;  %1197 = vmatmul.mubr.bf16.gmra.mrb[16].mxu1 %v8633_v51 }
  0xe6   : > { %1126 = vmatprep.mubr.bf16.mxu0 %v8634_v52  ;;  %1206 = vmatprep.mubr.bf16.mxu1 %v8636_v53 }
  0xed   : > { %1127 = vmatmul.mubr.bf16.gmra.mrb[20].mxu0 %v8638_v54  ;;  %1207 = vmatmul.mubr.bf16.gmra.mrb[20].mxu1 %v8639_v55 }
  0xee   : > { %1136 = vmatprep.mubr.bf16.mxu0 %v8640_v56  ;;  %1216 = vmatprep.mubr.bf16.mxu1 %v8642_v57 }
  0xf5   : > { %1137 = vmatmul.mubr.bf16.gmra.mrb[24].mxu0 %v8644_v58  ;;  %1217 = vmatmul.mubr.bf16.gmra.mrb[24].mxu1 %v8645_v59 }
  0xf6   : > { %1146 = vmatprep.mubr.bf16.mxu0 %v8646_v60  ;;  %1226 = vmatprep.mubr.bf16.mxu1 %v8648_v61 }
  0xfd   : > { %1147 = vmatmul.mubr.bf16.gmra.mrb[28].mxu0 %v8650_v62  ;;  %1227 = vmatmul.mubr.bf16.gmra.mrb[28].mxu1 %v8651_v63 }
 0x198   : > { %v1078_v7 = vpop.f32.mrb[0].mxu0  ;;  %v1158_v8 = vpop.f32.mrb[0].mxu1 }
 0x199   : > { %v10177_v9 = vadd.f32 %v1078_v7, %v10172_v5  ;;  %v10180_v10 = vadd.f32 %v1158_v8, %v10172_v5  ;;  %v1080_v11 = vpop.f32.mrb[1].mxu0  ;;  %v1160_v12 = vpop.f32.mrb[1].mxu1 }
 0x19a   : > { %v10183_v13 = vadd.f32 %v1080_v11, %v10174_v6  ;;  %v10186_v14 = vadd.f32 %v1160_v12, %v10174_v6  ;;  %v1082_v15 = vpop.f32.mrb[2].mxu0  ;;  %v1162_v16 = vpop.f32.mrb[2].mxu1 }
 0x19b   : > { %v7989_v17 = vmul.f32 -1.442695, %v10177_v9  ;;  %v8021_v18 = vmul.f32 -1.442695, %v10180_v10  ;;  %v10191_v19 = vadd.f32 %v1082_v15, %v10172_v5  ;;  %v10194_v20 = vadd.f32 %v1162_v16, %v10172_v5  ;;  %v1084_v21 = vpop.f32.mrb[3].mxu0  ;;  %v1164_v22 = vpop.f32.mrb[3].mxu1 }
 0x19c   : > { %v7990_v23 = vmul.f32 -1.442695, %v10183_v13  ;;  %v8022_v24 = vmul.f32 -1.442695, %v10186_v14  ;;  %v10199_v25 = vadd.f32 %v1084_v21, %v10174_v6  ;;  %v10202_v26 = vadd.f32 %v1164_v22, %v10174_v6 }
 0x19d   : > { %8652 = vpow2.f32 %v7989_v17  ;;  %v7991_v27 = vmul.f32 -1.442695, %v10191_v19  ;;  %v8023_v28 = vmul.f32 -1.442695, %v10194_v20 }
 0x19e   : > { %8654 = vpow2.f32 %v8021_v18  ;;  %v7992_v29 = vmul.f32 -1.442695, %v10199_v25  ;;  %v8024_v30 = vmul.f32 -1.442695, %v10202_v26 }
 0x19f   : > { %8656 = vpow2.f32 %v7990_v23 }
 0x1a0   : > { %8658 = vpow2.f32 %v8022_v24  ;;  %v1088_v31 = vpop.f32.mrb[4].mxu0  ;;  %v1168_v32 = vpop.f32.mrb[4].mxu1 }
 0x1a1   : > { %8660 = vpow2.f32 %v7991_v27  ;;  %v10209_v33 = vadd.f32 %v1088_v31, %v10172_v5  ;;  %v10212_v34 = vadd.f32 %v1168_v32, %v10172_v5  ;;  %v1090_v35 = vpop.f32.mrb[5].mxu0  ;;  %v1170_v36 = vpop.f32.mrb[5].mxu1 }
 0x1a2   : > { %8662 = vpow2.f32 %v8023_v28  ;;  %v10215_v37 = vadd.f32 %v1090_v35, %v10174_v6  ;;  %v10218_v38 = vadd.f32 %v1170_v36, %v10174_v6  ;;  %v1092_v39 = vpop.f32.mrb[6].mxu0  ;;  %v1172_v40 = vpop.f32.mrb[6].mxu1 }
 0x1a3   : > { %8664 = vpow2.f32 %v7992_v29  ;;  %v7993_v41 = vmul.f32 -1.442695, %v10209_v33  ;;  %v8025_v42 = vmul.f32 -1.442695, %v10212_v34  ;;  %v10223_v43 = vadd.f32 %v1092_v39, %v10172_v5  ;;  %v1094_v44 = vpop.f32.mrb[7].mxu0  ;;  %v1174_v45 = vpop.f32.mrb[7].mxu1 }
 0x1a4   : > { %8666 = vpow2.f32 %v8024_v30  ;;  %v7994_v46 = vmul.f32 -1.442695, %v10215_v37  ;;  %v8026_v47 = vmul.f32 -1.442695, %v10218_v38  ;;  %v10229_v3 = vadd.f32 %v1172_v40, %v10172_v5 }
 0x1a5   : > { %8668 = vpow2.f32 %v7993_v41  ;;  %v7995_v48 = vmul.f32 -1.442695, %v10223_v43  ;;  %v10232_v11 = vadd.f32 %v1094_v44, %v10174_v6  ;;  %v10236_v23 = vadd.f32 %v1174_v45, %v10174_v6 }
 0x1a6   : > { %8670 = vpow2.f32 %v8025_v42  ;;  %v8027_v22 = vmul.f32 -1.442695, %v10229_v3 }
 0x1a7   : > { %v8653_v49 = vpop.eup %8652  ;;  %8672 = vpow2.f32 %v7994_v46  ;;  %v7996_v29 = vmul.f32 -1.442695, %v10232_v11 }
 0x1a8   : > { %v8655_v50 = vpop.eup %8654  ;;  %v1429_v51 = vadd.f32 1.0, %v8653_v49  ;;  %8674 = vpow2.f32 %v8026_v47  ;;  %v1098_v52 = vpop.f32.mrb[8].mxu0 }
 0x1a9   : > { %v1178_v53 = vpop.f32.mrb[8].mxu1  ;;  %v8657_v54 = vpop.eup %8656  ;;  %v1461_v55 = vadd.f32 1.0, %v8655_v50  ;;  %8676 = vpow2.f32 %v7995_v48  ;;  %v10240_v30 = vadd.f32 %v1098_v52, %v10172_v5 }
 0x1aa   : > { %v1100_v56 = vpop.f32.mrb[9].mxu0  ;;  %v1180_v57 = vpop.f32.mrb[9].mxu1  ;;  %8678 = vrcp.f32 %v1429_v51  ;;  %v1430_v59 = vadd.f32 1.0, %v8657_v54  ;;  %v10245_v39 = vadd.f32 %v1178_v53, %v10172_v5 }
 0x1ab   : > { %v8659_v58 = vpop.eup %8658  ;;  %v1102_v60 = vpop.f32.mrb[10].mxu0  ;;  %8680 = vrcp.f32 %v1461_v55  ;;  %v10248_v40 = vadd.f32 %v1100_v56, %v10174_v6  ;;  %v10255_v46 = vadd.f32 %v1180_v57, %v10174_v6  ;;  %v8028_v56 = vmul.f32 -1.442695, %v10236_v23 }
 0x1ac   : > { %v1182_v61 = vpop.f32.mrb[10].mxu1  ;;  %v8661_v62 = vpop.eup %8660  ;;  %v1462_v63 = vadd.f32 1.0, %v8659_v58  ;;  %8682 = vrcp.f32 %v1430_v59  ;;  %v10258_v47 = vadd.f32 %v1102_v60, %v10172_v5  ;;  %v7997_v58 = vmul.f32 -1.442695, %v10240_v30 }
 0x1ad   : > { %v1104_v0 = vpop.f32.mrb[11].mxu0  ;;  %v8663_v1 = vpop.eup %8662  ;;  %v1431_v2 = vadd.f32 1.0, %v8661_v62  ;;  %v10265_v52 = vadd.f32 %v1182_v61, %v10172_v5  ;;  %v8029_v59 = vmul.f32 -1.442695, %v10245_v39  ;;  %v7998_v61 = vmul.f32 -1.442695, %v10248_v40 }
 0x1ae   : > { %v1184_v4 = vpop.f32.mrb[11].mxu1  ;;  %v8665_v7 = vpop.eup %8664  ;;  %8684 = vrcp.f32 %v1462_v63  ;;  %v1463_v8 = vadd.f32 1.0, %v8663_v1  ;;  %v10268_v53 = vadd.f32 %v1104_v0, %v10174_v6  ;;  %v8030_v62 = vmul.f32 -1.442695, %v10255_v46 }
 0x1af   : > { %v8667_v12 = vpop.eup %8666  ;;  %8686 = vrcp.f32 %v1431_v2  ;;  %v1432_v15 = vadd.f32 1.0, %v8665_v7  ;;  %v7999_v63 = vmul.f32 -1.442695, %v10258_v47  ;;  %v8031_v1 = vmul.f32 -1.442695, %v10265_v52 }
 0x1b0   : > { %v8669_v16 = vpop.eup %8668  ;;  %8688 = vrcp.f32 %v1463_v8  ;;  %v1464_v17 = vadd.f32 1.0, %v8667_v12  ;;  %v1108_v24 = vpop.f32.mrb[12].mxu0  ;;  %v8000_v2 = vmul.f32 -1.442695, %v10268_v53  ;;  %v10281_v7 = vadd.f32 %v1184_v4, %v10174_v6 }
 0x1b1   : > { %v8671_v18 = vpop.eup %8670  ;;  %8690 = vrcp.f32 %v1432_v15  ;;  %v1433_v21 = vadd.f32 1.0, %v8669_v16  ;;  %v1188_v31 = vpop.f32.mrb[12].mxu1 }
 0x1b2   : > { %v8673_v27 = vpop.eup %8672  ;;  %8692 = vrcp.f32 %v1464_v17  ;;  %v1465_v28 = vadd.f32 1.0, %v8671_v18  ;;  %v10242_v32 = vpop.f32.mrb[13].mxu0  ;;  %v10290_v18 = vadd.f32 %v1108_v24, %v10172_v5 }
 0x1b3   : > { %v8675_v35 = vpop.eup %8674  ;;  %8694 = vrcp.f32 %v1433_v21  ;;  %v1434_v36 = vadd.f32 1.0, %v8673_v27  ;;  %v10250_v41 = vpop.f32.mrb[13].mxu1 }
 0x1b4   : > { %v10252_v42 = vpop.f32.mrb[14].mxu0  ;;  %v8677_v44 = vpop.eup %8676  ;;  %8696 = vrcp.f32 %v1465_v28  ;;  %v1466_v45 = vadd.f32 1.0, %v8675_v35 }
 0x1b5   : > { %v10260_v48 = vpop.f32.mrb[14].mxu1  ;;  %v10262_v49 = vpop.f32.mrb[15].mxu0  ;;  %8698 = vrcp.f32 %v1434_v36  ;;  %v1435_v51 = vadd.f32 1.0, %v8677_v44 }
 0x1b6   : > { %v8679_v50 = vpop.eup %8678  ;;  %v10270_v54 = vpop.f32.mrb[15].mxu1  ;;  %8700 = vrcp.f32 %v1466_v45 }
 0x1b7   : > { %v8681_v55 = vpop.eup %8680  ;;  %8702 = vrcp.f32 %v1435_v51  ;;  %v1621_v16 = vmul.f32 %v8679_v50, %v10177_v9 }
 0x1b8   : > { %v8683_v57 = vpop.eup %8682  ;;  %8704 = vpow2.f32 %v8027_v22  ;;  %v10283_v8 = vpop.f32.mrb[16].mxu0  ;;  %v1653_v4 = vmul.f32 %v8681_v55, %v10180_v10 }
 0x1b9   : > { %v8685_v60 = vpop.eup %8684  ;;  %8706 = vpow2.f32 %v7996_v29  ;;  %v10285_v12 = vpop.f32.mrb[16].mxu1  ;;  %v10299_v29 = vadd.f32 %v1188_v31, %v10172_v5  ;;  %v1622_v24 = vmul.f32 %v8683_v57, %v10183_v13  ;;  %v8032_v13 = vmul.f32 -1.442695, %v10281_v7 }
 0x1ba   : > { %v8687_v0 = vpop.eup %8686  ;;  %8708 = vpow2.f32 %v8028_v56  ;;  %v10292_v21 = vpop.f32.mrb[17].mxu0  ;;  %v1654_v50 = vmul.f32 %v8685_v60, %v10186_v14 }
 0x1bb   : > { %v8689_v15 = vpop.eup %8688  ;;  %v1623_v17 = vmul.f32 %v8687_v0, %v10191_v19  ;;  %v10294_v22 = vpop.f32.mrb[17].mxu1  ;;  %8710 = vpow2.f32 %v7997_v58  ;;  %v8001_v58 = vmul.f32 -1.442695, %v10290_v18  ;;  %v8033_v14 = vmul.f32 -1.442695, %v10299_v29 }
 0x1bc   : > { %v8691_v27 = vpop.eup %8690  ;;  %v1655_v28 = vmul.f32 %v8689_v15, %v10194_v20  ;;  %v10301_v9 = vpop.f32.mrb[18].mxu0  ;;  %8712 = vpow2.f32 %v8029_v59 }
 0x1bd   : > { %v10303_v19 = vpop.f32.mrb[18].mxu1  ;;  %v8693_v35 = vpop.eup %8692  ;;  %v1685_v36 = vpack.c.bf16 %v1623_v17, %v1621_v16  ;;  %v1624_v44 = vmul.f32 %v8691_v27, %v10199_v25  ;;  %8714 = vpow2.f32 %v7998_v61 }
 0x1be   : > { %v10307_v45 = vpop.f32.mrb[19].mxu0  ;;  %v10309_v10 = vpop.f32.mrb[19].mxu1  ;;  %v1701_v31 = vpack.c.bf16 %v1655_v28, %v1653_v4  ;;  %v1656_v51 = vmul.f32 %v8693_v35, %v10202_v26  ;;  %8716 = vpow2.f32 %v8030_v62 }
 0x1bf   : > { %v8695_v20 = vpop.eup %8694  ;;  %1717 = vst [vmem:[#allocation2] sm:$0xff] %v1685_v36  ;;  %v1686_v56 = vpack.c.bf16 %v1624_v44, %v1622_v24  ;;  %8718 = vpow2.f32 %v7999_v63 }
 0x1c0   : > { %v10313_v55 = vpop.eup %8696  ;;  %1733 = vst [vmem:[#allocation2 + $0x80] sm:$0xff] %v1701_v31  ;;  %v1702_v57 = vpack.c.bf16 %v1656_v51, %v1654_v50  ;;  %8720 = vpow2.f32 %v8031_v1  ;;  %v10322_v60 = vpop.f32.mrb[20].mxu0  ;;  %v1625_v0 = vmul.f32 %v8695_v20, %v10209_v33  ;;  %v10342_v50 = vadd.f32 %v10242_v32, %v10174_v6 }
 0x1c1   : > { %v10316_v25 = vpop.eup %8698  ;;  %1718 = vst [vmem:[#allocation2 + $0x8] sm:$0xff] %v1686_v56  ;;  %8722 = vpow2.f32 %v8000_v2  ;;  %v10324_v61 = vpop.f32.mrb[20].mxu1  ;;  %v10346_v56 = vadd.f32 %v10250_v41, %v10174_v6  ;;  %v10354_v32 = vadd.f32 %v10260_v48, %v10172_v5 }
 0x1c2   : > { %v10319_v59 = vpop.eup %8700  ;;  %1734 = vst [vmem:[#allocation2 + $0x88] sm:$0xff] %v1702_v57  ;;  %8724 = vpow2.f32 %v8032_v13  ;;  %v10328_v15 = vpop.f32.mrb[21].mxu0 }
 0x1c3   : > { %v8703_v26 = vpop.eup %8702  ;;  %v10330_v16 = vpop.f32.mrb[21].mxu1  ;;  %8726 = vpow2.f32 %v8001_v58  ;;  %v10350_v58 = vadd.f32 %v10252_v42, %v10172_v5  ;;  %v10363_v42 = vadd.f32 %v10262_v49, %v10174_v6 }
 0x1c4   : > { %v8705_v62 = vpop.eup %8704  ;;  %v1627_v63 = vmul.f32 %v8703_v26, %v10223_v43  ;;  %v10332_v27 = vpop.f32.mrb[22].mxu0  ;;  %8728 = vpow2.f32 %v8033_v14 }
 0x1c5   : > { %v8707_v1 = vpop.eup %8706  ;;  %v1467_v17 = vadd.f32 1.0, %v8705_v62  ;;  %v10334_v2 = vpop.f32.mrb[22].mxu1 }
 0x1c6   : > { %v8709_v4 = vpop.eup %8708  ;;  %v1687_v28 = vpack.c.bf16 %v1627_v63, %v1625_v0  ;;  %v1436_v35 = vadd.f32 1.0, %v8707_v1  ;;  %v10336_v24 = vpop.f32.mrb[23].mxu0  ;;  %v8002_v1 = vmul.f32 -1.442695, %v10342_v50 }
 0x1c7   : > { %v10338_v33 = vpop.f32.mrb[23].mxu1  ;;  %v8711_v43 = vpop.eup %8710  ;;  %8730 = vrcp.f32 %v1467_v17  ;;  %v1468_v36 = vadd.f32 1.0, %v8709_v4 }
 0x1c8   : > { %v8713_v44 = vpop.eup %8712  ;;  %1719 = vst [vmem:[#allocation2 + $0x10] sm:$0xff] %v1687_v28  ;;  %8732 = vrcp.f32 %v1436_v35  ;;  %v1437_v20 = vadd.f32 1.0, %v8711_v43  ;;  %v10356_v62 = vpop.f32.mrb[24].mxu0  ;;  %v8034_v35 = vmul.f32 -1.442695, %v10346_v56 }
 0x1c9   : > { %v8715_v31 = vpop.eup %8714  ;;  %8734 = vrcp.f32 %v1468_v36  ;;  %v1469_v51 = vadd.f32 1.0, %v8713_v44  ;;  %v10358_v0 = vpop.f32.mrb[24].mxu1 }
 0x1ca   : > { %v8717_v13 = vpop.eup %8716  ;;  %8736 = vrcp.f32 %v1437_v20  ;;  %v1438_v57 = vadd.f32 1.0, %v8715_v31  ;;  %v10365_v17 = vpop.f32.mrb[25].mxu0  ;;  %v8003_v31 = vmul.f32 -1.442695, %v10350_v58 }
 0x1cb   : > { %v8719_v14 = vpop.eup %8718  ;;  %8738 = vrcp.f32 %v1469_v51  ;;  %v1470_v26 = vadd.f32 1.0, %v8717_v13  ;;  %v10367_v4 = vpop.f32.mrb[25].mxu1 }
 0x1cc   : > { %v8721_v41 = vpop.eup %8720  ;;  %8740 = vrcp.f32 %v1438_v57  ;;  %v1439_v63 = vadd.f32 1.0, %v8719_v14  ;;  %v10370_v43 = vpop.f32.mrb[26].mxu0  ;;  %v8035_v14 = vmul.f32 -1.442695, %v10354_v32 }
 0x1cd   : > { %v8723_v28 = vpop.eup %8722  ;;  %8742 = vrcp.f32 %v1470_v26  ;;  %v1471_v48 = vadd.f32 1.0, %v8721_v41  ;;  %17428 = vst [vmem:[#allocation15_spill] sm:$0xff] %v10370_v43  ;;  %v10372_v36 = vpop.f32.mrb[26].mxu1  ;;  %v10382_v26 = vadd.f32 %v10270_v54, %v10174_v6  ;;  %v10395_v54 = vadd.f32 %v10292_v21, %v10174_v6 }
 0x1ce   : > { %17429 = vst [vmem:[#allocation16_spill] sm:$0xff] %v10372_v36  ;;  %v8725_v44 = vpop.eup %8724  ;;  %8744 = vrcp.f32 %v1439_v63  ;;  %v1440_v20 = vadd.f32 1.0, %v8723_v28  ;;  %v10375_v49 = vpop.f32.mrb[27].mxu0  ;;  %v8004_v63 = vmul.f32 -1.442695, %v10363_v42  ;;  %v10387_v28 = vadd.f32 %v10283_v8, %v10172_v5 }
 0x1cf   : > { %17430 = vst [vmem:[#allocation17_spill] sm:$0xff] %v10375_v49  ;;  %v10377_v51 = vpop.f32.mrb[27].mxu1  ;;  %v8727_v13 = vpop.eup %8726  ;;  %8746 = vrcp.f32 %v1471_v48  ;;  %v1472_v57 = vadd.f32 1.0, %v8725_v44  ;;  %v10391_v48 = vadd.f32 %v10285_v12, %v10172_v5  ;;  %v10402_v8 = vadd.f32 %v10294_v22, %v10174_v6 }
 0x1d0   : > { %17431 = vst [vmem:[#allocation18_spill] sm:$0xff] %v10377_v51  ;;  %v8729_v41 = vpop.eup %8728  ;;  %8748 = vrcp.f32 %v1440_v20  ;;  %v1441_v36 = vadd.f32 1.0, %v8727_v13  ;;  %v1657_v20 = vmul.f32 %v10313_v55, %v10212_v34  ;;  %v1626_v12 = vmul.f32 %v10316_v25, %v10215_v37  ;;  %v10411_v43 = vpop.f32.mrb[28].mxu0 }
 0x1d1   : > { %v8731_v49 = vpop.eup %8730  ;;  %8750 = vrcp.f32 %v1472_v57  ;;  %v1473_v51 = vadd.f32 1.0, %v8729_v41  ;;  %17432 = vst [vmem:[#allocation19_spill] sm:$0xff] %v10402_v8  ;;  %v10409_v21 = vadd.f32 %v10301_v9, %v10172_v5  ;;  %v10413_v34 = vpop.f32.mrb[28].mxu1  ;;  %v1658_v22 = vmul.f32 %v10319_v59, %v10218_v38 }
 0x1d2   : > { %v8733_v44 = vpop.eup %8732  ;;  %v1659_v13 = vmul.f32 %v8731_v49, %v10229_v3  ;;  %8752 = vrcp.f32 %v1441_v36  ;;  %v10418_v37 = vpop.f32.mrb[29].mxu0  ;;  %v8036_v9 = vmul.f32 -1.442695, %v10382_v26 }
 0x1d3   : > { %v8735_v57 = vpop.eup %8734  ;;  %v1628_v41 = vmul.f32 %v8733_v44, %v10232_v11  ;;  %8754 = vrcp.f32 %v1473_v51  ;;  %v10420_v11 = vpop.f32.mrb[29].mxu1  ;;  %v10425_v51 = vadd.f32 %v10303_v19, %v10172_v5 }
 0x1d4   : > { %v8737_v3 = vpop.eup %8736  ;;  %v1703_v55 = vpack.c.bf16 %v1659_v13, %v1657_v20  ;;  %v1660_v36 = vmul.f32 %v8735_v57, %v10236_v23  ;;  %8756 = vpow2.f32 %v8002_v1  ;;  %v10427_v44 = vpop.f32.mrb[30].mxu0  ;;  %v8005_v1 = vmul.f32 -1.442695, %v10387_v28 }
 0x1d5   : > { %v8739_v25 = vpop.eup %8738  ;;  %v1688_v49 = vpack.c.bf16 %v1628_v41, %v1626_v12  ;;  %8758 = vpow2.f32 %v8034_v35  ;;  %17433 = vst [vmem:[#allocation20_spill] sm:$0xff] %v10427_v44  ;;  %v10429_v38 = vpop.f32.mrb[30].mxu1  ;;  %v10434_v20 = vadd.f32 %v10307_v45, %v10174_v6  ;;  %v8037_v57 = vmul.f32 -1.442695, %v10391_v48 }
 0x1d6   : > { %17434 = vst [vmem:[#allocation21_spill] sm:$0xff] %v10429_v38  ;;  %v8741_v59 = vpop.eup %8740  ;;  %1735 = vst [vmem:[#allocation2 + $0x90] sm:$0xff] %v1703_v55  ;;  %v1704_v23 = vpack.c.bf16 %v1660_v36, %v1658_v22  ;;  %8760 = vpow2.f32 %v8003_v31  ;;  %v10436_v35 = vpop.f32.mrb[31].mxu0  ;;  %v8006_v31 = vmul.f32 -1.442695, %v10395_v54  ;;  %v1629_v55 = vmul.f32 %v8737_v3, %v10240_v30 }
 0x1d7   : > { %17435 = vst [vmem:[#allocation22_spill] sm:$0xff] %v10436_v35  ;;  %v10438_v13 = vpop.f32.mrb[31].mxu1  ;;  %v8743_v19 = vpop.eup %8742  ;;  %1720 = vst [vmem:[#allocation2 + $0x18] sm:$0xff] %v1688_v49  ;;  %8762 = vpow2.f32 %v8035_v14  ;;  %v8038_v41 = vmul.f32 -1.442695, %v10402_v8  ;;  %v1630_v38 = vmul.f32 %v8741_v59, %v10248_v40 }
 0x1d8   : > { %17436 = vst [vmem:[#allocation23_spill] sm:$0xff] %v10438_v13  ;;  %v8745_v12 = vpop.eup %8744  ;;  %1736 = vst [vmem:[#allocation2 + $0x98] sm:$0xff] %v1704_v23  ;;  %8764 = vpow2.f32 %v8004_v63  ;;  %v8007_v22 = vmul.f32 -1.442695, %v10409_v21  ;;  %v8039_v49 = vmul.f32 -1.442695, %v10425_v51  ;;  %v1661_v13 = vmul.f32 %v8739_v25, %v10245_v39 }
 0x1d9   : > { %v8747_v45 = vpop.eup %8746  ;;  %v1631_v36 = vmul.f32 %v8745_v12, %v10258_v47  ;;  %8766 = vpow2.f32 %v8036_v9  ;;  %v8008_v63 = vmul.f32 -1.442695, %v10434_v20  ;;  %v1662_v47 = vmul.f32 %v8743_v19, %v10255_v46 }
 0x1da   : > { %v8749_v14 = vpop.eup %8748  ;;  %v1663_v23 = vmul.f32 %v8747_v45, %v10265_v52  ;;  %8768 = vpow2.f32 %v8005_v1  ;;  %v9622_v19 = vmov -inf   ;;  %v10628_v45 = vadd.f32 %v10309_v10, %v10174_v6 }
 0x1db   : > { %v8751_v35 = vpop.eup %8750  ;;  %v1689_v44 = vpack.c.bf16 %v1631_v36, %v1629_v55  ;;  %v1632_v8 = vmul.f32 %v8749_v14, %v10268_v53  ;;  %8770 = vpow2.f32 %v8037_v57  ;;  %1750 = vst.msk [vmem:[#allocation3] sm:$0xff] %vm1749_vm0, %v9622_v19  ;;  %1751 = vst.msk [vmem:[#allocation3 + $0x8] sm:$0xff] %vm1749_vm0, %v9622_v19  ;;  %v10637_v14 = vadd.f32 %v10324_v61, %v10172_v5 }
 0x1dc   : > { %v10452_v30 = vpop.eup %8752  ;;  %v1705_v3 = vpack.c.bf16 %v1663_v23, %v1661_v13  ;;  %v1664_v9 = vmul.f32 %v8751_v35, %v10281_v7  ;;  %8772 = vpow2.f32 %v8006_v31  ;;  %1752 = vst.msk [vmem:[#allocation3 + $0x10] sm:$0xff] %vm1749_vm0, %v9622_v19  ;;  %1753 = vst.msk [vmem:[#allocation3 + $0x18] sm:$0xff] %vm1749_vm0, %v9622_v19  ;;  %v9623_v31 = vmov 0.0  }
 0x1dd   : > { %v10456_v39 = vpop.eup %8754  ;;  %1721 = vst [vmem:[#allocation2 + $0x20] sm:$0xff] %v1689_v44  ;;  %v1690_v52 = vpack.c.bf16 %v1632_v8, %v1630_v38  ;;  %8774 = vpow2.f32 %v8038_v41  ;;  %1754 = vst.msk [vmem:[#allocation3 + $0x20] sm:$0xff] %vm1749_vm0, %v9622_v19  ;;  %v10645_v10 = vadd.f32 %v10330_v16, %v10174_v6  ;;  %v10653_v61 = vadd.f32 %v10334_v2, %v10172_v5 }
 0x1de   : > { %v8757_v25 = vpop.eup %8756  ;;  %1737 = vst [vmem:[#allocation2 + $0xa0] sm:$0xff] %v1705_v3  ;;  %v1706_v40 = vpack.c.bf16 %v1664_v9, %v1662_v47  ;;  %8776 = vpow2.f32 %v8007_v22  ;;  %1755 = vst.msk [vmem:[#allocation3 + $0x28] sm:$0xff] %vm1749_vm0, %v9622_v19  ;;  %v10641_v47 = vadd.f32 %v10328_v15, %v10174_v6  ;;  %v10657_v15 = vadd.f32 %v10336_v24, %v10174_v6 }
 0x1df   : > { %v8759_v59 = vpop.eup %8758  ;;  %1722 = vst [vmem:[#allocation2 + $0x28] sm:$0xff] %v1690_v52  ;;  %v1442_v53 = vadd.f32 1.0, %v8757_v25  ;;  %8778 = vpow2.f32 %v8039_v49  ;;  %1756 = vst.msk [vmem:[#allocation3 + $0x30] sm:$0xff] %vm1749_vm0, %v9622_v19  ;;  %v10633_v49 = vadd.f32 %v10322_v60, %v10172_v5  ;;  %v10649_v60 = vadd.f32 %v10332_v27, %v10172_v5 }
 0x1e0   : > { %v8761_v1 = vpop.eup %8760  ;;  %1738 = vst [vmem:[#allocation2 + $0xa8] sm:$0xff] %v1706_v40  ;;  %v1474_v46 = vadd.f32 1.0, %v8759_v59  ;;  %8780 = vpow2.f32 %v8008_v63  ;;  %1757 = vst.msk [vmem:[#allocation3 + $0x38] sm:$0xff] %vm1749_vm0, %v9622_v19  ;;  %v8040_v59 = vmul.f32 -1.442695, %v10628_v45 }
 0x1e1   : > { %v8763_v7 = vpop.eup %8762  ;;  %8782 = vrcp.f32 %v1442_v53  ;;  %v1443_v35 = vadd.f32 1.0, %v8761_v1  ;;  %1758 = vst.msk [vmem:[#allocation3 + $0x40] sm:$0xff] %vm1749_vm0, %v9622_v19  ;;  %1759 = vst.msk [vmem:[#allocation3 + $0x48] sm:$0xff] %vm1749_vm0, %v9622_v19  ;;  %v8009_v53 = vmul.f32 -1.442695, %v10633_v49 }
 0x1e2   : > { %v8765_v13 = vpop.eup %8764  ;;  %8784 = vrcp.f32 %v1474_v46  ;;  %v1475_v8 = vadd.f32 1.0, %v8763_v7  ;;  %1760 = vst.msk [vmem:[#allocation3 + $0x50] sm:$0xff] %vm1749_vm0, %v9622_v19  ;;  %1761 = vst.msk [vmem:[#allocation3 + $0x58] sm:$0xff] %vm1749_vm0, %v9622_v19  ;;  %v8041_v2 = vmul.f32 -1.442695, %v10637_v14 }
 0x1e3   : > { %v8767_v44 = vpop.eup %8766  ;;  %8786 = vrcp.f32 %v1443_v35  ;;  %v10458_v38 = vadd.f32 1.0, %v8765_v13  ;;  %1762 = vst.msk [vmem:[#allocation3 + $0x60] sm:$0xff] %vm1749_vm0, %v9622_v19  ;;  %1763 = vst.msk [vmem:[#allocation3 + $0x68] sm:$0xff] %vm1749_vm0, %v9622_v19  ;;  %v8010_v46 = vmul.f32 -1.442695, %v10641_v47 }
 0x1e4   : > { %1764 = vst.msk [vmem:[#allocation3 + $0x70] sm:$0xff] %vm1749_vm0, %v9622_v19  ;;  %1765 = vst.msk [vmem:[#allocation3 + $0x78] sm:$0xff] %vm1749_vm0, %v9622_v19  ;;  %v10492_v57 = vpop.eup %8768  ;;  %8788 = vrcp.f32 %v1475_v8  ;;  %v10494_v12 = vadd.f32 1.0, %v8767_v44  ;;  %v8042_v35 = vmul.f32 -1.442695, %v10645_v10 }
 0x1e5   : > { %1766 = vst.msk [vmem:[#allocation3 + $0x80] sm:$0xff] %vm1749_vm0, %v9622_v19  ;;  %1767 = vst.msk [vmem:[#allocation3 + $0x88] sm:$0xff] %vm1749_vm0, %v9622_v19  ;;  %v8771_v41 = vpop.eup %8770  ;;  %8790 = vrcp.f32 %v10458_v38  ;;  %v1445_v22 = vadd.f32 1.0, %v10492_v57  ;;  %v8011_v24 = vmul.f32 -1.442695, %v10649_v60  ;;  %v10669_v38 = vadd.f32 %v10338_v33, %v10174_v6 }
 0x1e6   : > { %1768 = vst.msk [vmem:[#allocation3 + $0x90] sm:$0xff] %vm1749_vm0, %v9622_v19  ;;  %1769 = vst.msk [vmem:[#allocation3 + $0x98] sm:$0xff] %vm1749_vm0, %v9622_v19  ;;  %v8773_v55 = vpop.eup %8772  ;;  %8792 = vrcp.f32 %v10494_v12  ;;  %v1477_v36 = vadd.f32 1.0, %v8771_v41  ;;  %v8043_v13 = vmul.f32 -1.442695, %v10653_v61  ;;  %v1633_v12 = vmul.f32 %v10452_v30, %v10290_v18 }
 0x1e7   : > { %1770 = vst.msk [vmem:[#allocation3 + $0xa0] sm:$0xff] %vm1749_vm0, %v9622_v19  ;;  %1771 = vst.msk [vmem:[#allocation3 + $0xa8] sm:$0xff] %vm1749_vm0, %v9622_v19  ;;  %v8775_v23 = vpop.eup %8774  ;;  %8794 = vrcp.f32 %v1445_v22  ;;  %v1446_v63 = vadd.f32 1.0, %v8773_v55  ;;  %v8012_v44 = vmul.f32 -1.442695, %v10657_v15  ;;  %v10680_v41 = vadd.f32 %v10358_v0, %v10172_v5 }
 0x1e8   : > { %1772 = vst.msk [vmem:[#allocation3 + $0xb0] sm:$0xff] %vm1749_vm0, %v9622_v19  ;;  %1773 = vst.msk [vmem:[#allocation3 + $0xb8] sm:$0xff] %vm1749_vm0, %v9622_v19  ;;  %v8777_v3 = vpop.eup %8776  ;;  %8796 = vrcp.f32 %v1477_v36  ;;  %v1478_v9 = vadd.f32 1.0, %v8775_v23  ;;  %v1665_v33 = vmul.f32 %v10456_v39, %v10299_v29 }
 0x1e9   : > { %1774 = vst.msk [vmem:[#allocation3 + $0xc0] sm:$0xff] %vm1749_vm0, %v9622_v19  ;;  %1775 = vst.msk [vmem:[#allocation3 + $0xc8] sm:$0xff] %vm1749_vm0, %v9622_v19  ;;  %v8779_v52 = vpop.eup %8778  ;;  %8798 = vrcp.f32 %v1446_v63  ;;  %v1447_v25 = vadd.f32 1.0, %v8777_v3 }
 0x1ea   : > { %1776 = vst.msk [vmem:[#allocation3 + $0xd0] sm:$0xff] %vm1749_vm0, %v9622_v19  ;;  %1777 = vst.msk [vmem:[#allocation3 + $0xd8] sm:$0xff] %vm1749_vm0, %v9622_v19  ;;  %v8781_v16 = vpop.eup %8780  ;;  %8800 = vrcp.f32 %v1478_v9  ;;  %v1479_v40 = vadd.f32 1.0, %v8779_v52 }
 0x1eb   : > { %1778 = vst.msk [vmem:[#allocation3 + $0xe0] sm:$0xff] %vm1749_vm0, %v9622_v19  ;;  %1779 = vst.msk [vmem:[#allocation3 + $0xe8] sm:$0xff] %vm1749_vm0, %v9622_v19  ;;  %v8783_v27 = vpop.eup %8782  ;;  %8802 = vrcp.f32 %v1447_v25  ;;  %v1448_v1 = vadd.f32 1.0, %v8781_v16 }
 0x1ec   : > { %1780 = vst.msk [vmem:[#allocation3 + $0xf0] sm:$0xff] %vm1749_vm0, %v9622_v19  ;;  %1781 = vst.msk [vmem:[#allocation3 + $0xf8] sm:$0xff] %vm1749_vm0, %v9622_v19  ;;  %v8785_v7 = vpop.eup %8784  ;;  %8804 = vrcp.f32 %v1479_v40  ;;  %v10673_v19 = vadd.f32 %v10356_v62, %v10172_v5  ;;  %v10687_v62 = vadd.f32 %v10365_v17, %v10174_v6  ;;  %v1634_v18 = vmul.f32 %v8783_v27, %v10342_v50 }
 0x1ed   : > { %1782 = vst.msk [vmem:[#allocation4] sm:$0xff] %vm1749_vm0, %v9623_v31  ;;  %1783 = vst.msk [vmem:[#allocation4 + $0x8] sm:$0xff] %vm1749_vm0, %v9623_v31  ;;  %v8787_v8 = vpop.eup %8786  ;;  %8806 = vrcp.f32 %v1448_v1  ;;  %v1666_v23 = vmul.f32 %v8785_v7, %v10346_v56  ;;  %v8044_v17 = vmul.f32 -1.442695, %v10669_v38  ;;  %v10696_v50 = vadd.f32 %v10367_v4, %v10174_v6 }
 0x1ee   : > { %1784 = vst.msk [vmem:[#allocation4 + $0x10] sm:$0xff] %vm1749_vm0, %v9623_v31  ;;  %1785 = vst.msk [vmem:[#allocation4 + $0x18] sm:$0xff] %vm1749_vm0, %v9623_v31  ;;  %v8789_v57 = vpop.eup %8788  ;;  %8808 = vpow2.f32 %v8040_v59  ;;  %v8013_v56 = vmul.f32 -1.442695, %v10673_v19  ;;  %v8014_v25 = vmul.f32 -1.442695, %v10687_v62 }
 0x1ef   : > { %1786 = vst.msk [vmem:[#allocation4 + $0x20] sm:$0xff] %vm1749_vm0, %v9623_v31  ;;  %1787 = vst.msk [vmem:[#allocation4 + $0x28] sm:$0xff] %vm1749_vm0, %v9623_v31  ;;  %v8791_v22 = vpop.eup %8790  ;;  %v1667_v55 = vmul.f32 %v8789_v57, %v10354_v32  ;;  %8810 = vpow2.f32 %v8009_v53  ;;  %v8046_v59 = vmul.f32 -1.442695, %v10696_v50 }
 0x1f0   : > { %1788 = vst.msk [vmem:[#allocation4 + $0x30] sm:$0xff] %vm1749_vm0, %v9623_v31  ;;  %1789 = vst.msk [vmem:[#allocation4 + $0x38] sm:$0xff] %vm1749_vm0, %v9623_v31  ;;  %v8793_v36 = vpop.eup %8792  ;;  %v1636_v30 = vmul.f32 %v8791_v22, %v10363_v42  ;;  %8812 = vpow2.f32 %v8041_v2 }
 0x1f1   : > { %1790 = vst.msk [vmem:[#allocation4 + $0x40] sm:$0xff] %vm1749_vm0, %v9623_v31  ;;  %1791 = vst.msk [vmem:[#allocation4 + $0x48] sm:$0xff] %vm1749_vm0, %v9623_v31  ;;  %v8795_v0 = vpop.eup %8794  ;;  %v1707_v63 = vpack.c.bf16 %v1667_v55, %v1665_v33  ;;  %v1668_v29 = vmul.f32 %v8793_v36, %v10382_v26  ;;  %8814 = vpow2.f32 %v8010_v46  ;;  %v8045_v26 = vmul.f32 -1.442695, %v10680_v41  ;;  %v17437_v36 = vld [vmem:[#allocation15_spill] sm:$0xff] }
 0x1f2   : > { %1792 = vst.msk [vmem:[#allocation4 + $0x50] sm:$0xff] %vm1749_vm0, %v9623_v31  ;;  %1793 = vst.msk [vmem:[#allocation4 + $0x58] sm:$0xff] %vm1749_vm0, %v9623_v31  ;;  %v8797_v32 = vpop.eup %8796  ;;  %v1692_v39 = vpack.c.bf16 %v1636_v30, %v1634_v18  ;;  %8816 = vpow2.f32 %v8042_v35  ;;  %v1637_v4 = vmul.f32 %v8795_v0, %v10387_v28  ;;  %v10712_v18 = vadd.f32 %v17437_v36, %v10172_v5  ;;  %v17438_v0 = vld [vmem:[#allocation16_spill] sm:$0xff] }
 0x1f3   : > { %1794 = vst.msk [vmem:[#allocation4 + $0x60] sm:$0xff] %vm1749_vm0, %v9623_v31  ;;  %1795 = vst.msk [vmem:[#allocation4 + $0x68] sm:$0xff] %vm1749_vm0, %v9623_v31  ;;  %v8799_v3 = vpop.eup %8798  ;;  %v1708_v42 = vpack.c.bf16 %v1668_v29, %v1666_v23  ;;  %8818 = vpow2.f32 %v8011_v24  ;;  %v1669_v27 = vmul.f32 %v8797_v32, %v10391_v48  ;;  %v10716_v23 = vadd.f32 %v17438_v0, %v10172_v5 }
 0x1f4   : > { %1796 = vst.msk [vmem:[#allocation4 + $0x70] sm:$0xff] %vm1749_vm0, %v9623_v31  ;;  %1797 = vst.msk [vmem:[#allocation4 + $0x78] sm:$0xff] %vm1749_vm0, %v9623_v31  ;;  %v10699_v9 = vpop.eup %8800  ;;  %8820 = vpow2.f32 %v8043_v13  ;;  %v1638_v46 = vmul.f32 %v8799_v3, %v10395_v54 }
 0x1f5   : > { %1798 = vst.msk [vmem:[#allocation4 + $0x80] sm:$0xff] %vm1749_vm0, %v9623_v31  ;;  %1799 = vst.msk [vmem:[#allocation4 + $0x88] sm:$0xff] %vm1749_vm0, %v9623_v31  ;;  %v8803_v52 = vpop.eup %8802  ;;  %8822 = vpow2.f32 %v8012_v44 }
 0x1f6   : > { %1800 = vst.msk [vmem:[#allocation4 + $0x90] sm:$0xff] %vm1749_vm0, %v9623_v31  ;;  %1801 = vst.msk [vmem:[#allocation4 + $0x98] sm:$0xff] %vm1749_vm0, %v9623_v31  ;;  %v8805_v16 = vpop.eup %8804  ;;  %v1639_v40 = vmul.f32 %v8803_v52, %v10409_v21  ;;  %8824 = vpow2.f32 %v8044_v17  ;;  %v17440_v52 = vld [vmem:[#allocation18_spill] sm:$0xff] }
 0x1f7   : > { %1802 = vst.msk [vmem:[#allocation4 + $0xa0] sm:$0xff] %vm1749_vm0, %v9623_v31  ;;  %1803 = vst.msk [vmem:[#allocation4 + $0xa8] sm:$0xff] %vm1749_vm0, %v9623_v31  ;;  %v8807_v53 = vpop.eup %8806  ;;  %v1671_v1 = vmul.f32 %v8805_v16, %v10425_v51  ;;  %8826 = vpow2.f32 %v8013_v56 }
 0x1f8   : > { %1804 = vst.msk [vmem:[#allocation4 + $0xb0] sm:$0xff] %vm1749_vm0, %v9623_v31  ;;  %1805 = vst.msk [vmem:[#allocation4 + $0xb8] sm:$0xff] %vm1749_vm0, %v9623_v31  ;;  %v8809_v2 = vpop.eup %8808  ;;  %v1693_v7 = vpack.c.bf16 %v1639_v40, %v1637_v4  ;;  %v1640_v35 = vmul.f32 %v8807_v53, %v10434_v20  ;;  %8828 = vpow2.f32 %v8045_v26  ;;  %v8015_v26 = vmul.f32 -1.442695, %v10712_v18 }
 0x1f9   : > { %1806 = vst.msk [vmem:[#allocation4 + $0xc0] sm:$0xff] %vm1749_vm0, %v9623_v31  ;;  %1807 = vst.msk [vmem:[#allocation4 + $0xc8] sm:$0xff] %vm1749_vm0, %v9623_v31  ;;  %v8811_v24 = vpop.eup %8810  ;;  %v1709_v28 = vpack.c.bf16 %v1671_v1, %v1669_v27  ;;  %v1480_v13 = vadd.f32 1.0, %v8809_v2  ;;  %8830 = vpow2.f32 %v8014_v25  ;;  %v10725_v25 = vadd.f32 %v17440_v52, %v10174_v6 }
 0x1fa   : > { %1808 = vst.msk [vmem:[#allocation4 + $0xd0] sm:$0xff] %vm1749_vm0, %v9623_v31  ;;  %1809 = vst.msk [vmem:[#allocation4 + $0xd8] sm:$0xff] %vm1749_vm0, %v9623_v31  ;;  %v8813_v21 = vpop.eup %8812  ;;  %v1449_v44 = vadd.f32 1.0, %v8811_v24  ;;  %8832 = vpow2.f32 %v8046_v59  ;;  %v8047_v40 = vmul.f32 -1.442695, %v10716_v23  ;;  %v10731_v53 = vadd.f32 %v10411_v43, %v10172_v5 }
 0x1fb   : > { %1810 = vst.msk [vmem:[#allocation4 + $0xe0] sm:$0xff] %vm1749_vm0, %v9623_v31  ;;  %1811 = vst.msk [vmem:[#allocation4 + $0xe8] sm:$0xff] %vm1749_vm0, %v9623_v31  ;;  %v8815_v48 = vpop.eup %8814  ;;  %8834 = vrcp.f32 %v1480_v13  ;;  %v1481_v51 = vadd.f32 1.0, %v8813_v21  ;;  %v10735_v1 = vadd.f32 %v10413_v34, %v10172_v5  ;;  %v10739_v2 = vadd.f32 %v10418_v37, %v10174_v6  ;;  %v17443_v21 = vld [vmem:[#allocation21_spill] sm:$0xff] }
 0x1fc   : > { %1812 = vst.msk [vmem:[#allocation4 + $0xf0] sm:$0xff] %vm1749_vm0, %v9623_v31  ;;  %1813 = vst.msk [vmem:[#allocation4 + $0xf8] sm:$0xff] %vm1749_vm0, %v9623_v31  ;;  %v8817_v57 = vpop.eup %8816  ;;  %8836 = vrcp.f32 %v1449_v44  ;;  %v1450_v54 = vadd.f32 1.0, %v8815_v48  ;;  %v8048_v37 = vmul.f32 -1.442695, %v10725_v25 }
 0x1fd   : > { %1814 = vst.msk [vmem:[#allocation5] sm:$0xff] %vm1749_vm0, %v9623_v31  ;;  %1815 = vst.msk [vmem:[#allocation5 + $0x8] sm:$0xff] %vm1749_vm0, %v9623_v31  ;;  %8838 = vrcp.f32 %v1481_v51  ;;  %v1482_v20 = vadd.f32 1.0, %v8817_v57  ;;  %v8049_v57 = vmul.f32 -1.442695, %v10735_v1 }
 0x1fe   : > { %1816 = vst.msk [vmem:[#allocation5 + $0x10] sm:$0xff] %vm1749_vm0, %v9623_v31  ;;  %1817 = vst.msk [vmem:[#allocation5 + $0x18] sm:$0xff] %vm1749_vm0, %v9623_v31  ;;  %8840 = vrcp.f32 %v1450_v54  ;;  %v8018_v54 = vmul.f32 -1.442695, %v10739_v2 }
 0x1ff   : > { %1818 = vst.msk [vmem:[#allocation5 + $0x20] sm:$0xff] %vm1749_vm0, %v9623_v31  ;;  %1819 = vst.msk [vmem:[#allocation5 + $0x28] sm:$0xff] %vm1749_vm0, %v9623_v31  ;;  %8842 = vrcp.f32 %v1482_v20 }
 0x200   : > { %1820 = vst.msk [vmem:[#allocation5 + $0x30] sm:$0xff] %vm1749_vm0, %v9623_v31  ;;  %1821 = vst.msk [vmem:[#allocation5 + $0x38] sm:$0xff] %vm1749_vm0, %v9623_v31 }
 0x201   : > { %1822 = vst.msk [vmem:[#allocation5 + $0x40] sm:$0xff] %vm1749_vm0, %v9623_v31  ;;  %1823 = vst.msk [vmem:[#allocation5 + $0x48] sm:$0xff] %vm1749_vm0, %v9623_v31 }
 0x202   : > { %1824 = vst.msk [vmem:[#allocation5 + $0x50] sm:$0xff] %vm1749_vm0, %v9623_v31  ;;  %1825 = vst.msk [vmem:[#allocation5 + $0x58] sm:$0xff] %vm1749_vm0, %v9623_v31 }
 0x203   : > { %1826 = vst.msk [vmem:[#allocation5 + $0x60] sm:$0xff] %vm1749_vm0, %v9623_v31  ;;  %1827 = vst.msk [vmem:[#allocation5 + $0x68] sm:$0xff] %vm1749_vm0, %v9623_v31 }
 0x204   : > { %1828 = vst.msk [vmem:[#allocation5 + $0x70] sm:$0xff] %vm1749_vm0, %v9623_v31  ;;  %1829 = vst.msk [vmem:[#allocation5 + $0x78] sm:$0xff] %vm1749_vm0, %v9623_v31 }
 0x205   : > { %1830 = vst.msk [vmem:[#allocation5 + $0x80] sm:$0xff] %vm1749_vm0, %v9623_v31  ;;  %1831 = vst.msk [vmem:[#allocation5 + $0x88] sm:$0xff] %vm1749_vm0, %v9623_v31 }
 0x206   : > { %1832 = vst.msk [vmem:[#allocation5 + $0x90] sm:$0xff] %vm1749_vm0, %v9623_v31  ;;  %1833 = vst.msk [vmem:[#allocation5 + $0x98] sm:$0xff] %vm1749_vm0, %v9623_v31 }
 0x207   : > { %1834 = vst.msk [vmem:[#allocation5 + $0xa0] sm:$0xff] %vm1749_vm0, %v9623_v31  ;;  %1835 = vst.msk [vmem:[#allocation5 + $0xa8] sm:$0xff] %vm1749_vm0, %v9623_v31 }
 0x208   : > { %1836 = vst.msk [vmem:[#allocation5 + $0xb0] sm:$0xff] %vm1749_vm0, %v9623_v31  ;;  %1837 = vst.msk [vmem:[#allocation5 + $0xb8] sm:$0xff] %vm1749_vm0, %v9623_v31 }
 0x209   : > { %1838 = vst.msk [vmem:[#allocation5 + $0xc0] sm:$0xff] %vm1749_vm0, %v9623_v31  ;;  %1839 = vst.msk [vmem:[#allocation5 + $0xc8] sm:$0xff] %vm1749_vm0, %v9623_v31 }
 0x20a   : > { %1840 = vst.msk [vmem:[#allocation5 + $0xd0] sm:$0xff] %vm1749_vm0, %v9623_v31  ;;  %1841 = vst.msk [vmem:[#allocation5 + $0xd8] sm:$0xff] %vm1749_vm0, %v9623_v31 }
 0x20b   : > { %1842 = vst.msk [vmem:[#allocation5 + $0xe0] sm:$0xff] %vm1749_vm0, %v9623_v31  ;;  %1843 = vst.msk [vmem:[#allocation5 + $0xe8] sm:$0xff] %vm1749_vm0, %v9623_v31 }
 0x20c   : > { %1844 = vst.msk [vmem:[#allocation5 + $0xf0] sm:$0xff] %vm1749_vm0, %v9623_v31  ;;  %1845 = vst.msk [vmem:[#allocation5 + $0xf8] sm:$0xff] %vm1749_vm0, %v9623_v31  ;;  %v1635_v31 = vmul.f32 %v8787_v8, %v10350_v58  ;;  %v1694_v8 = vpack.c.bf16 %v1640_v35, %v1638_v46  ;;  %v10743_v46 = vadd.f32 %v10420_v11, %v10174_v6  ;;  %v17441_v35 = vld [vmem:[#allocation19_spill] sm:$0xff] }
 0x20d   : > { %1739 = vst [vmem:[#allocation2 + $0xb0] sm:$0xff] %v1707_v63  ;;  %1724 = vst [vmem:[#allocation2 + $0x38] sm:$0xff] %v1692_v39  ;;  %v17439_v63 = vld [vmem:[#allocation17_spill] sm:$0xff]  ;;  %v1670_v24 = vmul.f32 %v10699_v9, %v17441_v35  ;;  %v8017_v9 = vmul.f32 -1.442695, %v10731_v53 }
 0x20e   : > { %v1691_v58 = vpack.c.bf16 %v1635_v31, %v1633_v12  ;;  %1740 = vst [vmem:[#allocation2 + $0xb8] sm:$0xff] %v1708_v42  ;;  %1725 = vst [vmem:[#allocation2 + $0x40] sm:$0xff] %v1693_v7  ;;  %v8819_v12 = vpop.eup %8818  ;;  %v10720_v29 = vadd.f32 %v17439_v63, %v10174_v6 }
 0x20f   : > { %1741 = vst [vmem:[#allocation2 + $0xc0] sm:$0xff] %v1709_v28  ;;  %1726 = vst [vmem:[#allocation2 + $0x48] sm:$0xff] %v1694_v8  ;;  %v8821_v31 = vpop.eup %8820  ;;  %v1451_v22 = vadd.f32 1.0, %v8819_v12  ;;  %v17442_v28 = vld [vmem:[#allocation20_spill] sm:$0xff]  ;;  %v10755_v8 = vadd.f32 %v17443_v21, %v10172_v5 }
 0x210   : > { %1723 = vst [vmem:[#allocation2 + $0x30] sm:$0xff] %v1691_v58  ;;  %v8823_v33 = vpop.eup %8822  ;;  %v1483_v55 = vadd.f32 1.0, %v8821_v31  ;;  %v8016_v59 = vmul.f32 -1.442695, %v10720_v29  ;;  %v10750_v13 = vadd.f32 %v17442_v28, %v10172_v5  ;;  %v8050_v5 = vmul.f32 -1.442695, %v10743_v46 }
 0x211   : > { %v8825_v58 = vpop.eup %8824  ;;  %8844 = vrcp.f32 %v1451_v22  ;;  %v1452_v30 = vadd.f32 1.0, %v8823_v33  ;;  %v17445_v31 = vld [vmem:[#allocation23_spill] sm:$0xff] }
 0x212   : > { %v8827_v32 = vpop.eup %8826  ;;  %8846 = vrcp.f32 %v1483_v55  ;;  %v1484_v39 = vadd.f32 1.0, %v8825_v58  ;;  %v8019_v20 = vmul.f32 -1.442695, %v10750_v13  ;;  %v10768_v22 = vadd.f32 %v17445_v31, %v10174_v6 }
 0x213   : > { %v8829_v17 = vpop.eup %8828  ;;  %8848 = vrcp.f32 %v1452_v30  ;;  %v1453_v3 = vadd.f32 1.0, %v8827_v32  ;;  %v8051_v58 = vmul.f32 -1.442695, %v10755_v8 }
 0x214   : > { %v8831_v42 = vpop.eup %8830  ;;  %8850 = vrcp.f32 %v1484_v39  ;;  %v1485_v56 = vadd.f32 1.0, %v8829_v17 }
 0x215   : > { %v8833_v16 = vpop.eup %8832  ;;  %v1454_v4 = vadd.f32 1.0, %v8831_v42  ;;  %8852 = vrcp.f32 %v1453_v3 }
 0x216   : > { %v8835_v27 = vpop.eup %8834  ;;  %8854 = vrcp.f32 %v1485_v56 }
 0x217   : > { %v8837_v7 = vpop.eup %8836  ;;  %v1672_v43 = vmul.f32 %v8835_v27, %v10628_v45  ;;  %8856 = vrcp.f32 %v1454_v4  ;;  %v17444_v45 = vld [vmem:[#allocation22_spill] sm:$0xff] }
 0x218   : > { %v8839_v34 = vpop.eup %8838  ;;  %8858 = vpow2.f32 %v8015_v26  ;;  %v10760_v48 = vadd.f32 %v17444_v45, %v10174_v6  ;;  %v1641_v55 = vmul.f32 %v8837_v7, %v10633_v49 }
 0x219   : > { %v8841_v11 = vpop.eup %8840  ;;  %v1710_v44 = vpack.c.bf16 %v1672_v43, %v1670_v24  ;;  %8860 = vpow2.f32 %v8047_v40  ;;  %v1673_v0 = vmul.f32 %v8839_v34, %v10637_v14 }
 0x21a   : > { %v8843_v51 = vpop.eup %8842  ;;  %8862 = vpow2.f32 %v8016_v59  ;;  %v8020_v32 = vmul.f32 -1.442695, %v10760_v48  ;;  %v1642_v6 = vmul.f32 %v8841_v11, %v10641_v47  ;;  %v1486_v47 = vadd.f32 1.0, %v8833_v16 }
 0x21b   : > { %v8845_v12 = vpop.eup %8844  ;;  %1742 = vst [vmem:[#allocation2 + $0xc8] sm:$0xff] %v1710_v44  ;;  %8864 = vpow2.f32 %v8048_v37  ;;  %v1674_v49 = vmul.f32 %v8843_v51, %v10645_v10 }
 0x21c   : > { %v8847_v33 = vpop.eup %8846  ;;  %v1643_v36 = vmul.f32 %v8845_v12, %v10649_v60  ;;  %8866 = vpow2.f32 %v8017_v9 }
 0x21d   : > { %v8849_v30 = vpop.eup %8848  ;;  %v1675_v63 = vmul.f32 %v8847_v33, %v10653_v61  ;;  %8868 = vpow2.f32 %v8049_v57  ;;  %v8052_v61 = vmul.f32 -1.442695, %v10768_v22 }
 0x21e   : > { %v8851_v39 = vpop.eup %8850  ;;  %v1695_v17 = vpack.c.bf16 %v1643_v36, %v1641_v55  ;;  %v1644_v3 = vmul.f32 %v8849_v30, %v10657_v15  ;;  %8870 = vpow2.f32 %v8018_v54 }
 0x21f   : > { %v1711_v60 = vpack.c.bf16 %v1675_v63, %v1673_v0  ;;  %v1676_v42 = vmul.f32 %v8851_v39, %v10669_v38  ;;  %v8853_v56 = vpop.eup %8852  ;;  %8872 = vpow2.f32 %v8050_v5 }
 0x220   : > { %1727 = vst [vmem:[#allocation2 + $0x50] sm:$0xff] %v1695_v17  ;;  %v1696_v14 = vpack.c.bf16 %v1644_v3, %v1642_v6  ;;  %v8855_v26 = vpop.eup %8854  ;;  %8874 = vpow2.f32 %v8019_v20  ;;  %v1645_v55 = vmul.f32 %v8853_v56, %v10673_v19 }
 0x221   : > { %1743 = vst [vmem:[#allocation2 + $0xd0] sm:$0xff] %v1711_v60  ;;  %v1712_v52 = vpack.c.bf16 %v1676_v42, %v1674_v49  ;;  %v8857_v4 = vpop.eup %8856  ;;  %8876 = vpow2.f32 %v8051_v58  ;;  %v1677_v30 = vmul.f32 %v8855_v26, %v10680_v41 }
 0x222   : > { %1728 = vst [vmem:[#allocation2 + $0x58] sm:$0xff] %v1696_v14  ;;  %v8859_v15 = vpop.eup %8858  ;;  %8878 = vpow2.f32 %v8020_v32  ;;  %v1646_v32 = vmul.f32 %v8857_v4, %v10687_v62 }
 0x223   : > { %1744 = vst [vmem:[#allocation2 + $0xd8] sm:$0xff] %v1712_v52  ;;  %v8861_v10 = vpop.eup %8860  ;;  %v1455_v38 = vadd.f32 1.0, %v8859_v15  ;;  %8880 = vpow2.f32 %v8052_v61 }
 0x224   : > { %v8863_v40 = vpop.eup %8862  ;;  %8882 = vrcp.f32 %v1486_v47  ;;  %v1487_v59 = vadd.f32 1.0, %v8861_v10 }
 0x225   : > { %v8865_v27 = vpop.eup %8864  ;;  %8884 = vrcp.f32 %v1455_v38  ;;  %v1456_v7 = vadd.f32 1.0, %v8863_v40 }
 0x226   : > { %v8867_v35 = vpop.eup %8866  ;;  %8886 = vrcp.f32 %v1487_v59  ;;  %v1488_v24 = vadd.f32 1.0, %v8865_v27 }
 0x227   : > { %v8869_v16 = vpop.eup %8868  ;;  %8888 = vrcp.f32 %v1456_v7  ;;  %v1457_v43 = vadd.f32 1.0, %v8867_v35 }
 0x228   : > { %v8871_v28 = vpop.eup %8870  ;;  %8890 = vrcp.f32 %v1488_v24  ;;  %v1489_v34 = vadd.f32 1.0, %v8869_v16 }
 0x229   : > { %v8873_v37 = vpop.eup %8872  ;;  %8892 = vrcp.f32 %v1457_v43  ;;  %v1458_v21 = vadd.f32 1.0, %v8871_v28 }
 0x22a   : > { %v8875_v11 = vpop.eup %8874  ;;  %8894 = vrcp.f32 %v1489_v34  ;;  %v1490_v44 = vadd.f32 1.0, %v8873_v37 }
 0x22b   : > { %v8877_v9 = vpop.eup %8876  ;;  %8896 = vrcp.f32 %v1458_v21  ;;  %v1459_v45 = vadd.f32 1.0, %v8875_v11 }
 0x22c   : > { %v8879_v51 = vpop.eup %8878  ;;  %8898 = vrcp.f32 %v1490_v44  ;;  %v1491_v57 = vadd.f32 1.0, %v8877_v9 }
 0x22d   : > { %v8881_v54 = vpop.eup %8880  ;;  %8900 = vrcp.f32 %v1459_v45  ;;  %v1460_v12 = vadd.f32 1.0, %v8879_v51 }
 0x22e   : > { %v8883_v5 = vpop.eup %8882  ;;  %8902 = vrcp.f32 %v1491_v57  ;;  %v1492_v20 = vadd.f32 1.0, %v8881_v54 }
 0x22f   : > { %v8885_v31 = vpop.eup %8884  ;;  %8904 = vrcp.f32 %v1460_v12  ;;  %v1678_v3 = vmul.f32 %v8883_v5, %v10696_v50 }
 0x230   : > { %v8887_v33 = vpop.eup %8886  ;;  %v1647_v36 = vmul.f32 %v8885_v31, %v10712_v18  ;;  %8906 = vrcp.f32 %v1492_v20 }
 0x231   : > { %v8889_v58 = vpop.eup %8888  ;;  %v1679_v0 = vmul.f32 %v8887_v33, %v10716_v23 }
 0x232   : > { %v8891_v63 = vpop.eup %8890  ;;  %v1697_v39 = vpack.c.bf16 %v1647_v36, %v1645_v55  ;;  %v1648_v6 = vmul.f32 %v8889_v58, %v10720_v29 }
 0x233   : > { %v8893_v17 = vpop.eup %8892  ;;  %v1713_v49 = vpack.c.bf16 %v1679_v0, %v1677_v30  ;;  %v1680_v19 = vmul.f32 %v8891_v63, %v10725_v25 }
 0x234   : > { %v8895_v60 = vpop.eup %8894  ;;  %1729 = vst [vmem:[#allocation2 + $0x60] sm:$0xff] %v1697_v39  ;;  %v1698_v18 = vpack.c.bf16 %v1648_v6, %v1646_v32  ;;  %v1649_v14 = vmul.f32 %v8893_v17, %v10731_v53 }
 0x235   : > { %v8897_v42 = vpop.eup %8896  ;;  %1745 = vst [vmem:[#allocation2 + $0xe0] sm:$0xff] %v1713_v49  ;;  %v1714_v41 = vpack.c.bf16 %v1680_v19, %v1678_v3  ;;  %v1681_v50 = vmul.f32 %v8895_v60, %v10735_v1 }
 0x236   : > { %v8899_v56 = vpop.eup %8898  ;;  %1730 = vst [vmem:[#allocation2 + $0x68] sm:$0xff] %v1698_v18  ;;  %v1650_v52 = vmul.f32 %v8897_v42, %v10739_v2 }
 0x237   : > { %v8901_v23 = vpop.eup %8900  ;;  %1746 = vst [vmem:[#allocation2 + $0xe8] sm:$0xff] %v1714_v41  ;;  %v1682_v15 = vmul.f32 %v8899_v56, %v10743_v46 }
 0x238   : > { %v8903_v62 = vpop.eup %8902  ;;  %v1651_v29 = vmul.f32 %v8901_v23, %v10750_v13 }
 0x239   : > { %v8905_v61 = vpop.eup %8904  ;;  %v1683_v25 = vmul.f32 %v8903_v62, %v10755_v8 }
 0x23a   : > { %v8907_v26 = vpop.eup %8906  ;;  %v1699_v47 = vpack.c.bf16 %v1651_v29, %v1649_v14  ;;  %v1652_v4 = vmul.f32 %v8905_v61, %v10760_v48 }
 0x23b   : > { %v1715_v10 = vpack.c.bf16 %v1683_v25, %v1681_v50  ;;  %v1684_v38 = vmul.f32 %v8907_v26, %v10768_v22 }
 0x23c   : > { %1731 = vst [vmem:[#allocation2 + $0x70] sm:$0xff] %v1699_v47  ;;  %v1700_v53 = vpack.c.bf16 %v1652_v4, %v1650_v52 }
 0x23d   : > { %1747 = vst [vmem:[#allocation2 + $0xf0] sm:$0xff] %v1715_v10  ;;  %v1716_v13 = vpack.c.bf16 %v1684_v38, %v1682_v15 }
 0x23e   : > { %1732 = vst [vmem:[#allocation2 + $0x78] sm:$0xff] %v1700_v53 }
 0x23f   : > { %1748 = vst [vmem:[#allocation2 + $0xf8] sm:$0xff] %v1716_v13 }
 0x240 PF: > { %v1878_v1 = vld [vmem:[%s10036_s21] sm:$0xff]  ;;  %v1879_v46 = vld [vmem:[%s10036_s21 + $0x8] sm:$0xff]  ;;  %v9624_v15 = vmov 0   ;;  %s8309_s23 = sshll.u32 %s9604_s28, 10  ;;  %p8310_p3 = scmp.ne.s32.totalorder %s9604_s28, 1 }
 0x241   : > { %v1882_v2 = vld [vmem:[%s10036_s21 + $0x20] sm:$0xff]  ;;  %v1883_v48 = vld [vmem:[%s10036_s21 + $0x28] sm:$0xff]  ;;  %8908 = vset.pattern.permute.xlu0 %v9624_v15  ;;  %8909 = vset.pattern.permute.xlu1 %v9624_v15 }
 0x242   : > { %v8054_v8 = vcombine.high %v1878_v1, %v1882_v2  ;;  %v8053_v22 = vcombine.low %v1878_v1, %v1882_v2  ;;  %v1886_v40 = vld [vmem:[%s10036_s21 + $0x40] sm:$0xff]  ;;  %v8056_v27 = vcombine.high %v1879_v46, %v1883_v48  ;;  %v8055_v7 = vcombine.low %v1879_v46, %v1883_v48  ;;  %v1887_v24 = vld [vmem:[%s10036_s21 + $0x48] sm:$0xff] }
 0x243   : > { %v1890_v59 = vld [vmem:[%s10036_s21 + $0x60] sm:$0xff]  ;;  %v1891_v16 = vld [vmem:[%s10036_s21 + $0x68] sm:$0xff] }
 0x244   : > { %v8062_v35 = vcombine.high %v1886_v40, %v1890_v59  ;;  %v1894_v43 = vld [vmem:[%s10036_s21 + $0x80] sm:$0xff]  ;;  %2688 = vmatprep.subr.bf16.mxu0 %v8054_v8  ;;  %v8064_v28 = vcombine.high %v1887_v24, %v1891_v16  ;;  %v1895_v37 = vld [vmem:[%s10036_s21 + $0x88] sm:$0xff]  ;;  %2881 = vmatprep.subr.bf16.mxu1 %v8056_v27  ;;  %v8061_v11 = vcombine.low %v1886_v40, %v1890_v59 }
 0x245   : > { %v1898_v34 = vld [vmem:[%s10036_s21 + $0xa0] sm:$0xff]  ;;  %v1899_v21 = vld [vmem:[%s10036_s21 + $0xa8] sm:$0xff]  ;;  %2689 = vmatpush1.bf16.msra.mxu0 %v8053_v22  ;;  %2882 = vmatpush1.bf16.msra.mxu1 %v8055_v7  ;;  %v8063_v44 = vcombine.low %v1887_v24, %v1891_v16 }
 0x246   : > { %2690 = vmatprep.subr.bf16.mxu0 %v8062_v35  ;;  %v8070_v9 = vcombine.high %v1894_v43, %v1898_v34  ;;  %2883 = vmatprep.subr.bf16.mxu1 %v8064_v28  ;;  %v8072_v45 = vcombine.high %v1895_v37, %v1899_v21  ;;  %v1902_v51 = vld [vmem:[%s10036_s21 + $0xc0] sm:$0xff]  ;;  %v1903_v54 = vld [vmem:[%s10036_s21 + $0xc8] sm:$0xff]  ;;  %v8069_v5 = vcombine.low %v1894_v43, %v1898_v34 }
 0x247   : > { %v1906_v57 = vld [vmem:[%s10036_s21 + $0xe0] sm:$0xff]  ;;  %v1907_v12 = vld [vmem:[%s10036_s21 + $0xe8] sm:$0xff]  ;;  %v8071_v20 = vcombine.low %v1895_v37, %v1899_v21 }
 0x248   : > { %v8078_v31 = vcombine.high %v1902_v51, %v1906_v57  ;;  %v8080_v33 = vcombine.high %v1903_v54, %v1907_v12  ;;  %v1910_v55 = vld [vmem:[%s10036_s21 + $0x100] sm:$0xff]  ;;  %v1911_v58 = vld [vmem:[%s10036_s21 + $0x108] sm:$0xff]  ;;  %v8077_v0 = vcombine.low %v1902_v51, %v1906_v57  ;;  %v8079_v63 = vcombine.low %v1903_v54, %v1907_v12 }
 0x249   : > { %2691 = vmatpush1.bf16.msra.mxu0 %v8061_v11  ;;  %2884 = vmatpush1.bf16.msra.mxu1 %v8063_v44  ;;  %v1914_v36 = vld [vmem:[%s10036_s21 + $0x120] sm:$0xff]  ;;  %v1915_v30 = vld [vmem:[%s10036_s21 + $0x128] sm:$0xff] }
 0x24a   : > { %2692 = vmatprep.subr.bf16.mxu0 %v8070_v9  ;;  %2885 = vmatprep.subr.bf16.mxu1 %v8072_v45  ;;  %v8086_v32 = vcombine.high %v1910_v55, %v1914_v36  ;;  %v8088_v39 = vcombine.high %v1911_v58, %v1915_v30  ;;  %v1918_v6 = vld [vmem:[%s10036_s21 + $0x140] sm:$0xff]  ;;  %v1919_v3 = vld [vmem:[%s10036_s21 + $0x148] sm:$0xff]  ;;  %v8085_v19 = vcombine.low %v1910_v55, %v1914_v36 }
 0x24b   : > { %v1922_v17 = vld [vmem:[%s10036_s21 + $0x160] sm:$0xff]  ;;  %v1923_v49 = vld [vmem:[%s10036_s21 + $0x168] sm:$0xff]  ;;  %v8087_v60 = vcombine.low %v1911_v58, %v1915_v30 }
 0x24c   : > { %v8094_v18 = vcombine.high %v1918_v6, %v1922_v17  ;;  %v8096_v42 = vcombine.high %v1919_v3, %v1923_v49  ;;  %v1926_v41 = vld [vmem:[%s10036_s21 + $0x180] sm:$0xff]  ;;  %v1927_v23 = vld [vmem:[%s10036_s21 + $0x188] sm:$0xff]  ;;  %v8093_v14 = vcombine.low %v1918_v6, %v1922_v17  ;;  %v8095_v29 = vcombine.low %v1919_v3, %v1923_v49 }
 0x24d   : > { %2693 = vmatpush1.bf16.msra.mxu0 %v8069_v5  ;;  %2886 = vmatpush1.bf16.msra.mxu1 %v8071_v20  ;;  %v1930_v56 = vld [vmem:[%s10036_s21 + $0x1a0] sm:$0xff]  ;;  %v1931_v62 = vld [vmem:[%s10036_s21 + $0x1a8] sm:$0xff] }
 0x24e   : > { %2694 = vmatprep.subr.bf16.mxu0 %v8078_v31  ;;  %2887 = vmatprep.subr.bf16.mxu1 %v8080_v33  ;;  %v8102_v61 = vcombine.high %v1926_v41, %v1930_v56  ;;  %v10825_v50 = vld [vmem:[#allocation2 + $0x8] sm:$0xff]  ;;  %v8104_v25 = vcombine.high %v1927_v23, %v1931_v62  ;;  %v1934_v26 = vld [vmem:[%s10036_s21 + $0x1c0] sm:$0xff]  ;;  %v8101_v10 = vcombine.low %v1926_v41, %v1930_v56  ;;  %v6202_v56 = vld [vmem:[%s10029_s8 + $0x10] sm:$0xff] }
 0x24f   : > { %v1938_v52 = vld [vmem:[%s10036_s21 + $0x1e0] sm:$0xff]  ;;  %2720 = vmatprep.mubr.bf16.mxu0 %v10825_v50  ;;  %v1935_v47 = vld [vmem:[%s10036_s21 + $0x1c8] sm:$0xff]  ;;  %2913 = vmatprep.mubr.bf16.mxu1 %v10825_v50  ;;  %v8103_v38 = vcombine.low %v1927_v23, %v1931_v62 }
 0x250   : > { %v1939_v4 = vld [vmem:[%s10036_s21 + $0x1e8] sm:$0xff]  ;;  %v8110_v53 = vcombine.high %v1934_v26, %v1938_v52  ;;  %v1942_v1 = vld [vmem:[%s10036_s21 + $0x200] sm:$0xff]  ;;  %v8109_v48 = vcombine.low %v1934_v26, %v1938_v52 }
 0x251   : > { %2695 = vmatpush1.bf16.msra.mxu0 %v8077_v0  ;;  %2888 = vmatpush1.bf16.msra.mxu1 %v8079_v63  ;;  %v8112_v13 = vcombine.high %v1935_v47, %v1939_v4  ;;  %v1946_v2 = vld [vmem:[%s10036_s21 + $0x220] sm:$0xff]  ;;  %v1943_v46 = vld [vmem:[%s10036_s21 + $0x208] sm:$0xff]  ;;  %v8111_v22 = vcombine.low %v1935_v47, %v1939_v4 }
 0x252   : > { %2696 = vmatprep.subr.bf16.mxu0 %v8086_v32  ;;  %2889 = vmatprep.subr.bf16.mxu1 %v8088_v39  ;;  %v1947_v8 = vld [vmem:[%s10036_s21 + $0x228] sm:$0xff]  ;;  %v8118_v40 = vcombine.high %v1942_v1, %v1946_v2  ;;  %v1950_v27 = vld [vmem:[%s10036_s21 + $0x240] sm:$0xff]  ;;  %v8117_v16 = vcombine.low %v1942_v1, %v1946_v2 }
 0x253   : > { %v8120_v59 = vcombine.high %v1943_v46, %v1947_v8  ;;  %v1954_v7 = vld [vmem:[%s10036_s21 + $0x260] sm:$0xff]  ;;  %v1951_v35 = vld [vmem:[%s10036_s21 + $0x248] sm:$0xff]  ;;  %v8119_v43 = vcombine.low %v1943_v46, %v1947_v8 }
 0x254   : > { %v1955_v24 = vld [vmem:[%s10036_s21 + $0x268] sm:$0xff]  ;;  %v8126_v28 = vcombine.high %v1950_v27, %v1954_v7  ;;  %v1958_v37 = vld [vmem:[%s10036_s21 + $0x280] sm:$0xff]  ;;  %v8125_v9 = vcombine.low %v1950_v27, %v1954_v7 }
 0x255   : > { %2697 = vmatpush1.bf16.msra.mxu0 %v8085_v19  ;;  %2890 = vmatpush1.bf16.msra.mxu1 %v8087_v60  ;;  %v8128_v34 = vcombine.high %v1951_v35, %v1955_v24  ;;  %v1962_v21 = vld [vmem:[%s10036_s21 + $0x2a0] sm:$0xff]  ;;  %v1959_v11 = vld [vmem:[%s10036_s21 + $0x288] sm:$0xff]  ;;  %v8127_v45 = vcombine.low %v1951_v35, %v1955_v24  ;;  %v1880_v35 = vld [vmem:[%s10036_s21 + $0x10] sm:$0xff] }
 0x256   : > { %2698 = vmatprep.subr.bf16.mxu0 %v8094_v18  ;;  %2891 = vmatprep.subr.bf16.mxu1 %v8096_v42  ;;  %v1963_v44 = vld [vmem:[%s10036_s21 + $0x2a8] sm:$0xff]  ;;  %v8134_v51 = vcombine.high %v1958_v37, %v1962_v21  ;;  %v1966_v54 = vld [vmem:[%s10036_s21 + $0x2c0] sm:$0xff]  ;;  %v8133_v31 = vcombine.low %v1958_v37, %v1962_v21  ;;  %v6203_v18 = vld [vmem:[%s10029_s8 + $0x18] sm:$0xff] }
 0x257   : > { %v8136_v57 = vcombine.high %v1959_v11, %v1963_v44  ;;  %v1970_v12 = vld [vmem:[%s10036_s21 + $0x2e0] sm:$0xff]  ;;  %v1967_v5 = vld [vmem:[%s10036_s21 + $0x2c8] sm:$0xff]  ;;  %v8135_v33 = vcombine.low %v1959_v11, %v1963_v44  ;;  %v1884_v24 = vld [vmem:[%s10036_s21 + $0x30] sm:$0xff] }
 0x258   : > { %v1971_v20 = vld [vmem:[%s10036_s21 + $0x2e8] sm:$0xff]  ;;  %v8142_v55 = vcombine.high %v1966_v54, %v1970_v12  ;;  %v1974_v58 = vld [vmem:[%s10036_s21 + $0x300] sm:$0xff]  ;;  %v8141_v6 = vcombine.low %v1966_v54, %v1970_v12  ;;  %v8058_v21 = vcombine.high %v1880_v35, %v1884_v24  ;;  %v6211_v11 = vld [vmem:[%s10029_s8 + $0x58] sm:$0xff]  ;;  %v8057_v54 = vcombine.low %v1880_v35, %v1884_v24 }
 0x259   : > { %2699 = vmatpush1.bf16.msra.mxu0 %v8093_v14  ;;  %2892 = vmatpush1.bf16.msra.mxu1 %v8095_v29  ;;  %v8144_v36 = vcombine.high %v1967_v5, %v1971_v20  ;;  %v1978_v30 = vld [vmem:[%s10036_s21 + $0x320] sm:$0xff]  ;;  %v1975_v0 = vld [vmem:[%s10036_s21 + $0x308] sm:$0xff]  ;;  %v8143_v17 = vcombine.low %v1967_v5, %v1971_v20  ;;  %v1889_v12 = vld [vmem:[%s10036_s21 + $0x58] sm:$0xff] }
 0x25a   : > { %2700 = vmatprep.subr.bf16.mxu0 %v8102_v61  ;;  %2893 = vmatprep.subr.bf16.mxu1 %v8104_v25  ;;  %v1979_v63 = vld [vmem:[%s10036_s21 + $0x328] sm:$0xff]  ;;  %v6200_v32 = vld [vmem:[%s10029_s8] sm:$0xff]  ;;  %v8150_v3 = vcombine.high %v1974_v58, %v1978_v30  ;;  %v8149_v23 = vcombine.low %v1974_v58, %v1978_v30  ;;  %v1893_v5 = vld [vmem:[%s10036_s21 + $0x78] sm:$0xff] }
 0x25b   : > { %v6201_v39 = vld [vmem:[%s10029_s8 + $0x8] sm:$0xff]  ;;  %6233 = vperm.xlu0 %8908, %v6200_v32   ;;  %v8152_v49 = vcombine.high %v1975_v0, %v1979_v63  ;;  %v1982_v19 = vld [vmem:[%s10036_s21 + $0x340] sm:$0xff]  ;;  %v8151_v62 = vcombine.low %v1975_v0, %v1979_v63  ;;  %v8068_v58 = vcombine.high %v1889_v12, %v1893_v5  ;;  %v1897_v30 = vld [vmem:[%s10036_s21 + $0x98] sm:$0xff] }
 0x25c   : > { %v1986_v60 = vld [vmem:[%s10036_s21 + $0x360] sm:$0xff]  ;;  %6236 = vperm.xlu1 %8909, %v6201_v39   ;;  %v1983_v42 = vld [vmem:[%s10036_s21 + $0x348] sm:$0xff]  ;;  %v1901_v0 = vld [vmem:[%s10036_s21 + $0xb8] sm:$0xff]  ;;  %v8067_v39 = vcombine.low %v1889_v12, %v1893_v5 }
 0x25d   : > { %2701 = vmatpush1.bf16.msra.mxu0 %v8101_v10  ;;  %2894 = vmatpush1.bf16.msra.mxu1 %v8103_v38  ;;  %v1987_v41 = vld [vmem:[%s10036_s21 + $0x368] sm:$0xff]  ;;  %v8158_v14 = vcombine.high %v1982_v19, %v1986_v60  ;;  %v1990_v25 = vld [vmem:[%s10036_s21 + $0x380] sm:$0xff]  ;;  %v8157_v15 = vcombine.low %v1982_v19, %v1986_v60  ;;  %v1908_v19 = vld [vmem:[%s10036_s21 + $0xf0] sm:$0xff] }
 0x25e   : > { %2702 = vmatprep.subr.bf16.mxu0 %v8110_v53  ;;  %2895 = vmatprep.subr.bf16.mxu1 %v8112_v13  ;;  %v6205_v29 = vld [vmem:[%s10029_s8 + $0x28] sm:$0xff]  ;;  %v8160_v61 = vcombine.high %v1983_v42, %v1987_v41  ;;  %v1994_v26 = vld [vmem:[%s10036_s21 + $0x3a0] sm:$0xff]  ;;  %v8159_v10 = vcombine.low %v1983_v42, %v1987_v41  ;;  %v6207_v53 = vld [vmem:[%s10029_s8 + $0x38] sm:$0xff] }
 0x25f   : > { %6242 = vperm.xlu0 %8908, %v6203_v18   ;;  %v1991_v52 = vld [vmem:[%s10036_s21 + $0x388] sm:$0xff]  ;;  %v6204_v4 = vld [vmem:[%s10029_s8 + $0x20] sm:$0xff]  ;;  %v8166_v38 = vcombine.high %v1990_v25, %v1994_v26  ;;  %v10901_v60 = vld [vmem:[#allocation2 + $0x10] sm:$0xff] }
 0x260   : > { %6239 = vperm.xlu1 %8909, %v6202_v56   ;;  %v1995_v47 = vld [vmem:[%s10036_s21 + $0x3a8] sm:$0xff]  ;;  %v1998_v1 = vld [vmem:[%s10036_s21 + $0x3c0] sm:$0xff]  ;;  %v1905_v18 = vld [vmem:[%s10036_s21 + $0xd8] sm:$0xff] }
 0x261   : > { %2703 = vmatpush1.bf16.msra.mxu0 %v8109_v48  ;;  %2896 = vmatpush1.bf16.msra.mxu1 %v8111_v22  ;;  %v8168_v13 = vcombine.high %v1991_v52, %v1995_v47  ;;  %v2002_v2 = vld [vmem:[%s10036_s21 + $0x3e0] sm:$0xff]  ;;  %v1999_v46 = vld [vmem:[%s10036_s21 + $0x3c8] sm:$0xff]  ;;  %v6206_v48 = vld [vmem:[%s10029_s8 + $0x30] sm:$0xff]  ;;  %v8165_v22 = vcombine.low %v1990_v25, %v1994_v26 }
 0x262   : > { %2704 = vmatprep.subr.bf16.mxu0 %v8118_v40  ;;  %2897 = vmatprep.subr.bf16.mxu1 %v8120_v59  ;;  %v2003_v8 = vld [vmem:[%s10036_s21 + $0x3e8] sm:$0xff]  ;;  %v8167_v40 = vcombine.low %v1991_v52, %v1995_v47  ;;  %v8174_v59 = vcombine.high %v1998_v1, %v2002_v2  ;;  %v6212_v32 = vld [vmem:[%s10029_s8 + $0x60] sm:$0xff]  ;;  %v1909_v42 = vld [vmem:[%s10036_s21 + $0xf8] sm:$0xff] }
 0x263   : > { %6248 = vperm.xlu0 %8908, %v6205_v29   ;;  %v6209_v27 = vld [vmem:[%s10029_s8 + $0x48] sm:$0xff]  ;;  %v8176_v7 = vcombine.high %v1999_v46, %v2003_v8  ;;  %v8175_v37 = vcombine.low %v1999_v46, %v2003_v8  ;;  %v1912_v29 = vld [vmem:[%s10036_s21 + $0x110] sm:$0xff]  ;;  %v1913_v25 = vld [vmem:[%s10036_s21 + $0x118] sm:$0xff] }
 0x264   : > { %6245 = vperm.xlu1 %8909, %v6204_v4   ;;  %v10905_v41 = vld [vmem:[#allocation2 + $0x28] sm:$0xff]  ;;  %v1917_v26 = vld [vmem:[%s10036_s21 + $0x138] sm:$0xff]  ;;  %v6214_v52 = vld [vmem:[%s10029_s8 + $0x70] sm:$0xff] }
 0x265   : > { %2705 = vmatpush1.bf16.msra.mxu0 %v8117_v16  ;;  %2898 = vmatpush1.bf16.msra.mxu1 %v8119_v43  ;;  %v1881_v16 = vld [vmem:[%s10036_s21 + $0x18] sm:$0xff] }
 0x266   : > { %2706 = vmatprep.subr.bf16.mxu0 %v8126_v28  ;;  %2899 = vmatprep.subr.bf16.mxu1 %v8128_v34  ;;  %v1885_v43 = vld [vmem:[%s10036_s21 + $0x38] sm:$0xff]  ;;  %v6208_v28 = vld [vmem:[%s10029_s8 + $0x40] sm:$0xff]  ;;  %v8173_v34 = vcombine.low %v1998_v1, %v2002_v2 }
 0x267   : > { %6254 = vperm.xlu0 %8908, %v6207_v53   ;;  %v8060_v44 = vcombine.high %v1881_v16, %v1885_v43  ;;  %v8059_v20 = vcombine.low %v1881_v16, %v1885_v43  ;;  %v6215_v4 = vld [vmem:[%s10029_s8 + $0x78] sm:$0xff]  ;;  %v1920_v53 = vld [vmem:[%s10036_s21 + $0x150] sm:$0xff]  ;;  %v10919_v1 = vld [vmem:[#allocation2 + $0x20] sm:$0xff] }
 0x268   : > { %6251 = vperm.xlu1 %8909, %v6206_v48   ;;  %v1921_v2 = vld [vmem:[%s10036_s21 + $0x158] sm:$0xff]  ;;  %v6216_v16 = vld [vmem:[%s10029_s8 + $0x80] sm:$0xff] }
 0x269   : > { %2707 = vmatpush1.bf16.msra.mxu0 %v8125_v9  ;;  %2900 = vmatpush1.bf16.msra.mxu1 %v8127_v45  ;;  %v1888_v9 = vld [vmem:[%s10036_s21 + $0x50] sm:$0xff]  ;;  %v1925_v46 = vld [vmem:[%s10036_s21 + $0x178] sm:$0xff] }
 0x26a   : > { %2708 = vmatprep.subr.bf16.mxu0 %v8134_v51  ;;  %2901 = vmatprep.subr.bf16.mxu1 %v8136_v57  ;;  %v1892_v45 = vld [vmem:[%s10036_s21 + $0x70] sm:$0xff]  ;;  %v10883_v57 = vld [vmem:[#allocation2] sm:$0xff]  ;;  %v10923_v8 = vld [vmem:[#allocation2 + $0x38] sm:$0xff] }
 0x26b   : > { %6260 = vperm.xlu0 %8908, %v6209_v27   ;;  %v6210_v51 = vld [vmem:[%s10029_s8 + $0x50] sm:$0xff]  ;;  %v8065_v63 = vcombine.low %v1888_v9, %v1892_v45  ;;  %v1929_v35 = vld [vmem:[%s10036_s21 + $0x198] sm:$0xff] }
 0x26c   : > { %6257 = vperm.xlu1 %8909, %v6208_v28   ;;  %v1928_v27 = vld [vmem:[%s10036_s21 + $0x190] sm:$0xff]  ;;  %v1933_v24 = vld [vmem:[%s10036_s21 + $0x1b8] sm:$0xff]  ;;  %v6217_v28 = vld [vmem:[%s10029_s8 + $0x88] sm:$0xff] }
 0x26d   : > { %2709 = vmatpush1.bf16.msra.mxu0 %v8133_v31  ;;  %2902 = vmatpush1.bf16.msra.mxu1 %v8135_v33  ;;  %v10887_v31 = vld [vmem:[#allocation2 + $0x18] sm:$0xff]  ;;  %v8066_v33 = vcombine.high %v1888_v9, %v1892_v45  ;;  %v10937_v9 = vld [vmem:[#allocation2 + $0x30] sm:$0xff]  ;;  %v8107_v5 = vcombine.low %v1929_v35, %v1933_v24 }
 0x26e   : > { %2710 = vmatprep.subr.bf16.mxu0 %v8142_v55  ;;  %2903 = vmatprep.subr.bf16.mxu1 %v8144_v36  ;;  %v1896_v55 = vld [vmem:[%s10036_s21 + $0x90] sm:$0xff]  ;;  %v1937_v45 = vld [vmem:[%s10036_s21 + $0x1d8] sm:$0xff] }
 0x26f   : > { %6266 = vperm.xlu0 %8908, %v6211_v11   ;;  %v1900_v36 = vld [vmem:[%s10036_s21 + $0xb0] sm:$0xff] }
 0x270   : > { %6263 = vperm.xlu1 %8909, %v6210_v51   ;;  %v8073_v56 = vcombine.low %v1896_v55, %v1900_v36  ;;  %v1936_v11 = vld [vmem:[%s10036_s21 + $0x1d0] sm:$0xff]  ;;  %v1941_v51 = vld [vmem:[%s10036_s21 + $0x1f8] sm:$0xff] }
 0x271   : > { %2711 = vmatpush1.bf16.msra.mxu0 %v8141_v6  ;;  %2904 = vmatpush1.bf16.msra.mxu1 %v8143_v17  ;;  %v8074_v6 = vcombine.high %v1896_v55, %v1900_v36  ;;  %v6213_v17 = vld [vmem:[%s10029_s8 + $0x68] sm:$0xff]  ;;  %v1944_v55 = vld [vmem:[%s10036_s21 + $0x210] sm:$0xff] }
 0x272   : > { %2712 = vmatprep.subr.bf16.mxu0 %v8150_v3  ;;  %2905 = vmatprep.subr.bf16.mxu1 %v8152_v49  ;;  %v8076_v3 = vcombine.high %v1897_v30, %v1901_v0  ;;  %v1904_v49 = vld [vmem:[%s10036_s21 + $0xd0] sm:$0xff] }
 0x273   : > { %6272 = vperm.xlu0 %8908, %v6213_v17   ;;  %v8081_v47 = vcombine.low %v1904_v49, %v1908_v19  ;;  %v1948_v36 = vld [vmem:[%s10036_s21 + $0x230] sm:$0xff] }
 0x274   : > { %6269 = vperm.xlu1 %8909, %v6212_v32   ;;  %v6219_v32 = vld [vmem:[%s10029_s8 + $0x98] sm:$0xff] }
 0x275   : > { %2713 = vmatpush1.bf16.msra.mxu0 %v8149_v23  ;;  %2906 = vmatpush1.bf16.msra.mxu1 %v8151_v62  ;;  %v8075_v23 = vcombine.low %v1897_v30, %v1901_v0  ;;  %v8082_v62 = vcombine.high %v1904_v49, %v1908_v19  ;;  %v1949_v30 = vld [vmem:[%s10036_s21 + $0x238] sm:$0xff]  ;;  %v6218_v0 = vld [vmem:[%s10029_s8 + $0x90] sm:$0xff]  ;;  %v10955_v19 = vld [vmem:[#allocation2 + $0x40] sm:$0xff] }
 0x276   : > { %2714 = vmatprep.subr.bf16.mxu0 %v8158_v14  ;;  %2907 = vmatprep.subr.bf16.mxu1 %v8160_v61  ;;  %v8084_v14 = vcombine.high %v1905_v18, %v1909_v42  ;;  %v1916_v61 = vld [vmem:[%s10036_s21 + $0x130] sm:$0xff] }
 0x277   : > { %6278 = vperm.xlu0 %8908, %v6215_v4   ;;  %v8089_v48 = vcombine.low %v1912_v29, %v1916_v61  ;;  %v1956_v49 = vld [vmem:[%s10036_s21 + $0x270] sm:$0xff] }
 0x278   : > { %6275 = vperm.xlu1 %8909, %v6214_v52   ;;  %v1965_v52 = vld [vmem:[%s10036_s21 + $0x2b8] sm:$0xff] }
 0x279   : > { %2715 = vmatpush1.bf16.msra.mxu0 %v8157_v15  ;;  %2908 = vmatpush1.bf16.msra.mxu1 %v8159_v10  ;;  %v8083_v15 = vcombine.low %v1905_v18, %v1909_v42  ;;  %v8090_v10 = vcombine.high %v1912_v29, %v1916_v61  ;;  %v1953_v18 = vld [vmem:[%s10036_s21 + $0x258] sm:$0xff]  ;;  %v1960_v61 = vld [vmem:[%s10036_s21 + $0x290] sm:$0xff] }
 0x27a   : > { %2716 = vmatprep.subr.bf16.mxu0 %v8166_v38  ;;  %2909 = vmatprep.subr.bf16.mxu1 %v8168_v13  ;;  %v8092_v38 = vcombine.high %v1913_v25, %v1917_v26  ;;  %v1924_v13 = vld [vmem:[%s10036_s21 + $0x170] sm:$0xff]  ;;  %v1957_v42 = vld [vmem:[%s10036_s21 + $0x278] sm:$0xff] }
 0x27b   : > { %v8097_v43 = vcombine.low %v1920_v53, %v1924_v13  ;;  %6284 = vperm.xlu0 %8908, %v6217_v28   ;;  %v8132_v29 = vcombine.high %v1953_v18, %v1957_v42  ;;  %v1981_v28 = vld [vmem:[%s10036_s21 + $0x338] sm:$0xff] }
 0x27c   : > { %6281 = vperm.xlu1 %8909, %v6216_v16   ;;  %v1980_v16 = vld [vmem:[%s10036_s21 + $0x330] sm:$0xff] }
 0x27d   : > { %2717 = vmatpush1.bf16.msra.mxu0 %v8165_v22  ;;  %2910 = vmatpush1.bf16.msra.mxu1 %v8167_v40  ;;  %v8091_v22 = vcombine.low %v1913_v25, %v1917_v26  ;;  %v8098_v40 = vcombine.high %v1920_v53, %v1924_v13  ;;  %v1964_v25 = vld [vmem:[%s10036_s21 + $0x2b0] sm:$0xff]  ;;  %v1961_v26 = vld [vmem:[%s10036_s21 + $0x298] sm:$0xff] }
 0x27e   : > { %2718 = vmatprep.subr.bf16.mxu0 %v8174_v59  ;;  %2911 = vmatprep.subr.bf16.mxu1 %v8176_v7  ;;  %v8100_v59 = vcombine.high %v1921_v2, %v1925_v46  ;;  %v1932_v7 = vld [vmem:[%s10036_s21 + $0x1b0] sm:$0xff]  ;;  %v8140_v53 = vcombine.high %v1961_v26, %v1965_v52 }
 0x27f   : > { %v8105_v12 = vcombine.low %v1928_v27, %v1932_v7  ;;  %6290 = vperm.xlu0 %8908, %v6219_v32   ;;  %v1968_v13 = vld [vmem:[%s10036_s21 + $0x2d0] sm:$0xff] }
 0x280   : > { %6287 = vperm.xlu1 %8909, %v6218_v0   ;;  %v1996_v32 = vld [vmem:[%s10036_s21 + $0x3b0] sm:$0xff] }
 0x281   : > { %2719 = vmatpush1.bf16.msra.mxu0 %v8173_v34  ;;  %2912 = vmatpush1.bf16.msra.mxu1 %v8175_v37  ;;  %v8099_v34 = vcombine.low %v1921_v2, %v1925_v46  ;;  %v8106_v37 = vcombine.high %v1928_v27, %v1932_v7  ;;  %v1972_v2 = vld [vmem:[%s10036_s21 + $0x2f0] sm:$0xff]  ;;  %v8139_v27 = vcombine.low %v1961_v26, %v1965_v52  ;;  %v11013_v26 = vld [vmem:[#allocation2 + $0x88] sm:$0xff] }
 0x282   : > { %3074 = vmatprep.subr.bf16.mxu0 %v8058_v21  ;;  %3267 = vmatprep.subr.bf16.mxu1 %v8060_v44  ;;  %v8108_v21 = vcombine.high %v1929_v35, %v1933_v24  ;;  %v1940_v44 = vld [vmem:[%s10036_s21 + $0x1f0] sm:$0xff]  ;;  %v8146_v7 = vcombine.high %v1968_v13, %v1972_v2 }
 0x283   : > { %v10973_v46 = vld [vmem:[#allocation2 + $0x50] sm:$0xff] }
 0x284   : > { %2721 = vmatmul.mubr.bf16.vlgmr.msra.gmra.mrb[0].mxu0 %v10883_v57  ;;  %2914 = vmatmul.mubr.bf16.vlgmr.msra.gmra.mrb[0].mxu1 %v10883_v57  ;;  %v1976_v24 = vld [vmem:[%s10036_s21 + $0x310] sm:$0xff] }
 0x285   : > { %3075 = vmatpush1.bf16.msra.mxu0 %v8057_v54  ;;  %3268 = vmatpush1.bf16.msra.mxu1 %v8059_v20  ;;  %v10941_v54 = vld [vmem:[#allocation2 + $0x48] sm:$0xff]  ;;  %v8114_v20 = vcombine.high %v1936_v11, %v1940_v44 }
 0x286   : > { %2730 = vmatprep.mubr.bf16.mxu0 %v10887_v31  ;;  %2923 = vmatprep.mubr.bf16.mxu1 %v10887_v31 }
 0x287   : > { %3076 = vmatprep.subr.bf16.mxu0 %v8066_v33  ;;  %3269 = vmatprep.subr.bf16.mxu1 %v8068_v58  ;;  %v8116_v33 = vcombine.high %v1937_v45, %v1941_v51  ;;  %v1945_v58 = vld [vmem:[%s10036_s21 + $0x218] sm:$0xff] }
 0x288   : > { %v8124_v17 = vcombine.high %v1945_v58, %v1949_v30 }
 0x289   : > { %3077 = vmatpush1.bf16.msra.mxu0 %v8065_v63  ;;  %3270 = vmatpush1.bf16.msra.mxu1 %v8067_v39  ;;  %v8113_v63 = vcombine.low %v1936_v11, %v1940_v44  ;;  %v8115_v39 = vcombine.low %v1937_v45, %v1941_v51  ;;  %v8154_v44 = vcombine.high %v1976_v24, %v1980_v16  ;;  %v1984_v51 = vld [vmem:[%s10036_s21 + $0x350] sm:$0xff] }
 0x28a   : > { %3078 = vmatprep.subr.bf16.mxu0 %v8074_v6  ;;  %3271 = vmatprep.subr.bf16.mxu1 %v8076_v3  ;;  %v8122_v6 = vcombine.high %v1944_v55, %v1948_v36  ;;  %v1952_v3 = vld [vmem:[%s10036_s21 + $0x250] sm:$0xff] }
 0x28b   : > { %v8129_v4 = vcombine.low %v1952_v3, %v1956_v49 }
 0x28c   : > { %2731 = vmatmul.mubr.bf16.gmra.mrb[4].mxu0 %v10901_v60  ;;  %2924 = vmatmul.mubr.bf16.gmra.mrb[4].mxu1 %v10901_v60 }
 0x28d   : > { %2740 = vmatprep.mubr.bf16.mxu0 %v10905_v41  ;;  %2933 = vmatprep.mubr.bf16.mxu1 %v10905_v41 }
 0x28e   : > { %3079 = vmatpush1.bf16.msra.mxu0 %v8073_v56  ;;  %3272 = vmatpush1.bf16.msra.mxu1 %v8075_v23  ;;  %v10959_v56 = vld [vmem:[#allocation2 + $0x58] sm:$0xff]  ;;  %v8121_v23 = vcombine.low %v1944_v55, %v1948_v36  ;;  %v8153_v36 = vcombine.low %v1976_v24, %v1980_v16  ;;  %v11047_v16 = vld [vmem:[#allocation2 + $0xb0] sm:$0xff] }
 0x28f   : > { %3080 = vmatprep.subr.bf16.mxu0 %v8082_v62  ;;  %3273 = vmatprep.subr.bf16.mxu1 %v8084_v14  ;;  %v8123_v62 = vcombine.low %v1945_v58, %v1949_v30  ;;  %v8130_v14 = vcombine.high %v1952_v3, %v1956_v49  ;;  %v10995_v55 = vld [vmem:[#allocation2 + $0x78] sm:$0xff]  ;;  %v6225_v49 = vld [vmem:[%s10029_s8 + $0xc8] sm:$0xff] }
 0x290   : > { %v11041_v24 = vld [vmem:[#allocation2 + $0xb8] sm:$0xff] }
 0x292   : > { %3081 = vmatpush1.bf16.msra.mxu0 %v8081_v47  ;;  %3274 = vmatpush1.bf16.msra.mxu1 %v8083_v15  ;;  %v6220_v47 = vld [vmem:[%s10029_s8 + $0xa0] sm:$0xff]  ;;  %v6221_v15 = vld [vmem:[%s10029_s8 + $0xa8] sm:$0xff] }
 0x293   : > { %3082 = vmatprep.subr.bf16.mxu0 %v8090_v10  ;;  %3275 = vmatprep.subr.bf16.mxu1 %v8092_v38  ;;  %v8131_v10 = vcombine.low %v1953_v18, %v1957_v42  ;;  %v8138_v38 = vcombine.high %v1960_v61, %v1964_v25 }
 0x294   : > { %2741 = vmatmul.mubr.bf16.gmra.mrb[8].mxu0 %v10919_v1  ;;  %2934 = vmatmul.mubr.bf16.gmra.mrb[8].mxu1 %v10919_v1 }
 0x295   : > { %2750 = vmatprep.mubr.bf16.mxu0 %v10923_v8  ;;  %2943 = vmatprep.mubr.bf16.mxu1 %v10923_v8 }
 0x296   : > { %3083 = vmatpush1.bf16.msra.mxu0 %v8089_v48  ;;  %3276 = vmatpush1.bf16.msra.mxu1 %v8091_v22  ;;  %v1969_v48 = vld [vmem:[%s10036_s21 + $0x2d8] sm:$0xff] }
 0x297   : > { %3084 = vmatprep.subr.bf16.mxu0 %v8098_v40  ;;  %3277 = vmatprep.subr.bf16.mxu1 %v8100_v59  ;;  %v1973_v22 = vld [vmem:[%s10036_s21 + $0x2f8] sm:$0xff]  ;;  %v10977_v40 = vld [vmem:[#allocation2 + $0x68] sm:$0xff]  ;;  %v8137_v59 = vcombine.low %v1960_v61, %v1964_v25 }
 0x298   : > { %6293 = vperm.xlu1 %8909, %v6220_v47   ;;  %6296 = vperm.xlu0 %8908, %v6221_v15   ;;  %v8148_v35 = vcombine.high %v1969_v48, %v1973_v22  ;;  %v8147_v11 = vcombine.low %v1969_v48, %v1973_v22  ;;  %v2001_v61 = vld [vmem:[%s10036_s21 + $0x3d8] sm:$0xff]  ;;  %v6228_v22 = vld [vmem:[%s10029_s8 + $0xe0] sm:$0xff] }
 0x299   : > { %v2005_v25 = vld [vmem:[%s10036_s21 + $0x3f8] sm:$0xff] }
 0x29a   : > { %3085 = vmatpush1.bf16.msra.mxu0 %v8097_v43  ;;  %3278 = vmatpush1.bf16.msra.mxu1 %v8099_v34  ;;  %v1977_v43 = vld [vmem:[%s10036_s21 + $0x318] sm:$0xff]  ;;  %v6222_v34 = vld [vmem:[%s10029_s8 + $0xb0] sm:$0xff]  ;;  %v8180_v15 = vcombine.high %v2001_v61, %v2005_v25 }
 0x29b   : > { %3086 = vmatprep.subr.bf16.mxu0 %v8106_v37  ;;  %3279 = vmatprep.subr.bf16.mxu1 %v8108_v21  ;;  %v8145_v37 = vcombine.low %v1968_v13, %v1972_v2  ;;  %v6223_v21 = vld [vmem:[%s10029_s8 + $0xb8] sm:$0xff]  ;;  %v8156_v45 = vcombine.high %v1977_v43, %v1981_v28  ;;  %v8155_v58 = vcombine.low %v1977_v43, %v1981_v28  ;;  %v11021_v2 = vld [vmem:[#allocation2 + $0x80] sm:$0xff]  ;;  %v11049_v43 = vld [vmem:[#allocation2 + $0xc8] sm:$0xff] }
 0x29c   : > { %2751 = vmatmul.mubr.bf16.gmra.mrb[12].mxu0 %v10937_v9  ;;  %2944 = vmatmul.mubr.bf16.gmra.mrb[12].mxu1 %v10937_v9  ;;  %v8179_v13 = vcombine.low %v2001_v61, %v2005_v25  ;;  %v11023_v48 = vld [vmem:[#allocation2 + $0x98] sm:$0xff]  ;;  %v11055_v28 = vld [vmem:[#allocation2 + $0xc0] sm:$0xff] }
 0x29d   : > { %2760 = vmatprep.mubr.bf16.mxu0 %v10941_v54  ;;  %2953 = vmatprep.mubr.bf16.mxu1 %v10941_v54 }
 0x29e   : > { %3087 = vmatpush1.bf16.msra.mxu0 %v8105_v12  ;;  %3280 = vmatpush1.bf16.msra.mxu1 %v8107_v5  ;;  %v1988_v12 = vld [vmem:[%s10036_s21 + $0x370] sm:$0xff]  ;;  %v10991_v5 = vld [vmem:[#allocation2 + $0x60] sm:$0xff] }
 0x29f   : > { %3088 = vmatprep.subr.bf16.mxu0 %v8114_v20  ;;  %3281 = vmatprep.subr.bf16.mxu1 %v8116_v33  ;;  %v1985_v20 = vld [vmem:[%s10036_s21 + $0x358] sm:$0xff]  ;;  %v8162_v30 = vcombine.high %v1984_v51, %v1988_v12  ;;  %v8161_v3 = vcombine.low %v1984_v51, %v1988_v12 }
 0x2a0   : > { %6299 = vperm.xlu1 %8909, %v6222_v34   ;;  %v1989_v33 = vld [vmem:[%s10036_s21 + $0x378] sm:$0xff]  ;;  %6302 = vperm.xlu0 %8908, %v6223_v21   ;;  %v11065_v21 = vld [vmem:[#allocation2 + $0xe8] sm:$0xff] }
 0x2a1   : > { %v8164_v0 = vcombine.high %v1985_v20, %v1989_v33  ;;  %v8163_v18 = vcombine.low %v1985_v20, %v1989_v33  ;;  %v11057_v34 = vld [vmem:[#allocation2 + $0xd8] sm:$0xff] }
 0x2a2   : > { %3089 = vmatpush1.bf16.msra.mxu0 %v8113_v63  ;;  %3282 = vmatpush1.bf16.msra.mxu1 %v8115_v39  ;;  %v1992_v63 = vld [vmem:[%s10036_s21 + $0x390] sm:$0xff]  ;;  %v1993_v39 = vld [vmem:[%s10036_s21 + $0x398] sm:$0xff] }
 0x2a3   : > { %3090 = vmatprep.subr.bf16.mxu0 %v8122_v6  ;;  %3283 = vmatprep.subr.bf16.mxu1 %v8124_v17  ;;  %v1997_v6 = vld [vmem:[%s10036_s21 + $0x3b8] sm:$0xff]  ;;  %v6224_v17 = vld [vmem:[%s10029_s8 + $0xc0] sm:$0xff]  ;;  %v8170_v42 = vcombine.high %v1992_v63, %v1996_v32  ;;  %v8169_v52 = vcombine.low %v1992_v63, %v1996_v32 }
 0x2a4   : > { %2761 = vmatmul.mubr.bf16.gmra.mrb[16].mxu0 %v10955_v19  ;;  %2954 = vmatmul.mubr.bf16.gmra.mrb[16].mxu1 %v10955_v19  ;;  %v8171_v47 = vcombine.low %v1993_v39, %v1997_v6 }
 0x2a5   : > { %2770 = vmatprep.mubr.bf16.mxu0 %v10959_v56  ;;  %2963 = vmatprep.mubr.bf16.mxu1 %v10959_v56 }
 0x2a6   : > { %3091 = vmatpush1.bf16.msra.mxu0 %v8121_v23  ;;  %3284 = vmatpush1.bf16.msra.mxu1 %v8123_v62  ;;  %v8172_v23 = vcombine.high %v1993_v39, %v1997_v6  ;;  %v2000_v62 = vld [vmem:[%s10036_s21 + $0x3d0] sm:$0xff] }
 0x2a7   : > { %3092 = vmatprep.subr.bf16.mxu0 %v8130_v14  ;;  %3285 = vmatprep.subr.bf16.mxu1 %v8132_v29  ;;  %v2004_v14 = vld [vmem:[%s10036_s21 + $0x3f0] sm:$0xff] }
 0x2a8   : > { %6305 = vperm.xlu1 %8909, %v6224_v17   ;;  %v11009_v29 = vld [vmem:[#allocation2 + $0x70] sm:$0xff]  ;;  %6308 = vperm.xlu0 %8908, %v6225_v49  }
 0x2aa   : > { %3093 = vmatpush1.bf16.msra.mxu0 %v8129_v4  ;;  %3286 = vmatpush1.bf16.msra.mxu1 %v8131_v10  ;;  %v8178_v4 = vcombine.high %v2000_v62, %v2004_v14  ;;  %v6226_v10 = vld [vmem:[%s10029_s8 + $0xd0] sm:$0xff] }
 0x2ab   : > { %3094 = vmatprep.subr.bf16.mxu0 %v8138_v38  ;;  %3287 = vmatprep.subr.bf16.mxu1 %v8140_v53  ;;  %v8177_v38 = vcombine.low %v2000_v62, %v2004_v14  ;;  %v6227_v53 = vld [vmem:[%s10029_s8 + $0xd8] sm:$0xff] }
 0x2ac   : > { %2771 = vmatmul.mubr.bf16.gmra.mrb[20].mxu0 %v10973_v46  ;;  %2964 = vmatmul.mubr.bf16.gmra.mrb[20].mxu1 %v10973_v46 }
 0x2ad   : > { %2780 = vmatprep.mubr.bf16.mxu0 %v10977_v40  ;;  %2973 = vmatprep.mubr.bf16.mxu1 %v10977_v40 }
 0x2ae   : > { %3095 = vmatpush1.bf16.msra.mxu0 %v8137_v59  ;;  %3288 = vmatpush1.bf16.msra.mxu1 %v8139_v27  ;;  %v11030_v59 = vld [vmem:[#allocation2 + $0x90] sm:$0xff]  ;;  %v11032_v27 = vld [vmem:[#allocation2 + $0xa8] sm:$0xff] }
 0x2af   : > { %3096 = vmatprep.subr.bf16.mxu0 %v8146_v7  ;;  %3289 = vmatprep.subr.bf16.mxu1 %v8148_v35  ;;  %v6230_v7 = vld [vmem:[%s10029_s8 + $0xf0] sm:$0xff]  ;;  %v11039_v35 = vld [vmem:[#allocation2 + $0xa0] sm:$0xff] }
 0x2b0   : > { %6311 = vperm.xlu1 %8909, %v6226_v10   ;;  %6314 = vperm.xlu0 %8908, %v6227_v53  }
 0x2b2   : > { %3097 = vmatpush1.bf16.msra.mxu0 %v8145_v37  ;;  %3290 = vmatpush1.bf16.msra.mxu1 %v8147_v11  ;;  %v11063_v37 = vld [vmem:[#allocation2 + $0xd0] sm:$0xff]  ;;  %v11071_v11 = vld [vmem:[#allocation2 + $0xe0] sm:$0xff] }
 0x2b3   : > { %3098 = vmatprep.subr.bf16.mxu0 %v8154_v44  ;;  %3291 = vmatprep.subr.bf16.mxu1 %v8156_v45  ;;  %v11073_v44 = vld [vmem:[#allocation2 + $0xf8] sm:$0xff]  ;;  %v11079_v45 = vld [vmem:[#allocation2 + $0xf0] sm:$0xff] }
 0x2b4   : > { %2781 = vmatmul.mubr.bf16.gmra.mrb[24].mxu0 %v10991_v5  ;;  %2974 = vmatmul.mubr.bf16.gmra.mrb[24].mxu1 %v10991_v5 }
 0x2b5   : > { %2790 = vmatprep.mubr.bf16.mxu0 %v10995_v55  ;;  %2983 = vmatprep.mubr.bf16.mxu1 %v10995_v55 }
 0x2b6   : > { %3099 = vmatpush1.bf16.msra.mxu0 %v8153_v36  ;;  %3292 = vmatpush1.bf16.msra.mxu1 %v8155_v58 }
 0x2b7   : > { %3100 = vmatprep.subr.bf16.mxu0 %v8162_v30  ;;  %3293 = vmatprep.subr.bf16.mxu1 %v8164_v0 }
 0x2b8   : > { %6317 = vperm.xlu1 %8909, %v6228_v22  }
 0x2ba   : > { %3101 = vmatpush1.bf16.msra.mxu0 %v8161_v3  ;;  %3294 = vmatpush1.bf16.msra.mxu1 %v8163_v18 }
 0x2bb   : > { %3102 = vmatprep.subr.bf16.mxu0 %v8170_v42  ;;  %3295 = vmatprep.subr.bf16.mxu1 %v8172_v23 }
 0x2bc   : > { %2791 = vmatmul.mubr.bf16.gmra.mrb[28].mxu0 %v11009_v29  ;;  %2984 = vmatmul.mubr.bf16.gmra.mrb[28].mxu1 %v11009_v29 }
 0x2bd   : > { %2800 = vmatprep.mubr.bf16.mxu0 %v11013_v26  ;;  %2993 = vmatprep.mubr.bf16.mxu1 %v11013_v26 }
 0x2be   : > { %3103 = vmatpush1.bf16.msra.mxu0 %v8169_v52  ;;  %3296 = vmatpush1.bf16.msra.mxu1 %v8171_v47 }
 0x2bf   : > { %3104 = vmatprep.subr.bf16.mxu0 %v8178_v4  ;;  %3297 = vmatprep.subr.bf16.mxu1 %v8180_v15 }
 0x2c0   : > { %6323 = vperm.xlu1 %8909, %v6230_v7  }
 0x2c2   : > { %3105 = vmatpush1.bf16.msra.mxu0 %v8177_v38  ;;  %3298 = vmatpush1.bf16.msra.mxu1 %v8179_v13 }
 0x2c4   : > { %2801 = vmatmul.mubr.bf16.gmra.mrb[32].mxu0 %v11021_v2  ;;  %2994 = vmatmul.mubr.bf16.gmra.mrb[32].mxu1 %v11021_v2 }
 0x2c5   : > { %2810 = vmatprep.mubr.bf16.mxu0 %v11023_v48  ;;  %3003 = vmatprep.mubr.bf16.mxu1 %v11023_v48 }
 0x2cc   : > { %2811 = vmatmul.mubr.bf16.gmra.mrb[36].mxu0 %v11030_v59  ;;  %3004 = vmatmul.mubr.bf16.gmra.mrb[36].mxu1 %v11030_v59 }
 0x2cd   : > { %2820 = vmatprep.mubr.bf16.mxu0 %v11032_v27  ;;  %3013 = vmatprep.mubr.bf16.mxu1 %v11032_v27 }
 0x2d4   : > { %2821 = vmatmul.mubr.bf16.gmra.mrb[40].mxu0 %v11039_v35  ;;  %3014 = vmatmul.mubr.bf16.gmra.mrb[40].mxu1 %v11039_v35 }
 0x2d5   : > { %2830 = vmatprep.mubr.bf16.mxu0 %v11041_v24  ;;  %3023 = vmatprep.mubr.bf16.mxu1 %v11041_v24 }
 0x2dc   : > { %2831 = vmatmul.mubr.bf16.gmra.mrb[44].mxu0 %v11047_v16  ;;  %3024 = vmatmul.mubr.bf16.gmra.mrb[44].mxu1 %v11047_v16 }
 0x2dd   : > { %2840 = vmatprep.mubr.bf16.mxu0 %v11049_v43  ;;  %3033 = vmatprep.mubr.bf16.mxu1 %v11049_v43 }
 0x2e4   : > { %2841 = vmatmul.mubr.bf16.gmra.mrb[48].mxu0 %v11055_v28  ;;  %3034 = vmatmul.mubr.bf16.gmra.mrb[48].mxu1 %v11055_v28 }
 0x2e5   : > { %2850 = vmatprep.mubr.bf16.mxu0 %v11057_v34  ;;  %3043 = vmatprep.mubr.bf16.mxu1 %v11057_v34 }
 0x2ec   : > { %2851 = vmatmul.mubr.bf16.gmra.mrb[52].mxu0 %v11063_v37  ;;  %3044 = vmatmul.mubr.bf16.gmra.mrb[52].mxu1 %v11063_v37 }
 0x2ed   : > { %2860 = vmatprep.mubr.bf16.mxu0 %v11065_v21  ;;  %3053 = vmatprep.mubr.bf16.mxu1 %v11065_v21 }
 0x2f4   : > { %2861 = vmatmul.mubr.bf16.gmra.mrb[56].mxu0 %v11071_v11  ;;  %3054 = vmatmul.mubr.bf16.gmra.mrb[56].mxu1 %v11071_v11 }
 0x2f5   : > { %2870 = vmatprep.mubr.bf16.mxu0 %v11073_v44  ;;  %3063 = vmatprep.mubr.bf16.mxu1 %v11073_v44 }
 0x2fc   : > { %2871 = vmatmul.mubr.bf16.gmra.mrb[60].mxu0 %v11079_v45  ;;  %3064 = vmatmul.mubr.bf16.gmra.mrb[60].mxu1 %v11079_v45 }
 0x2fd   : > { %3106 = vmatprep.mubr.bf16.mxu0 %v10825_v50  ;;  %3299 = vmatprep.mubr.bf16.mxu1 %v10825_v50  ;;  %v2008_v50 = vlaneseq }
 0x304   : > { %3107 = vmatmul.mubr.bf16.vlgmr.msra.gmra.mrb[64].mxu0 %v10883_v57  ;;  %3300 = vmatmul.mubr.bf16.vlgmr.msra.gmra.mrb[64].mxu1 %v10883_v57  ;;  %v11123_v57 = vshrl.u32 %v2008_v50, 7 }
 0x305   : > { %3116 = vmatprep.mubr.bf16.mxu0 %v10887_v31  ;;  %3309 = vmatprep.mubr.bf16.mxu1 %v10887_v31 }
 0x306   : > { %v2010_v31 = vsub.s32 0, %v11123_v57 }
 0x30c   : > { %3117 = vmatmul.mubr.bf16.gmra.mrb[68].mxu0 %v10901_v60  ;;  %3310 = vmatmul.mubr.bf16.gmra.mrb[68].mxu1 %v10901_v60  ;;  %v11134_v60 = vld [vmem:[%s628_s12] sm:$0xff] }
 0x30d   : > { %3126 = vmatprep.mubr.bf16.mxu0 %v10905_v41  ;;  %3319 = vmatprep.mubr.bf16.mxu1 %v10905_v41  ;;  %v2014_v41 = vsub.s32 1, %v11123_v57 }
 0x314   : > { %3127 = vmatmul.mubr.bf16.gmra.mrb[72].mxu0 %v10919_v1  ;;  %3320 = vmatmul.mubr.bf16.gmra.mrb[72].mxu1 %v10919_v1  ;;  %v2018_v1 = vsub.s32 2, %v11123_v57 }
 0x315   : > { %3136 = vmatprep.mubr.bf16.mxu0 %v10923_v8  ;;  %3329 = vmatprep.mubr.bf16.mxu1 %v10923_v8  ;;  %v2022_v8 = vsub.s32 3, %v11123_v57 }
 0x31c   : > { %3137 = vmatmul.mubr.bf16.gmra.mrb[76].mxu0 %v10937_v9  ;;  %3330 = vmatmul.mubr.bf16.gmra.mrb[76].mxu1 %v10937_v9  ;;  %v11141_v9 = vrot.slane %v11134_v60, %v2010_v31 }
 0x31d   : > { %3146 = vmatprep.mubr.bf16.mxu0 %v10941_v54  ;;  %3339 = vmatprep.mubr.bf16.mxu1 %v10941_v54  ;;  %v11145_v54 = vrot.slane %v11134_v60, %v2014_v41 }
 0x324   : > { %3147 = vmatmul.mubr.bf16.gmra.mrb[80].mxu0 %v10955_v19  ;;  %3340 = vmatmul.mubr.bf16.gmra.mrb[80].mxu1 %v10955_v19  ;;  %v11148_v19 = vrot.slane %v11134_v60, %v2018_v1 }
 0x325   : > { %3156 = vmatprep.mubr.bf16.mxu0 %v10959_v56  ;;  %3349 = vmatprep.mubr.bf16.mxu1 %v10959_v56  ;;  %v11152_v56 = vrot.slane %v11134_v60, %v2022_v8 }
 0x32c   : > { %3157 = vmatmul.mubr.bf16.gmra.mrb[84].mxu0 %v10973_v46  ;;  %3350 = vmatmul.mubr.bf16.gmra.mrb[84].mxu1 %v10973_v46 }
 0x32d   : > { %3166 = vmatprep.mubr.bf16.mxu0 %v10977_v40  ;;  %3359 = vmatprep.mubr.bf16.mxu1 %v10977_v40 }
 0x334   : > { %3167 = vmatmul.mubr.bf16.gmra.mrb[88].mxu0 %v10991_v5  ;;  %3360 = vmatmul.mubr.bf16.gmra.mrb[88].mxu1 %v10991_v5 }
 0x335   : > { %3176 = vmatprep.mubr.bf16.mxu0 %v10995_v55  ;;  %3369 = vmatprep.mubr.bf16.mxu1 %v10995_v55 }
 0x33c   : > { %3177 = vmatmul.mubr.bf16.gmra.mrb[92].mxu0 %v11009_v29  ;;  %3370 = vmatmul.mubr.bf16.gmra.mrb[92].mxu1 %v11009_v29 }
 0x33d   : > { %3186 = vmatprep.mubr.bf16.mxu0 %v11013_v26  ;;  %3379 = vmatprep.mubr.bf16.mxu1 %v11013_v26 }
 0x344   : > { %3187 = vmatmul.mubr.bf16.gmra.mrb[96].mxu0 %v11021_v2  ;;  %3380 = vmatmul.mubr.bf16.gmra.mrb[96].mxu1 %v11021_v2 }
 0x345   : > { %3196 = vmatprep.mubr.bf16.mxu0 %v11023_v48  ;;  %3389 = vmatprep.mubr.bf16.mxu1 %v11023_v48 }
 0x34c   : > { %3197 = vmatmul.mubr.bf16.gmra.mrb[100].mxu0 %v11030_v59  ;;  %3390 = vmatmul.mubr.bf16.gmra.mrb[100].mxu1 %v11030_v59 }
 0x34d   : > { %3206 = vmatprep.mubr.bf16.mxu0 %v11032_v27  ;;  %3399 = vmatprep.mubr.bf16.mxu1 %v11032_v27 }
 0x354   : > { %3207 = vmatmul.mubr.bf16.gmra.mrb[104].mxu0 %v11039_v35  ;;  %3400 = vmatmul.mubr.bf16.gmra.mrb[104].mxu1 %v11039_v35 }
 0x355   : > { %3216 = vmatprep.mubr.bf16.mxu0 %v11041_v24  ;;  %3409 = vmatprep.mubr.bf16.mxu1 %v11041_v24 }
 0x357   : > { %v2722_v46 = vpop.f32.mrb[0].mxu0  ;;  %v2915_v12 = vpop.f32.mrb[0].mxu1 }
 0x358   : > { %v11156_v40 = vadd.f32 %v2722_v46, %v11141_v9  ;;  %v2724_v51 = vpop.f32.mrb[1].mxu0  ;;  %v11162_v33 = vadd.f32 %v2915_v12, %v11148_v19  ;;  %v2917_v55 = vpop.f32.mrb[1].mxu1 }
 0x359   : > { %v11159_v5 = vadd.f32 %v2724_v51, %v11145_v54  ;;  %v2726_v20 = vpop.f32.mrb[2].mxu0  ;;  %v11168_v30 = vadd.f32 %v2917_v55, %v11152_v56  ;;  %v2919_v0 = vpop.f32.mrb[2].mxu1 }
 0x35a   : > { %17446 = vst [vmem:[#allocation24_spill] sm:$0xff] %v11156_v40  ;;  %17448 = vst [vmem:[#allocation26_spill] sm:$0xff] %v11162_v33  ;;  %v11165_v36 = vadd.f32 %v2726_v20, %v11141_v9  ;;  %v2728_v58 = vpop.f32.mrb[3].mxu0  ;;  %v2921_v32 = vpop.f32.mrb[3].mxu1  ;;  %v11180_v17 = vadd.f32 %v2919_v0, %v11148_v19 }
 0x35b   : > { %17447 = vst [vmem:[#allocation25_spill] sm:$0xff] %v11159_v5  ;;  %17450 = vst [vmem:[#allocation28_spill] sm:$0xff] %v11168_v30  ;;  %v8320_v63 = vpack.c.bf16 %v11159_v5, %v11156_v40  ;;  %v11173_v39 = vadd.f32 %v2728_v58, %v11145_v54  ;;  %v8321_v6 = vpack.c.bf16 %v11168_v30, %v11162_v33 }
 0x35c   : > { %17449 = vst [vmem:[#allocation27_spill] sm:$0xff] %v11165_v36  ;;  %3217 = vmatmul.mubr.bf16.gmra.mrb[108].mxu0 %v11047_v16  ;;  %17452 = vst [vmem:[#allocation30_spill] sm:$0xff] %v11180_v17  ;;  %v11183_v3 = vadd.f32 %v2921_v32, %v11152_v56  ;;  %3410 = vmatmul.mubr.bf16.gmra.mrb[108].mxu1 %v11047_v16 }
 0x35d   : > { %17451 = vst [vmem:[#allocation29_spill] sm:$0xff] %v11173_v39  ;;  %4228 = vst [vmem:[%s10038_s20] sm:$0xff] %v8320_v63  ;;  %3226 = vmatprep.mubr.bf16.mxu0 %v11049_v43  ;;  %v8324_v49 = vpack.c.bf16 %v11173_v39, %v11165_v36  ;;  %3419 = vmatprep.mubr.bf16.mxu1 %v11049_v43 }
 0x35e   : > { %17453 = vst [vmem:[#allocation31_spill] sm:$0xff] %v11183_v3  ;;  %4229 = vst [vmem:[%s10038_s20 + $0x8] sm:$0xff] %v8321_v6  ;;  %v8325_v18 = vpack.c.bf16 %v11183_v3, %v11180_v17 }
 0x35f   : > { %v2732_v42 = vpop.f32.mrb[4].mxu0  ;;  %4232 = vst [vmem:[%s10038_s20 + $0x20] sm:$0xff] %v8324_v49  ;;  %v2925_v14 = vpop.f32.mrb[4].mxu1 }
 0x360   : > { %v11195_v23 = vadd.f32 %v2732_v42, %v11141_v9  ;;  %v2734_v62 = vpop.f32.mrb[5].mxu0  ;;  %4233 = vst [vmem:[%s10038_s20 + $0x28] sm:$0xff] %v8325_v18  ;;  %v11202_v25 = vadd.f32 %v2925_v14, %v11148_v19  ;;  %v2927_v26 = vpop.f32.mrb[5].mxu1 }
 0x361   : > { %v11199_v29 = vadd.f32 %v2734_v62, %v11145_v54  ;;  %v2736_v61 = vpop.f32.mrb[6].mxu0  ;;  %v11208_v4 = vadd.f32 %v2927_v26, %v11152_v56  ;;  %v2929_v15 = vpop.f32.mrb[6].mxu1 }
 0x362   : > { %17454 = vst [vmem:[#allocation32_spill] sm:$0xff] %v11195_v23  ;;  %17456 = vst [vmem:[#allocation34_spill] sm:$0xff] %v11202_v25  ;;  %v11205_v52 = vadd.f32 %v2736_v61, %v11141_v9  ;;  %v2738_v47 = vpop.f32.mrb[7].mxu0  ;;  %v2931_v38 = vpop.f32.mrb[7].mxu1  ;;  %v11220_v2 = vadd.f32 %v2929_v15, %v11148_v19  ;;  %v11291_v15 = vand.u32 127, %v2008_v50 }
 0x363   : > { %17455 = vst [vmem:[#allocation33_spill] sm:$0xff] %v11199_v29  ;;  %17458 = vst [vmem:[#allocation36_spill] sm:$0xff] %v11208_v4  ;;  %v8328_v10 = vpack.c.bf16 %v11199_v29, %v11195_v23  ;;  %v11213_v53 = vadd.f32 %v2738_v47, %v11145_v54  ;;  %v8329_v13 = vpack.c.bf16 %v11208_v4, %v11202_v25 }
 0x364   : > { %17457 = vst [vmem:[#allocation35_spill] sm:$0xff] %v11205_v52  ;;  %3227 = vmatmul.mubr.bf16.gmra.mrb[112].mxu0 %v11055_v28  ;;  %17460 = vst [vmem:[#allocation38_spill] sm:$0xff] %v11220_v2  ;;  %v11223_v48 = vadd.f32 %v2931_v38, %v11152_v56  ;;  %3420 = vmatmul.mubr.bf16.gmra.mrb[112].mxu1 %v11055_v28 }
 0x365   : > { %17459 = vst [vmem:[#allocation37_spill] sm:$0xff] %v11213_v53  ;;  %4236 = vst [vmem:[%s10038_s20 + $0x40] sm:$0xff] %v8328_v10  ;;  %3236 = vmatprep.mubr.bf16.mxu0 %v11057_v34  ;;  %v8332_v22 = vpack.c.bf16 %v11213_v53, %v11205_v52  ;;  %3429 = vmatprep.mubr.bf16.mxu1 %v11057_v34 }
 0x366   : > { %17461 = vst [vmem:[#allocation39_spill] sm:$0xff] %v11223_v48  ;;  %4237 = vst [vmem:[%s10038_s20 + $0x48] sm:$0xff] %v8329_v13  ;;  %v8333_v59 = vpack.c.bf16 %v11223_v48, %v11220_v2 }
 0x367   : > { %v2742_v27 = vpop.f32.mrb[8].mxu0  ;;  %4240 = vst [vmem:[%s10038_s20 + $0x60] sm:$0xff] %v8332_v22  ;;  %v2935_v24 = vpop.f32.mrb[8].mxu1 }
 0x368   : > { %v11235_v7 = vadd.f32 %v2742_v27, %v11141_v9  ;;  %v2744_v35 = vpop.f32.mrb[9].mxu0  ;;  %4241 = vst [vmem:[%s10038_s20 + $0x68] sm:$0xff] %v8333_v59  ;;  %v11242_v28 = vadd.f32 %v2935_v24, %v11148_v19  ;;  %v2937_v34 = vpop.f32.mrb[9].mxu1  ;;  %v6183_v24 = vadd.s32 128, %v11291_v15 }
 0x369   : > { %v11239_v16 = vadd.f32 %v2744_v35, %v11145_v54  ;;  %v2746_v43 = vpop.f32.mrb[10].mxu0  ;;  %v11248_v1 = vadd.f32 %v2937_v34, %v11152_v56  ;;  %v2939_v8 = vpop.f32.mrb[10].mxu1 }
 0x36a   : > { %17462 = vst [vmem:[#allocation40_spill] sm:$0xff] %v11235_v7  ;;  %17464 = vst [vmem:[#allocation42_spill] sm:$0xff] %v11242_v28  ;;  %v11245_v31 = vadd.f32 %v2746_v43, %v11141_v9  ;;  %v2748_v41 = vpop.f32.mrb[11].mxu0  ;;  %v2941_v51 = vpop.f32.mrb[11].mxu1  ;;  %v11260_v55 = vadd.f32 %v2939_v8, %v11148_v19  ;;  %v6185_v8 = vadd.s32 384, %v11291_v15 }
 0x36b   : > { %17463 = vst [vmem:[#allocation41_spill] sm:$0xff] %v11239_v16  ;;  %17466 = vst [vmem:[#allocation44_spill] sm:$0xff] %v11248_v1  ;;  %v8336_v46 = vpack.c.bf16 %v11239_v16, %v11235_v7  ;;  %v11253_v12 = vadd.f32 %v2748_v41, %v11145_v54  ;;  %v8337_v20 = vpack.c.bf16 %v11248_v1, %v11242_v28  ;;  %v11315_v35 = vpop.permute.xlu0 %6233  ;;  %v6184_v41 = vadd.s32 256, %v11291_v15 }
 0x36c   : > { %17465 = vst [vmem:[#allocation43_spill] sm:$0xff] %v11245_v31  ;;  %3237 = vmatmul.mubr.bf16.gmra.mrb[116].mxu0 %v11063_v37  ;;  %17468 = vst [vmem:[#allocation46_spill] sm:$0xff] %v11260_v55  ;;  %v11263_v58 = vadd.f32 %v2941_v51, %v11152_v56  ;;  %3430 = vmatmul.mubr.bf16.gmra.mrb[116].mxu1 %v11063_v37 }
 0x36d   : > { %17467 = vst [vmem:[#allocation45_spill] sm:$0xff] %v11253_v12  ;;  %4244 = vst [vmem:[%s10038_s20 + $0x80] sm:$0xff] %v8336_v46  ;;  %3246 = vmatprep.mubr.bf16.mxu0 %v11065_v21  ;;  %v8340_v0 = vpack.c.bf16 %v11253_v12, %v11245_v31  ;;  %3439 = vmatprep.mubr.bf16.mxu1 %v11065_v21 }
 0x36e   : > { %17469 = vst [vmem:[#allocation47_spill] sm:$0xff] %v11263_v58  ;;  %4245 = vst [vmem:[%s10038_s20 + $0x88] sm:$0xff] %v8337_v20  ;;  %v8341_v63 = vpack.c.bf16 %v11263_v58, %v11260_v55 }
 0x36f   : > { %v2752_v32 = vpop.f32.mrb[12].mxu0  ;;  %4248 = vst [vmem:[%s10038_s20 + $0xa0] sm:$0xff] %v8340_v0  ;;  %v2945_v18 = vpop.f32.mrb[12].mxu1  ;;  %17478 = vst [vmem:[#allocation56_spill] sm:$0xff] %v11315_v35 }
 0x370   : > { %v11275_v6 = vadd.f32 %v2752_v32, %v11141_v9  ;;  %v2754_v49 = vpop.f32.mrb[13].mxu0  ;;  %4249 = vst [vmem:[%s10038_s20 + $0xa8] sm:$0xff] %v8341_v63  ;;  %v11282_v62 = vadd.f32 %v2945_v18, %v11148_v19  ;;  %v2947_v21 = vpop.f32.mrb[13].mxu1 }
 0x371   : > { %v11279_v37 = vadd.f32 %v2754_v49, %v11145_v54  ;;  %v2756_v42 = vpop.f32.mrb[14].mxu0  ;;  %v11288_v26 = vadd.f32 %v2947_v21, %v11152_v56  ;;  %v2949_v47 = vpop.f32.mrb[14].mxu1 }
 0x372   : > { %17470 = vst [vmem:[#allocation48_spill] sm:$0xff] %v11275_v6  ;;  %17472 = vst [vmem:[#allocation50_spill] sm:$0xff] %v11282_v62  ;;  %v11285_v14 = vadd.f32 %v2756_v42, %v11141_v9  ;;  %v2758_v61 = vpop.f32.mrb[15].mxu0  ;;  %v2951_v38 = vpop.f32.mrb[15].mxu1  ;;  %v11304_v59 = vadd.f32 %v2949_v47, %v11148_v19 }
 0x373   : > { %17471 = vst [vmem:[#allocation49_spill] sm:$0xff] %v11279_v37  ;;  %17474 = vst [vmem:[#allocation52_spill] sm:$0xff] %v11288_v26  ;;  %v8344_v10 = vpack.c.bf16 %v11279_v37, %v11275_v6  ;;  %v11296_v13 = vadd.f32 %v2758_v61, %v11145_v54  ;;  %v8345_v22 = vpack.c.bf16 %v11288_v26, %v11282_v62 }
 0x374   : > { %17473 = vst [vmem:[#allocation51_spill] sm:$0xff] %v11285_v14  ;;  %3247 = vmatmul.mubr.bf16.gmra.mrb[120].mxu0 %v11071_v11  ;;  %17476 = vst [vmem:[#allocation54_spill] sm:$0xff] %v11304_v59  ;;  %v11307_v50 = vadd.f32 %v2951_v38, %v11152_v56  ;;  %3440 = vmatmul.mubr.bf16.gmra.mrb[120].mxu1 %v11071_v11  ;;  %v11321_v11 = vstv %s8309_s23 }
 0x375   : > { %17475 = vst [vmem:[#allocation53_spill] sm:$0xff] %v11296_v13  ;;  %4252 = vst [vmem:[%s10038_s20 + $0xc0] sm:$0xff] %v8344_v10  ;;  %3256 = vmatprep.mubr.bf16.mxu0 %v11073_v44  ;;  %v8348_v27 = vpack.c.bf16 %v11296_v13, %v11285_v14  ;;  %3449 = vmatprep.mubr.bf16.mxu1 %v11073_v44  ;;  %v11343_v61 = vadd.s32 %v11321_v11, %v11291_v15  ;;  %v11348_v10 = vpop.permute.xlu1 %6236 }
 0x376   : > { %17477 = vst [vmem:[#allocation55_spill] sm:$0xff] %v11307_v50  ;;  %4253 = vst [vmem:[%s10038_s20 + $0xc8] sm:$0xff] %v8345_v22  ;;  %v8349_v43 = vpack.c.bf16 %v11307_v50, %v11304_v59  ;;  %v11346_v47 = vadd.s32 %v11321_v11, %v6183_v24  ;;  %v2030_v50 = vsub.s32 5, %v11123_v57 }
 0x377   : > { %v2762_v34 = vpop.f32.mrb[16].mxu0  ;;  %17479 = vst [vmem:[#allocation57_spill] sm:$0xff] %v11321_v11  ;;  %4256 = vst [vmem:[%s10038_s20 + $0xe0] sm:$0xff] %v8348_v27  ;;  %v2955_v44 = vpop.f32.mrb[16].mxu1  ;;  %v11353_v27 = vadd.s32 %v11321_v11, %v6184_v41  ;;  %vm6328_vm1 = vcmp.eq.s32.totalorder %v11343_v61, %v11315_v35  ;;  %vm6336_vm4 = vcmp.eq.s32.totalorder %v11343_v61, %v11348_v10 }
 0x378   : > { %v11326_v46 = vadd.f32 %v2762_v34, %v11141_v9  ;;  %v2764_v51 = vpop.f32.mrb[17].mxu0  ;;  %4257 = vst [vmem:[%s10038_s20 + $0xe8] sm:$0xff] %v8349_v43  ;;  %v11333_v63 = vadd.f32 %v2955_v44, %v11148_v19  ;;  %v2957_v32 = vpop.f32.mrb[17].mxu1  ;;  %17485 = vst [vmem:[#allocation63_spill] sm:$0xff] %v11343_v61  ;;  %v11356_v43 = vadd.s32 %v11321_v11, %v6185_v8 }
 0x379   : > { %v11330_v20 = vadd.f32 %v2764_v51, %v11145_v54  ;;  %v2766_v0 = vpop.f32.mrb[18].mxu0  ;;  %v11339_v42 = vadd.f32 %v2957_v32, %v11152_v56  ;;  %v2959_v21 = vpop.f32.mrb[18].mxu1  ;;  %17486 = vst [vmem:[#allocation64_spill] sm:$0xff] %v11346_v47  ;;  %17487 = vst [vmem:[#allocation65_spill] sm:$0xff] %v11348_v10  ;;  %vm6329_vm2 = vcmp.eq.s32.totalorder %v11346_v47, %v11315_v35 }
 0x37a   : > { %17480 = vst [vmem:[#allocation58_spill] sm:$0xff] %v11326_v46  ;;  %17482 = vst [vmem:[#allocation60_spill] sm:$0xff] %v11333_v63  ;;  %v11336_v49 = vadd.f32 %v2766_v0, %v11141_v9  ;;  %v2768_v18 = vpop.f32.mrb[19].mxu0  ;;  %v2961_v22 = vpop.f32.mrb[19].mxu1  ;;  %v11366_v24 = vadd.f32 %v2959_v21, %v11148_v19  ;;  %vm6330_vm3 = vcmp.eq.s32.totalorder %v11353_v27, %v11315_v35 }
 0x37b   : > { %17481 = vst [vmem:[#allocation59_spill] sm:$0xff] %v11330_v20  ;;  %17484 = vst [vmem:[#allocation62_spill] sm:$0xff] %v11339_v42  ;;  %v8352_v38 = vpack.c.bf16 %v11330_v20, %v11326_v46  ;;  %v11359_v34 = vadd.f32 %v2768_v18, %v11145_v54  ;;  %v8353_v51 = vpack.c.bf16 %v11339_v42, %v11333_v63  ;;  %v11372_v41 = vpop.permute.xlu0 %6242  ;;  %v11381_v0 = vpop.permute.xlu1 %6239 }
 0x37c   : > { %17483 = vst [vmem:[#allocation61_spill] sm:$0xff] %v11336_v49  ;;  %17488 = vst [vmem:[#allocation66_spill] sm:$0xff] %v11353_v27  ;;  %3257 = vmatmul.mubr.bf16.gmra.mrb[124].mxu0 %v11079_v45  ;;  %v11369_v44 = vadd.f32 %v2961_v22, %v11152_v56  ;;  %3450 = vmatmul.mubr.bf16.gmra.mrb[124].mxu1 %v11079_v45  ;;  %vm6331_vm5 = vcmp.eq.s32.totalorder %v11356_v43, %v11315_v35 }
 0x37d   : > { %17489 = vst [vmem:[#allocation67_spill] sm:$0xff] %v11356_v43  ;;  %17490 = vst [vmem:[#allocation68_spill] sm:$0xff] %v11359_v34  ;;  %v8356_v8 = vpack.c.bf16 %v11359_v34, %v11336_v49  ;;  %vm6337_vm6 = vcmp.eq.s32.totalorder %v11346_v47, %v11348_v10  ;;  %vm6338_vm7 = vcmp.eq.s32.totalorder %v11353_v27, %v11348_v10 }
 0x37e   : > { %4260 = vst [vmem:[%s10038_s20 + $0x100] sm:$0xff] %v8352_v38  ;;  %17491 = vst [vmem:[#allocation69_spill] sm:$0xff] %v11366_v24  ;;  %v8357_v32 = vpack.c.bf16 %v11369_v44, %v11366_v24  ;;  %vm6339_vm8 = vcmp.eq.s32.totalorder %v11356_v43, %v11348_v10  ;;  %vm6344_vm9 = vcmp.eq.s32.totalorder %v11343_v61, %v11381_v0 }
 0x37f   : > { %17492 = vst [vmem:[#allocation70_spill] sm:$0xff] %v11369_v44  ;;  %17493 = vst [vmem:[#allocation71_spill] sm:$0xff] %v11372_v41  ;;  %v2772_v18 = vpop.f32.mrb[20].mxu0  ;;  %v2965_v38 = vpop.f32.mrb[20].mxu1  ;;  %v4388_v34 = vmax.f32 %v11156_v40, %v11159_v5  ;;  %vm6352_vm10 = vcmp.eq.s32.totalorder %v11343_v61, %v11372_v41  ;;  %vm6353_vm11 = vcmp.eq.s32.totalorder %v11346_v47, %v11372_v41 }
 0x380   : > { %4261 = vst [vmem:[%s10038_s20 + $0x108] sm:$0xff] %v8353_v51  ;;  %17494 = vst [vmem:[#allocation72_spill] sm:$0xff] %v11381_v0  ;;  %v11393_v45 = vadd.f32 %v2772_v18, %v11141_v9  ;;  %v2774_v21 = vpop.f32.mrb[21].mxu0  ;;  %v11404_v44 = vadd.f32 %v2965_v38, %v11148_v19  ;;  %v6617_v38 = vsel %vm6329_vm2, %v11159_v5, 0.0  ;;  %vm6345_vm12 = vcmp.eq.s32.totalorder %v11346_v47, %v11381_v0  ;;  %v11443_v5 = vpop.permute.xlu1 %6245 }
 0x381   : > { %4264 = vst [vmem:[%s10038_s20 + $0x120] sm:$0xff] %v8356_v8  ;;  %4265 = vst [vmem:[%s10038_s20 + $0x128] sm:$0xff] %v8357_v32  ;;  %v11401_v22 = vadd.f32 %v2774_v21, %v11145_v54  ;;  %v2776_v51 = vpop.f32.mrb[22].mxu0  ;;  %v2967_v8 = vpop.f32.mrb[21].mxu1  ;;  %v2026_v32 = vsub.s32 4, %v11123_v57  ;;  %v6616_v21 = vsel %vm6328_vm1, %v11156_v40, 0.0  ;;  %vm6346_vm13 = vcmp.eq.s32.totalorder %v11353_v27, %v11381_v0 }
 0x382   : > { %17495 = vst [vmem:[#allocation73_spill] sm:$0xff] %v11393_v45  ;;  %17497 = vst [vmem:[#allocation75_spill] sm:$0xff] %v11404_v44  ;;  %v11409_v18 = vadd.f32 %v2776_v51, %v11141_v9  ;;  %v2778_v24 = vpop.f32.mrb[23].mxu0  ;;  %v11412_v42 = vadd.f32 %v2967_v8, %v11152_v56  ;;  %v2969_v11 = vpop.f32.mrb[22].mxu1  ;;  %vm6347_vm14 = vcmp.eq.s32.totalorder %v11356_v43, %v11381_v0 }
 0x383   : > { %17496 = vst [vmem:[#allocation74_spill] sm:$0xff] %v11401_v22  ;;  %v8360_v51 = vpack.c.bf16 %v11401_v22, %v11393_v45  ;;  %v2971_v8 = vpop.f32.mrb[23].mxu1  ;;  %v11434_v49 = vadd.f32 %v2778_v24, %v11145_v54  ;;  %17501 = vst [vmem:[#allocation79_spill] sm:$0xff] %v11443_v5  ;;  %v11447_v40 = vadd.f32 %v2969_v11, %v11148_v19  ;;  %v6618_v11 = vsel %vm6330_vm3, %v11162_v33, 0.0 }
 0x384   : > { %17498 = vst [vmem:[#allocation76_spill] sm:$0xff] %v11409_v18  ;;  %17499 = vst [vmem:[#allocation77_spill] sm:$0xff] %v11412_v42  ;;  %v8361_v63 = vpack.c.bf16 %v11412_v42, %v11404_v44  ;;  %v11450_v24 = vadd.f32 %v2971_v8, %v11152_v56  ;;  %v6872_v22 = vadd.f32 %v6617_v38, %v6616_v21  ;;  %v6624_v21 = vsel %vm6336_vm4, %v11165_v36, 0.0 }
 0x385   : > { %17500 = vst [vmem:[#allocation78_spill] sm:$0xff] %v11434_v49  ;;  %4268 = vst [vmem:[%s10038_s20 + $0x140] sm:$0xff] %v8360_v51  ;;  %v8364_v42 = vpack.c.bf16 %v11434_v49, %v11409_v18  ;;  %v11458_v44 = vrot.slane %v11134_v60, %v2026_v32  ;;  %v11461_v51 = vadd.s32 512, %v11291_v15  ;;  %v11475_v32 = vpop.permute.xlu0 %6248  ;;  %vm6354_vm15 = vcmp.eq.s32.totalorder %v11353_v27, %v11372_v41 }
 0x386   : > { %17502 = vst [vmem:[#allocation80_spill] sm:$0xff] %v11447_v40  ;;  %17503 = vst [vmem:[#allocation81_spill] sm:$0xff] %v11450_v24  ;;  %v8365_v38 = vpack.c.bf16 %v11450_v24, %v11447_v40  ;;  %vm6360_vm0 = vcmp.eq.s32.totalorder %v11343_v61, %v11443_v5  ;;  %vm6361_vm1 = vcmp.eq.s32.totalorder %v11346_v47, %v11443_v5  ;;  %v11504_v40 = vsel %vm6331_vm5, %v11168_v30, 0.0 }
 0x387   : > { %4269 = vst [vmem:[%s10038_s20 + $0x148] sm:$0xff] %v8361_v63  ;;  %17504 = vst [vmem:[#allocation82_spill] sm:$0xff] %v11458_v44  ;;  %v6625_v63 = vsel %vm6337_vm6, %v11173_v39, 0.0  ;;  %v2782_v8 = vpop.f32.mrb[24].mxu0  ;;  %v11480_v44 = vmax.f32 %v4388_v34, %v11162_v33  ;;  %v2975_v45 = vpop.f32.mrb[24].mxu1  ;;  %v11493_v24 = vrot.slane %v11134_v60, %v2030_v50  ;;  %v11496_v34 = vadd.s32 640, %v11291_v15 }
 0x388   : > { %17505 = vst [vmem:[#allocation83_spill] sm:$0xff] %v11461_v51  ;;  %17506 = vst [vmem:[#allocation84_spill] sm:$0xff] %v11475_v32  ;;  %v11490_v18 = vadd.f32 %v2782_v8, %v11141_v9  ;;  %v2784_v49 = vpop.f32.mrb[25].mxu0  ;;  %v4397_v33 = vmax.f32 %v11165_v36, %v11173_v39  ;;  %v11511_v50 = vadd.f32 %v2975_v45, %v11148_v19  ;;  %v6626_v45 = vsel %vm6338_vm7, %v11180_v17, 0.0 }
 0x389   : > { %17507 = vst [vmem:[#allocation85_spill] sm:$0xff] %v11480_v44  ;;  %4272 = vst [vmem:[%s10038_s20 + $0x160] sm:$0xff] %v8364_v42  ;;  %v11508_v42 = vadd.f32 %v2784_v49, %v11145_v54  ;;  %v2786_v8 = vpop.f32.mrb[26].mxu0  ;;  %v11513_v51 = vadd.f32 %v6872_v22, %v6618_v11  ;;  %vm6355_vm2 = vcmp.eq.s32.totalorder %v11356_v43, %v11372_v41  ;;  %v6632_v22 = vsel %vm6344_vm9, %v11195_v23, 0.0 }
 0x38a   : > { %17508 = vst [vmem:[#allocation86_spill] sm:$0xff] %v11490_v18  ;;  %17509 = vst [vmem:[#allocation87_spill] sm:$0xff] %v11493_v24  ;;  %v2977_v24 = vpop.f32.mrb[25].mxu1  ;;  %v11518_v39 = vadd.f32 %v2786_v8, %v11141_v9  ;;  %v2788_v36 = vpop.f32.mrb[27].mxu0  ;;  %v6633_v11 = vsel %vm6345_vm12, %v11199_v29, 0.0  ;;  %v4406_v8 = vmax.f32 %v11195_v23, %v11199_v29  ;;  %vm6362_vm3 = vcmp.eq.s32.totalorder %v11353_v27, %v11443_v5 }
 0x38b   : > { %17510 = vst [vmem:[#allocation88_spill] sm:$0xff] %v11496_v34  ;;  %17511 = vst [vmem:[#allocation89_spill] sm:$0xff] %v11504_v40  ;;  %v6881_v34 = vadd.f32 %v6625_v63, %v6624_v21  ;;  %v2979_v49 = vpop.f32.mrb[26].mxu1  ;;  %vm6368_vm4 = vcmp.eq.s32.totalorder %v11343_v61, %v11475_v32  ;;  %vm6369_vm5 = vcmp.eq.s32.totalorder %v11346_v47, %v11475_v32  ;;  %v11559_v29 = vsel %vm6339_vm8, %v11183_v3, 0.0  ;;  %v11561_v23 = vpop.permute.xlu1 %6251 }
 0x38c   : > { %4273 = vst [vmem:[%s10038_s20 + $0x168] sm:$0xff] %v8365_v38  ;;  %17512 = vst [vmem:[#allocation90_spill] sm:$0xff] %v11508_v42  ;;  %v11521_v38 = vadd.f32 %v2977_v24, %v11152_v56  ;;  %v8368_v24 = vpack.c.bf16 %v11508_v42, %v11490_v18  ;;  %v2981_v21 = vpop.f32.mrb[27].mxu1  ;;  %v11548_v35 = vadd.f32 %v2788_v36, %v11145_v54 }
 0x38d   : > { %17513 = vst [vmem:[#allocation91_spill] sm:$0xff] %v11511_v50  ;;  %17514 = vst [vmem:[#allocation92_spill] sm:$0xff] %v11513_v51  ;;  %v11553_v63 = vmax.f32 %v4397_v33, %v11180_v17  ;;  %v11565_v30 = vadd.f32 %v2979_v49, %v11148_v19  ;;  %v11568_v36 = vadd.f32 %v2981_v21, %v11152_v56  ;;  %v2034_v17 = vsub.s32 6, %v11123_v57 }
 0x38e   : > { %17515 = vst [vmem:[#allocation93_spill] sm:$0xff] %v11518_v39  ;;  %17516 = vst [vmem:[#allocation94_spill] sm:$0xff] %v11521_v38  ;;  %v8369_v51 = vpack.c.bf16 %v11521_v38, %v11511_v50  ;;  %v11570_v44 = vadd.f32 %v6881_v34, %v6626_v45  ;;  %v6890_v40 = vadd.f32 %v6633_v11, %v6632_v22  ;;  %v6634_v49 = vsel %vm6346_vm13, %v11202_v25, 0.0  ;;  %v11590_v22 = vpop.permute.xlu0 %6254 }
 0x38f   : > { %17517 = vst [vmem:[#allocation95_spill] sm:$0xff] %v11548_v35  ;;  %17518 = vst [vmem:[#allocation96_spill] sm:$0xff] %v11553_v63  ;;  %vm6363_vm6 = vcmp.eq.s32.totalorder %v11356_v43, %v11443_v5  ;;  %v8372_v33 = vpack.c.bf16 %v11548_v35, %v11518_v39  ;;  %v6640_v34 = vsel %vm6352_vm10, %v11205_v52, 0.0  ;;  %v6641_v45 = vsel %vm6353_vm11, %v11213_v53, 0.0  ;;  %v2792_v11 = vpop.f32.mrb[28].mxu0  ;;  %v2985_v10 = vpop.f32.mrb[28].mxu1 }
 0x390   : > { %17519 = vst [vmem:[#allocation97_spill] sm:$0xff] %v11559_v29  ;;  %17520 = vst [vmem:[#allocation98_spill] sm:$0xff] %v11561_v23  ;;  %v4415_v21 = vmax.f32 %v11205_v52, %v11213_v53  ;;  %vm6370_vm7 = vcmp.eq.s32.totalorder %v11353_v27, %v11475_v32  ;;  %vm6376_vm8 = vcmp.eq.s32.totalorder %v11343_v61, %v11561_v23  ;;  %v2794_v29 = vpop.f32.mrb[29].mxu0  ;;  %v11616_v52 = vsel %vm6347_vm14, %v11208_v4, 0.0 }
 0x391   : > { %4276 = vst [vmem:[%s10038_s20 + $0x180] sm:$0xff] %v8368_v24  ;;  %17521 = vst [vmem:[#allocation99_spill] sm:$0xff] %v11565_v30  ;;  %v11595_v24 = vmax.f32 %v4406_v8, %v11202_v25  ;;  %vm6377_vm9 = vcmp.eq.s32.totalorder %v11346_v47, %v11561_v23  ;;  %v2038_v8 = vsub.s32 7, %v11123_v57  ;;  %v11620_v25 = vadd.f32 %v2794_v29, %v11145_v54 }
 0x392   : > { %17522 = vst [vmem:[#allocation100_spill] sm:$0xff] %v11568_v36  ;;  %17523 = vst [vmem:[#allocation101_spill] sm:$0xff] %v11570_v44  ;;  %v11607_v44 = vadd.f32 %v2792_v11, %v11141_v9  ;;  %v11623_v11 = vadd.f32 %v2985_v10, %v11148_v19  ;;  %v6899_v57 = vadd.f32 %v6641_v45, %v6640_v34  ;;  %v6642_v10 = vsel %vm6354_vm15, %v11220_v2, 0.0 }
 0x393   : > { %4277 = vst [vmem:[%s10038_s20 + $0x188] sm:$0xff] %v8369_v51  ;;  %17524 = vst [vmem:[#allocation102_spill] sm:$0xff] %v11590_v22  ;;  %v8373_v51 = vpack.c.bf16 %v11568_v36, %v11565_v30  ;;  %v2987_v36 = vpop.f32.mrb[29].mxu1  ;;  %v11625_v30 = vadd.f32 %v6890_v40, %v6634_v49  ;;  %vm6371_vm10 = vcmp.eq.s32.totalorder %v11356_v43, %v11475_v32  ;;  %v6648_v40 = vsel %vm6360_vm0, %v11235_v7, 0.0 }
 0x394   : > { %17525 = vst [vmem:[#allocation103_spill] sm:$0xff] %v11595_v24  ;;  %4280 = vst [vmem:[%s10038_s20 + $0x1a0] sm:$0xff] %v8372_v33  ;;  %v2796_v33 = vpop.f32.mrb[30].mxu0  ;;  %v2989_v29 = vpop.f32.mrb[30].mxu1  ;;  %v6649_v49 = vsel %vm6361_vm1, %v11239_v16, 0.0  ;;  %vm6378_vm11 = vcmp.eq.s32.totalorder %v11353_v27, %v11561_v23  ;;  %vm6384_vm12 = vcmp.eq.s32.totalorder %v11343_v61, %v11590_v22  ;;  %vm6385_vm13 = vcmp.eq.s32.totalorder %v11346_v47, %v11590_v22 }
 0x395   : > { %17526 = vst [vmem:[#allocation104_spill] sm:$0xff] %v11607_v44  ;;  %17527 = vst [vmem:[#allocation105_spill] sm:$0xff] %v11616_v52  ;;  %v11630_v53 = vadd.f32 %v2796_v33, %v11141_v9  ;;  %v2798_v3 = vpop.f32.mrb[31].mxu0  ;;  %v2991_v34 = vpop.f32.mrb[31].mxu1  ;;  %v11652_v33 = vmax.f32 %v4415_v21, %v11220_v2  ;;  %v11669_v21 = vsel %vm6355_vm2, %v11223_v48, 0.0  ;;  %v4424_v45 = vmax.f32 %v11235_v7, %v11239_v16 }
 0x396   : > { %4281 = vst [vmem:[%s10038_s20 + $0x1a8] sm:$0xff] %v8373_v51  ;;  %17528 = vst [vmem:[#allocation106_spill] sm:$0xff] %v11620_v25  ;;  %v11633_v51 = vadd.f32 %v2987_v36, %v11152_v56  ;;  %v8376_v36 = vpack.c.bf16 %v11620_v25, %v11607_v44  ;;  %v11661_v63 = vadd.f32 %v2798_v3, %v11145_v54  ;;  %v11673_v2 = vpop.permute.xlu1 %6257 }
 0x397   : > { %17529 = vst [vmem:[#allocation107_spill] sm:$0xff] %v11623_v11  ;;  %17530 = vst [vmem:[#allocation108_spill] sm:$0xff] %v11625_v30  ;;  %v11677_v4 = vadd.f32 %v2989_v29, %v11148_v19  ;;  %v11680_v3 = vadd.f32 %v2991_v34, %v11152_v56  ;;  %v11682_v24 = vadd.f32 %v6899_v57, %v6642_v10  ;;  %v6650_v29 = vsel %vm6362_vm3, %v11242_v28, 0.0 }
 0x398   : > { %17531 = vst [vmem:[#allocation109_spill] sm:$0xff] %v11630_v53  ;;  %17532 = vst [vmem:[#allocation110_spill] sm:$0xff] %v11633_v51  ;;  %v8377_v30 = vpack.c.bf16 %v11633_v51, %v11623_v11  ;;  %v6908_v52 = vadd.f32 %v6649_v49, %v6648_v40  ;;  %vm6379_vm14 = vcmp.eq.s32.totalorder %v11356_v43, %v11561_v23  ;;  %v6656_v57 = vsel %vm6368_vm4, %v11245_v31, 0.0  ;;  %v2802_v40 = vpop.f32.mrb[32].mxu0 }
 0x399   : > { %17533 = vst [vmem:[#allocation111_spill] sm:$0xff] %v11652_v33  ;;  %17534 = vst [vmem:[#allocation112_spill] sm:$0xff] %v11661_v63  ;;  %v8380_v41 = vpack.c.bf16 %v11661_v63, %v11630_v53  ;;  %v11690_v16 = vrot.slane %v11134_v60, %v2034_v17  ;;  %v6657_v10 = vsel %vm6369_vm5, %v11253_v12, 0.0  ;;  %v8381_v17 = vpack.c.bf16 %v11680_v3, %v11677_v4  ;;  %v2804_v7 = vpop.f32.mrb[33].mxu0 }
 0x39a   : > { %17535 = vst [vmem:[#allocation113_spill] sm:$0xff] %v11669_v21  ;;  %17536 = vst [vmem:[#allocation114_spill] sm:$0xff] %v11673_v2  ;;  %vm6392_vm15 = vcmp.eq.s32.totalorder %v11343_v61, %v11673_v2  ;;  %vm6393_vm0 = vcmp.eq.s32.totalorder %v11346_v47, %v11673_v2  ;;  %v11718_v34 = vadd.f32 %v2802_v40, %v11141_v9  ;;  %v2806_v40 = vpop.f32.mrb[34].mxu0 }
 0x39b   : > { %4284 = vst [vmem:[%s10038_s20 + $0x1c0] sm:$0xff] %v8376_v36  ;;  %17537 = vst [vmem:[#allocation115_spill] sm:$0xff] %v11677_v4  ;;  %v4433_v36 = vmax.f32 %v11245_v31, %v11253_v12  ;;  %v11721_v21 = vrot.slane %v11134_v60, %v2038_v8  ;;  %v11724_v49 = vmax.f32 %v4424_v45, %v11242_v28  ;;  %v11730_v12 = vsel %vm6363_vm6, %v11248_v1, 0.0  ;;  %v2808_v48 = vpop.f32.mrb[35].mxu0 }
 0x39c   : > { %17538 = vst [vmem:[#allocation116_spill] sm:$0xff] %v11680_v3  ;;  %17539 = vst [vmem:[#allocation117_spill] sm:$0xff] %v11682_v24  ;;  %v2995_v24 = vpop.f32.mrb[32].mxu1  ;;  %vm6386_vm1 = vcmp.eq.s32.totalorder %v11353_v27, %v11590_v22  ;;  %v11741_v45 = vadd.f32 %v6908_v52, %v6650_v29  ;;  %v6917_v31 = vadd.f32 %v6657_v10, %v6656_v57  ;;  %v6664_v52 = vsel %vm6376_vm8, %v11275_v6, 0.0 }
 0x39d   : > { %4285 = vst [vmem:[%s10038_s20 + $0x1c8] sm:$0xff] %v8377_v30  ;;  %17540 = vst [vmem:[#allocation118_spill] sm:$0xff] %v11690_v16  ;;  %v11704_v30 = vpop.permute.xlu0 %6260  ;;  %v11739_v60 = vadd.f32 %v2995_v24, %v11148_v19  ;;  %v2997_v8 = vpop.f32.mrb[33].mxu1  ;;  %vm6387_vm2 = vcmp.eq.s32.totalorder %v11356_v43, %v11590_v22  ;;  %v11746_v28 = vadd.f32 %v2806_v40, %v11141_v9  ;;  %v6658_v24 = vsel %vm6370_vm7, %v11260_v55, 0.0  ;;  %v17574_v22 = vld [vmem:[#allocation61_spill] sm:$0xff]  ;;  %v17580_v16 = vld [vmem:[#allocation83_spill] sm:$0xff] }
 0x39e   : > { %17541 = vst [vmem:[#allocation119_spill] sm:$0xff] %v11704_v30  ;;  %4288 = vst [vmem:[%s10038_s20 + $0x1e0] sm:$0xff] %v8380_v41  ;;  %v11736_v41 = vadd.f32 %v2804_v7, %v11145_v54  ;;  %v2999_v7 = vpop.f32.mrb[34].mxu1  ;;  %v6665_v29 = vsel %vm6377_vm9, %v11279_v37, 0.0  ;;  %vm6394_vm3 = vcmp.eq.s32.totalorder %v11353_v27, %v11673_v2  ;;  %vm6400_vm4 = vcmp.eq.s32.totalorder %v11343_v61, %v11704_v30 }
 0x39f   : > { %17542 = vst [vmem:[#allocation120_spill] sm:$0xff] %v11718_v34  ;;  %17543 = vst [vmem:[#allocation121_spill] sm:$0xff] %v11721_v21  ;;  %v3001_v10 = vpop.f32.mrb[35].mxu1  ;;  %v11770_v40 = vmax.f32 %v4433_v36, %v11260_v55  ;;  %vm6401_vm5 = vcmp.eq.s32.totalorder %v11346_v47, %v11704_v30  ;;  %v11777_v33 = vadd.f32 %v2808_v48, %v11145_v54  ;;  %v11787_v36 = vsel %vm6371_vm10, %v11263_v58, 0.0 }
 0x3a0   : > { %17544 = vst [vmem:[#allocation122_spill] sm:$0xff] %v11724_v49  ;;  %17545 = vst [vmem:[#allocation123_spill] sm:$0xff] %v11730_v12  ;;  %v8384_v57 = vpack.c.bf16 %v11736_v41, %v11718_v34  ;;  %v11796_v48 = vadd.f32 %v6917_v31, %v6658_v24  ;;  %v6926_v55 = vadd.f32 %v6665_v29, %v6664_v52  ;;  %v6666_v31 = vsel %vm6378_vm11, %v11282_v62, 0.0  ;;  %v2812_v29 = vpop.f32.mrb[36].mxu0  ;;  %v3005_v32 = vpop.f32.mrb[36].mxu1 }
 0x3a1   : > { %4289 = vst [vmem:[%s10038_s20 + $0x1e8] sm:$0xff] %v8381_v17  ;;  %17546 = vst [vmem:[#allocation124_spill] sm:$0xff] %v11736_v41  ;;  %v11749_v17 = vadd.f32 %v2997_v8, %v11152_v56  ;;  %v4442_v8 = vmax.f32 %v11275_v6, %v11279_v37  ;;  %v11791_v37 = vadd.f32 %v2999_v7, %v11148_v19  ;;  %v6672_v7 = vsel %vm6384_vm12, %v11285_v14, 0.0  ;;  %v2814_v49 = vpop.f32.mrb[37].mxu0 }
 0x3a2   : > { %17547 = vst [vmem:[#allocation125_spill] sm:$0xff] %v11739_v60  ;;  %17548 = vst [vmem:[#allocation126_spill] sm:$0xff] %v11741_v45  ;;  %v11794_v6 = vadd.f32 %v3001_v10, %v11152_v56  ;;  %vm6395_vm6 = vcmp.eq.s32.totalorder %v11356_v43, %v11673_v2  ;;  %v11800_v45 = vpop.permute.xlu1 %6263  ;;  %v8388_v1 = vpack.c.bf16 %v11777_v33, %v11746_v28  ;;  %v6673_v24 = vsel %vm6385_vm13, %v11296_v13, 0.0  ;;  %v3007_v10 = vpop.f32.mrb[37].mxu1 }
 0x3a3   : > { %17549 = vst [vmem:[#allocation127_spill] sm:$0xff] %v11746_v28  ;;  %17550 = vst [vmem:[#allocation128_spill] sm:$0xff] %v11749_v17  ;;  %v8385_v5 = vpack.c.bf16 %v11749_v17, %v11739_v60  ;;  %vm6402_vm7 = vcmp.eq.s32.totalorder %v11353_v27, %v11704_v30  ;;  %v11836_v12 = vadd.s32 896, %v11291_v15  ;;  %v4451_v0 = vmax.f32 %v11285_v14, %v11296_v13 }
 0x3a4   : > { %17551 = vst [vmem:[#allocation129_spill] sm:$0xff] %v11770_v40  ;;  %17552 = vst [vmem:[#allocation130_spill] sm:$0xff] %v11777_v33  ;;  %v8389_v52 = vpack.c.bf16 %v11794_v6, %v11791_v37  ;;  %vm6408_vm8 = vcmp.eq.s32.totalorder %v11343_v61, %v11800_v45  ;;  %vm6409_vm9 = vcmp.eq.s32.totalorder %v11346_v47, %v11800_v45  ;;  %v6688_v58 = vsel %vm6400_vm4, %v17574_v22, 0.0 }
 0x3a5   : > { %17553 = vst [vmem:[#allocation131_spill] sm:$0xff] %v11787_v36  ;;  %4292 = vst [vmem:[%s10038_s20 + $0x200] sm:$0xff] %v8384_v57  ;;  %v11806_v57 = vadd.s32 768, %v11291_v15  ;;  %v11833_v36 = vadd.f32 %v2812_v29, %v11141_v9  ;;  %v2816_v15 = vpop.f32.mrb[38].mxu0  ;;  %v11855_v29 = vadd.f32 %v3005_v32, %v11148_v19  ;;  %v11857_v13 = vadd.f32 %v6926_v55, %v6666_v31 }
 0x3a6   : > { %17554 = vst [vmem:[#allocation132_spill] sm:$0xff] %v11791_v37  ;;  %17555 = vst [vmem:[#allocation133_spill] sm:$0xff] %v11794_v6  ;;  %v6935_v14 = vadd.f32 %v6673_v24, %v6672_v7  ;;  %vm6403_vm10 = vcmp.eq.s32.totalorder %v11356_v43, %v11704_v30  ;;  %v4460_v32 = vmax.f32 %v11326_v46, %v11330_v20  ;;  %v6680_v55 = vsel %vm6392_vm15, %v11326_v46, 0.0  ;;  %v11887_v46 = vpop.permute.xlu1 %6269 }
 0x3a7   : > { %17556 = vst [vmem:[#allocation134_spill] sm:$0xff] %v11796_v48  ;;  %17557 = vst [vmem:[#allocation135_spill] sm:$0xff] %v11800_v45  ;;  %v11827_v48 = vmax.f32 %v4442_v8, %v11282_v62  ;;  %v11844_v8 = vsel %vm6379_vm14, %v11288_v26, 0.0  ;;  %v11862_v62 = vadd.f32 %v2816_v15, %v11141_v9  ;;  %v6681_v31 = vsel %vm6393_vm0, %v11330_v20, 0.0 }
 0x3a8   : > { %4293 = vst [vmem:[%s10038_s20 + $0x208] sm:$0xff] %v8385_v5  ;;  %v11820_v5 = vpop.permute.xlu0 %6266  ;;  %4296 = vst [vmem:[%s10038_s20 + $0x220] sm:$0xff] %v8388_v1  ;;  %v11852_v1 = vadd.f32 %v2814_v49, %v11145_v54  ;;  %v3009_v49 = vpop.f32.mrb[38].mxu1  ;;  %v6674_v15 = vsel %vm6386_vm1, %v11304_v59, 0.0  ;;  %vm6410_vm11 = vcmp.eq.s32.totalorder %v11353_v27, %v11800_v45  ;;  %v11895_v23 = vmax.f32 %v4451_v0, %v11304_v59  ;;  %v17573_v0 = vld [vmem:[#allocation60_spill] sm:$0xff] }
 0x3a9   : > { %17558 = vst [vmem:[#allocation136_spill] sm:$0xff] %v11827_v48  ;;  %17559 = vst [vmem:[#allocation137_spill] sm:$0xff] %v11833_v36  ;;  %v3011_v24 = vpop.f32.mrb[39].mxu1  ;;  %vm6416_vm12 = vcmp.eq.s32.totalorder %v11343_v61, %v11820_v5  ;;  %vm6417_vm13 = vcmp.eq.s32.totalorder %v11346_v47, %v11820_v5  ;;  %v6682_v59 = vsel %vm6394_vm3, %v17573_v0, 0.0  ;;  %vm6411_vm14 = vcmp.eq.s32.totalorder %v11356_v43, %v11800_v45 }
 0x3aa   : > { %17560 = vst [vmem:[#allocation138_spill] sm:$0xff] %v11844_v8  ;;  %4297 = vst [vmem:[%s10038_s20 + $0x228] sm:$0xff] %v8389_v52  ;;  %v2818_v8 = vpop.f32.mrb[39].mxu0  ;;  %v11865_v52 = vadd.f32 %v3007_v10, %v11152_v56  ;;  %v8392_v7 = vpack.c.bf16 %v11852_v1, %v11833_v36  ;;  %v17569_v10 = vld [vmem:[#allocation55_spill] sm:$0xff]  ;;  %v11912_v48 = vadd.f32 %v3011_v24, %v11152_v56  ;;  %v17576_v24 = vld [vmem:[#allocation68_spill] sm:$0xff]  ;;  %v3015_v21 = vpop.f32.mrb[40].mxu1 }
 0x3ab   : > { %17561 = vst [vmem:[#allocation139_spill] sm:$0xff] %v11852_v1  ;;  %17562 = vst [vmem:[#allocation140_spill] sm:$0xff] %v11855_v29  ;;  %v11890_v20 = vadd.f32 %v2818_v8, %v11145_v54  ;;  %v11901_v26 = vsel %vm6387_vm2, %v17569_v10, 0.0  ;;  %v11909_v8 = vadd.f32 %v3009_v49, %v11148_v19  ;;  %v4469_v40 = vmax.f32 %v17574_v22, %v17576_v24 }
 0x3ac   : > { %17563 = vst [vmem:[#allocation141_spill] sm:$0xff] %v11857_v13  ;;  %17564 = vst [vmem:[#allocation142_spill] sm:$0xff] %v11862_v62  ;;  %v8393_v13 = vpack.c.bf16 %v11865_v52, %v11855_v29  ;;  %vm6424_vm15 = vcmp.eq.s32.totalorder %v11343_v61, %v11887_v46  ;;  %vm6425_vm0 = vcmp.eq.s32.totalorder %v11346_v47, %v11887_v46 }
 0x3ad   : > { %17565 = vst [vmem:[#allocation143_spill] sm:$0xff] %v11865_v52  ;;  %17566 = vst [vmem:[#allocation144_spill] sm:$0xff] %v11887_v46  ;;  %v8396_v49 = vpack.c.bf16 %v11890_v20, %v11862_v62  ;;  %vm6418_vm1 = vcmp.eq.s32.totalorder %v11353_v27, %v11820_v5  ;;  %v17581_v52 = vld [vmem:[#allocation57_spill] sm:$0xff]  ;;  %vm6426_vm2 = vcmp.eq.s32.totalorder %v11353_v27, %v11887_v46 }
 0x3ae   : > { %17567 = vst [vmem:[#allocation145_spill] sm:$0xff] %v11890_v20  ;;  %17568 = vst [vmem:[#allocation146_spill] sm:$0xff] %v11895_v23  ;;  %v11954_v6 = vadd.s32 %v17581_v52, %v17580_v16  ;;  %v17583_v20 = vld [vmem:[#allocation88_spill] sm:$0xff]  ;;  %v11973_v16 = vadd.f32 %v3015_v21, %v11148_v19  ;;  %v17594_v21 = vld [vmem:[#allocation73_spill] sm:$0xff] }
 0x3af   : > { %17570 = vst [vmem:[#allocation147_spill] sm:$0xff] %v11901_v26  ;;  %4300 = vst [vmem:[%s10038_s20 + $0x240] sm:$0xff] %v8392_v7  ;;  %v6944_v26 = vadd.f32 %v6681_v31, %v6680_v55  ;;  %v11928_v7 = vmax.f32 %v4460_v32, %v17573_v0  ;;  %v6689_v55 = vsel %vm6401_vm5, %v17576_v24, 0.0  ;;  %v11940_v31 = vpop.permute.xlu0 %6272  ;;  %v2822_v32 = vpop.f32.mrb[40].mxu0  ;;  %v11944_v0 = vadd.f32 %v6935_v14, %v6674_v15  ;;  %v17585_v15 = vld [vmem:[#allocation62_spill] sm:$0xff] }
 0x3b0   : > { %17571 = vst [vmem:[#allocation148_spill] sm:$0xff] %v11909_v8  ;;  %17572 = vst [vmem:[#allocation149_spill] sm:$0xff] %v11912_v48  ;;  %v11950_v24 = vadd.f32 %v2822_v32, %v11141_v9  ;;  %v2824_v22 = vpop.f32.mrb[41].mxu0  ;;  %v11958_v62 = vadd.s32 %v17581_v52, %v17583_v20  ;;  %vm6432_vm3 = vcmp.eq.s32.totalorder %v11343_v61, %v11940_v31 }
 0x3b1   : > { %4301 = vst [vmem:[%s10038_s20 + $0x248] sm:$0xff] %v8393_v13  ;;  %17575 = vst [vmem:[#allocation150_spill] sm:$0xff] %v11928_v7  ;;  %v8397_v13 = vpack.c.bf16 %v11912_v48, %v11909_v8  ;;  %v11970_v32 = vadd.f32 %v2824_v22, %v11145_v54  ;;  %v3017_v48 = vpop.f32.mrb[41].mxu1  ;;  %v11975_v20 = vadd.f32 %v6944_v26, %v6682_v59  ;;  %v12025_v7 = vpop.permute.xlu1 %6275 }
 0x3b2   : > { %17577 = vst [vmem:[#allocation151_spill] sm:$0xff] %v11940_v31  ;;  %17578 = vst [vmem:[#allocation152_spill] sm:$0xff] %v11944_v0  ;;  %v2826_v0 = vpop.f32.mrb[42].mxu0  ;;  %v6953_v8 = vadd.f32 %v6689_v55, %v6688_v58  ;;  %v11981_v2 = vadd.f32 %v3017_v48, %v11152_v56  ;;  %vm6433_vm4 = vcmp.eq.s32.totalorder %v11346_v47, %v11940_v31  ;;  %v17595_v48 = vld [vmem:[#allocation74_spill] sm:$0xff] }
 0x3b3   : > { %4304 = vst [vmem:[%s10038_s20 + $0x260] sm:$0xff] %v8396_v49  ;;  %17579 = vst [vmem:[#allocation153_spill] sm:$0xff] %v11950_v24  ;;  %v11966_v49 = vsel %vm6395_vm6, %v17585_v15, 0.0  ;;  %v11978_v14 = vadd.f32 %v2826_v0, %v11141_v9  ;;  %v2828_v10 = vpop.f32.mrb[43].mxu0  ;;  %v8400_v26 = vpack.c.bf16 %v11970_v32, %v11950_v24  ;;  %v6697_v0 = vsel %vm6409_vm9, %v17595_v48, 0.0 }
 0x3b4   : > { %17582 = vst [vmem:[#allocation83_spill] sm:$0xff] %v11954_v6  ;;  %17584 = vst [vmem:[#allocation57_spill] sm:$0xff] %v11958_v62  ;;  %vm6419_vm5 = vcmp.eq.s32.totalorder %v11356_v43, %v11820_v5  ;;  %v12011_v55 = vadd.f32 %v2828_v10, %v11145_v54  ;;  %v8401_v22 = vpack.c.bf16 %v11981_v2, %v11973_v16 }
 0x3b5   : > { %17586 = vst [vmem:[#allocation88_spill] sm:$0xff] %v11966_v49  ;;  %4305 = vst [vmem:[%s10038_s20 + $0x268] sm:$0xff] %v8397_v13  ;;  %v3019_v49 = vpop.f32.mrb[42].mxu1  ;;  %v17592_v13 = vld [vmem:[#allocation69_spill] sm:$0xff]  ;;  %v4478_v15 = vmax.f32 %v17594_v21, %v17595_v48  ;;  %vm6427_vm6 = vcmp.eq.s32.totalorder %v11356_v43, %v11887_v46  ;;  %v12041_v48 = vadd.s32 %v17581_v52, %v11806_v57 }
 0x3b6   : > { %17587 = vst [vmem:[#allocation154_spill] sm:$0xff] %v11970_v32  ;;  %17588 = vst [vmem:[#allocation155_spill] sm:$0xff] %v11973_v16  ;;  %v11986_v23 = vmax.f32 %v4469_v40, %v17592_v13  ;;  %v6690_v58 = vsel %vm6402_vm7, %v17592_v13, 0.0  ;;  %v3021_v59 = vpop.f32.mrb[43].mxu1  ;;  %v6696_v40 = vsel %vm6408_vm8, %v17594_v21, 0.0  ;;  %v17597_v13 = vld [vmem:[#allocation70_spill] sm:$0xff]  ;;  %v12029_v10 = vadd.f32 %v3019_v49, %v11148_v19 }
 0x3b7   : > { %17589 = vst [vmem:[#allocation156_spill] sm:$0xff] %v11975_v20  ;;  %17590 = vst [vmem:[#allocation157_spill] sm:$0xff] %v11978_v14  ;;  %v12019_v20 = vsel %vm6403_vm10, %v17597_v13, 0.0  ;;  %v12034_v16 = vadd.f32 %v6953_v8, %v6690_v58  ;;  %v6962_v58 = vadd.f32 %v6697_v0, %v6696_v40  ;;  %vm6434_vm7 = vcmp.eq.s32.totalorder %v11353_v27, %v11940_v31  ;;  %v17608_v21 = vld [vmem:[#allocation76_spill] sm:$0xff]  ;;  %v3025_v13 = vpop.f32.mrb[44].mxu1 }
 0x3b8   : > { %17591 = vst [vmem:[#allocation158_spill] sm:$0xff] %v11981_v2  ;;  %17593 = vst [vmem:[#allocation159_spill] sm:$0xff] %v11986_v23  ;;  %v12032_v2 = vadd.f32 %v3021_v59, %v11152_v56  ;;  %v17605_v59 = vld [vmem:[#allocation75_spill] sm:$0xff]  ;;  %v6704_v49 = vsel %vm6416_vm12, %v17608_v21, 0.0  ;;  %vm6440_vm8 = vcmp.eq.s32.totalorder %v11343_v61, %v12025_v7  ;;  %vm6441_vm9 = vcmp.eq.s32.totalorder %v11346_v47, %v12025_v7 }
 0x3b9   : > { %17596 = vst [vmem:[#allocation160_spill] sm:$0xff] %v12011_v55  ;;  %17598 = vst [vmem:[#allocation161_spill] sm:$0xff] %v12019_v20  ;;  %v8404_v20 = vpack.c.bf16 %v12011_v55, %v11978_v14  ;;  %v6698_v8 = vsel %vm6410_vm11, %v17605_v59, 0.0  ;;  %v12078_v23 = vmax.f32 %v4478_v15, %v17605_v59  ;;  %vm6435_vm10 = vcmp.eq.s32.totalorder %v11356_v43, %v11940_v31  ;;  %v12119_v14 = vpop.permute.xlu1 %6281 }
 0x3ba   : > { %17599 = vst [vmem:[#allocation162_spill] sm:$0xff] %v12025_v7  ;;  %4308 = vst [vmem:[%s10038_s20 + $0x280] sm:$0xff] %v8400_v26  ;;  %v12045_v26 = vadd.s32 %v17581_v52, %v11836_v12  ;;  %v8405_v57 = vpack.c.bf16 %v12032_v2, %v12029_v10  ;;  %v2832_v12 = vpop.f32.mrb[44].mxu0  ;;  %v17607_v52 = vld [vmem:[#allocation78_spill] sm:$0xff]  ;;  %v6712_v15 = vsel %vm6424_vm15, %v11490_v18, 0.0  ;;  %v6713_v59 = vsel %vm6425_vm0, %v11508_v42, 0.0 }
 0x3bb   : > { %17600 = vst [vmem:[#allocation163_spill] sm:$0xff] %v12029_v10  ;;  %17601 = vst [vmem:[#allocation164_spill] sm:$0xff] %v12032_v2  ;;  %v6705_v40 = vsel %vm6417_vm13, %v17607_v52, 0.0  ;;  %v12075_v0 = vadd.f32 %v2832_v12, %v11141_v9  ;;  %v2834_v30 = vpop.f32.mrb[45].mxu0  ;;  %v12093_v2 = vadd.f32 %v3025_v13, %v11148_v19  ;;  %v3027_v10 = vpop.f32.mrb[45].mxu1  ;;  %v12113_v45 = vadd.f32 %v6962_v58, %v6698_v8 }
 0x3bc   : > { %17602 = vst [vmem:[#allocation165_spill] sm:$0xff] %v12034_v16  ;;  %4309 = vst [vmem:[%s10038_s20 + $0x288] sm:$0xff] %v8401_v22  ;;  %v12055_v22 = vpop.permute.xlu0 %6278  ;;  %v4487_v16 = vmax.f32 %v17608_v21, %v17607_v52  ;;  %v17610_v21 = vld [vmem:[#allocation77_spill] sm:$0xff]  ;;  %v2836_v12 = vpop.f32.mrb[46].mxu0  ;;  %vm6442_vm13 = vcmp.eq.s32.totalorder %v11353_v27, %v12025_v7  ;;  %v6980_v58 = vadd.f32 %v6713_v59, %v6712_v15  ;;  %v6720_v59 = vsel %vm6432_vm3, %v11518_v39, 0.0 }
 0x3bd   : > { %17603 = vst [vmem:[#allocation166_spill] sm:$0xff] %v12041_v48  ;;  %17604 = vst [vmem:[#allocation167_spill] sm:$0xff] %v12045_v26  ;;  %v12084_v52 = vsel %vm6411_vm14, %v17610_v21, 0.0  ;;  %vm6448_vm11 = vcmp.eq.s32.totalorder %v11343_v61, %v12055_v22  ;;  %vm6449_vm12 = vcmp.eq.s32.totalorder %v11346_v47, %v12055_v22  ;;  %v2838_v13 = vpop.f32.mrb[47].mxu0  ;;  %v6971_v26 = vadd.f32 %v6705_v40, %v6704_v49  ;;  %v17616_v48 = vld [vmem:[#allocation80_spill] sm:$0xff] }
 0x3be   : > { %17606 = vst [vmem:[#allocation168_spill] sm:$0xff] %v12055_v22  ;;  %4312 = vst [vmem:[%s10038_s20 + $0x2a0] sm:$0xff] %v8404_v20  ;;  %v12090_v20 = vadd.f32 %v2834_v30, %v11145_v54  ;;  %v12108_v30 = vadd.f32 %v2836_v12, %v11141_v9  ;;  %v6706_v62 = vsel %vm6418_vm1, %v17616_v48, 0.0  ;;  %v12124_v6 = vmax.f32 %v4487_v16, %v17616_v48  ;;  %v17623_v16 = vld [vmem:[#allocation81_spill] sm:$0xff] }
 0x3bf   : > { %17609 = vst [vmem:[#allocation169_spill] sm:$0xff] %v12075_v0  ;;  %17611 = vst [vmem:[#allocation170_spill] sm:$0xff] %v12084_v52  ;;  %v3029_v52 = vpop.f32.mrb[46].mxu1  ;;  %vm6443_vm14 = vcmp.eq.s32.totalorder %v11356_v43, %v12025_v7  ;;  %v12133_v49 = vadd.f32 %v2838_v13, %v11145_v54  ;;  %vm6450_vm15 = vcmp.eq.s32.totalorder %v11353_v27, %v12055_v22  ;;  %v6714_v13 = vsel %vm6426_vm2, %v11511_v50, 0.0 }
 0x3c0   : > { %4313 = vst [vmem:[%s10038_s20 + $0x2a8] sm:$0xff] %v8405_v57  ;;  %17612 = vst [vmem:[#allocation171_spill] sm:$0xff] %v12090_v20  ;;  %v12111_v57 = vadd.f32 %v3027_v10, %v11152_v56  ;;  %v8408_v12 = vpack.c.bf16 %v12090_v20, %v12075_v0  ;;  %v3031_v55 = vpop.f32.mrb[47].mxu1  ;;  %v4496_v10 = vmax.f32 %v11490_v18, %v11508_v42  ;;  %v6721_v15 = vsel %vm6433_vm4, %v11548_v35, 0.0 }
 0x3c1   : > { %17613 = vst [vmem:[#allocation172_spill] sm:$0xff] %v12093_v2  ;;  %17614 = vst [vmem:[#allocation173_spill] sm:$0xff] %v12108_v30  ;;  %v12143_v40 = vadd.f32 %v3029_v52, %v11148_v19  ;;  %v12146_v42 = vadd.f32 %v3031_v55, %v11152_v56  ;;  %vm6456_vm0 = vcmp.eq.s32.totalorder %v11343_v61, %v12119_v14  ;;  %v12164_v55 = vpop.permute.xlu0 %6284  ;;  %v12175_v18 = vsel %vm6419_vm5, %v17623_v16, 0.0 }
 0x3c2   : > { %17615 = vst [vmem:[#allocation174_spill] sm:$0xff] %v12111_v57  ;;  %17617 = vst [vmem:[#allocation175_spill] sm:$0xff] %v12119_v14  ;;  %v8409_v8 = vpack.c.bf16 %v12111_v57, %v12093_v2  ;;  %vm6457_vm1 = vcmp.eq.s32.totalorder %v11346_v47, %v12119_v14  ;;  %v8412_v52 = vpack.c.bf16 %v12133_v49, %v12108_v30  ;;  %v12181_v57 = vpop.permute.xlu1 %6287  ;;  %v3035_v2 = vpop.f32.mrb[48].mxu1 }
 0x3c3   : > { %17618 = vst [vmem:[#allocation176_spill] sm:$0xff] %v12133_v49  ;;  %4316 = vst [vmem:[%s10038_s20 + $0x2c0] sm:$0xff] %v8408_v12  ;;  %v12169_v12 = vadd.f32 %v6971_v26, %v6706_v62  ;;  %v4505_v48 = vmax.f32 %v11518_v39, %v11548_v35  ;;  %vm6451_vm2 = vcmp.eq.s32.totalorder %v11356_v43, %v12055_v22  ;;  %v2842_v62 = vpop.f32.mrb[48].mxu0  ;;  %v12194_v35 = vsel %vm6427_vm6, %v11521_v38, 0.0  ;;  %v3037_v46 = vpop.f32.mrb[49].mxu1  ;;  %v17649_v22 = vld [vmem:[#allocation89_spill] sm:$0xff] }
 0x3c4   : > { %17619 = vst [vmem:[#allocation177_spill] sm:$0xff] %v12143_v40  ;;  %17620 = vst [vmem:[#allocation178_spill] sm:$0xff] %v12146_v42  ;;  %v12188_v30 = vmax.f32 %v4496_v10, %v11511_v50  ;;  %v12198_v39 = vadd.f32 %v2842_v62, %v11141_v9  ;;  %v2844_v49 = vpop.f32.mrb[49].mxu0  ;;  %v12207_v50 = vadd.f32 %v3035_v2, %v11148_v19  ;;  %v3039_v2 = vpop.f32.mrb[50].mxu1 }
 0x3c5   : > { %17621 = vst [vmem:[#allocation179_spill] sm:$0xff] %v12164_v55  ;;  %4317 = vst [vmem:[%s10038_s20 + $0x2c8] sm:$0xff] %v8409_v8  ;;  %v8413_v8 = vpack.c.bf16 %v12146_v42, %v12143_v40  ;;  %v12200_v42 = vadd.f32 %v6980_v58, %v6714_v13  ;;  %v6989_v40 = vadd.f32 %v6721_v15, %v6720_v59  ;;  %v2846_v10 = vpop.f32.mrb[50].mxu0  ;;  %v6728_v15 = vsel %vm6440_vm8, %v11607_v44, 0.0  ;;  %v12280_v31 = vpop.permute.xlu0 %6290 }
 0x3c6   : > { %17622 = vst [vmem:[#allocation180_spill] sm:$0xff] %v12169_v12  ;;  %17624 = vst [vmem:[#allocation181_spill] sm:$0xff] %v12181_v57  ;;  %v12204_v26 = vadd.f32 %v2844_v49, %v11145_v54  ;;  %v17629_v12 = vld [vmem:[#allocation99_spill] sm:$0xff]  ;;  %v4514_v62 = vmax.f32 %v11607_v44, %v11620_v25  ;;  %vm6458_vm3 = vcmp.eq.s32.totalorder %v11353_v27, %v12119_v14  ;;  %v2848_v49 = vpop.f32.mrb[51].mxu0 }
 0x3c7   : > { %4320 = vst [vmem:[%s10038_s20 + $0x2e0] sm:$0xff] %v8412_v52  ;;  %17625 = vst [vmem:[#allocation182_spill] sm:$0xff] %v12198_v39  ;;  %v6722_v52 = vsel %vm6434_vm7, %v17629_v12, 0.0  ;;  %v12218_v58 = vadd.f32 %v2846_v10, %v11141_v9  ;;  %v12221_v13 = vadd.f32 %v3037_v46, %v11152_v56  ;;  %v12224_v59 = vmax.f32 %v4505_v48, %v17629_v12  ;;  %v3041_v48 = vpop.f32.mrb[51].mxu1  ;;  %v17632_v12 = vld [vmem:[#allocation100_spill] sm:$0xff] }
 0x3c8   : > { %17626 = vst [vmem:[#allocation183_spill] sm:$0xff] %v12200_v42  ;;  %4321 = vst [vmem:[%s10038_s20 + $0x2e8] sm:$0xff] %v8413_v8  ;;  %v6729_v8 = vsel %vm6441_vm9, %v11620_v25, 0.0  ;;  %vm6464_vm4 = vcmp.eq.s32.totalorder %v11343_v61, %v12164_v55  ;;  %vm6465_vm5 = vcmp.eq.s32.totalorder %v11346_v47, %v12164_v55  ;;  %v8416_v46 = vpack.c.bf16 %v12204_v26, %v12198_v39 }
 0x3c9   : > { %17627 = vst [vmem:[#allocation184_spill] sm:$0xff] %v12204_v26  ;;  %17628 = vst [vmem:[#allocation185_spill] sm:$0xff] %v12207_v50  ;;  %v12246_v44 = vsel %vm6435_vm10, %v17632_v12, 0.0  ;;  %v4523_v25 = vmax.f32 %v11630_v53, %v11661_v63  ;;  %vm6459_vm6 = vcmp.eq.s32.totalorder %v11356_v43, %v12119_v14  ;;  %v12253_v42 = vadd.f32 %v2848_v49, %v11145_v54 }
 0x3ca   : > { %17630 = vst [vmem:[#allocation186_spill] sm:$0xff] %v12218_v58  ;;  %17631 = vst [vmem:[#allocation187_spill] sm:$0xff] %v12221_v13  ;;  %v6736_v10 = vsel %vm6448_vm11, %v11630_v53, 0.0  ;;  %v6737_v39 = vsel %vm6449_vm12, %v11661_v63, 0.0  ;;  %vm6472_vm7 = vcmp.eq.s32.totalorder %v11343_v61, %v12181_v57  ;;  %vm6473_vm8 = vcmp.eq.s32.totalorder %v11346_v47, %v12181_v57 }
 0x3cb   : > { %17633 = vst [vmem:[#allocation188_spill] sm:$0xff] %v12246_v44  ;;  %17634 = vst [vmem:[#allocation189_spill] sm:$0xff] %v12253_v42  ;;  %v8417_v49 = vpack.c.bf16 %v12221_v13, %v12207_v50  ;;  %v12271_v26 = vadd.f32 %v3039_v2, %v11148_v19  ;;  %v12273_v53 = vadd.f32 %v6989_v40, %v6722_v52  ;;  %v6730_v40 = vsel %vm6442_vm13, %v11623_v11, 0.0 }
 0x3cc   : > { %4324 = vst [vmem:[%s10038_s20 + $0x300] sm:$0xff] %v8416_v46  ;;  %v12276_v44 = vmax.f32 %v4514_v62, %v11623_v11  ;;  %v6998_v63 = vadd.f32 %v6729_v8, %v6728_v15  ;;  %vm6466_vm9 = vcmp.eq.s32.totalorder %v11353_v27, %v12164_v55  ;;  %17638 = vst [vmem:[#allocation193_spill] sm:$0xff] %v12280_v31  ;;  %v12294_v52 = vsel %vm6443_vm14, %v11633_v51, 0.0  ;;  %v12296_v62 = vpop.permute.xlu1 %6293  ;;  %v2852_v15 = vpop.f32.mrb[52].mxu0 }
 0x3cd   : > { %17635 = vst [vmem:[#allocation190_spill] sm:$0xff] %v12271_v26  ;;  %17636 = vst [vmem:[#allocation191_spill] sm:$0xff] %v12273_v53  ;;  %v8420_v46 = vpack.c.bf16 %v12253_v42, %v12218_v58  ;;  %v12300_v2 = vadd.f32 %v3041_v48, %v11152_v56  ;;  %v7007_v8 = vadd.f32 %v6737_v39, %v6736_v10  ;;  %v6738_v11 = vsel %vm6450_vm15, %v11677_v4, 0.0  ;;  %v3045_v48 = vpop.f32.mrb[52].mxu1  ;;  %v12365_v51 = vpop.permute.xlu0 %6296  ;;  %v17812_v53 = vld [vmem:[#allocation114_spill] sm:$0xff] }
 0x3ce   : > { %17637 = vst [vmem:[#allocation192_spill] sm:$0xff] %v12276_v44  ;;  %17639 = vst [vmem:[#allocation194_spill] sm:$0xff] %v12294_v52  ;;  %v12303_v13 = vmax.f32 %v4523_v25, %v11677_v4  ;;  %vm6474_vm10 = vcmp.eq.s32.totalorder %v11353_v27, %v12181_v57  ;;  %v12313_v58 = vadd.f32 %v2852_v15, %v11141_v9  ;;  %v6744_v39 = vsel %vm6456_vm0, %v11718_v34, 0.0  ;;  %v3047_v4 = vpop.f32.mrb[53].mxu1 }
 0x3cf   : > { %17640 = vst [vmem:[#allocation195_spill] sm:$0xff] %v12296_v62  ;;  %4325 = vst [vmem:[%s10038_s20 + $0x308] sm:$0xff] %v8417_v49  ;;  %v2854_v49 = vpop.f32.mrb[53].mxu0  ;;  %v6745_v25 = vsel %vm6457_vm1, %v11736_v41, 0.0  ;;  %vm6480_vm11 = vcmp.eq.s32.totalorder %v11343_v61, %v12280_v31  ;;  %vm6481_vm12 = vcmp.eq.s32.totalorder %v11346_v47, %v12280_v31  ;;  %v8421_v10 = vpack.c.bf16 %v12300_v2, %v12271_v26  ;;  %v3049_v26 = vpop.f32.mrb[54].mxu1 }
 0x3d0   : > { %17641 = vst [vmem:[#allocation196_spill] sm:$0xff] %v12300_v2  ;;  %17642 = vst [vmem:[#allocation197_spill] sm:$0xff] %v12303_v13  ;;  %v2856_v15 = vpop.f32.mrb[54].mxu0  ;;  %v12332_v42 = vadd.f32 %v6998_v63, %v6730_v40  ;;  %v12340_v52 = vsel %vm6451_vm2, %v11680_v3, 0.0  ;;  %vm6467_vm13 = vcmp.eq.s32.totalorder %v11356_v43, %v12164_v55  ;;  %v4532_v63 = vmax.f32 %v11718_v34, %v11736_v41  ;;  %v17689_v55 = vld [vmem:[#allocation148_spill] sm:$0xff]  ;;  %v17810_v13 = vld [vmem:[#allocation70_spill] sm:$0xff] }
 0x3d1   : > { %4328 = vst [vmem:[%s10038_s20 + $0x320] sm:$0xff] %v8420_v46  ;;  %17643 = vst [vmem:[#allocation198_spill] sm:$0xff] %v12313_v58  ;;  %v12330_v46 = vadd.f32 %v2854_v49, %v11145_v54  ;;  %v12345_v2 = vadd.f32 %v2856_v15, %v11141_v9  ;;  %v2858_v49 = vpop.f32.mrb[55].mxu0  ;;  %vm6475_vm14 = vcmp.eq.s32.totalorder %v11356_v43, %v12181_v57  ;;  %v17650_v15 = vld [vmem:[#allocation92_spill] sm:$0xff] }
 0x3d2   : > { %17645 = vst [vmem:[#allocation200_spill] sm:$0xff] %v12332_v42  ;;  %17646 = vst [vmem:[#allocation201_spill] sm:$0xff] %v12340_v52  ;;  %v12355_v50 = vadd.f32 %v3045_v48, %v11148_v19  ;;  %v3051_v52 = vpop.f32.mrb[55].mxu1  ;;  %v12359_v42 = vadd.f32 %v17650_v15, %v17649_v22  ;;  %v12361_v7 = vadd.f32 %v7007_v8, %v6738_v11  ;;  %v6746_v48 = vsel %vm6458_vm3, %v11739_v60, 0.0  ;;  %v2862_v15 = vpop.f32.mrb[56].mxu0 }
 0x3d3   : > { %17644 = vst [vmem:[#allocation199_spill] sm:$0xff] %v12330_v46  ;;  %17647 = vst [vmem:[#allocation202_spill] sm:$0xff] %v12345_v2  ;;  %v8424_v40 = vpack.c.bf16 %v12330_v46, %v12313_v58  ;;  %v7016_v34 = vadd.f32 %v6745_v25, %v6744_v39  ;;  %vm6488_vm15 = vcmp.eq.s32.totalorder %v11343_v61, %v12296_v62  ;;  %v6752_v25 = vsel %vm6464_vm4, %v11746_v28, 0.0  ;;  %v17671_v58 = vld [vmem:[#allocation133_spill] sm:$0xff] }
 0x3d4   : > { %4329 = vst [vmem:[%s10038_s20 + $0x328] sm:$0xff] %v8421_v10  ;;  %17648 = vst [vmem:[#allocation203_spill] sm:$0xff] %v12355_v50  ;;  %v12368_v10 = vadd.f32 %v2858_v49, %v11145_v54  ;;  %v12378_v11 = vadd.f32 %v3047_v4, %v11152_v56  ;;  %v12381_v22 = vadd.f32 %v3049_v26, %v11148_v19  ;;  %v6753_v4 = vsel %vm6465_vm5, %v11777_v33, 0.0 }
 0x3d5   : > { %17651 = vst [vmem:[#allocation89_spill] sm:$0xff] %v12361_v7  ;;  %17652 = vst [vmem:[#allocation92_spill] sm:$0xff] %v12365_v51  ;;  %v12384_v8 = vadd.f32 %v3051_v52, %v11152_v56  ;;  %v4541_v39 = vmax.f32 %v11746_v28, %v11777_v33  ;;  %vm6489_vm0 = vcmp.eq.s32.totalorder %v11346_v47, %v12296_v62  ;;  %v12407_v49 = vsel %vm6459_vm6, %v11749_v17, 0.0 }
 0x3d6   : > { %17653 = vst [vmem:[#allocation204_spill] sm:$0xff] %v12368_v10  ;;  %4332 = vst [vmem:[%s10038_s20 + $0x340] sm:$0xff] %v8424_v40  ;;  %v8428_v26 = vpack.c.bf16 %v12368_v10, %v12345_v2  ;;  %v12401_v52 = vmax.f32 %v4532_v63, %v11739_v60  ;;  %v4550_v40 = vmax.f32 %v11833_v36, %v11852_v1  ;;  %v6760_v33 = vsel %vm6472_vm7, %v11833_v36, 0.0  ;;  %v3055_v60 = vpop.f32.mrb[56].mxu1 }
 0x3d7   : > { %17654 = vst [vmem:[#allocation205_spill] sm:$0xff] %v12378_v11  ;;  %17655 = vst [vmem:[#allocation206_spill] sm:$0xff] %v12381_v22  ;;  %vm6496_vm1 = vcmp.eq.s32.totalorder %v11343_v61, %v12365_v51  ;;  %vm6497_vm2 = vcmp.eq.s32.totalorder %v11346_v47, %v12365_v51  ;;  %v8425_v63 = vpack.c.bf16 %v12378_v11, %v12355_v50  ;;  %v6761_v28 = vsel %vm6473_vm8, %v11852_v1, 0.0 }
 0x3d8   : > { %17656 = vst [vmem:[#allocation207_spill] sm:$0xff] %v12384_v8  ;;  %17657 = vst [vmem:[#allocation208_spill] sm:$0xff] %v12401_v52  ;;  %v12417_v41 = vadd.f32 %v7016_v34, %v6746_v48  ;;  %vm6482_vm3 = vcmp.eq.s32.totalorder %v11353_v27, %v12280_v31  ;;  %vm6490_vm4 = vcmp.eq.s32.totalorder %v11353_v27, %v12296_v62  ;;  %v2864_v48 = vpop.f32.mrb[57].mxu0  ;;  %v6754_v36 = vsel %vm6466_vm9, %v11791_v37, 0.0  ;;  %v17807_v52 = vld [vmem:[#allocation62_spill] sm:$0xff] }
 0x3d9   : > { %17658 = vst [vmem:[#allocation209_spill] sm:$0xff] %v12407_v49  ;;  %4336 = vst [vmem:[%s10038_s20 + $0x360] sm:$0xff] %v8428_v26  ;;  %v8429_v34 = vpack.c.bf16 %v12384_v8, %v12381_v22  ;;  %v7025_v11 = vadd.f32 %v6753_v4, %v6752_v25  ;;  %v12440_v1 = vadd.f32 %v2862_v15, %v11141_v9  ;;  %v2866_v10 = vpop.f32.mrb[58].mxu0  ;;  %v3057_v26 = vpop.f32.mrb[57].mxu1  ;;  %v12496_v46 = vsel %vm6467_vm13, %v17671_v58, 0.0  ;;  %v17695_v58 = vld [vmem:[#allocation167_spill] sm:$0xff] }
 0x3da   : > { %17659 = vst [vmem:[#allocation210_spill] sm:$0xff] %v12417_v41  ;;  %4333 = vst [vmem:[%s10038_s20 + $0x348] sm:$0xff] %v8425_v63  ;;  %v12443_v2 = vadd.f32 %v2864_v48, %v11145_v54  ;;  %v12446_v50 = vmax.f32 %v4541_v39, %v11791_v37  ;;  %v12450_v25 = vadd.f32 %v2866_v10, %v11141_v9  ;;  %v2868_v8 = vpop.f32.mrb[59].mxu0  ;;  %v3059_v15 = vpop.f32.mrb[58].mxu1  ;;  %v6762_v39 = vsel %vm6474_vm10, %v11855_v29, 0.0  ;;  %v17668_v37 = vld [vmem:[#allocation145_spill] sm:$0xff] }
 0x3db   : > { %17660 = vst [vmem:[#allocation211_spill] sm:$0xff] %v12440_v1  ;;  %4337 = vst [vmem:[%s10038_s20 + $0x368] sm:$0xff] %v8429_v34  ;;  %v12453_v4 = vadd.f32 %v3055_v60, %v11148_v19  ;;  %v12456_v63 = vadd.f32 %v3057_v26, %v11152_v56  ;;  %v12459_v48 = vmax.f32 %v4550_v40, %v11855_v29  ;;  %v3061_v10 = vpop.f32.mrb[59].mxu1  ;;  %v17667_v26 = vld [vmem:[#allocation142_spill] sm:$0xff]  ;;  %v17692_v41 = vld [vmem:[#allocation65_spill] sm:$0xff] }
 0x3dc   : > { %17661 = vst [vmem:[#allocation212_spill] sm:$0xff] %v12443_v2  ;;  %17662 = vst [vmem:[#allocation213_spill] sm:$0xff] %v12446_v50  ;;  %v7034_v34 = vadd.f32 %v6761_v28, %v6760_v33  ;;  %vm6483_vm5 = vcmp.eq.s32.totalorder %v11356_v43, %v12280_v31  ;;  %vm6498_vm6 = vcmp.eq.s32.totalorder %v11353_v27, %v12365_v51  ;;  %v6768_v40 = vsel %vm6480_vm11, %v17667_v26, 0.0  ;;  %v12481_v33 = vpop.permute.xlu1 %6299 }
 0x3dd   : > { %17663 = vst [vmem:[#allocation214_spill] sm:$0xff] %v12450_v25  ;;  %17664 = vst [vmem:[#allocation215_spill] sm:$0xff] %v12453_v4  ;;  %v8432_v60 = vpack.c.bf16 %v12443_v2, %v12440_v1  ;;  %v6769_v28 = vsel %vm6481_vm12, %v17668_v37, 0.0  ;;  %vm6491_vm7 = vcmp.eq.s32.totalorder %v11356_v43, %v12296_v62  ;;  %v12484_v29 = vadd.f32 %v2868_v8, %v11145_v54  ;;  %v17674_v2 = vld [vmem:[#allocation143_spill] sm:$0xff] }
 0x3de   : > { %17665 = vst [vmem:[#allocation216_spill] sm:$0xff] %v12456_v63  ;;  %17666 = vst [vmem:[#allocation217_spill] sm:$0xff] %v12459_v48  ;;  %v8433_v1 = vpack.c.bf16 %v12456_v63, %v12453_v4  ;;  %v12490_v22 = vadd.f32 %v7025_v11, %v6754_v36  ;;  %vm6499_vm8 = vcmp.eq.s32.totalorder %v11356_v43, %v12365_v51  ;;  %v12510_v36 = vsel %vm6475_vm14, %v17674_v2, 0.0  ;;  %v17680_v63 = vld [vmem:[#allocation83_spill] sm:$0xff]  ;;  %v17724_v51 = vld [vmem:[#allocation72_spill] sm:$0xff] }
 0x3df   : > { %17669 = vst [vmem:[#allocation218_spill] sm:$0xff] %v12484_v29  ;;  %17672 = vst [vmem:[#allocation220_spill] sm:$0xff] %v12496_v46  ;;  %v12502_v8 = vadd.f32 %v3059_v15, %v11148_v19  ;;  %v8436_v11 = vpack.c.bf16 %v12484_v29, %v12450_v25  ;;  %v12516_v4 = vadd.f32 %v3061_v10, %v11152_v56  ;;  %v17688_v46 = vld [vmem:[#allocation166_spill] sm:$0xff]  ;;  %v17748_v43 = vld [vmem:[#allocation79_spill] sm:$0xff] }
 0x3e0   : > { %17670 = vst [vmem:[#allocation219_spill] sm:$0xff] %v12490_v22  ;;  %4340 = vst [vmem:[%s10038_s20 + $0x380] sm:$0xff] %v8432_v60  ;;  %v12518_v60 = vadd.f32 %v7034_v34, %v6762_v39  ;;  %v4559_v15 = vmax.f32 %v17667_v26, %v17668_v37  ;;  %v7043_v22 = vadd.f32 %v6769_v28, %v6768_v40  ;;  %v3065_v40 = vpop.f32.mrb[60].mxu1  ;;  %v17679_v28 = vld [vmem:[#allocation56_spill] sm:$0xff]  ;;  %v6777_v37 = vsel %vm6489_vm0, %v11970_v32, 0.0 }
 0x3e1   : > { %17673 = vst [vmem:[#allocation221_spill] sm:$0xff] %v12502_v8  ;;  %17675 = vst [vmem:[#allocation222_spill] sm:$0xff] %v12510_v36  ;;  %vm6504_vm9 = vcmp.eq.s32.totalorder %v11343_v61, %v12481_v33  ;;  %v2872_v36 = vpop.f32.mrb[60].mxu0  ;;  %v4568_v25 = vmax.f32 %v11950_v24, %v11970_v32  ;;  %v8437_v39 = vpack.c.bf16 %v12516_v4, %v12502_v8  ;;  %v17681_v26 = vld [vmem:[#allocation160_spill] sm:$0xff]  ;;  %v3067_v8 = vpop.f32.mrb[61].mxu1 }
 0x3e2   : > { %4341 = vst [vmem:[%s10038_s20 + $0x388] sm:$0xff] %v8433_v1  ;;  %17676 = vst [vmem:[#allocation223_spill] sm:$0xff] %v12516_v4  ;;  %v6776_v1 = vsel %vm6488_vm15, %v11950_v24, 0.0  ;;  %v12536_v34 = vadd.f32 %v2872_v36, %v11141_v9  ;;  %v2874_v10 = vpop.f32.mrb[61].mxu0  ;;  %vm6332_vm10 = vcmp.eq.s32.totalorder %v17680_v63, %v17679_v28  ;;  %v17682_v24 = vld [vmem:[#allocation157_spill] sm:$0xff]  ;;  %v12550_v36 = vadd.f32 %v3065_v40, %v11148_v19  ;;  %v3069_v48 = vpop.f32.mrb[62].mxu1 }
 0x3e3   : > { %17677 = vst [vmem:[#allocation224_spill] sm:$0xff] %v12518_v60  ;;  %4344 = vst [vmem:[%s10038_s20 + $0x3a0] sm:$0xff] %v8436_v11  ;;  %v4577_v29 = vmax.f32 %v17682_v24, %v17681_v26  ;;  %v12547_v11 = vadd.f32 %v2874_v10, %v11145_v54  ;;  %v2876_v4 = vpop.f32.mrb[62].mxu0  ;;  %v17685_v60 = vld [vmem:[#allocation57_spill] sm:$0xff]  ;;  %v6784_v57 = vsel %vm6496_vm1, %v17682_v24, 0.0  ;;  %v6785_v32 = vsel %vm6497_vm2, %v17681_v26, 0.0 }
 0x3e4   : > { %17678 = vst [vmem:[#allocation225_spill] sm:$0xff] %v12536_v34  ;;  %17684 = vst [vmem:[#allocation226_spill] sm:$0xff] %v12550_v36  ;;  %vm6333_vm11 = vcmp.eq.s32.totalorder %v17685_v60, %v17679_v28  ;;  %v12564_v10 = vadd.f32 %v2876_v4, %v11141_v9  ;;  %v2878_v40 = vpop.f32.mrb[63].mxu0  ;;  %v12567_v2 = vadd.f32 %v3067_v8, %v11152_v56  ;;  %v17691_v26 = vld [vmem:[#allocation155_spill] sm:$0xff]  ;;  %v3071_v8 = vpop.f32.mrb[63].mxu1 }
 0x3e5   : > { %17683 = vst [vmem:[#allocation56_spill] sm:$0xff] %v12547_v11  ;;  %4345 = vst [vmem:[%s10038_s20 + $0x3a8] sm:$0xff] %v8437_v39  ;;  %vm6334_vm12 = vcmp.eq.s32.totalorder %v17688_v46, %v17679_v28  ;;  %v12572_v24 = vmax.f32 %v4559_v15, %v17689_v55  ;;  %v6770_v39 = vsel %vm6482_vm3, %v17689_v55, 0.0  ;;  %v6778_v9 = vsel %vm6490_vm4, %v17691_v26, 0.0 }
 0x3e6   : > { %17686 = vst [vmem:[#allocation227_spill] sm:$0xff] %v12564_v10  ;;  %17687 = vst [vmem:[#allocation228_spill] sm:$0xff] %v12567_v2  ;;  %v8440_v4 = vpack.c.bf16 %v12547_v11, %v12536_v34  ;;  %vm6340_vm13 = vcmp.eq.s32.totalorder %v17680_v63, %v17692_v41  ;;  %v12587_v15 = vmax.f32 %v4568_v25, %v17691_v26  ;;  %v17696_v34 = vld [vmem:[#allocation163_spill] sm:$0xff]  ;;  %v17701_v25 = vld [vmem:[#allocation149_spill] sm:$0xff] }
 0x3e7   : > { %17690 = vst [vmem:[#allocation229_spill] sm:$0xff] %v12572_v24  ;;  %v7052_v49 = vadd.f32 %v6777_v37, %v6776_v1  ;;  %v12590_v14 = vadd.f32 %v2878_v40, %v11145_v54  ;;  %v8441_v55 = vpack.c.bf16 %v12567_v2, %v12550_v36  ;;  %vm6335_vm14 = vcmp.eq.s32.totalorder %v17695_v58, %v17679_v28  ;;  %v3108_v1 = vpop.f32.mrb[64].mxu0  ;;  %v17705_v40 = vld [vmem:[#allocation97_spill] sm:$0xff]  ;;  %v17710_v26 = vld [vmem:[#allocation82_spill] sm:$0xff] }
 0x3e8   : > { %17693 = vst [vmem:[#allocation65_spill] sm:$0xff] %v12587_v15  ;;  %v7061_v50 = vadd.f32 %v6785_v32, %v6784_v57  ;;  %v12597_v11 = vmax.f32 %v4577_v29, %v17696_v34  ;;  %4348 = vst [vmem:[%s10038_s20 + $0x3c0] sm:$0xff] %v8440_v4  ;;  %v12601_v17 = vadd.f32 %v3069_v48, %v11148_v19  ;;  %v12614_v32 = vsel %vm6483_vm5, %v17701_v25, 0.0  ;;  %v17703_v57 = vld [vmem:[#allocation158_spill] sm:$0xff]  ;;  %v17708_v29 = vld [vmem:[#allocation164_spill] sm:$0xff] }
 0x3e9   : > { %17694 = vst [vmem:[#allocation230_spill] sm:$0xff] %v12590_v14  ;;  %v12604_v37 = vadd.f32 %v3071_v8, %v11152_v56  ;;  %vm6341_vm15 = vcmp.eq.s32.totalorder %v17685_v60, %v17692_v41  ;;  %v12608_v54 = vadd.f32 %v7043_v22, %v6770_v39  ;;  %17702 = vst [vmem:[#allocation235_spill] sm:$0xff] %v12614_v32  ;;  %v6786_v19 = vsel %vm6498_vm6, %v17696_v34, 0.0  ;;  %v17706_v39 = vld [vmem:[#allocation101_spill] sm:$0xff]  ;;  %v17735_v32 = vld [vmem:[#allocation123_spill] sm:$0xff] }
 0x3ea   : > { %17697 = vst [vmem:[#allocation231_spill] sm:$0xff] %v12597_v11  ;;  %17698 = vst [vmem:[#allocation232_spill] sm:$0xff] %v12601_v17  ;;  %v8444_v56 = vpack.c.bf16 %v12590_v14, %v12564_v10  ;;  %v12629_v22 = vsel %vm6491_vm7, %v17703_v57, 0.0  ;;  %v12635_v4 = vadd.f32 %v17706_v39, %v17705_v40  ;;  %v12637_v8 = vadd.f32 %v7052_v49, %v6778_v9  ;;  %v17713_v9 = vld [vmem:[#allocation87_spill] sm:$0xff]  ;;  %v17721_v49 = vld [vmem:[#allocation85_spill] sm:$0xff] }
 0x3eb   : > { %17699 = vst [vmem:[#allocation233_spill] sm:$0xff] %v12604_v37  ;;  %17700 = vst [vmem:[#allocation234_spill] sm:$0xff] %v12608_v54  ;;  %v8445_v48 = vpack.c.bf16 %v12604_v37, %v12601_v17  ;;  %v12645_v34 = vsel %vm6499_vm8, %v17708_v29, 0.0  ;;  %v12649_v2 = vadd.f32 %v3108_v1, %v17710_v26  ;;  %v3110_v37 = vpop.f32.mrb[65].mxu0  ;;  %v3301_v17 = vpop.f32.mrb[64].mxu1  ;;  %v12651_v36 = vadd.f32 %v7061_v50, %v6786_v19  ;;  %v17719_v1 = vld [vmem:[#allocation121_spill] sm:$0xff] }
 0x3ec   : > { %4349 = vst [vmem:[%s10038_s20 + $0x3c8] sm:$0xff] %v8441_v55  ;;  %17704 = vst [vmem:[#allocation236_spill] sm:$0xff] %v12629_v22  ;;  %v12657_v40 = vadd.f32 %v3110_v37, %v17713_v9  ;;  %v3112_v39 = vpop.f32.mrb[66].mxu0  ;;  %v17715_v55 = vld [vmem:[#allocation118_spill] sm:$0xff]  ;;  %v3303_v14 = vpop.f32.mrb[65].mxu1  ;;  %vm6348_vm0 = vcmp.eq.s32.totalorder %v17680_v63, %v17724_v51  ;;  %vm6342_vm1 = vcmp.eq.s32.totalorder %v17688_v46, %v17692_v41  ;;  %v17729_v22 = vld [vmem:[#allocation108_spill] sm:$0xff] }
 0x3ed   : > { %17707 = vst [vmem:[#allocation97_spill] sm:$0xff] %v12637_v8  ;;  %17709 = vst [vmem:[#allocation101_spill] sm:$0xff] %v12645_v34  ;;  %v12660_v10 = vadd.f32 %v3301_v17, %v17715_v55  ;;  %v12669_v50 = vadd.f32 %v3112_v39, %v17710_v26  ;;  %v3114_v19 = vpop.f32.mrb[67].mxu0  ;;  %v3305_v37 = vpop.f32.mrb[66].mxu1  ;;  %v17722_v17 = vld [vmem:[#allocation28_spill] sm:$0xff]  ;;  %vm6343_vm2 = vcmp.eq.s32.totalorder %v17695_v58, %v17692_v41  ;;  %v17731_v57 = vld [vmem:[#allocation31_spill] sm:$0xff] }
 0x3ee   : > { %4352 = vst [vmem:[%s10038_s20 + $0x3e0] sm:$0xff] %v8444_v56  ;;  %17711 = vst [vmem:[#allocation82_spill] sm:$0xff] %v12649_v2  ;;  %v12666_v56 = vsel %vm6504_vm9, %v12075_v0, 0.0  ;;  %v8322_v61 = vpack.c.bf16 %v12657_v40, %v12649_v2  ;;  %v12683_v39 = vadd.f32 %v3114_v19, %v17713_v9  ;;  %v12686_v8 = vadd.f32 %v3305_v37, %v17715_v55  ;;  %v17730_v11 = vld [vmem:[#allocation96_spill] sm:$0xff]  ;;  %v3118_v54 = vpop.f32.mrb[68].mxu0  ;;  %v17751_v25 = vld [vmem:[#allocation39_spill] sm:$0xff] }
 0x3ef   : > { %17712 = vst [vmem:[#allocation237_spill] sm:$0xff] %v12651_v36  ;;  %4353 = vst [vmem:[%s10038_s20 + $0x3e8] sm:$0xff] %v8445_v48  ;;  %v12672_v48 = vadd.f32 %v3303_v14, %v17719_v1  ;;  %v17723_v36 = vmax.f32 %v17721_v49, %v17722_v17  ;;  %v3307_v14 = vpop.f32.mrb[67].mxu1  ;;  %v6620_v49 = vsel %vm6332_vm10, %v12649_v2, 0.0  ;;  %vm6349_vm3 = vcmp.eq.s32.totalorder %v17685_v60, %v17724_v51  ;;  %v17806_v0 = vld [vmem:[#allocation150_spill] sm:$0xff] }
 0x3f0   : > { %17714 = vst [vmem:[#allocation87_spill] sm:$0xff] %v12657_v40  ;;  %17716 = vst [vmem:[#allocation118_spill] sm:$0xff] %v12660_v10  ;;  %v12699_v19 = vadd.f32 %v3307_v14, %v17719_v1  ;;  %v8326_v17 = vpack.c.bf16 %v12683_v39, %v12669_v50  ;;  %v6622_v14 = vsel %vm6334_vm12, %v12660_v10, 0.0  ;;  %vm6350_vm4 = vcmp.eq.s32.totalorder %v17688_v46, %v17724_v51 }
 0x3f1   : > { %17717 = vst [vmem:[#allocation238_spill] sm:$0xff] %v12666_v56  ;;  %17718 = vst [vmem:[#allocation239_spill] sm:$0xff] %v12669_v50  ;;  %v4391_v34 = vmax.f32 %v17723_v36, %v12649_v2  ;;  %v8323_v36 = vpack.c.bf16 %v12672_v48, %v12660_v10  ;;  %v6621_v2 = vsel %vm6333_vm11, %v12657_v40, 0.0  ;;  %vm6351_vm5 = vcmp.eq.s32.totalorder %v17695_v58, %v17724_v51  ;;  %v17766_v56 = vld [vmem:[#allocation47_spill] sm:$0xff] }
 0x3f2   : > { %17720 = vst [vmem:[#allocation121_spill] sm:$0xff] %v12672_v48  ;;  %17725 = vst [vmem:[#allocation85_spill] sm:$0xff] %v12683_v39  ;;  %v8327_v62 = vpack.c.bf16 %v12699_v19, %v12686_v8  ;;  %v6628_v15 = vsel %vm6340_vm13, %v12669_v50, 0.0  ;;  %vm6364_vm8 = vcmp.eq.s32.totalorder %v17680_v63, %v17748_v43  ;;  %vm6365_vm9 = vcmp.eq.s32.totalorder %v17685_v60, %v17748_v43 }
 0x3f3   : > { %17726 = vst [vmem:[#allocation72_spill] sm:$0xff] %v12686_v8  ;;  %17727 = vst [vmem:[#allocation240_spill] sm:$0xff] %v12699_v19  ;;  %v4392_v37 = vmax.f32 %v4391_v34, %v12657_v40  ;;  %v6875_v34 = vadd.f32 %v12359_v42, %v6620_v49  ;;  %v17728_v40 = vld [vmem:[#allocation105_spill] sm:$0xff]  ;;  %v17732_v42 = vmax.f32 %v17730_v11, %v17731_v57  ;;  %v17736_v11 = vld [vmem:[#allocation126_spill] sm:$0xff] }
 0x3f4   : > { %4230 = vst [vmem:[%s10038_s20 + $0x10] sm:$0xff] %v8322_v61  ;;  %v12722_v61 = vadd.f32 %v17729_v22, %v17728_v40  ;;  %4231 = vst [vmem:[%s10038_s20 + $0x18] sm:$0xff] %v8323_v36  ;;  %v6623_v22 = vsel %vm6335_vm14, %v12672_v48, 0.0  ;;  %v17733_v36 = vld [vmem:[#allocation113_spill] sm:$0xff]  ;;  %v12751_v57 = vadd.f32 %v3118_v54, %v17710_v26  ;;  %vm6366_vm11 = vcmp.eq.s32.totalorder %v17688_v46, %v17748_v43 }
 0x3f5   : > { %v4393_v29 = vmax.f32 %v4392_v37, %v12660_v10  ;;  %v4400_v49 = vmax.f32 %v17732_v42, %v12669_v50  ;;  %4234 = vst [vmem:[%s10038_s20 + $0x30] sm:$0xff] %v8326_v17  ;;  %v6876_v40 = vadd.f32 %v6875_v34, %v6621_v2  ;;  %v17734_v37 = vld [vmem:[#allocation117_spill] sm:$0xff]  ;;  %v12747_v42 = vadd.f32 %v17736_v11, %v17735_v32  ;;  %v3311_v17 = vpop.f32.mrb[68].mxu1  ;;  %v3120_v50 = vpop.f32.mrb[69].mxu0  ;;  %v17740_v11 = vld [vmem:[#allocation71_spill] sm:$0xff] }
 0x3f6   : > { %v12743_v10 = vadd.f32 %v17734_v37, %v17733_v36  ;;  %4235 = vst [vmem:[%s10038_s20 + $0x38] sm:$0xff] %v8327_v62  ;;  %17737 = vst [vmem:[#allocation105_spill] sm:$0xff] %v12751_v57  ;;  %v6629_v2 = vsel %vm6341_vm15, %v12683_v39, 0.0  ;;  %v12760_v34 = vadd.f32 %v3311_v17, %v17715_v55  ;;  %v12763_v32 = vadd.f32 %v3120_v50, %v17713_v9  ;;  %v3313_v62 = vpop.f32.mrb[69].mxu1  ;;  %v3122_v54 = vpop.f32.mrb[70].mxu0 }
 0x3f7   : > { %v4394_v31 = vmax.f32 %v4393_v29, %v12672_v48  ;;  %v4401_v28 = vmax.f32 %v4400_v49, %v12683_v39  ;;  %v6877_v36 = vadd.f32 %v6876_v40, %v6622_v14  ;;  %v6884_v37 = vadd.f32 %v12635_v4, %v6628_v15  ;;  %v3315_v48 = vpop.f32.mrb[70].mxu1  ;;  %v3124_v17 = vpop.f32.mrb[71].mxu0  ;;  %v17743_v39 = vld [vmem:[#allocation103_spill] sm:$0xff]  ;;  %v17744_v14 = vld [vmem:[#allocation36_spill] sm:$0xff] }
 0x3f8   : > { %17738 = vst [vmem:[#allocation108_spill] sm:$0xff] %v12760_v34  ;;  %17739 = vst [vmem:[#allocation96_spill] sm:$0xff] %v12763_v32  ;;  %vm6356_vm6 = vcmp.eq.s32.totalorder %v17680_v63, %v17740_v11  ;;  %v12769_v29 = vadd.f32 %v3313_v62, %v17719_v1  ;;  %v12772_v49 = vadd.f32 %v3122_v54, %v17710_v26 }
 0x3f9   : > { %4395 = vmax.xlane.f32.xlu0 %v4394_v31  ;;  %v4402_v50 = vmax.f32 %v4401_v28, %v12686_v8  ;;  %v17745_v40 = vmax.f32 %v17743_v39, %v17744_v14  ;;  %vm6357_vm7 = vcmp.eq.s32.totalorder %v17685_v60, %v17740_v11  ;;  %v8330_v4 = vpack.c.bf16 %v12763_v32, %v12751_v57  ;;  %v3317_v31 = vpop.f32.mrb[71].mxu1 }
 0x3fa   : > { %17741 = vst [vmem:[#allocation113_spill] sm:$0xff] %v12769_v29  ;;  %17742 = vst [vmem:[#allocation117_spill] sm:$0xff] %v12772_v49  ;;  %v12784_v62 = vadd.f32 %v3315_v48, %v17715_v55  ;;  %v12787_v54 = vadd.f32 %v3124_v17, %v17713_v9  ;;  %v6878_v28 = vadd.f32 %v6877_v36, %v6623_v22  ;;  %v17750_v17 = vld [vmem:[#allocation111_spill] sm:$0xff]  ;;  %v3321_v41 = vpop.f32.mrb[72].mxu1 }
 0x3fb   : > { %v4409_v15 = vmax.f32 %v17745_v40, %v12751_v57  ;;  %v8331_v39 = vpack.c.bf16 %v12769_v29, %v12760_v34  ;;  %v12794_v40 = vadd.f32 %v3317_v31, %v17719_v1  ;;  %v4403_v14 = vmax.f32 %v4402_v50, %v12699_v19  ;;  %4238 = vst [vmem:[%s10038_s20 + $0x50] sm:$0xff] %v8330_v4  ;;  %v3128_v4 = vpop.f32.mrb[72].mxu0 }
 0x3fc   : > { %17746 = vst [vmem:[#allocation123_spill] sm:$0xff] %v12784_v62  ;;  %17747 = vst [vmem:[#allocation126_spill] sm:$0xff] %v12787_v54  ;;  %v8334_v22 = vpack.c.bf16 %v12787_v54, %v12772_v49  ;;  %6879 = vadd.xlane.f32.xlu1 %v6878_v28  ;;  %v6885_v36 = vadd.f32 %v6884_v37, %v6629_v2  ;;  %v17752_v24 = vmax.f32 %v17750_v17, %v17751_v25 }
 0x3fd   : > { %17749 = vst [vmem:[#allocation71_spill] sm:$0xff] %v12794_v40  ;;  %v4410_v48 = vmax.f32 %v4409_v15, %v12763_v32  ;;  %v6636_v50 = vsel %vm6348_vm0, %v12751_v57, 0.0  ;;  %vm6358_vm10 = vcmp.eq.s32.totalorder %v17688_v46, %v17740_v11  ;;  %4239 = vst [vmem:[%s10038_s20 + $0x58] sm:$0xff] %v8331_v39  ;;  %v8335_v2 = vpack.c.bf16 %v12794_v40, %v12784_v62 }
 0x3fe   : > { %v4418_v31 = vmax.f32 %v17752_v24, %v12772_v49  ;;  %4404 = vmax.xlane.f32.xlu0 %v4403_v14  ;;  %v6630_v24 = vsel %vm6342_vm1, %v12686_v8, 0.0  ;;  %v6631_v15 = vsel %vm6343_vm2, %v12699_v19, 0.0  ;;  %4242 = vst [vmem:[%s10038_s20 + $0x70] sm:$0xff] %v8334_v22  ;;  %v6637_v14 = vsel %vm6349_vm3, %v12763_v32, 0.0  ;;  %v3130_v22 = vpop.f32.mrb[73].mxu0 }
 0x3ff   : > { %v4411_v37 = vmax.f32 %v4410_v48, %v12760_v34  ;;  %v6886_v28 = vadd.f32 %v6885_v36, %v6630_v24  ;;  %v6893_v48 = vadd.f32 %v12722_v61, %v6636_v50  ;;  %vm6359_vm12 = vcmp.eq.s32.totalorder %v17695_v58, %v17740_v11  ;;  %4243 = vst [vmem:[%s10038_s20 + $0x78] sm:$0xff] %v8335_v2  ;;  %v3132_v24 = vpop.f32.mrb[74].mxu0 }
 0x400   : > { %v4419_v39 = vmax.f32 %v4418_v31, %v12787_v54  ;;  %v12838_v17 = vadd.f32 %v3128_v4, %v17710_v26  ;;  %v6638_v31 = vsel %vm6350_vm4, %v12760_v34, 0.0  ;;  %v6639_v61 = vsel %vm6351_vm5, %v12769_v29, 0.0  ;;  %v3134_v8 = vpop.f32.mrb[75].mxu0 }
 0x401   : > { %v4412_v36 = vmax.f32 %v4411_v37, %v12769_v29  ;;  %vm6367_vm13 = vcmp.eq.s32.totalorder %v17695_v58, %v17748_v43  ;;  %v12852_v50 = vadd.f32 %v3321_v41, %v17715_v55  ;;  %v12855_v2 = vadd.f32 %v3130_v22, %v17713_v9  ;;  %v3323_v37 = vpop.f32.mrb[73].mxu1 }
 0x402   : > { %17753 = vst [vmem:[#allocation103_spill] sm:$0xff] %v12838_v17  ;;  %v6887_v4 = vadd.f32 %v6886_v28, %v6631_v15  ;;  %v4420_v19 = vmax.f32 %v4419_v39, %v12784_v62  ;;  %v12859_v34 = vadd.f32 %v3323_v37, %v17719_v1  ;;  %v12862_v51 = vadd.f32 %v3132_v24, %v17710_v26  ;;  %v3325_v29 = vpop.f32.mrb[74].mxu1 }
 0x403   : > { %17754 = vst [vmem:[#allocation79_spill] sm:$0xff] %v12852_v50  ;;  %17755 = vst [vmem:[#allocation111_spill] sm:$0xff] %v12855_v2  ;;  %4413 = vmax.xlane.f32.xlu1 %v4412_v36  ;;  %v6894_v41 = vadd.f32 %v6893_v48, %v6637_v14  ;;  %v6644_v22 = vsel %vm6356_vm6, %v12772_v49, 0.0  ;;  %v8338_v15 = vpack.c.bf16 %v12855_v2, %v12838_v17  ;;  %v3327_v37 = vpop.f32.mrb[75].mxu1  ;;  %v6645_v14 = vsel %vm6357_vm7, %v12787_v54, 0.0  ;;  %v17762_v54 = vld [vmem:[#allocation122_spill] sm:$0xff] }
 0x404   : > { %17756 = vst [vmem:[#allocation241_spill] sm:$0xff] %v12859_v34  ;;  %17757 = vst [vmem:[#allocation242_spill] sm:$0xff] %v12862_v51  ;;  %v12871_v28 = vadd.f32 %v3325_v29, %v17715_v55  ;;  %v12874_v39 = vadd.f32 %v3134_v8, %v17713_v9  ;;  %6888 = vadd.xlane.f32.xlu0 %v6887_v4  ;;  %v8339_v48 = vpack.c.bf16 %v12859_v34, %v12852_v50  ;;  %v17761_v8 = vld [vmem:[#allocation84_spill] sm:$0xff] }
 0x405   : > { %v12883_v36 = vadd.f32 %v3327_v37, %v17719_v1  ;;  %v4421_v29 = vmax.f32 %v4420_v19, %v12794_v40  ;;  %v6895_v24 = vadd.f32 %v6894_v41, %v6638_v31  ;;  %vm6372_vm14 = vcmp.eq.s32.totalorder %v17680_v63, %v17761_v8  ;;  %4246 = vst [vmem:[%s10038_s20 + $0x90] sm:$0xff] %v8338_v15  ;;  %v17763_v49 = vld [vmem:[#allocation44_spill] sm:$0xff]  ;;  %v17765_v37 = vld [vmem:[#allocation129_spill] sm:$0xff] }
 0x406   : > { %17758 = vst [vmem:[#allocation243_spill] sm:$0xff] %v12871_v28  ;;  %17759 = vst [vmem:[#allocation244_spill] sm:$0xff] %v12874_v39  ;;  %v8342_v4 = vpack.c.bf16 %v12874_v39, %v12862_v51  ;;  %v6902_v32 = vadd.f32 %v12743_v10, %v6644_v22  ;;  %v17764_v25 = vmax.f32 %v17762_v54, %v17763_v49  ;;  %v6652_v54 = vsel %vm6364_vm8, %v12838_v17, 0.0  ;;  %v3138_v22 = vpop.f32.mrb[76].mxu0  ;;  %v17784_v49 = vld [vmem:[#allocation98_spill] sm:$0xff] }
 0x407   : > { %17760 = vst [vmem:[#allocation245_spill] sm:$0xff] %v12883_v36  ;;  %v17767_v19 = vmax.f32 %v17765_v37, %v17766_v56  ;;  %vm6373_vm15 = vcmp.eq.s32.totalorder %v17685_v60, %v17761_v8  ;;  %vm6374_vm0 = vcmp.eq.s32.totalorder %v17688_v46, %v17761_v8  ;;  %4247 = vst [vmem:[%s10038_s20 + $0x98] sm:$0xff] %v8339_v48  ;;  %4422 = vmax.xlane.f32.xlu1 %v4421_v29  ;;  %v17782_v56 = vld [vmem:[#allocation55_spill] sm:$0xff] }
 0x408   : > { %v4427_v57 = vmax.f32 %v17764_v25, %v12838_v17  ;;  %v8343_v10 = vpack.c.bf16 %v12883_v36, %v12871_v28  ;;  %v6896_v41 = vadd.f32 %v6895_v24, %v6639_v61  ;;  %v6646_v25 = vsel %vm6358_vm10, %v12784_v62, 0.0  ;;  %4250 = vst [vmem:[%s10038_s20 + $0xb0] sm:$0xff] %v8342_v4  ;;  %v3331_v24 = vpop.f32.mrb[76].mxu1 }
 0x409   : > { %v4436_v31 = vmax.f32 %v17767_v19, %v12862_v51  ;;  %v6903_v15 = vadd.f32 %v6902_v32, %v6645_v14  ;;  %v6653_v61 = vsel %vm6365_vm9, %v12855_v2, 0.0  ;;  %v12924_v29 = vadd.f32 %v3138_v22, %v17710_v26  ;;  %v3140_v19 = vpop.f32.mrb[77].mxu0 }
 0x40a   : > { %v4428_v48 = vmax.f32 %v4427_v57, %v12855_v2  ;;  %4251 = vst [vmem:[%s10038_s20 + $0xb8] sm:$0xff] %v8343_v10  ;;  %6897 = vadd.xlane.f32.xlu0 %v6896_v41  ;;  %v6647_v32 = vsel %vm6359_vm12, %v12794_v40, 0.0  ;;  %v6654_v57 = vsel %vm6366_vm11, %v12852_v50, 0.0  ;;  %v6911_v14 = vadd.f32 %v12747_v42, %v6652_v54  ;;  %v3333_v10 = vpop.f32.mrb[77].mxu1  ;;  %v3142_v41 = vpop.f32.mrb[78].mxu0 }
 0x40b   : > { %v4437_v37 = vmax.f32 %v4436_v31, %v12874_v39  ;;  %17768 = vst [vmem:[#allocation84_spill] sm:$0xff] %v12924_v29  ;;  %v12936_v4 = vadd.f32 %v3331_v24, %v17715_v55  ;;  %v12939_v31 = vadd.f32 %v3140_v19, %v17713_v9  ;;  %v6904_v22 = vadd.f32 %v6903_v15, %v6646_v25  ;;  %v3335_v2 = vpop.f32.mrb[78].mxu1  ;;  %v3144_v42 = vpop.f32.mrb[79].mxu0 }
 0x40c   : > { %v4429_v62 = vmax.f32 %v4428_v48, %v12852_v50  ;;  %v12943_v11 = vadd.f32 %v3333_v10, %v17719_v1  ;;  %v12946_v40 = vadd.f32 %v3142_v41, %v17710_v26  ;;  %v6912_v24 = vadd.f32 %v6911_v14, %v6653_v61  ;;  %v3337_v15 = vpop.f32.mrb[79].mxu1 }
 0x40d   : > { %17769 = vst [vmem:[#allocation122_spill] sm:$0xff] %v12936_v4  ;;  %17770 = vst [vmem:[#allocation129_spill] sm:$0xff] %v12939_v31  ;;  %v4438_v54 = vmax.f32 %v4437_v37, %v12871_v28  ;;  %v8346_v19 = vpack.c.bf16 %v12939_v31, %v12924_v29  ;;  %v12952_v25 = vadd.f32 %v3144_v42, %v17713_v9  ;;  %v6655_v10 = vsel %vm6367_vm13, %v12859_v34, 0.0 }
 0x40e   : > { %17771 = vst [vmem:[#allocation246_spill] sm:$0xff] %v12943_v11  ;;  %17772 = vst [vmem:[#allocation247_spill] sm:$0xff] %v12946_v40  ;;  %v6905_v48 = vadd.f32 %v6904_v22, %v6647_v32  ;;  %v8347_v41 = vpack.c.bf16 %v12943_v11, %v12936_v4  ;;  %v12961_v37 = vadd.f32 %v3335_v2, %v17715_v55  ;;  %v6660_v2 = vsel %vm6372_vm14, %v12862_v51, 0.0  ;;  %v17781_v51 = vld [vmem:[#allocation146_spill] sm:$0xff] }
 0x40f   : > { %17773 = vst [vmem:[#allocation248_spill] sm:$0xff] %v12952_v25  ;;  %v12964_v61 = vadd.f32 %v3337_v15, %v17719_v1  ;;  %v4430_v14 = vmax.f32 %v4429_v62, %v12859_v34  ;;  %vm6375_vm1 = vcmp.eq.s32.totalorder %v17695_v58, %v17761_v8  ;;  %4254 = vst [vmem:[%s10038_s20 + $0xd0] sm:$0xff] %v8346_v19  ;;  %v6661_v42 = vsel %vm6373_vm15, %v12874_v39, 0.0  ;;  %v17779_v34 = vld [vmem:[#allocation52_spill] sm:$0xff] }
 0x410   : > { %17774 = vst [vmem:[#allocation249_spill] sm:$0xff] %v12961_v37  ;;  %v8350_v43 = vpack.c.bf16 %v12952_v25, %v12946_v40  ;;  %6906 = vadd.xlane.f32.xlu1 %v6905_v48  ;;  %v4439_v32 = vmax.f32 %v4438_v54, %v12883_v36  ;;  %v6913_v22 = vadd.f32 %v6912_v24, %v6654_v57  ;;  %4255 = vst [vmem:[%s10038_s20 + $0xd8] sm:$0xff] %v8347_v41  ;;  %v17776_v54 = vld [vmem:[#allocation131_spill] sm:$0xff]  ;;  %v17777_v24 = vld [vmem:[#allocation134_spill] sm:$0xff]  ;;  %v3148_v48 = vpop.f32.mrb[80].mxu0 }
 0x411   : > { %17775 = vst [vmem:[#allocation250_spill] sm:$0xff] %v12964_v61  ;;  %v8351_v62 = vpack.c.bf16 %v12964_v61, %v12961_v37  ;;  %4431 = vmax.xlane.f32.xlu0 %v4430_v14  ;;  %v6662_v57 = vsel %vm6374_vm0, %v12871_v28, 0.0  ;;  %v6919_v19 = vadd.f32 %v17777_v24, %v17776_v54  ;;  %v17778_v41 = vld [vmem:[#allocation136_spill] sm:$0xff]  ;;  %v17783_v39 = vmax.f32 %v17781_v51, %v17782_v56 }
 0x412   : > { %4258 = vst [vmem:[%s10038_s20 + $0xf0] sm:$0xff] %v8350_v43  ;;  %v6914_v15 = vadd.f32 %v6913_v22, %v6655_v10  ;;  %v17780_v14 = vmax.f32 %v17778_v41, %v17779_v34  ;;  %vm6380_vm2 = vcmp.eq.s32.totalorder %v17680_v63, %v17784_v49  ;;  %v13003_v28 = vadd.f32 %v3148_v48, %v17710_v26  ;;  %v3341_v43 = vpop.f32.mrb[80].mxu1  ;;  %v3150_v10 = vpop.f32.mrb[81].mxu0 }
 0x413   : > { %v4454_v17 = vmax.f32 %v17783_v39, %v12946_v40  ;;  %4259 = vst [vmem:[%s10038_s20 + $0xf8] sm:$0xff] %v8351_v62  ;;  %v6920_v22 = vadd.f32 %v6919_v19, %v6660_v2  ;;  %vm6381_vm3 = vcmp.eq.s32.totalorder %v17685_v60, %v17784_v49  ;;  %vm6382_vm4 = vcmp.eq.s32.totalorder %v17688_v46, %v17784_v49  ;;  %v3343_v62 = vpop.f32.mrb[81].mxu1  ;;  %v3152_v54 = vpop.f32.mrb[82].mxu0 }
 0x414   : > { %v4445_v50 = vmax.f32 %v17780_v14, %v12924_v29  ;;  %17785 = vst [vmem:[#allocation131_spill] sm:$0xff] %v13003_v28  ;;  %4440 = vmax.xlane.f32.xlu1 %v4439_v32  ;;  %v13010_v51 = vadd.f32 %v3341_v43, %v17715_v55  ;;  %v13013_v39 = vadd.f32 %v3150_v10, %v17713_v9  ;;  %v3345_v32 = vpop.f32.mrb[82].mxu1  ;;  %v3154_v41 = vpop.f32.mrb[83].mxu0 }
 0x415   : > { %v4455_v48 = vmax.f32 %v4454_v17, %v12952_v25  ;;  %6915 = vadd.xlane.f32.xlu0 %v6914_v15  ;;  %v13018_v2 = vadd.f32 %v3343_v62, %v17719_v1  ;;  %v13021_v19 = vadd.f32 %v3152_v54, %v17710_v26  ;;  %v6921_v14 = vadd.f32 %v6920_v22, %v6661_v42  ;;  %v3347_v43 = vpop.f32.mrb[83].mxu1 }
 0x416   : > { %17786 = vst [vmem:[#allocation134_spill] sm:$0xff] %v13010_v51  ;;  %17787 = vst [vmem:[#allocation136_spill] sm:$0xff] %v13013_v39  ;;  %v4446_v24 = vmax.f32 %v4445_v50, %v12939_v31  ;;  %vm6383_vm5 = vcmp.eq.s32.totalorder %v17695_v58, %v17784_v49  ;;  %v8354_v50 = vpack.c.bf16 %v13013_v39, %v13003_v28 }
 0x417   : > { %17788 = vst [vmem:[#allocation146_spill] sm:$0xff] %v13018_v2  ;;  %17789 = vst [vmem:[#allocation98_spill] sm:$0xff] %v13021_v19  ;;  %v13028_v17 = vadd.f32 %v3345_v32, %v17715_v55  ;;  %v13031_v15 = vadd.f32 %v3154_v41, %v17713_v9  ;;  %v8355_v42 = vpack.c.bf16 %v13018_v2, %v13010_v51  ;;  %v3158_v32 = vpop.f32.mrb[84].mxu0 }
 0x418   : > { %v4447_v10 = vmax.f32 %v4446_v24, %v12936_v4  ;;  %v13037_v22 = vadd.f32 %v3347_v43, %v17719_v1  ;;  %v6922_v62 = vadd.f32 %v6921_v14, %v6662_v57  ;;  %v4456_v54 = vmax.f32 %v4455_v48, %v12961_v37  ;;  %4262 = vst [vmem:[%s10038_s20 + $0x110] sm:$0xff] %v8354_v50 }
 0x419   : > { %17790 = vst [vmem:[#allocation251_spill] sm:$0xff] %v13028_v17  ;;  %17791 = vst [vmem:[#allocation252_spill] sm:$0xff] %v13031_v15  ;;  %v8358_v41 = vpack.c.bf16 %v13031_v15, %v13021_v19  ;;  %v6663_v24 = vsel %vm6375_vm1, %v12883_v36, 0.0  ;;  %v6668_v14 = vsel %vm6380_vm2, %v12924_v29, 0.0  ;;  %v6669_v50 = vsel %vm6381_vm3, %v12939_v31, 0.0  ;;  %v17796_v36 = vld [vmem:[#allocation102_spill] sm:$0xff] }
 0x41a   : > { %17792 = vst [vmem:[#allocation253_spill] sm:$0xff] %v13037_v22  ;;  %v4448_v56 = vmax.f32 %v4447_v10, %v12943_v11  ;;  %4263 = vst [vmem:[%s10038_s20 + $0x118] sm:$0xff] %v8355_v42  ;;  %v8359_v57 = vpack.c.bf16 %v13037_v22, %v13028_v17  ;;  %v6923_v48 = vadd.f32 %v6922_v62, %v6663_v24  ;;  %v6670_v43 = vsel %vm6382_vm4, %v12936_v4, 0.0  ;;  %v17793_v42 = vld [vmem:[#allocation138_spill] sm:$0xff]  ;;  %v17794_v62 = vld [vmem:[#allocation141_spill] sm:$0xff] }
 0x41b   : > { %4266 = vst [vmem:[%s10038_s20 + $0x130] sm:$0xff] %v8358_v41  ;;  %v4457_v8 = vmax.f32 %v4456_v54, %v12964_v61  ;;  %v6671_v10 = vsel %vm6383_vm5, %v12943_v11, 0.0  ;;  %v6928_v24 = vadd.f32 %v17794_v62, %v17793_v42  ;;  %v3351_v54 = vpop.f32.mrb[84].mxu1  ;;  %v3160_v41 = vpop.f32.mrb[85].mxu0  ;;  %vm6388_vm6 = vcmp.eq.s32.totalorder %v17680_v63, %v17796_v36 }
 0x41c   : > { %4449 = vmax.xlane.f32.xlu0 %v4448_v56  ;;  %4267 = vst [vmem:[%s10038_s20 + $0x138] sm:$0xff] %v8359_v57  ;;  %6924 = vadd.xlane.f32.xlu1 %v6923_v48  ;;  %v13075_v56 = vadd.f32 %v3158_v32, %v17710_v26  ;;  %vm6389_vm7 = vcmp.eq.s32.totalorder %v17685_v60, %v17796_v36  ;;  %v3353_v32 = vpop.f32.mrb[85].mxu1  ;;  %v3162_v48 = vpop.f32.mrb[86].mxu0 }
 0x41d   : > { %vm6390_vm8 = vcmp.eq.s32.totalorder %v17688_v46, %v17796_v36  ;;  %v6929_v49 = vadd.f32 %v6928_v24, %v6668_v14  ;;  %v13084_v42 = vadd.f32 %v3351_v54, %v17715_v55  ;;  %v13087_v57 = vadd.f32 %v3160_v41, %v17713_v9  ;;  %v3355_v4 = vpop.f32.mrb[86].mxu1  ;;  %v3164_v14 = vpop.f32.mrb[87].mxu0 }
 0x41e   : > { %17795 = vst [vmem:[#allocation138_spill] sm:$0xff] %v13075_v56  ;;  %vm6391_vm9 = vcmp.eq.s32.totalorder %v17695_v58, %v17796_v36  ;;  %v13092_v62 = vadd.f32 %v3353_v32, %v17719_v1  ;;  %v13095_v11 = vadd.f32 %v3162_v48, %v17710_v26  ;;  %v6676_v24 = vsel %vm6388_vm6, %v12946_v40, 0.0  ;;  %v3357_v48 = vpop.f32.mrb[87].mxu1 }
 0x41f   : > { %17797 = vst [vmem:[#allocation141_spill] sm:$0xff] %v13084_v42  ;;  %17798 = vst [vmem:[#allocation102_spill] sm:$0xff] %v13087_v57  ;;  %v6677_v54 = vsel %vm6389_vm7, %v12952_v25, 0.0  ;;  %v6930_v41 = vadd.f32 %v6929_v49, %v6669_v50  ;;  %v8362_v31 = vpack.c.bf16 %v13087_v57, %v13075_v56  ;;  %v13102_v29 = vadd.f32 %v3355_v4, %v17715_v55  ;;  %v17804_v25 = vld [vmem:[#allocation147_spill] sm:$0xff]  ;;  %v17805_v50 = vld [vmem:[#allocation152_spill] sm:$0xff] }
 0x420   : > { %17799 = vst [vmem:[#allocation254_spill] sm:$0xff] %v13092_v62  ;;  %17800 = vst [vmem:[#allocation255_spill] sm:$0xff] %v13095_v11  ;;  %v13105_v32 = vadd.f32 %v3164_v14, %v17713_v9  ;;  %4458 = vmax.xlane.f32.xlu1 %v4457_v8  ;;  %v8363_v34 = vpack.c.bf16 %v13092_v62, %v13084_v42  ;;  %v13110_v40 = vadd.f32 %v3357_v48, %v17719_v1  ;;  %v17809_v14 = vld [vmem:[#allocation159_spill] sm:$0xff] }
 0x421   : > { %17801 = vst [vmem:[#allocation256_spill] sm:$0xff] %v13102_v29  ;;  %v6937_v49 = vadd.f32 %v17805_v50, %v17804_v25  ;;  %v17808_v4 = vmax.f32 %v17806_v0, %v17807_v52  ;;  %v6931_v3 = vadd.f32 %v6930_v41, %v6670_v43  ;;  %4270 = vst [vmem:[%s10038_s20 + $0x150] sm:$0xff] %v8362_v31 }
 0x422   : > { %17802 = vst [vmem:[#allocation257_spill] sm:$0xff] %v13105_v32  ;;  %17803 = vst [vmem:[#allocation258_spill] sm:$0xff] %v13110_v40  ;;  %v8366_v8 = vpack.c.bf16 %v13105_v32, %v13095_v11  ;;  %v17811_v44 = vmax.f32 %v17809_v14, %v17810_v13  ;;  %vm6396_vm10 = vcmp.eq.s32.totalorder %v17680_v63, %v17812_v53 }
 0x423   : > { %v4463_v7 = vmax.f32 %v17808_v4, %v13003_v28  ;;  %4271 = vst [vmem:[%s10038_s20 + $0x158] sm:$0xff] %v8363_v34  ;;  %v8367_v25 = vpack.c.bf16 %v13110_v40, %v13102_v29  ;;  %v6938_v0 = vadd.f32 %v6937_v49, %v6676_v24  ;;  %vm6397_vm11 = vcmp.eq.s32.totalorder %v17685_v60, %v17812_v53  ;;  %v3168_v24 = vpop.f32.mrb[88].mxu0  ;;  %v17813_v4 = vld [vmem:[#allocation88_spill] sm:$0xff] }
 0x424   : > { %v4472_v48 = vmax.f32 %v17811_v44, %v13021_v19  ;;  %v6932_v31 = vadd.f32 %v6931_v3, %v6671_v10  ;;  %4274 = vst [vmem:[%s10038_s20 + $0x170] sm:$0xff] %v8366_v8  ;;  %v6678_v44 = vsel %vm6390_vm8, %v12961_v37, 0.0  ;;  %v6679_v34 = vsel %vm6391_vm9, %v12964_v61, 0.0  ;;  %v3361_v10 = vpop.f32.mrb[88].mxu1  ;;  %v3170_v49 = vpop.f32.mrb[89].mxu0  ;;  %v17814_v8 = vld [vmem:[#allocation156_spill] sm:$0xff] }
 0x425   : > { %v4464_v43 = vmax.f32 %v4463_v7, %v13013_v39  ;;  %4275 = vst [vmem:[%s10038_s20 + $0x178] sm:$0xff] %v8367_v25  ;;  %v6939_v7 = vadd.f32 %v6938_v0, %v6677_v54  ;;  %vm6398_vm12 = vcmp.eq.s32.totalorder %v17688_v46, %v17812_v53  ;;  %v6684_v3 = vsel %vm6396_vm10, %v13003_v28, 0.0  ;;  %v3172_v25 = vpop.f32.mrb[90].mxu0 }
 0x426   : > { %v4473_v41 = vmax.f32 %v4472_v48, %v13031_v15  ;;  %6933 = vadd.xlane.f32.xlu0 %v6932_v31  ;;  %vm6399_vm13 = vcmp.eq.s32.totalorder %v17695_v58, %v17812_v53  ;;  %v6685_v54 = vsel %vm6397_vm11, %v13013_v39, 0.0  ;;  %v6946_v14 = vadd.f32 %v17814_v8, %v17813_v4  ;;  %v3363_v48 = vpop.f32.mrb[89].mxu1  ;;  %v3174_v37 = vpop.f32.mrb[91].mxu0 }
 0x427   : > { %v4465_v50 = vmax.f32 %v4464_v43, %v13010_v51  ;;  %v6940_v0 = vadd.f32 %v6939_v7, %v6678_v44  ;;  %v13162_v31 = vadd.f32 %v3168_v24, %v17710_v26  ;;  %v3365_v61 = vpop.f32.mrb[90].mxu1  ;;  %v6686_v39 = vsel %vm6398_vm12, %v13010_v51, 0.0  ;;  %v3178_v53 = vpop.f32.mrb[92].mxu0 }
 0x428   : > { %v4474_v36 = vmax.f32 %v4473_v41, %v13028_v17  ;;  %v13165_v41 = vadd.f32 %v3361_v10, %v17715_v55  ;;  %v6947_v13 = vadd.f32 %v6946_v14, %v6684_v3  ;;  %v13172_v4 = vadd.f32 %v3170_v49, %v17713_v9  ;;  %v3367_v7 = vpop.f32.mrb[91].mxu1 }
 0x429   : > { %v4466_v43 = vmax.f32 %v4465_v50, %v13018_v2  ;;  %17815 = vst [vmem:[#allocation147_spill] sm:$0xff] %v13162_v31  ;;  %v13175_v44 = vadd.f32 %v3363_v48, %v17719_v1  ;;  %v6941_v24 = vadd.f32 %v6940_v0, %v6679_v34  ;;  %v13178_v50 = vadd.f32 %v3172_v25, %v17710_v26  ;;  %v17824_v0 = vld [vmem:[#allocation161_spill] sm:$0xff] }
 0x42a   : > { %17816 = vst [vmem:[#allocation152_spill] sm:$0xff] %v13165_v41  ;;  %17817 = vst [vmem:[#allocation150_spill] sm:$0xff] %v13172_v4  ;;  %v13181_v10 = vadd.f32 %v3365_v61, %v17715_v55  ;;  %v13184_v8 = vadd.f32 %v3174_v37, %v17713_v9  ;;  %v6948_v3 = vadd.f32 %v6947_v13, %v6685_v54  ;;  %v6687_v37 = vsel %vm6399_vm13, %v13018_v2, 0.0  ;;  %v17823_v61 = vld [vmem:[#allocation119_spill] sm:$0xff] }
 0x42b   : > { %17818 = vst [vmem:[#allocation159_spill] sm:$0xff] %v13175_v44  ;;  %17819 = vst [vmem:[#allocation114_spill] sm:$0xff] %v13178_v50  ;;  %4467 = vmax.xlane.f32.xlu0 %v4466_v43  ;;  %v8370_v49 = vpack.c.bf16 %v13172_v4, %v13162_v31  ;;  %v8371_v14 = vpack.c.bf16 %v13175_v44, %v13165_v41  ;;  %v13191_v34 = vadd.f32 %v3367_v7, %v17719_v1  ;;  %v17825_v43 = vld [vmem:[#allocation165_spill] sm:$0xff] }
 0x42c   : > { %17820 = vst [vmem:[#allocation88_spill] sm:$0xff] %v13181_v10  ;;  %17821 = vst [vmem:[#allocation156_spill] sm:$0xff] %v13184_v8  ;;  %6942 = vadd.xlane.f32.xlu1 %v6941_v24  ;;  %v4475_v48 = vmax.f32 %v4474_v36, %v13037_v22  ;;  %v8374_v13 = vpack.c.bf16 %v13184_v8, %v13178_v50  ;;  %vm6404_vm14 = vcmp.eq.s32.totalorder %v17680_v63, %v17823_v61  ;;  %v3371_v24 = vpop.f32.mrb[92].mxu1 }
 0x42d   : > { %17822 = vst [vmem:[#allocation259_spill] sm:$0xff] %v13191_v34  ;;  %v6949_v54 = vadd.f32 %v6948_v3, %v6686_v39  ;;  %4278 = vst [vmem:[%s10038_s20 + $0x190] sm:$0xff] %v8370_v49  ;;  %v8375_v25 = vpack.c.bf16 %v13191_v34, %v13181_v10  ;;  %vm6405_vm15 = vcmp.eq.s32.totalorder %v17685_v60, %v17823_v61  ;;  %v6692_v36 = vsel %vm6404_vm14, %v13021_v19, 0.0  ;;  %v3180_v3 = vpop.f32.mrb[93].mxu0 }
 0x42e   : > { %4279 = vst [vmem:[%s10038_s20 + $0x198] sm:$0xff] %v8371_v14  ;;  %4282 = vst [vmem:[%s10038_s20 + $0x1b0] sm:$0xff] %v8374_v13  ;;  %vm6406_vm0 = vcmp.eq.s32.totalorder %v17688_v46, %v17823_v61  ;;  %vm6407_vm1 = vcmp.eq.s32.totalorder %v17695_v58, %v17823_v61  ;;  %v6693_v39 = vsel %vm6405_vm15, %v13031_v15, 0.0  ;;  %v6955_v7 = vadd.f32 %v17825_v43, %v17824_v0  ;;  %v17828_v61 = vld [vmem:[#allocation135_spill] sm:$0xff]  ;;  %v3373_v15 = vpop.f32.mrb[93].mxu1  ;;  %v3182_v19 = vpop.f32.mrb[94].mxu0 }
 0x42f   : > { %v6950_v49 = vadd.f32 %v6949_v54, %v6687_v37  ;;  %4283 = vst [vmem:[%s10038_s20 + $0x1b8] sm:$0xff] %v8375_v25  ;;  %v17826_v14 = vmax.f32 %v12078_v23, %v17610_v21  ;;  %v17827_v2 = vmax.f32 %v12124_v6, %v17623_v16  ;;  %vm6412_vm2 = vcmp.eq.s32.totalorder %v17680_v63, %v17828_v61  ;;  %v3375_v23 = vpop.f32.mrb[94].mxu1  ;;  %v3184_v25 = vpop.f32.mrb[95].mxu0  ;;  %v17860_v21 = vld [vmem:[#allocation162_spill] sm:$0xff] }
 0x430   : > { %4476 = vmax.xlane.f32.xlu1 %v4475_v48  ;;  %v6694_v0 = vsel %vm6406_vm0, %v13028_v17, 0.0  ;;  %v6695_v37 = vsel %vm6407_vm1, %v13037_v22, 0.0  ;;  %v6956_v54 = vadd.f32 %v6955_v7, %v6692_v36  ;;  %vm6413_vm3 = vcmp.eq.s32.totalorder %v17685_v60, %v17828_v61  ;;  %v3377_v43 = vpop.f32.mrb[95].mxu1  ;;  %v17829_v7 = vld [vmem:[#allocation170_spill] sm:$0xff] }
 0x431   : > { %v4481_v13 = vmax.f32 %v17826_v14, %v13075_v56  ;;  %v4490_v51 = vmax.f32 %v17827_v2, %v13095_v11  ;;  %6951 = vadd.xlane.f32.xlu0 %v6950_v49  ;;  %vm6414_vm4 = vcmp.eq.s32.totalorder %v17688_v46, %v17828_v61  ;;  %v6700_v48 = vsel %vm6412_vm2, %v13075_v56, 0.0 }
 0x432   : > { %v6957_v14 = vadd.f32 %v6956_v54, %v6693_v39  ;;  %vm6415_vm5 = vcmp.eq.s32.totalorder %v17695_v58, %v17828_v61  ;;  %v6701_v36 = vsel %vm6413_vm3, %v13087_v57, 0.0  ;;  %v6964_v22 = vadd.f32 %v12113_v45, %v17829_v7 }
 0x433   : > { %v4482_v6 = vmax.f32 %v4481_v13, %v13087_v57  ;;  %v4491_v2 = vmax.f32 %v4490_v51, %v13105_v32  ;;  %v13245_v51 = vadd.f32 %v3178_v53, %v17710_v26  ;;  %v13248_v17 = vadd.f32 %v3371_v24, %v17715_v55 }
 0x434   : > { %v6958_v16 = vadd.f32 %v6957_v14, %v6694_v0  ;;  %v6965_v39 = vadd.f32 %v6964_v22, %v6700_v48  ;;  %v13251_v54 = vadd.f32 %v3180_v3, %v17713_v9  ;;  %v13254_v57 = vadd.f32 %v3373_v15, %v17719_v1  ;;  %v3188_v0 = vpop.f32.mrb[96].mxu0  ;;  %v3381_v48 = vpop.f32.mrb[96].mxu1 }
 0x435   : > { %v4483_v49 = vmax.f32 %v4482_v6, %v13084_v42  ;;  %v4492_v13 = vmax.f32 %v4491_v2, %v13102_v29  ;;  %17830 = vst [vmem:[#allocation119_spill] sm:$0xff] %v13245_v51  ;;  %17831 = vst [vmem:[#allocation161_spill] sm:$0xff] %v13248_v17  ;;  %v6702_v6 = vsel %vm6414_vm4, %v13084_v42, 0.0  ;;  %v6703_v53 = vsel %vm6415_vm5, %v13092_v62, 0.0  ;;  %v3190_v14 = vpop.f32.mrb[97].mxu0 }
 0x436   : > { %17832 = vst [vmem:[#allocation165_spill] sm:$0xff] %v13251_v54  ;;  %17833 = vst [vmem:[#allocation135_spill] sm:$0xff] %v13254_v57  ;;  %v13263_v24 = vadd.f32 %v3182_v19, %v17710_v26  ;;  %v6959_v22 = vadd.f32 %v6958_v16, %v6695_v37  ;;  %v6966_v3 = vadd.f32 %v6965_v39, %v6701_v36  ;;  %v3383_v37 = vpop.f32.mrb[97].mxu1  ;;  %v3192_v36 = vpop.f32.mrb[98].mxu0 }
 0x437   : > { %v4484_v45 = vmax.f32 %v4483_v49, %v13092_v62  ;;  %v8378_v15 = vpack.c.bf16 %v13251_v54, %v13245_v51  ;;  %v8379_v2 = vpack.c.bf16 %v13254_v57, %v13248_v17  ;;  %v4493_v61 = vmax.f32 %v4492_v13, %v13110_v40 }
 0x438   : > { %17834 = vst [vmem:[#allocation170_spill] sm:$0xff] %v13263_v24  ;;  %v13271_v7 = vadd.f32 %v3375_v23, %v17715_v55  ;;  %v13274_v19 = vadd.f32 %v3184_v25, %v17713_v9  ;;  %v13277_v16 = vadd.f32 %v3377_v43, %v17719_v1  ;;  %vm6505_vm6 = vcmp.eq.s32.totalorder %v11346_v47, %v12481_v33  ;;  %v3385_v23 = vpop.f32.mrb[98].mxu1  ;;  %v3194_v25 = vpop.f32.mrb[99].mxu0 }
 0x439   : > { %4485 = vmax.xlane.f32.xlu0 %v4484_v45  ;;  %6960 = vadd.xlane.f32.xlu1 %v6959_v22  ;;  %v6967_v49 = vadd.f32 %v6966_v3, %v6702_v6  ;;  %4286 = vst [vmem:[%s10038_s20 + $0x1d0] sm:$0xff] %v8378_v15  ;;  %4287 = vst [vmem:[%s10038_s20 + $0x1d8] sm:$0xff] %v8379_v2  ;;  %vm6420_vm7 = vcmp.eq.s32.totalorder %v17680_v63, %v11820_v5  ;;  %v3387_v45 = vpop.f32.mrb[99].mxu1  ;;  %v17838_v3 = vld [vmem:[#allocation180_spill] sm:$0xff] }
 0x43a   : > { %17835 = vst [vmem:[#allocation260_spill] sm:$0xff] %v13271_v7  ;;  %17836 = vst [vmem:[#allocation261_spill] sm:$0xff] %v13274_v19  ;;  %vm6421_vm8 = vcmp.eq.s32.totalorder %v17685_v60, %v11820_v5  ;;  %vm6422_vm9 = vcmp.eq.s32.totalorder %v17688_v46, %v11820_v5  ;;  %v8382_v43 = vpack.c.bf16 %v13274_v19, %v13263_v24  ;;  %v6708_v39 = vsel %vm6420_vm7, %v13095_v11, 0.0 }
 0x43b   : > { %17837 = vst [vmem:[#allocation262_spill] sm:$0xff] %v13277_v16  ;;  %v8383_v13 = vpack.c.bf16 %v13277_v16, %v13271_v7  ;;  %vm6423_vm10 = vcmp.eq.s32.totalorder %v17695_v58, %v11820_v5  ;;  %v6968_v6 = vadd.f32 %v6967_v49, %v6703_v53  ;;  %v6709_v22 = vsel %vm6421_vm8, %v13105_v32, 0.0  ;;  %v17841_v53 = vld [vmem:[#allocation144_spill] sm:$0xff] }
 0x43c   : > { %v6973_v15 = vadd.f32 %v17838_v3, %v12175_v18  ;;  %v17839_v2 = vmax.f32 %v12188_v30, %v11521_v38  ;;  %4290 = vst [vmem:[%s10038_s20 + $0x1f0] sm:$0xff] %v8382_v43  ;;  %v6710_v42 = vsel %vm6422_vm9, %v13102_v29, 0.0  ;;  %v17840_v11 = vmax.f32 %v12224_v59, %v17632_v12  ;;  %v13328_v43 = vpop.f32.mrb[100].mxu0  ;;  %v13336_v3 = vpop.f32.mrb[100].mxu1  ;;  %v17858_v12 = vld [vmem:[#allocation116_spill] sm:$0xff] }
 0x43d   : > { %4291 = vst [vmem:[%s10038_s20 + $0x1f8] sm:$0xff] %v8383_v13  ;;  %vm6428_vm11 = vcmp.eq.s32.totalorder %v17680_v63, %v17841_v53  ;;  %vm6429_vm12 = vcmp.eq.s32.totalorder %v17685_v60, %v17841_v53  ;;  %vm6506_vm13 = vcmp.eq.s32.totalorder %v11353_v27, %v12481_v33  ;;  %4494 = vmax.xlane.f32.xlu1 %v4493_v61  ;;  %v6711_v18 = vsel %vm6423_vm10, %v13110_v40, 0.0 }
 0x43e   : > { %v4499_v62 = vmax.f32 %v17839_v2, %v13162_v31  ;;  %v4508_v56 = vmax.f32 %v17840_v11, %v13178_v50  ;;  %6969 = vadd.xlane.f32.xlu0 %v6968_v6  ;;  %v6974_v30 = vadd.f32 %v6973_v15, %v6708_v39  ;;  %vm6430_vm14 = vcmp.eq.s32.totalorder %v17688_v46, %v17841_v53  ;;  %v17842_v39 = vld [vmem:[#allocation183_spill] sm:$0xff] }
 0x43f   : > { %vm6431_vm15 = vcmp.eq.s32.totalorder %v17695_v58, %v17841_v53  ;;  %v6716_v49 = vsel %vm6428_vm11, %v13162_v31, 0.0  ;;  %v6717_v61 = vsel %vm6429_vm12, %v13172_v4, 0.0  ;;  %v13334_v6 = vadd.f32 %v3188_v0, %v17710_v26 }
 0x440   : > { %v4500_v59 = vmax.f32 %v4499_v62, %v13172_v4  ;;  %v4509_v11 = vmax.f32 %v4508_v56, %v13184_v8  ;;  %v6975_v13 = vadd.f32 %v6974_v30, %v6709_v22  ;;  %v6982_v62 = vadd.f32 %v17842_v39, %v12194_v35  ;;  %v13338_v56 = vpop.f32.mrb[101].mxu0  ;;  %v13350_v30 = vpop.f32.mrb[101].mxu1 }
 0x441   : > { %17843 = vst [vmem:[#allocation180_spill] sm:$0xff] %v13334_v6  ;;  %v6718_v15 = vsel %vm6430_vm14, %v13165_v41, 0.0  ;;  %v13342_v2 = vadd.f32 %v3381_v48, %v17715_v55  ;;  %v13345_v40 = vadd.f32 %v3190_v14, %v17713_v9  ;;  %v13348_v22 = vadd.f32 %v3383_v37, %v17719_v1  ;;  %v13352_v35 = vpop.f32.mrb[102].mxu0  ;;  %v13358_v48 = vpop.f32.mrb[102].mxu1 }
 0x442   : > { %v4501_v5 = vmax.f32 %v4500_v59, %v13165_v41  ;;  %v6976_v0 = vadd.f32 %v6975_v13, %v6710_v42  ;;  %v6983_v39 = vadd.f32 %v6982_v62, %v6716_v49  ;;  %v13356_v29 = vadd.f32 %v3192_v36, %v17710_v26  ;;  %v13360_v14 = vpop.f32.mrb[103].mxu0  ;;  %v13370_v49 = vpop.f32.mrb[103].mxu1 }
 0x443   : > { %17844 = vst [vmem:[#allocation144_spill] sm:$0xff] %v13342_v2  ;;  %17845 = vst [vmem:[#allocation183_spill] sm:$0xff] %v13345_v40  ;;  %v4510_v37 = vmax.f32 %v4509_v11, %v13181_v10  ;;  %v8386_v41 = vpack.c.bf16 %v13345_v40, %v13334_v6  ;;  %v8387_v42 = vpack.c.bf16 %v13348_v22, %v13342_v2  ;;  %v13382_v11 = vsel %vm6505_vm6, %v12090_v20, 0.0 }
 0x444   : > { %17846 = vst [vmem:[#allocation263_spill] sm:$0xff] %v13348_v22  ;;  %v4502_v59 = vmax.f32 %v4501_v5, %v13175_v44  ;;  %17847 = vst [vmem:[#allocation264_spill] sm:$0xff] %v13356_v29  ;;  %v13368_v13 = vadd.f32 %v3385_v23, %v17715_v55  ;;  %v6977_v36 = vadd.f32 %v6976_v0, %v6711_v18  ;;  %v6719_v23 = vsel %vm6431_vm15, %v13175_v44, 0.0  ;;  %v17855_v44 = vld [vmem:[#allocation110_spill] sm:$0xff] }
 0x445   : > { %v6984_v5 = vadd.f32 %v6983_v39, %v6717_v61  ;;  %v13373_v62 = vadd.f32 %v3194_v25, %v17713_v9  ;;  %v13376_v4 = vadd.f32 %v3387_v45, %v17719_v1  ;;  %4294 = vst [vmem:[%s10038_s20 + $0x210] sm:$0xff] %v8386_v41  ;;  %4295 = vst [vmem:[%s10038_s20 + $0x218] sm:$0xff] %v8387_v42  ;;  %v17851_v25 = vld [vmem:[#allocation151_spill] sm:$0xff] }
 0x446   : > { %17848 = vst [vmem:[#allocation265_spill] sm:$0xff] %v13368_v13  ;;  %4503 = vmax.xlane.f32.xlu0 %v4502_v59  ;;  %vm6436_vm0 = vcmp.eq.s32.totalorder %v17680_v63, %v17851_v25  ;;  %vm6437_vm1 = vcmp.eq.s32.totalorder %v17685_v60, %v17851_v25  ;;  %6978 = vadd.xlane.f32.xlu1 %v6977_v36  ;;  %v17852_v59 = vld [vmem:[#allocation188_spill] sm:$0xff]  ;;  %v17853_v39 = vld [vmem:[#allocation191_spill] sm:$0xff]  ;;  %v13405_v36 = vpop.f32.mrb[104].mxu0 }
 0x447   : > { %17849 = vst [vmem:[#allocation266_spill] sm:$0xff] %v13373_v62  ;;  %17850 = vst [vmem:[#allocation267_spill] sm:$0xff] %v13376_v4  ;;  %v6985_v45 = vadd.f32 %v6984_v5, %v6718_v15  ;;  %v8390_v18 = vpack.c.bf16 %v13373_v62, %v13356_v29  ;;  %v8391_v61 = vpack.c.bf16 %v13376_v4, %v13368_v13  ;;  %v6724_v53 = vsel %vm6436_vm0, %v13178_v50, 0.0  ;;  %v17854_v5 = vld [vmem:[#allocation192_spill] sm:$0xff] }
 0x448   : > { %v4511_v41 = vmax.f32 %v4510_v37, %v13191_v34  ;;  %vm6438_vm2 = vcmp.eq.s32.totalorder %v17688_v46, %v17851_v25  ;;  %v6725_v0 = vsel %vm6437_vm1, %v13184_v8, 0.0  ;;  %v6991_v42 = vadd.f32 %v17853_v39, %v17852_v59  ;;  %v17857_v37 = vld [vmem:[#allocation197_spill] sm:$0xff]  ;;  %v13419_v8 = vpop.f32.mrb[104].mxu1  ;;  %v13421_v59 = vpop.f32.mrb[105].mxu0 }
 0x449   : > { %v6986_v15 = vadd.f32 %v6985_v45, %v6719_v23  ;;  %4298 = vst [vmem:[%s10038_s20 + $0x230] sm:$0xff] %v8390_v18  ;;  %4299 = vst [vmem:[%s10038_s20 + $0x238] sm:$0xff] %v8391_v61  ;;  %v17856_v32 = vmax.f32 %v17854_v5, %v17855_v44  ;;  %v17859_v31 = vmax.f32 %v17857_v37, %v17858_v12  ;;  %v17861_v23 = vld [vmem:[#allocation172_spill] sm:$0xff]  ;;  %v13434_v61 = vpop.f32.mrb[106].mxu0 }
 0x44a   : > { %vm6444_vm3 = vcmp.eq.s32.totalorder %v17680_v63, %v17860_v21  ;;  %v13427_v45 = vsel %vm6506_vm13, %v17861_v23, 0.0  ;;  %vm6439_vm4 = vcmp.eq.s32.totalorder %v17695_v58, %v17851_v25  ;;  %v6992_v18 = vadd.f32 %v6991_v42, %v6724_v53  ;;  %4512 = vmax.xlane.f32.xlu1 %v4511_v41  ;;  %v13443_v44 = vpop.f32.mrb[107].mxu0  ;;  %v17863_v42 = vld [vmem:[#allocation194_spill] sm:$0xff] }
 0x44b   : > { %v4517_v50 = vmax.f32 %v17856_v32, %v13245_v51  ;;  %v4526_v38 = vmax.f32 %v17859_v31, %v13263_v24  ;;  %17862 = vst [vmem:[#allocation151_spill] sm:$0xff] %v13427_v45  ;;  %v6726_v32 = vsel %vm6438_vm2, %v13181_v10, 0.0  ;;  %v13432_v31 = vpop.f32.mrb[105].mxu1  ;;  %6987 = vadd.xlane.f32.xlu0 %v6986_v15  ;;  %vm6445_vm5 = vcmp.eq.s32.totalorder %v17685_v60, %v17860_v21  ;;  %v17864_v15 = vld [vmem:[#allocation200_spill] sm:$0xff]  ;;  %v17880_v45 = vld [vmem:[#allocation133_spill] sm:$0xff] }
 0x44c   : > { %v6732_v37 = vsel %vm6444_vm3, %v13245_v51, 0.0  ;;  %v13441_v12 = vpop.f32.mrb[106].mxu1  ;;  %v6993_v53 = vadd.f32 %v6992_v18, %v6725_v0  ;;  %vm6446_vm6 = vcmp.eq.s32.totalorder %v17688_v46, %v17860_v21  ;;  %v6733_v41 = vsel %vm6445_vm5, %v13251_v54, 0.0 }
 0x44d   : > { %v4518_v39 = vmax.f32 %v4517_v50, %v13251_v54  ;;  %v4527_v5 = vmax.f32 %v4526_v38, %v13274_v19  ;;  %v7000_v50 = vadd.f32 %v17864_v15, %v17863_v42  ;;  %v13450_v10 = vpop.f32.mrb[107].mxu1  ;;  %v13456_v51 = vadd.f32 %v13328_v43, %v17710_v26 }
 0x44e   : > { %v13460_v0 = vadd.f32 %v13336_v3, %v17715_v55  ;;  %v6994_v18 = vadd.f32 %v6993_v53, %v6726_v32  ;;  %v13464_v54 = vadd.f32 %v13338_v56, %v17713_v9  ;;  %v13468_v42 = vadd.f32 %v13350_v30, %v17719_v1 }
 0x44f   : > { %v4519_v38 = vmax.f32 %v4518_v39, %v13248_v17  ;;  %v4528_v28 = vmax.f32 %v4527_v5, %v13271_v7  ;;  %17865 = vst [vmem:[#allocation188_spill] sm:$0xff] %v13456_v51  ;;  %v7001_v52 = vadd.f32 %v7000_v50, %v6732_v37  ;;  %v6727_v43 = vsel %vm6439_vm4, %v13191_v34, 0.0  ;;  %v13485_v5 = vpop.f32.mrb[108].mxu0  ;;  %v17876_v34 = vld [vmem:[#allocation208_spill] sm:$0xff] }
 0x450   : > { %17866 = vst [vmem:[#allocation191_spill] sm:$0xff] %v13460_v0  ;;  %17867 = vst [vmem:[#allocation192_spill] sm:$0xff] %v13464_v54  ;;  %vm6447_vm7 = vcmp.eq.s32.totalorder %v17695_v58, %v17860_v21  ;;  %v13479_v3 = vadd.f32 %v13352_v35, %v17710_v26  ;;  %v6995_v56 = vadd.f32 %v6994_v18, %v6727_v43  ;;  %v6734_v37 = vsel %vm6446_vm6, %v13248_v17, 0.0  ;;  %v13505_v15 = vpop.f32.mrb[109].mxu0 }
 0x451   : > { %17868 = vst [vmem:[#allocation197_spill] sm:$0xff] %v13468_v42  ;;  %v4520_v39 = vmax.f32 %v4519_v38, %v13254_v57  ;;  %v7002_v32 = vadd.f32 %v7001_v52, %v6733_v41  ;;  %v8394_v30 = vpack.c.bf16 %v13464_v54, %v13456_v51  ;;  %v8395_v25 = vpack.c.bf16 %v13468_v42, %v13460_v0  ;;  %v13503_v41 = vpop.f32.mrb[108].mxu1  ;;  %v13518_v18 = vpop.f32.mrb[110].mxu0 }
 0x452   : > { %17869 = vst [vmem:[#allocation162_spill] sm:$0xff] %v13479_v3  ;;  %v13493_v35 = vadd.f32 %v13358_v48, %v17715_v55  ;;  %v13497_v52 = vadd.f32 %v13360_v14, %v17713_v9  ;;  %v13501_v53 = vadd.f32 %v13370_v49, %v17719_v1  ;;  %6996 = vadd.xlane.f32.xlu1 %v6995_v56  ;;  %v6735_v48 = vsel %vm6447_vm7, %v13254_v57, 0.0  ;;  %v17873_v14 = vld [vmem:[#allocation168_spill] sm:$0xff]  ;;  %v13516_v49 = vpop.f32.mrb[109].mxu1  ;;  %v13529_v56 = vpop.f32.mrb[111].mxu0 }
 0x453   : > { %4521 = vmax.xlane.f32.xlu0 %v4520_v39  ;;  %v4529_v50 = vmax.f32 %v4528_v28, %v13277_v16  ;;  %v7003_v38 = vadd.f32 %v7002_v32, %v6734_v37  ;;  %4302 = vst [vmem:[%s10038_s20 + $0x250] sm:$0xff] %v8394_v30  ;;  %4303 = vst [vmem:[%s10038_s20 + $0x258] sm:$0xff] %v8395_v25  ;;  %vm6452_vm8 = vcmp.eq.s32.totalorder %v17680_v63, %v17873_v14  ;;  %v13527_v39 = vpop.f32.mrb[110].mxu1  ;;  %v17874_v30 = vld [vmem:[#allocation201_spill] sm:$0xff]  ;;  %v17877_v57 = vld [vmem:[#allocation128_spill] sm:$0xff] }
 0x454   : > { %17870 = vst [vmem:[#allocation194_spill] sm:$0xff] %v13493_v35  ;;  %17871 = vst [vmem:[#allocation200_spill] sm:$0xff] %v13497_v52  ;;  %v8398_v28 = vpack.c.bf16 %v13497_v52, %v13479_v3  ;;  %v8399_v43 = vpack.c.bf16 %v13501_v53, %v13493_v35  ;;  %vm6453_vm9 = vcmp.eq.s32.totalorder %v17685_v60, %v17873_v14  ;;  %v6740_v21 = vsel %vm6452_vm8, %v13263_v24, 0.0  ;;  %v17875_v25 = vld [vmem:[#allocation89_spill] sm:$0xff]  ;;  %v13539_v47 = vpop.f32.mrb[111].mxu1 }
 0x455   : > { %17872 = vst [vmem:[#allocation268_spill] sm:$0xff] %v13501_v53  ;;  %v7004_v32 = vadd.f32 %v7003_v38, %v6735_v48  ;;  %vm6454_vm10 = vcmp.eq.s32.totalorder %v17688_v46, %v17873_v14  ;;  %v7009_v37 = vadd.f32 %v17875_v25, %v17874_v30  ;;  %v17878_v17 = vmax.f32 %v17876_v34, %v17877_v57  ;;  %v17879_v24 = vld [vmem:[#allocation213_spill] sm:$0xff] }
 0x456   : > { %4306 = vst [vmem:[%s10038_s20 + $0x270] sm:$0xff] %v8398_v28  ;;  %4307 = vst [vmem:[%s10038_s20 + $0x278] sm:$0xff] %v8399_v43  ;;  %vm6455_vm11 = vcmp.eq.s32.totalorder %v17695_v58, %v17873_v14  ;;  %v6741_v48 = vsel %vm6453_vm9, %v13274_v19, 0.0  ;;  %v6742_v38 = vsel %vm6454_vm10, %v13271_v7, 0.0  ;;  %v17881_v30 = vmax.f32 %v17879_v24, %v17880_v45  ;;  %4530 = vmax.xlane.f32.xlu1 %v4529_v50  ;;  %v17882_v43 = vld [vmem:[#allocation175_spill] sm:$0xff] }
 0x457   : > { %v4535_v27 = vmax.f32 %v17878_v17, %v13334_v6  ;;  %7005 = vadd.xlane.f32.xlu0 %v7004_v32  ;;  %v6743_v17 = vsel %vm6455_vm11, %v13277_v16, 0.0  ;;  %v7010_v34 = vadd.f32 %v7009_v37, %v6740_v21  ;;  %vm6460_vm12 = vcmp.eq.s32.totalorder %v17680_v63, %v17882_v43  ;;  %v17884_v21 = vld [vmem:[#allocation210_spill] sm:$0xff]  ;;  %v13568_v16 = vpop.f32.mrb[112].mxu0 }
 0x458   : > { %v4544_v25 = vmax.f32 %v17881_v30, %v13356_v29  ;;  %vm6461_vm13 = vcmp.eq.s32.totalorder %v17685_v60, %v17882_v43  ;;  %vm6462_vm14 = vcmp.eq.s32.totalorder %v17688_v46, %v17882_v43  ;;  %v6748_v24 = vsel %vm6460_vm12, %v13334_v6, 0.0  ;;  %v17883_v30 = vld [vmem:[#allocation209_spill] sm:$0xff] }
 0x459   : > { %v4536_v28 = vmax.f32 %v4535_v27, %v13345_v40  ;;  %v7011_v50 = vadd.f32 %v7010_v34, %v6741_v48  ;;  %v7018_v37 = vadd.f32 %v17884_v21, %v17883_v30  ;;  %v13566_v27 = vadd.f32 %v13405_v36, %v17710_v26  ;;  %v13585_v36 = vpop.f32.mrb[113].mxu0 }
 0x45a   : > { %v4545_v14 = vmax.f32 %v4544_v25, %v13373_v62  ;;  %v6749_v25 = vsel %vm6461_vm13, %v13345_v40, 0.0  ;;  %v13573_v7 = vadd.f32 %v13419_v8, %v17715_v55  ;;  %v13577_v48 = vadd.f32 %v13421_v59, %v17713_v9  ;;  %v13594_v59 = vpop.f32.mrb[114].mxu0 }
 0x45b   : > { %v4537_v32 = vmax.f32 %v4536_v28, %v13342_v2  ;;  %17885 = vst [vmem:[#allocation168_spill] sm:$0xff] %v13566_v27  ;;  %v13581_v34 = vadd.f32 %v13432_v31, %v17719_v1  ;;  %v13583_v28 = vpop.f32.mrb[112].mxu1  ;;  %v7012_v30 = vadd.f32 %v7011_v50, %v6742_v38  ;;  %v7019_v45 = vadd.f32 %v7018_v37, %v6748_v24  ;;  %v13607_v50 = vpop.f32.mrb[115].mxu0 }
 0x45c   : > { %17886 = vst [vmem:[#allocation201_spill] sm:$0xff] %v13573_v7  ;;  %17887 = vst [vmem:[#allocation89_spill] sm:$0xff] %v13577_v48  ;;  %v13590_v8 = vadd.f32 %v13434_v61, %v17710_v26  ;;  %v13592_v40 = vpop.f32.mrb[113].mxu1  ;;  %v4546_v31 = vmax.f32 %v4545_v14, %v13368_v13  ;;  %v8402_v6 = vpack.c.bf16 %v13577_v48, %v13566_v27 }
 0x45d   : > { %17888 = vst [vmem:[#allocation208_spill] sm:$0xff] %v13581_v34  ;;  %v4538_v21 = vmax.f32 %v4537_v32, %v13348_v22  ;;  %17890 = vst [vmem:[#allocation175_spill] sm:$0xff] %v13594_v59  ;;  %v8403_v38 = vpack.c.bf16 %v13581_v34, %v13573_v7  ;;  %v13603_v24 = vadd.f32 %v13441_v12, %v17715_v55  ;;  %v13605_v61 = vpop.f32.mrb[114].mxu1  ;;  %v17897_v59 = vld [vmem:[#allocation238_spill] sm:$0xff] }
 0x45e   : > { %17889 = vst [vmem:[#allocation213_spill] sm:$0xff] %v13590_v8  ;;  %17892 = vst [vmem:[#allocation210_spill] sm:$0xff] %v13605_v61  ;;  %v7013_v32 = vadd.f32 %v7012_v30, %v6743_v17  ;;  %v7020_v37 = vadd.f32 %v7019_v45, %v6749_v25  ;;  %v13611_v14 = vadd.f32 %v13443_v44, %v17713_v9  ;;  %v13617_v19 = vpop.f32.mrb[115].mxu1  ;;  %v6750_v44 = vsel %vm6462_vm14, %v13342_v2, 0.0  ;;  %v13655_v61 = vpop.f32.mrb[116].mxu0 }
 0x45f   : > { %17891 = vst [vmem:[#allocation209_spill] sm:$0xff] %v13603_v24  ;;  %17893 = vst [vmem:[#allocation269_spill] sm:$0xff] %v13607_v50  ;;  %4539 = vmax.xlane.f32.xlu0 %v4538_v21  ;;  %v13615_v57 = vadd.f32 %v13450_v10, %v17719_v1  ;;  %v13621_v12 = vadd.f32 %v13382_v11, %v17897_v59  ;;  %vm6463_vm15 = vcmp.eq.s32.totalorder %v17695_v58, %v17882_v43  ;;  %v17898_v10 = vld [vmem:[#allocation179_spill] sm:$0xff] }
 0x460   : > { %17894 = vst [vmem:[#allocation270_spill] sm:$0xff] %v13611_v14  ;;  %17896 = vst [vmem:[#allocation272_spill] sm:$0xff] %v13617_v19  ;;  %vm6468_vm0 = vcmp.eq.s32.totalorder %v17680_v63, %v17898_v10  ;;  %7014 = vadd.xlane.f32.xlu1 %v7013_v32  ;;  %v7021_v45 = vadd.f32 %v7020_v37, %v6750_v44  ;;  %v8406_v11 = vpack.c.bf16 %v13611_v14, %v13590_v8  ;;  %v17900_v21 = vld [vmem:[#allocation219_spill] sm:$0xff]  ;;  %v17901_v37 = vld [vmem:[#allocation217_spill] sm:$0xff] }
 0x461   : > { %17895 = vst [vmem:[#allocation271_spill] sm:$0xff] %v13615_v57  ;;  %4310 = vst [vmem:[%s10038_s20 + $0x290] sm:$0xff] %v8402_v6  ;;  %v8407_v17 = vpack.c.bf16 %v13615_v57, %v13603_v24  ;;  %v6756_v25 = vsel %vm6468_vm0, %v13356_v29, 0.0  ;;  %v4547_v30 = vmax.f32 %v4546_v31, %v13376_v4  ;;  %v6751_v43 = vsel %vm6463_vm15, %v13348_v22, 0.0  ;;  %v17899_v6 = vld [vmem:[#allocation220_spill] sm:$0xff]  ;;  %v17902_v44 = vld [vmem:[#allocation143_spill] sm:$0xff] }
 0x462   : > { %4311 = vst [vmem:[%s10038_s20 + $0x298] sm:$0xff] %v8403_v38  ;;  %vm6469_vm1 = vcmp.eq.s32.totalorder %v17685_v60, %v17898_v10  ;;  %v7027_v59 = vadd.f32 %v17900_v21, %v17899_v6  ;;  %v7022_v38 = vadd.f32 %v7021_v45, %v6751_v43  ;;  %4314 = vst [vmem:[%s10038_s20 + $0x2b0] sm:$0xff] %v8406_v11  ;;  %v17904_v31 = vld [vmem:[#allocation229_spill] sm:$0xff]  ;;  %v17907_v50 = vld [vmem:[#allocation67_spill] sm:$0xff] }
 0x463   : > { %4315 = vst [vmem:[%s10038_s20 + $0x2b8] sm:$0xff] %v8407_v17  ;;  %v6757_v32 = vsel %vm6469_vm1, %v13373_v62, 0.0  ;;  %v17903_v2 = vmax.f32 %v17901_v37, %v17902_v44  ;;  %v17905_v57 = vld [vmem:[#allocation149_spill] sm:$0xff]  ;;  %vm6507_vm2 = vcmp.eq.s32.totalorder %v17907_v50, %v12481_v33  ;;  %vm6470_vm3 = vcmp.eq.s32.totalorder %v17688_v46, %v17898_v10  ;;  %v13667_v17 = vpop.f32.mrb[117].mxu0  ;;  %v17941_v50 = vld [vmem:[#allocation158_spill] sm:$0xff] }
 0x464   : > { %v17906_v22 = vmax.f32 %v17904_v31, %v17905_v57  ;;  %vm6471_vm4 = vcmp.eq.s32.totalorder %v17695_v58, %v17898_v10  ;;  %v7028_v45 = vadd.f32 %v7027_v59, %v6756_v25  ;;  %v17908_v11 = vld [vmem:[#allocation181_spill] sm:$0xff]  ;;  %4548 = vmax.xlane.f32.xlu1 %v4547_v30  ;;  %7023 = vadd.xlane.f32.xlu0 %v7022_v38  ;;  %v13675_v10 = vpop.f32.mrb[118].mxu0  ;;  %v17909_v30 = vld [vmem:[#allocation222_spill] sm:$0xff]  ;;  %v17910_v38 = vld [vmem:[#allocation224_spill] sm:$0xff] }
 0x465   : > { %v4553_v29 = vmax.f32 %v17903_v2, %v13456_v51  ;;  %vm6476_vm5 = vcmp.eq.s32.totalorder %v17680_v63, %v17908_v11  ;;  %v13665_v2 = vpop.f32.mrb[116].mxu1  ;;  %v6759_v25 = vsel %vm6471_vm4, %v13376_v4, 0.0  ;;  %vm6477_vm6 = vcmp.eq.s32.totalorder %v17685_v60, %v17908_v11  ;;  %v17920_v44 = vld [vmem:[#allocation173_spill] sm:$0xff] }
 0x466   : > { %v4562_v19 = vmax.f32 %v17906_v22, %v13479_v3  ;;  %v6758_v22 = vsel %vm6470_vm3, %v13368_v13, 0.0  ;;  %v6764_v21 = vsel %vm6476_vm5, %v13456_v51, 0.0  ;;  %v13673_v37 = vpop.f32.mrb[117].mxu1  ;;  %v7029_v59 = vadd.f32 %v7028_v45, %v6757_v32 }
 0x467   : > { %v4554_v43 = vmax.f32 %v4553_v29, %v13464_v54  ;;  %v7036_v31 = vadd.f32 %v17910_v38, %v17909_v30  ;;  %v13682_v13 = vpop.f32.mrb[118].mxu1  ;;  %v13684_v29 = vpop.f32.mrb[119].mxu0  ;;  %v6765_v57 = vsel %vm6477_vm6, %v13464_v54, 0.0  ;;  %v13690_v51 = vadd.f32 %v13485_v5, %v17710_v26 }
 0x468   : > { %v4563_v6 = vmax.f32 %v4562_v19, %v13497_v52  ;;  %v13694_v32 = vadd.f32 %v13503_v41, %v17715_v55  ;;  %v13696_v45 = vpop.f32.mrb[119].mxu1  ;;  %v7030_v4 = vadd.f32 %v7029_v59, %v6758_v22  ;;  %v13700_v38 = vadd.f32 %v13505_v15, %v17713_v9  ;;  %v17917_v59 = vld [vmem:[#allocation169_spill] sm:$0xff] }
 0x469   : > { %v4555_v19 = vmax.f32 %v4554_v43, %v13460_v0  ;;  %17911 = vst [vmem:[#allocation238_spill] sm:$0xff] %v13690_v51  ;;  %17913 = vst [vmem:[#allocation220_spill] sm:$0xff] %v13696_v45  ;;  %v7037_v30 = vadd.f32 %v7036_v31, %v6764_v21  ;;  %v13704_v43 = vadd.f32 %v13516_v49, %v17719_v1 }
 0x46a   : > { %17912 = vst [vmem:[#allocation179_spill] sm:$0xff] %v13694_v32  ;;  %17914 = vst [vmem:[#allocation219_spill] sm:$0xff] %v13700_v38  ;;  %v4564_v5 = vmax.f32 %v4563_v6, %v13493_v35  ;;  %vm6478_vm7 = vcmp.eq.s32.totalorder %v17688_v46, %v17908_v11  ;;  %v13712_v41 = vadd.f32 %v13518_v18, %v17710_v26 }
 0x46b   : > { %17915 = vst [vmem:[#allocation217_spill] sm:$0xff] %v13704_v43  ;;  %v4556_v54 = vmax.f32 %v4555_v19, %v13468_v42  ;;  %v7031_v22 = vadd.f32 %v7030_v4, %v6759_v25  ;;  %v7038_v15 = vadd.f32 %v7037_v30, %v6765_v57  ;;  %v8410_v21 = vpack.c.bf16 %v13700_v38, %v13690_v51  ;;  %v17919_v19 = vld [vmem:[#allocation176_spill] sm:$0xff]  ;;  %v13731_v4 = vpop.f32.mrb[120].mxu0 }
 0x46c   : > { %17916 = vst [vmem:[#allocation229_spill] sm:$0xff] %v13712_v41  ;;  %v8411_v49 = vpack.c.bf16 %v13704_v43, %v13694_v32  ;;  %v17918_v6 = vmax.f32 %v17917_v59, %v12090_v20  ;;  %v4595_v62 = vmax.f32 %v17920_v44, %v17919_v19  ;;  %v6766_v18 = vsel %vm6478_vm7, %v13460_v0, 0.0  ;;  %17922 = vst [vmem:[#allocation222_spill] sm:$0xff] %v13731_v4  ;;  %v17928_v0 = vld [vmem:[#allocation182_spill] sm:$0xff] }
 0x46d   : > { %4557 = vmax.xlane.f32.xlu0 %v4556_v54  ;;  %v13729_v57 = vadd.f32 %v13529_v56, %v17713_v9  ;;  %7032 = vadd.xlane.f32.xlu1 %v7031_v22  ;;  %vm6479_vm8 = vcmp.eq.s32.totalorder %v17695_v58, %v17908_v11  ;;  %v7039_v25 = vadd.f32 %v7038_v15, %v6766_v18  ;;  %v13747_v56 = vpop.f32.mrb[121].mxu0  ;;  %v17927_v22 = vld [vmem:[#allocation184_spill] sm:$0xff]  ;;  %v17935_v44 = vld [vmem:[#allocation174_spill] sm:$0xff] }
 0x46e   : > { %v13722_v31 = vmax.f32 %v17918_v6, %v17861_v23  ;;  %4318 = vst [vmem:[%s10038_s20 + $0x2d0] sm:$0xff] %v8410_v21  ;;  %4319 = vst [vmem:[%s10038_s20 + $0x2d8] sm:$0xff] %v8411_v49  ;;  %v13739_v30 = vadd.f32 %v13527_v39, %v17715_v55  ;;  %v13743_v54 = vadd.f32 %v13539_v47, %v17719_v1  ;;  %v13745_v6 = vpop.f32.mrb[120].mxu1  ;;  %v6767_v11 = vsel %vm6479_vm8, %v13468_v42, 0.0  ;;  %v17929_v21 = vld [vmem:[#allocation193_spill] sm:$0xff]  ;;  %v13758_v47 = vpop.f32.mrb[122].mxu0 }
 0x46f   : > { %17921 = vst [vmem:[#allocation181_spill] sm:$0xff] %v13729_v57  ;;  %17925 = vst [vmem:[#allocation274_spill] sm:$0xff] %v13745_v6  ;;  %v4604_v23 = vmax.f32 %v17928_v0, %v17927_v22  ;;  %v8414_v15 = vpack.c.bf16 %v13729_v57, %v13712_v41  ;;  %vm6484_vm9 = vcmp.eq.s32.totalorder %v17680_v63, %v17929_v21  ;;  %v13756_v39 = vpop.f32.mrb[121].mxu1  ;;  %v13764_v42 = vpop.f32.mrb[123].mxu0  ;;  %v17934_v0 = vld [vmem:[#allocation151_spill] sm:$0xff] }
 0x470   : > { %17923 = vst [vmem:[#allocation224_spill] sm:$0xff] %v13739_v30  ;;  %17924 = vst [vmem:[#allocation273_spill] sm:$0xff] %v13743_v54  ;;  %v4565_v49 = vmax.f32 %v4564_v5, %v13501_v53  ;;  %v7040_v18 = vadd.f32 %v7039_v25, %v6767_v11  ;;  %v8415_v20 = vpack.c.bf16 %v13743_v54, %v13739_v30  ;;  %v6772_v59 = vsel %vm6484_vm9, %v13479_v3, 0.0  ;;  %v13766_v22 = vpop.f32.mrb[122].mxu1  ;;  %v17936_v5 = vld [vmem:[#allocation235_spill] sm:$0xff]  ;;  %v17937_v25 = vld [vmem:[#allocation234_spill] sm:$0xff] }
 0x471   : > { %17926 = vst [vmem:[#allocation275_spill] sm:$0xff] %v13747_v56  ;;  %17930 = vst [vmem:[#allocation193_spill] sm:$0xff] %v13756_v39  ;;  %v13770_v19 = vadd.f32 %v13621_v12, %v17934_v0  ;;  %vm6485_vm10 = vcmp.eq.s32.totalorder %v17685_v60, %v17929_v21  ;;  %v7045_v11 = vadd.f32 %v17937_v25, %v17936_v5  ;;  %v13783_v3 = vpop.f32.mrb[123].mxu1  ;;  %v17940_v12 = vld [vmem:[#allocation65_spill] sm:$0xff]  ;;  %v17943_v6 = vld [vmem:[#allocation231_spill] sm:$0xff]  ;;  %vm6116_vm9 = vcmask 7168  }
 0x472   : > { %17931 = vst [vmem:[#allocation276_spill] sm:$0xff] %v13758_v47  ;;  %17932 = vst [vmem:[#allocation277_spill] sm:$0xff] %v13764_v42  ;;  %v13776_v47 = vsel %vm6507_vm2, %v17935_v44, 0.0  ;;  %4566 = vmax.xlane.f32.xlu1 %v4565_v49  ;;  %7041 = vadd.xlane.f32.xlu0 %v7040_v18  ;;  %v6773_v0 = vsel %vm6485_vm10, %v13497_v52, 0.0  ;;  %v17944_v56 = vld [vmem:[#allocation164_spill] sm:$0xff]  ;;  %v17946_v25 = vld [vmem:[#allocation185_spill] sm:$0xff]  ;;  %vm6486_vm12 = vcmp.eq.s32.totalorder %v17688_v46, %v17929_v21 }
 0x473   : > { %17933 = vst [vmem:[#allocation278_spill] sm:$0xff] %v13766_v22  ;;  %4322 = vst [vmem:[%s10038_s20 + $0x2f0] sm:$0xff] %v8414_v15  ;;  %v17939_v22 = vld [vmem:[#allocation177_spill] sm:$0xff]  ;;  %v17942_v15 = vmax.f32 %v17940_v12, %v17941_v50  ;;  %v17945_v4 = vmax.f32 %v17943_v6, %v17944_v56  ;;  %v7046_v18 = vadd.f32 %v7045_v11, %v6772_v59  ;;  %v17950_v52 = vld [vmem:[#allocation199_spill] sm:$0xff]  ;;  %v13816_v56 = vpop.f32.mrb[124].mxu0  ;;  %v6774_v50 = vsel %vm6486_vm12, %v13493_v35, 0.0 }
 0x474   : > { %17938 = vst [vmem:[#allocation151_spill] sm:$0xff] %v13783_v3  ;;  %v13786_v42 = vmax.f32 %v4595_v62, %v17939_v22  ;;  %4323 = vst [vmem:[%s10038_s20 + $0x2f8] sm:$0xff] %v8415_v20  ;;  %v13799_v3 = vmax.f32 %v4604_v23, %v17946_v25  ;;  %v17947_v62 = vld [vmem:[#allocation189_spill] sm:$0xff]  ;;  %v17948_v22 = vld [vmem:[#allocation186_spill] sm:$0xff]  ;;  %vm6487_vm14 = vcmp.eq.s32.totalorder %v17695_v58, %v17929_v21 }
 0x475   : > { %v4571_v39 = vmax.f32 %v17942_v15, %v13566_v27  ;;  %v4580_v5 = vmax.f32 %v17945_v4, %v13590_v8  ;;  %v4613_v49 = vmax.f32 %v17948_v22, %v17947_v62  ;;  %v17949_v20 = vld [vmem:[#allocation195_spill] sm:$0xff]  ;;  %v17951_v54 = vld [vmem:[#allocation198_spill] sm:$0xff]  ;;  %v7047_v6 = vadd.f32 %v7046_v18, %v6773_v0  ;;  %v17952_v59 = vld [vmem:[#allocation236_spill] sm:$0xff]  ;;  %v13825_v0 = vpop.f32.mrb[124].mxu1 }
 0x476   : > { %vm6492_vm11 = vcmp.eq.s32.totalorder %v17680_v63, %v17949_v20  ;;  %v4622_v45 = vmax.f32 %v17951_v54, %v17950_v52  ;;  %vm6493_vm13 = vcmp.eq.s32.totalorder %v17685_v60, %v17949_v20  ;;  %v17953_v11 = vld [vmem:[#allocation97_spill] sm:$0xff]  ;;  %vm6494_vm15 = vcmp.eq.s32.totalorder %v17688_v46, %v17949_v20 }
 0x477   : > { %v4572_v12 = vmax.f32 %v4571_v39, %v13577_v48  ;;  %v6780_v4 = vsel %vm6492_vm11, %v13566_v27, 0.0  ;;  %v4581_v23 = vmax.f32 %v4580_v5, %v13611_v14  ;;  %v7054_v15 = vadd.f32 %v17953_v11, %v17952_v59  ;;  %v13827_v5 = vpop.f32.mrb[125].mxu0 }
 0x478   : > { %v6781_v52 = vsel %vm6493_vm13, %v13577_v48, 0.0  ;;  %v13823_v39 = vadd.f32 %v13568_v16, %v17710_v26  ;;  %v7048_v18 = vadd.f32 %v7047_v6, %v6774_v50  ;;  %v13833_v11 = vadd.f32 %v13585_v36, %v17713_v9  ;;  %v13837_v35 = vpop.f32.mrb[126].mxu0  ;;  %v17956_v48 = vld [vmem:[#allocation190_spill] sm:$0xff] }
 0x479   : > { %v4573_v25 = vmax.f32 %v4572_v12, %v13573_v7  ;;  %v7055_v59 = vadd.f32 %v7054_v15, %v6780_v4  ;;  %v13835_v12 = vpop.f32.mrb[125].mxu1  ;;  %v13840_v16 = vmax.f32 %v4613_v49, %v17956_v48  ;;  %v6775_v27 = vsel %vm6487_vm14, %v13501_v53, 0.0  ;;  %v13846_v50 = vpop.f32.mrb[127].mxu0 }
 0x47a   : > { %17954 = vst [vmem:[#allocation235_spill] sm:$0xff] %v13823_v39  ;;  %17955 = vst [vmem:[#allocation234_spill] sm:$0xff] %v13833_v11  ;;  %v13848_v21 = vpop.f32.mrb[126].mxu1  ;;  %v7049_v36 = vadd.f32 %v7048_v18, %v6775_v27  ;;  %v4582_v4 = vmax.f32 %v4581_v23, %v13603_v24  ;;  %v8418_v49 = vpack.c.bf16 %v13833_v11, %v13823_v39  ;;  %v17962_v27 = vld [vmem:[#allocation175_spill] sm:$0xff] }
 0x47b   : > { %v4574_v54 = vmax.f32 %v4573_v25, %v13581_v34  ;;  %17957 = vst [vmem:[#allocation65_spill] sm:$0xff] %v13846_v50  ;;  %17958 = vst [vmem:[#allocation231_spill] sm:$0xff] %v13848_v21  ;;  %v7056_v6 = vadd.f32 %v7055_v59, %v6781_v52  ;;  %v13853_v15 = vpop.f32.mrb[127].mxu1  ;;  %v6782_v25 = vsel %vm6494_vm15, %v13573_v7, 0.0  ;;  %v13858_v53 = vadd.f32 %v13583_v28, %v17715_v55  ;;  %v17964_v52 = vld [vmem:[#allocation203_spill] sm:$0xff]  ;;  %v17965_v28 = vld [vmem:[#allocation269_spill] sm:$0xff] }
 0x47c   : > { %17959 = vst [vmem:[#allocation195_spill] sm:$0xff] %v13853_v15  ;;  %v13862_v48 = vadd.f32 %v13592_v40, %v17719_v1  ;;  %v13866_v23 = vadd.f32 %v17962_v27, %v17710_v26  ;;  %v13869_v18 = vmax.f32 %v4622_v45, %v17964_v52  ;;  %7050 = vadd.xlane.f32.xlu1 %v7049_v36  ;;  %4326 = vst [vmem:[%s10038_s20 + $0x310] sm:$0xff] %v8418_v49  ;;  %v17967_v7 = vld [vmem:[#allocation210_spill] sm:$0xff]  ;;  %v17969_v36 = vld [vmem:[#allocation272_spill] sm:$0xff] }
 0x47d   : > { %4575 = vmax.xlane.f32.xlu0 %v4574_v54  ;;  %17960 = vst [vmem:[#allocation236_spill] sm:$0xff] %v13858_v53  ;;  %vm6495_vm0 = vcmp.eq.s32.totalorder %v17695_v58, %v17949_v20  ;;  %v7057_v54 = vadd.f32 %v7056_v6, %v6782_v25  ;;  %v13876_v59 = vadd.f32 %v17965_v28, %v17713_v9  ;;  %v17971_v20 = vld [vmem:[#allocation204_spill] sm:$0xff]  ;;  %v17972_v6 = vld [vmem:[#allocation202_spill] sm:$0xff]  ;;  %v17973_v25 = vld [vmem:[#allocation271_spill] sm:$0xff] }
 0x47e   : > { %17961 = vst [vmem:[#allocation97_spill] sm:$0xff] %v13862_v48  ;;  %17963 = vst [vmem:[#allocation175_spill] sm:$0xff] %v13866_v23  ;;  %v6783_v40 = vsel %vm6495_vm0, %v13581_v34, 0.0  ;;  %v8419_v27 = vpack.c.bf16 %v13862_v48, %v13858_v53  ;;  %v13883_v45 = vadd.f32 %v17967_v7, %v17715_v55  ;;  %v13887_v52 = vadd.f32 %v17969_v36, %v17719_v1  ;;  %v17974_v7 = vld [vmem:[#allocation178_spill] sm:$0xff]  ;;  %v17975_v21 = vld [vmem:[#allocation92_spill] sm:$0xff] }
 0x47f   : > { %17966 = vst [vmem:[#allocation269_spill] sm:$0xff] %v13876_v59  ;;  %v4631_v49 = vmax.f32 %v17972_v6, %v17971_v20  ;;  %v4583_v28 = vmax.f32 %v4582_v4, %v17973_v25  ;;  %v7058_v62 = vadd.f32 %v7057_v54, %v6783_v40  ;;  %v8422_v34 = vpack.c.bf16 %v13876_v59, %v13866_v23  ;;  %v17976_v20 = vld [vmem:[#allocation187_spill] sm:$0xff]  ;;  %v17977_v54 = vld [vmem:[#allocation196_spill] sm:$0xff]  ;;  %v17978_v6 = vld [vmem:[#allocation205_spill] sm:$0xff] }
 0x480   : > { %17968 = vst [vmem:[#allocation210_spill] sm:$0xff] %v13883_v45  ;;  %17970 = vst [vmem:[#allocation272_spill] sm:$0xff] %v13887_v52  ;;  %v4588_v22 = vmax.f32 %v13722_v31, %v17935_v44  ;;  %v4597_v15 = vmax.f32 %v13786_v42, %v17974_v7  ;;  %v8423_v36 = vpack.c.bf16 %v13887_v52, %v13883_v45  ;;  %v17979_v31 = vld [vmem:[#allocation101_spill] sm:$0xff]  ;;  %v17981_v40 = vld [vmem:[#allocation206_spill] sm:$0xff] }
 0x481   : > { %4327 = vst [vmem:[%s10038_s20 + $0x318] sm:$0xff] %v8419_v27  ;;  %vm6500_vm1 = vcmp.eq.s32.totalorder %v17680_v63, %v17975_v21  ;;  %v4606_v4 = vmax.f32 %v13799_v3, %v17976_v20  ;;  %4584 = vmax.xlane.f32.xlu1 %v4583_v28  ;;  %7059 = vadd.xlane.f32.xlu0 %v7058_v62  ;;  %4330 = vst [vmem:[%s10038_s20 + $0x330] sm:$0xff] %v8422_v34  ;;  %v17980_v27 = vld [vmem:[#allocation237_spill] sm:$0xff]  ;;  %v17982_v50 = vld [vmem:[#allocation212_spill] sm:$0xff] }
 0x482   : > { %v6788_v42 = vsel %vm6500_vm1, %v13590_v8, 0.0  ;;  %4331 = vst [vmem:[%s10038_s20 + $0x338] sm:$0xff] %v8423_v36  ;;  %vm6501_vm2 = vcmp.eq.s32.totalorder %v17685_v60, %v17975_v21  ;;  %v7063_v44 = vadd.f32 %v17980_v27, %v17979_v31  ;;  %v4589_v3 = vmax.f32 %v4588_v22, %v13690_v51  ;;  %v17983_v28 = vld [vmem:[#allocation211_spill] sm:$0xff] }
 0x483   : > { %v4598_v20 = vmax.f32 %v4597_v15, %v13712_v41  ;;  %v13919_v7 = vmax.f32 %v4631_v49, %v17981_v40  ;;  %v4640_v62 = vmax.f32 %v17983_v28, %v17982_v50  ;;  %v6789_v34 = vsel %vm6501_vm2, %v13611_v14, 0.0 }
 0x484   : > { %vm6508_vm3 = vcmp.eq.s32.totalorder %v17680_v63, %v12481_v33  ;;  %v7064_v36 = vadd.f32 %v7063_v44, %v6788_v42  ;;  %v4590_v8 = vmax.f32 %v4589_v3, %v13700_v38  ;;  %vm6502_vm4 = vcmp.eq.s32.totalorder %v17688_v46, %v17975_v21 }
 0x485   : > { %v4599_v31 = vmax.f32 %v4598_v20, %v13729_v57  ;;  %v6796_v22 = vsel %vm6508_vm3, %v13690_v51, 0.0  ;;  %vm6509_vm5 = vcmp.eq.s32.totalorder %v17685_v60, %v12481_v33  ;;  %v7072_v15 = vadd.f32 %v13770_v19, %v13776_v47  ;;  %v18023_v57 = vld [vmem:[#allocation232_spill] sm:$0xff] }
 0x486   : > { %v13937_v49 = vadd.f32 %v13655_v61, %v17710_v26  ;;  %vm6503_vm6 = vcmp.eq.s32.totalorder %v17695_v58, %v17975_v21  ;;  %v7065_v44 = vadd.f32 %v7064_v36, %v6789_v34  ;;  %v4591_v20 = vmax.f32 %v4590_v8, %v13694_v32 }
 0x487   : > { %v6797_v42 = vsel %vm6509_vm5, %v13700_v38, 0.0  ;;  %v6790_v27 = vsel %vm6502_vm4, %v13603_v24, 0.0  ;;  %v6791_v3 = vsel %vm6503_vm6, %v17973_v25, 0.0  ;;  %v7073_v51 = vadd.f32 %v7072_v15, %v6796_v22  ;;  %v13963_v22 = vpop.permute.xlu1 %6305  ;;  %v17988_v15 = vld [vmem:[#allocation218_spill] sm:$0xff]  ;;  %v17997_v24 = vld [vmem:[#allocation273_spill] sm:$0xff]  ;;  %v18002_v38 = vld [vmem:[#allocation215_spill] sm:$0xff] }
 0x488   : > { %17984 = vst [vmem:[#allocation92_spill] sm:$0xff] %v13937_v49  ;;  %v13947_v19 = vadd.f32 %v13667_v17, %v17713_v9  ;;  %v7066_v47 = vadd.f32 %v7065_v44, %v6790_v27  ;;  %v4592_v61 = vmax.f32 %v4591_v20, %v13704_v43  ;;  %v4600_v21 = vmax.f32 %v4599_v31, %v13739_v30  ;;  %v17989_v44 = vld [vmem:[#allocation214_spill] sm:$0xff]  ;;  %v18004_v30 = vld [vmem:[#allocation227_spill] sm:$0xff] }
 0x489   : > { %vm6510_vm7 = vcmp.eq.s32.totalorder %v17688_v46, %v12481_v33  ;;  %v7074_v8 = vadd.f32 %v7073_v51, %v6797_v42  ;;  %v13955_v34 = vadd.f32 %v13665_v2, %v17715_v55  ;;  %v13961_v17 = vadd.f32 %v13673_v37, %v17719_v1  ;;  %v13972_v42 = vpop.permute.xlu0 %6302 }
 0x48a   : > { %17985 = vst [vmem:[#allocation101_spill] sm:$0xff] %v13947_v19  ;;  %v8426_v36 = vpack.c.bf16 %v13947_v19, %v13937_v49  ;;  %v4649_v31 = vmax.f32 %v17989_v44, %v17988_v15  ;;  %v7067_v20 = vadd.f32 %v7066_v47, %v6791_v3  ;;  %4593 = vmax.xlane.f32.xlu0 %v4592_v61  ;;  %v6798_v51 = vsel %vm6510_vm7, %v13694_v32, 0.0  ;;  %v17993_v61 = vld [vmem:[#allocation220_spill] sm:$0xff] }
 0x48b   : > { %17986 = vst [vmem:[#allocation237_spill] sm:$0xff] %v13955_v34  ;;  %17987 = vst [vmem:[#allocation279_spill] sm:$0xff] %v13961_v17  ;;  %v13970_v2 = vadd.f32 %v13675_v10, %v17710_v26  ;;  %vm6511_vm8 = vcmp.eq.s32.totalorder %v17695_v58, %v12481_v33  ;;  %v7075_v37 = vadd.f32 %v7074_v8, %v6798_v51  ;;  %v17995_v8 = vld [vmem:[#allocation56_spill] sm:$0xff] }
 0x48c   : > { %4334 = vst [vmem:[%s10038_s20 + $0x350] sm:$0xff] %v8426_v36  ;;  %v8427_v27 = vpack.c.bf16 %v13961_v17, %v13955_v34  ;;  %v13981_v3 = vadd.f32 %v13684_v29, %v17713_v9  ;;  %7068 = vadd.xlane.f32.xlu1 %v7067_v20  ;;  %v6799_v47 = vsel %vm6511_vm8, %v13704_v43, 0.0  ;;  %v13986_v10 = vadd.f32 %v13682_v13, %v17715_v55  ;;  %v17996_v36 = vld [vmem:[#allocation225_spill] sm:$0xff]  ;;  %v13999_v13 = vpop.permute.xlu1 %6311 }
 0x48d   : > { %17990 = vst [vmem:[#allocation280_spill] sm:$0xff] %v13970_v2  ;;  %v13990_v25 = vadd.f32 %v17993_v61, %v17719_v1  ;;  %v4607_v33 = vmax.f32 %v4606_v4, %v13823_v39  ;;  %v4658_v51 = vmax.f32 %v17996_v36, %v17995_v8  ;;  %v4601_v29 = vmax.f32 %v4600_v21, %v17997_v24  ;;  %v17999_v21 = vld [vmem:[#allocation222_spill] sm:$0xff] }
 0x48e   : > { %17991 = vst [vmem:[#allocation281_spill] sm:$0xff] %v13981_v3  ;;  %17992 = vst [vmem:[#allocation282_spill] sm:$0xff] %v13986_v10  ;;  %v7076_v32 = vadd.f32 %v7075_v37, %v6799_v47  ;;  %v8430_v20 = vpack.c.bf16 %v13981_v3, %v13970_v2  ;;  %v17998_v4 = vmax.f32 %v13840_v16, %v17977_v54  ;;  %v18001_v47 = vld [vmem:[#allocation207_spill] sm:$0xff]  ;;  %v18003_v24 = vld [vmem:[#allocation230_spill] sm:$0xff] }
 0x48f   : > { %17994 = vst [vmem:[#allocation220_spill] sm:$0xff] %v13990_v25  ;;  %4335 = vst [vmem:[%s10038_s20 + $0x358] sm:$0xff] %v8427_v27  ;;  %v8431_v61 = vpack.c.bf16 %v13990_v25, %v13986_v10  ;;  %v4608_v43 = vmax.f32 %v4607_v33, %v13833_v11  ;;  %v14010_v37 = vadd.f32 %v17999_v21, %v17710_v26  ;;  %v14012_v27 = vpop.permute.xlu0 %6308  ;;  %v18005_v33 = vld [vmem:[#allocation275_spill] sm:$0xff]  ;;  %v18018_v11 = vld [vmem:[#allocation278_spill] sm:$0xff] }
 0x490   : > { %v4616_v15 = vmax.f32 %v17998_v4, %v13866_v23  ;;  %v4633_v44 = vmax.f32 %v13919_v7, %v18001_v47  ;;  %v4641_v14 = vmax.f32 %v4640_v62, %v18002_v38  ;;  %v4667_v58 = vmax.f32 %v18004_v30, %v18003_v24  ;;  %7077 = vadd.xlane.f32.xlu0 %v7076_v32  ;;  %v18007_v7 = vld [vmem:[#allocation274_spill] sm:$0xff]  ;;  %v18009_v62 = vld [vmem:[#allocation193_spill] sm:$0xff] }
 0x491   : > { %18000 = vst [vmem:[#allocation222_spill] sm:$0xff] %v14010_v37  ;;  %4338 = vst [vmem:[%s10038_s20 + $0x370] sm:$0xff] %v8430_v20  ;;  %v14022_v16 = vadd.f32 %v18005_v33, %v17713_v9  ;;  %4602 = vmax.xlane.f32.xlu1 %v4601_v29  ;;  %v4609_v4 = vmax.f32 %v4608_v43, %v13858_v53  ;;  %v14029_v46 = vadd.f32 %v18007_v7, %v17715_v55  ;;  %v18011_v32 = vld [vmem:[#allocation221_spill] sm:$0xff]  ;;  %v18012_v30 = vld [vmem:[#allocation226_spill] sm:$0xff] }
 0x492   : > { %4339 = vst [vmem:[%s10038_s20 + $0x378] sm:$0xff] %v8431_v61  ;;  %v4617_v21 = vmax.f32 %v4616_v15, %v13876_v59  ;;  %v14033_v24 = vadd.f32 %v18009_v62, %v17719_v1  ;;  %v4650_v20 = vmax.f32 %v4649_v31, %v18011_v32  ;;  %v4659_v33 = vmax.f32 %v4658_v51, %v18012_v30  ;;  %v18013_v61 = vld [vmem:[#allocation276_spill] sm:$0xff]  ;;  %v14043_v15 = vpop.permute.xlu1 %6317  ;;  %v18015_v31 = vld [vmem:[#allocation277_spill] sm:$0xff] }
 0x493   : > { %18006 = vst [vmem:[#allocation275_spill] sm:$0xff] %v14022_v16  ;;  %18008 = vst [vmem:[#allocation274_spill] sm:$0xff] %v14029_v46  ;;  %v8434_v29 = vpack.c.bf16 %v14022_v16, %v14010_v37  ;;  %v14041_v43 = vadd.f32 %v18013_v61, %v17710_v26  ;;  %v4610_v7 = vmax.f32 %v4609_v4, %v13862_v48  ;;  %v14053_v32 = vpop.permute.xlu0 %6314  ;;  %v18022_v48 = vld [vmem:[#allocation216_spill] sm:$0xff] }
 0x494   : > { %18010 = vst [vmem:[#allocation193_spill] sm:$0xff] %v14033_v24  ;;  %v4618_v53 = vmax.f32 %v4617_v21, %v13883_v45  ;;  %v8435_v62 = vpack.c.bf16 %v14033_v24, %v14029_v46  ;;  %v14051_v51 = vadd.f32 %v18015_v31, %v17713_v9  ;;  %v18017_v61 = vmax.f32 %v13869_v18, %v17978_v6  ;;  %v18020_v21 = vld [vmem:[#allocation151_spill] sm:$0xff] }
 0x495   : > { %18014 = vst [vmem:[#allocation276_spill] sm:$0xff] %v14041_v43  ;;  %4342 = vst [vmem:[%s10038_s20 + $0x390] sm:$0xff] %v8434_v29  ;;  %v14062_v4 = vadd.f32 %v18018_v11, %v17715_v55  ;;  %v14066_v45 = vadd.f32 %v18020_v21, %v17719_v1  ;;  %v4634_v31 = vmax.f32 %v4633_v44, %v13970_v2  ;;  %4611 = vmax.xlane.f32.xlu0 %v4610_v7  ;;  %v18024_v11 = vld [vmem:[#allocation223_spill] sm:$0xff]  ;;  %v18029_v7 = vld [vmem:[#allocation228_spill] sm:$0xff] }
 0x496   : > { %18016 = vst [vmem:[#allocation277_spill] sm:$0xff] %v14051_v51  ;;  %v4625_v59 = vmax.f32 %v18017_v61, %v13937_v49  ;;  %v4642_v23 = vmax.f32 %v4641_v14, %v18022_v48  ;;  %v4668_v29 = vmax.f32 %v4667_v58, %v18023_v57  ;;  %v4619_v39 = vmax.f32 %v4618_v53, %v13887_v52  ;;  %v14080_v14 = vpop.permute.xlu1 %6323 }
 0x497   : > { %18019 = vst [vmem:[#allocation278_spill] sm:$0xff] %v14062_v4  ;;  %18021 = vst [vmem:[#allocation151_spill] sm:$0xff] %v14066_v45  ;;  %v8438_v18 = vpack.c.bf16 %v14051_v51, %v14041_v43  ;;  %v4651_v61 = vmax.f32 %v4650_v20, %v18024_v11  ;;  %v8439_v21 = vpack.c.bf16 %v14066_v45, %v14062_v4 }
 0x498   : > { %4343 = vst [vmem:[%s10038_s20 + $0x398] sm:$0xff] %v8435_v62  ;;  %v4626_v49 = vmax.f32 %v4625_v59, %v13947_v19  ;;  %v4635_v44 = vmax.f32 %v4634_v31, %v13981_v3  ;;  %4620 = vmax.xlane.f32.xlu1 %v4619_v39  ;;  %v14085_v58 = vadd.f32 %v13816_v56, %v17710_v26  ;;  %v4396_v31 = vpop.xlane.xlu0 %4395 }
 0x499   : > { %4346 = vst [vmem:[%s10038_s20 + $0x3b0] sm:$0xff] %v8438_v18  ;;  %v14089_v53 = vadd.f32 %v13825_v0, %v17715_v55  ;;  %v14093_v59 = vadd.f32 %v13827_v5, %v17713_v9  ;;  %v14097_v20 = vadd.f32 %v13835_v12, %v17719_v1  ;;  %v4660_v39 = vmax.f32 %v4659_v33, %v18029_v7  ;;  %v18031_v5 = vld [vmem:[#allocation233_spill] sm:$0xff] }
 0x49a   : > { %18025 = vst [vmem:[#allocation283_spill] sm:$0xff] %v14085_v58  ;;  %v4627_v62 = vmax.f32 %v4626_v49, %v13955_v34  ;;  %4347 = vst [vmem:[%s10038_s20 + $0x3b8] sm:$0xff] %v8439_v21  ;;  %v4636_v56 = vmax.f32 %v4635_v44, %v13986_v10  ;;  %v14105_v0 = vadd.f32 %v13837_v35, %v17710_v26  ;;  %v18032_v44 = vld [vmem:[#allocation65_spill] sm:$0xff]  ;;  %v14120_v35 = vld [vmem:[#allocation3] sm:$0xff] }
 0x49b   : > { %18026 = vst [vmem:[#allocation284_spill] sm:$0xff] %v14089_v53  ;;  %18027 = vst [vmem:[#allocation285_spill] sm:$0xff] %v14093_v59  ;;  %v4669_v18 = vmax.f32 %v4668_v29, %v18031_v5  ;;  %v8442_v12 = vpack.c.bf16 %v14093_v59, %v14085_v58  ;;  %v8443_v57 = vpack.c.bf16 %v14097_v20, %v14089_v53  ;;  %v18035_v5 = vld [vmem:[#allocation231_spill] sm:$0xff] }
 0x49c   : > { %18028 = vst [vmem:[#allocation286_spill] sm:$0xff] %v14097_v20  ;;  %18030 = vst [vmem:[#allocation287_spill] sm:$0xff] %v14105_v0  ;;  %v4643_v33 = vmax.f32 %v4642_v23, %v14010_v37  ;;  %v4628_v49 = vmax.f32 %v4627_v62, %v13961_v17  ;;  %v4637_v21 = vmax.f32 %v4636_v56, %v13990_v25  ;;  %v18037_v23 = vld [vmem:[#allocation195_spill] sm:$0xff]  ;;  %v6584_v56 = vld [vmem:[#allocation5] sm:$0xff] }
 0x49d   : > { %v14117_v11 = vadd.f32 %v18032_v44, %v17713_v9  ;;  %v4652_v26 = vmax.f32 %v4651_v61, %v14041_v43  ;;  %18034 = vst [vmem:[#allocation288_spill] sm:$0xff] %v14120_v35  ;;  %4350 = vst [vmem:[%s10038_s20 + $0x3d0] sm:$0xff] %v8442_v12  ;;  %v14127_v10 = vadd.f32 %v18035_v5, %v17715_v55  ;;  %v6880_v44 = vpop.xlane.xlu1 %6879  ;;  %v14134_v61 = vld [vmem:[#allocation3 + $0x8] sm:$0xff] }
 0x49e   : > { %4351 = vst [vmem:[%s10038_s20 + $0x3d8] sm:$0xff] %v8443_v57  ;;  %v4644_v29 = vmax.f32 %v4643_v33, %v14022_v16  ;;  %v14131_v62 = vadd.f32 %v18037_v23, %v17719_v1  ;;  %v4661_v9 = vmax.f32 %v4660_v39, %v14085_v58  ;;  %4629 = vmax.xlane.f32.xlu0 %v4628_v49  ;;  %v4405_v1 = vpop.xlane.xlu0 %4404 }
 0x49f   : > { %18033 = vst [vmem:[#allocation65_spill] sm:$0xff] %v14117_v11  ;;  %18036 = vst [vmem:[#allocation231_spill] sm:$0xff] %v14127_v10  ;;  %4638 = vmax.xlane.f32.xlu1 %v4637_v21  ;;  %v8446_v57 = vpack.c.bf16 %v14117_v11, %v14105_v0  ;;  %v4653_v55 = vmax.f32 %v4652_v26, %v14051_v51  ;;  %v4670_v5 = vmax.f32 %v4669_v18, %v14105_v0  ;;  %v14153_v0 = vld [vmem:[#allocation3 + $0x10] sm:$0xff] }
 0x4a0   : > { %18038 = vst [vmem:[#allocation195_spill] sm:$0xff] %v14131_v62  ;;  %v4645_v12 = vmax.f32 %v4644_v29, %v14029_v46  ;;  %v8447_v39 = vpack.c.bf16 %v14131_v62, %v14127_v10  ;;  %v4662_v33 = vmax.f32 %v4661_v9, %v14093_v59  ;;  %v14145_v49 = vmax.f32 %v14120_v35, %v4396_v31  ;;  %v6585_v9 = vld [vmem:[#allocation5 + $0x8] sm:$0xff]  ;;  %v18103_v59 = vld [vmem:[#allocation190_spill] sm:$0xff] }
 0x4a1   : > { %4354 = vst [vmem:[%s10038_s20 + $0x3f0] sm:$0xff] %v8446_v57  ;;  %v4654_v21 = vmax.f32 %v4653_v55, %v14062_v4  ;;  %v4671_v23 = vmax.f32 %v4670_v5, %v14117_v11  ;;  %v7160_v26 = vadd.f32 %v6880_v44, %v6584_v56  ;;  %v14151_v18 = vmax.f32 %v14134_v61, %v4405_v1  ;;  %v4414_v55 = vpop.xlane.xlu1 %4413  ;;  %v18093_v11 = vld [vmem:[#allocation198_spill] sm:$0xff]  ;;  %v18094_v4 = vld [vmem:[#allocation199_spill] sm:$0xff] }
 0x4a2   : > { %18039 = vst [vmem:[#allocation289_spill] sm:$0xff] %v14145_v49  ;;  %v4646_v29 = vmax.f32 %v4645_v12, %v14033_v24  ;;  %4355 = vst [vmem:[%s10038_s20 + $0x3f8] sm:$0xff] %v8447_v39  ;;  %v4663_v51 = vmax.f32 %v4662_v33, %v14089_v53  ;;  %v14171_v1 = vmax.f32 %v14153_v0, %v4414_v55  ;;  %v6889_v12 = vpop.xlane.xlu0 %6888  ;;  %v6587_v55 = vld [vmem:[#allocation5 + $0x18] sm:$0xff] }
 0x4a3   : > { %6149 = vst.msk [vmem:[#allocation3] sm:$0xff] %vm6116_vm9, %v14145_v49  ;;  %v4655_v57 = vmax.f32 %v4654_v21, %v14066_v45  ;;  %v4672_v56 = vmax.f32 %v4671_v23, %v14127_v10  ;;  %7192 = vst.msk [vmem:[#allocation5] sm:$0xff] %vm6116_vm9, %v7160_v26  ;;  %v7161_v33 = vadd.f32 %v6889_v12, %v6585_v9  ;;  %v14174_v21 = vld [vmem:[#allocation3 + $0x18] sm:$0xff]  ;;  %v14189_v12 = vld [vmem:[#allocation3 + $0x20] sm:$0xff] }
 0x4a4   : > { %6150 = vst.msk [vmem:[#allocation3 + $0x8] sm:$0xff] %vm6116_vm9, %v14151_v18  ;;  %4647 = vmax.xlane.f32.xlu0 %v4646_v29  ;;  %v4664_v5 = vmax.f32 %v4663_v51, %v14097_v20  ;;  %18040 = vst [vmem:[#allocation290_spill] sm:$0xff] %v14174_v21  ;;  %v6586_v51 = vld [vmem:[#allocation5 + $0x10] sm:$0xff]  ;;  %v6588_v9 = vld [vmem:[#allocation5 + $0x20] sm:$0xff] }
 0x4a5   : > { %4656 = vmax.xlane.f32.xlu1 %v4655_v57  ;;  %v4673_v39 = vmax.f32 %v4672_v56, %v14131_v62  ;;  %6151 = vst.msk [vmem:[#allocation3 + $0x10] sm:$0xff] %vm6116_vm9, %v14171_v1  ;;  %7193 = vst.msk [vmem:[#allocation5 + $0x8] sm:$0xff] %vm6116_vm9, %v7161_v33  ;;  %v4423_v26 = vpop.xlane.xlu1 %4422  ;;  %v18092_v62 = vld [vmem:[#allocation189_spill] sm:$0xff] }
 0x4a6   : > { %v14182_v29 = vmax.f32 %v14174_v21, %v4423_v26  ;;  %v6898_v57 = vpop.xlane.xlu0 %6897  ;;  %18042 = vst [vmem:[#allocation292_spill] sm:$0xff] %v14189_v12 }
 0x4a7   : > { %v7162_v56 = vadd.f32 %v6898_v57, %v6586_v51 }
 0x4a8   : > { %4665 = vmax.xlane.f32.xlu0 %v4664_v5  ;;  %18041 = vst [vmem:[#allocation291_spill] sm:$0xff] %v14182_v29  ;;  %6152 = vst.msk [vmem:[#allocation3 + $0x18] sm:$0xff] %vm6116_vm9, %v14182_v29 }
 0x4a9   : > { %4674 = vmax.xlane.f32.xlu1 %v4673_v39  ;;  %7194 = vst.msk [vmem:[#allocation5 + $0x10] sm:$0xff] %vm6116_vm9, %v7162_v56  ;;  %v6907_v33 = vpop.xlane.xlu1 %6906  ;;  %v14194_v39 = vld [vmem:[#allocation3 + $0x28] sm:$0xff] }
 0x4aa   : > { %v7163_v31 = vadd.f32 %v6907_v33, %v6587_v55  ;;  %v4432_v5 = vpop.xlane.xlu0 %4431  ;;  %18044 = vst [vmem:[#allocation294_spill] sm:$0xff] %v14194_v39 }
 0x4ab   : > { %v14192_v26 = vmax.f32 %v14189_v12, %v4432_v5  ;;  %v6589_v5 = vld [vmem:[#allocation5 + $0x28] sm:$0xff] }
 0x4ac   : > { %7195 = vst.msk [vmem:[#allocation5 + $0x18] sm:$0xff] %vm6116_vm9, %v7163_v31  ;;  %v14209_v31 = vld [vmem:[#allocation3 + $0x30] sm:$0xff] }
 0x4ad   : > { %18043 = vst [vmem:[#allocation293_spill] sm:$0xff] %v14192_v26  ;;  %6153 = vst.msk [vmem:[#allocation3 + $0x20] sm:$0xff] %vm6116_vm9, %v14192_v26  ;;  %v4441_v51 = vpop.xlane.xlu1 %4440 }
 0x4ae   : > { %v14202_v57 = vmax.f32 %v14194_v39, %v4441_v51  ;;  %v6916_v56 = vpop.xlane.xlu0 %6915  ;;  %18046 = vst [vmem:[#allocation296_spill] sm:$0xff] %v14209_v31  ;;  %v6591_v39 = vld [vmem:[#allocation5 + $0x38] sm:$0xff] }
 0x4af   : > { %v7164_v55 = vadd.f32 %v6916_v56, %v6588_v9  ;;  %v14219_v56 = vld [vmem:[#allocation3 + $0x38] sm:$0xff] }
 0x4b0   : > { %18045 = vst [vmem:[#allocation295_spill] sm:$0xff] %v14202_v57  ;;  %6154 = vst.msk [vmem:[#allocation3 + $0x28] sm:$0xff] %vm6116_vm9, %v14202_v57 }
 0x4b1   : > { %7196 = vst.msk [vmem:[#allocation5 + $0x20] sm:$0xff] %vm6116_vm9, %v7164_v55  ;;  %v6925_v44 = vpop.xlane.xlu1 %6924  ;;  %18048 = vst [vmem:[#allocation298_spill] sm:$0xff] %v14219_v56 }
 0x4b2   : > { %v4450_v23 = vpop.xlane.xlu0 %4449  ;;  %v7165_v51 = vadd.f32 %v6925_v44, %v6589_v5  ;;  %v6590_v5 = vld [vmem:[#allocation5 + $0x30] sm:$0xff] }
 0x4b3   : > { %v14212_v21 = vmax.f32 %v14209_v31, %v4450_v23 }
 0x4b4   : > { %7197 = vst.msk [vmem:[#allocation5 + $0x28] sm:$0xff] %vm6116_vm9, %v7165_v51  ;;  %v14232_v51 = vld [vmem:[#allocation3 + $0x40] sm:$0xff] }
 0x4b5   : > { %18047 = vst [vmem:[#allocation297_spill] sm:$0xff] %v14212_v21  ;;  %6155 = vst.msk [vmem:[#allocation3 + $0x30] sm:$0xff] %vm6116_vm9, %v14212_v21  ;;  %v4459_v55 = vpop.xlane.xlu1 %4458 }
 0x4b6   : > { %v14225_v23 = vmax.f32 %v14219_v56, %v4459_v55  ;;  %v6934_v33 = vpop.xlane.xlu0 %6933  ;;  %18050 = vst [vmem:[#allocation300_spill] sm:$0xff] %v14232_v51 }
 0x4b7   : > { %v7166_v9 = vadd.f32 %v6934_v33, %v6590_v5  ;;  %v14243_v33 = vld [vmem:[#allocation3 + $0x48] sm:$0xff] }
 0x4b8   : > { %18049 = vst [vmem:[#allocation299_spill] sm:$0xff] %v14225_v23  ;;  %6156 = vst.msk [vmem:[#allocation3 + $0x38] sm:$0xff] %vm6116_vm9, %v14225_v23 }
 0x4b9   : > { %7198 = vst.msk [vmem:[#allocation5 + $0x30] sm:$0xff] %vm6116_vm9, %v7166_v9  ;;  %18052 = vst [vmem:[#allocation302_spill] sm:$0xff] %v14243_v33  ;;  %v6592_v9 = vld [vmem:[#allocation5 + $0x40] sm:$0xff] }
 0x4ba   : > { %4875 = vperm.xlu1 %8909, %v14151_v18   ;;  %v4468_v55 = vpop.xlane.xlu0 %4467 }
 0x4bb   : > { %v14237_v35 = vmax.f32 %v14232_v51, %v4468_v55 }
 0x4bd   : > { %18051 = vst [vmem:[#allocation301_spill] sm:$0xff] %v14237_v35  ;;  %6157 = vst.msk [vmem:[#allocation3 + $0x40] sm:$0xff] %vm6116_vm9, %v14237_v35 }
 0x4be   : > { %4870 = vperm.xlu0 %8908, %v14145_v49   ;;  %4880 = vperm.xlu1 %8909, %v14171_v1   ;;  %v6943_v49 = vpop.xlane.xlu1 %6942  ;;  %v6952_v55 = vpop.xlane.xlu0 %6951 }
 0x4bf   : > { %v7167_v44 = vadd.f32 %v6943_v49, %v6591_v39  ;;  %v7168_v31 = vadd.f32 %v6952_v55, %v6592_v9  ;;  %v14257_v39 = vld [vmem:[#allocation3 + $0x50] sm:$0xff] }
 0x4c0   : > { %18054 = vst [vmem:[#allocation304_spill] sm:$0xff] %v14257_v39 }
 0x4c1   : > { %7199 = vst.msk [vmem:[#allocation5 + $0x38] sm:$0xff] %vm6116_vm9, %v7167_v44  ;;  %7200 = vst.msk [vmem:[#allocation5 + $0x40] sm:$0xff] %vm6116_vm9, %v7168_v31  ;;  %v6593_v44 = vld [vmem:[#allocation5 + $0x48] sm:$0xff]  ;;  %v6594_v31 = vld [vmem:[#allocation5 + $0x50] sm:$0xff] }
 0x4c2   : > { %4885 = vperm.xlu1 %8909, %v14182_v29   ;;  %v4477_v5 = vpop.xlane.xlu1 %4476 }
 0x4c3   : > { %v14248_v29 = vmax.f32 %v14243_v33, %v4477_v5 }
 0x4c5   : > { %18053 = vst [vmem:[#allocation303_spill] sm:$0xff] %v14248_v29  ;;  %6158 = vst.msk [vmem:[#allocation3 + $0x48] sm:$0xff] %vm6116_vm9, %v14248_v29  ;;  %4915 = vperm.xlu0 %8908, %v14248_v29   ;;  %v14267_v29 = vld [vmem:[#allocation3 + $0x58] sm:$0xff] }
 0x4c6   : > { %4890 = vperm.xlu1 %8909, %v14192_v26   ;;  %v4486_v5 = vpop.xlane.xlu0 %4485  ;;  %v6961_v56 = vpop.xlane.xlu1 %6960  ;;  %18056 = vst [vmem:[#allocation306_spill] sm:$0xff] %v14267_v29  ;;  %v18091_v26 = vld [vmem:[#allocation186_spill] sm:$0xff] }
 0x4c7   : > { %v14261_v9 = vmax.f32 %v14257_v39, %v4486_v5  ;;  %v7169_v55 = vadd.f32 %v6961_v56, %v6593_v44  ;;  %v14281_v44 = vld [vmem:[#allocation3 + $0x60] sm:$0xff] }
 0x4c8   : > { %18058 = vst [vmem:[#allocation308_spill] sm:$0xff] %v14281_v44  ;;  %v6596_v56 = vld [vmem:[#allocation5 + $0x60] sm:$0xff] }
 0x4c9   : > { %18055 = vst [vmem:[#allocation305_spill] sm:$0xff] %v14261_v9  ;;  %6159 = vst.msk [vmem:[#allocation3 + $0x50] sm:$0xff] %vm6116_vm9, %v14261_v9 }
 0x4ca   : > { %4895 = vperm.xlu1 %8909, %v14202_v57   ;;  %7201 = vst.msk [vmem:[#allocation5 + $0x48] sm:$0xff] %vm6116_vm9, %v7169_v55  ;;  %v4495_v33 = vpop.xlane.xlu1 %4494  ;;  %v6595_v55 = vld [vmem:[#allocation5 + $0x58] sm:$0xff] }
 0x4cb   : > { %v14272_v57 = vmax.f32 %v14267_v29, %v4495_v33 }
 0x4cd   : > { %18057 = vst [vmem:[#allocation307_spill] sm:$0xff] %v14272_v57  ;;  %6160 = vst.msk [vmem:[#allocation3 + $0x58] sm:$0xff] %vm6116_vm9, %v14272_v57  ;;  %4925 = vperm.xlu0 %8908, %v14272_v57  }
 0x4ce   : > { %4900 = vperm.xlu1 %8909, %v14212_v21  }
 0x4d2   : > { %4905 = vperm.xlu1 %8909, %v14225_v23   ;;  %v6970_v23 = vpop.xlane.xlu0 %6969 }
 0x4d3   : > { %v7170_v5 = vadd.f32 %v6970_v23, %v6594_v31  ;;  %v6979_v23 = vpop.xlane.xlu1 %6978 }
 0x4d4   : > { %v7171_v31 = vadd.f32 %v6979_v23, %v6595_v55  ;;  %v14303_v23 = vld [vmem:[#allocation3 + $0x70] sm:$0xff] }
 0x4d5   : > { %7202 = vst.msk [vmem:[#allocation5 + $0x50] sm:$0xff] %vm6116_vm9, %v7170_v5  ;;  %v14291_v5 = vld [vmem:[#allocation3 + $0x68] sm:$0xff]  ;;  %18062 = vst [vmem:[#allocation312_spill] sm:$0xff] %v14303_v23 }
 0x4d6   : > { %4910 = vperm.xlu1 %8909, %v14237_v35   ;;  %v4504_v49 = vpop.xlane.xlu0 %4503  ;;  %18060 = vst [vmem:[#allocation310_spill] sm:$0xff] %v14291_v5  ;;  %7203 = vst.msk [vmem:[#allocation5 + $0x58] sm:$0xff] %vm6116_vm9, %v7171_v31 }
 0x4d7   : > { %v14284_v33 = vmax.f32 %v14281_v44, %v4504_v49  ;;  %v4513_v57 = vpop.xlane.xlu1 %4512 }
 0x4d8   : > { %v14295_v49 = vmax.f32 %v14291_v5, %v4513_v57 }
 0x4d9   : > { %18059 = vst [vmem:[#allocation309_spill] sm:$0xff] %v14284_v33  ;;  %6161 = vst.msk [vmem:[#allocation3 + $0x60] sm:$0xff] %vm6116_vm9, %v14284_v33 }
 0x4da   : > { %4920 = vperm.xlu1 %8909, %v14261_v9   ;;  %v6988_v29 = vpop.xlane.xlu0 %6987  ;;  %18061 = vst [vmem:[#allocation311_spill] sm:$0xff] %v14295_v49  ;;  %6162 = vst.msk [vmem:[#allocation3 + $0x68] sm:$0xff] %vm6116_vm9, %v14295_v49  ;;  %4935 = vperm.xlu0 %8908, %v14295_v49   ;;  %v6597_v9 = vld [vmem:[#allocation5 + $0x68] sm:$0xff] }
 0x4db   : > { %v7172_v39 = vadd.f32 %v6988_v29, %v6596_v56  ;;  %v6598_v56 = vld [vmem:[#allocation5 + $0x70] sm:$0xff]  ;;  %v6599_v29 = vld [vmem:[#allocation5 + $0x78] sm:$0xff] }
 0x4dd   : > { %7204 = vst.msk [vmem:[#allocation5 + $0x60] sm:$0xff] %vm6116_vm9, %v7172_v39  ;;  %v14313_v39 = vld [vmem:[#allocation3 + $0x78] sm:$0xff] }
 0x4de   : > { %4930 = vperm.xlu1 %8909, %v14284_v33   ;;  %18064 = vst [vmem:[#allocation314_spill] sm:$0xff] %v14313_v39 }
 0x4df   : > { %v6997_v33 = vpop.xlane.xlu1 %6996 }
 0x4e0   : > { %v4522_v31 = vpop.xlane.xlu0 %4521  ;;  %v7173_v57 = vadd.f32 %v6997_v33, %v6597_v9  ;;  %v14325_v33 = vld [vmem:[#allocation3 + $0x80] sm:$0xff] }
 0x4e1   : > { %v14306_v44 = vmax.f32 %v14303_v23, %v4522_v31  ;;  %18066 = vst [vmem:[#allocation316_spill] sm:$0xff] %v14325_v33 }
 0x4e2   : > { %7205 = vst.msk [vmem:[#allocation5 + $0x68] sm:$0xff] %vm6116_vm9, %v7173_v57 }
 0x4e3   : > { %18063 = vst [vmem:[#allocation313_spill] sm:$0xff] %v14306_v44  ;;  %6163 = vst.msk [vmem:[#allocation3 + $0x70] sm:$0xff] %vm6116_vm9, %v14306_v44  ;;  %4940 = vperm.xlu1 %8909, %v14306_v44   ;;  %v4531_v55 = vpop.xlane.xlu1 %4530 }
 0x4e4   : > { %v7006_v49 = vpop.xlane.xlu0 %7005  ;;  %v14317_v5 = vmax.f32 %v14313_v39, %v4531_v55 }
 0x4e5   : > { %v7174_v31 = vadd.f32 %v7006_v49, %v6598_v56  ;;  %v14335_v56 = vld [vmem:[#allocation3 + $0x88] sm:$0xff] }
 0x4e6   : > { %18065 = vst [vmem:[#allocation315_spill] sm:$0xff] %v14317_v5  ;;  %6164 = vst.msk [vmem:[#allocation3 + $0x78] sm:$0xff] %vm6116_vm9, %v14317_v5  ;;  %4945 = vperm.xlu0 %8908, %v14317_v5   ;;  %v6601_v49 = vld [vmem:[#allocation5 + $0x88] sm:$0xff] }
 0x4e7   : > { %7206 = vst.msk [vmem:[#allocation5 + $0x70] sm:$0xff] %vm6116_vm9, %v7174_v31  ;;  %18068 = vst [vmem:[#allocation318_spill] sm:$0xff] %v14335_v56  ;;  %v6600_v31 = vld [vmem:[#allocation5 + $0x80] sm:$0xff] }
 0x4ec   : > { %v4540_v57 = vpop.xlane.xlu0 %4539 }
 0x4ed   : > { %v14328_v44 = vmax.f32 %v14325_v33, %v4540_v57  ;;  %v7015_v55 = vpop.xlane.xlu1 %7014 }
 0x4ee   : > { %v7175_v23 = vadd.f32 %v7015_v55, %v6599_v29  ;;  %v14347_v55 = vld [vmem:[#allocation3 + $0x90] sm:$0xff] }
 0x4ef   : > { %18067 = vst [vmem:[#allocation317_spill] sm:$0xff] %v14328_v44  ;;  %6165 = vst.msk [vmem:[#allocation3 + $0x80] sm:$0xff] %vm6116_vm9, %v14328_v44  ;;  %4950 = vperm.xlu1 %8909, %v14328_v44  }
 0x4f0   : > { %7207 = vst.msk [vmem:[#allocation5 + $0x78] sm:$0xff] %vm6116_vm9, %v7175_v23  ;;  %18070 = vst [vmem:[#allocation320_spill] sm:$0xff] %v14347_v55 }
 0x4f1   : > { %v4549_v9 = vpop.xlane.xlu1 %4548  ;;  %v7024_v5 = vpop.xlane.xlu0 %7023 }
 0x4f2   : > { %v14339_v57 = vmax.f32 %v14335_v56, %v4549_v9  ;;  %v7176_v39 = vadd.f32 %v7024_v5, %v6600_v31  ;;  %v6602_v31 = vld [vmem:[#allocation5 + $0x90] sm:$0xff]  ;;  %v6603_v5 = vld [vmem:[#allocation5 + $0x98] sm:$0xff] }
 0x4f4   : > { %18069 = vst [vmem:[#allocation319_spill] sm:$0xff] %v14339_v57  ;;  %6166 = vst.msk [vmem:[#allocation3 + $0x88] sm:$0xff] %vm6116_vm9, %v14339_v57  ;;  %4955 = vperm.xlu0 %8908, %v14339_v57  }
 0x4f5   : > { %7208 = vst.msk [vmem:[#allocation5 + $0x80] sm:$0xff] %vm6116_vm9, %v7176_v39  ;;  %v14357_v39 = vld [vmem:[#allocation3 + $0x98] sm:$0xff] }
 0x4f6   : > { %18072 = vst [vmem:[#allocation322_spill] sm:$0xff] %v14357_v39 }
 0x4fa   : > { %v4558_v23 = vpop.xlane.xlu0 %4557  ;;  %v7033_v44 = vpop.xlane.xlu1 %7032 }
 0x4fb   : > { %v14350_v33 = vmax.f32 %v14347_v55, %v4558_v23  ;;  %v7177_v9 = vadd.f32 %v7033_v44, %v6601_v49  ;;  %v14369_v49 = vld [vmem:[#allocation3 + $0xa0] sm:$0xff] }
 0x4fc   : > { %18074 = vst [vmem:[#allocation324_spill] sm:$0xff] %v14369_v49 }
 0x4fd   : > { %18071 = vst [vmem:[#allocation321_spill] sm:$0xff] %v14350_v33  ;;  %6167 = vst.msk [vmem:[#allocation3 + $0x90] sm:$0xff] %vm6116_vm9, %v14350_v33  ;;  %4960 = vperm.xlu1 %8909, %v14350_v33  }
 0x4fe   : > { %7209 = vst.msk [vmem:[#allocation5 + $0x88] sm:$0xff] %vm6116_vm9, %v7177_v9 }
 0x4ff   : > { %v4567_v29 = vpop.xlane.xlu1 %4566  ;;  %v7042_v57 = vpop.xlane.xlu0 %7041 }
 0x500   : > { %v14361_v56 = vmax.f32 %v14357_v39, %v4567_v29  ;;  %v7178_v23 = vadd.f32 %v7042_v57, %v6602_v31  ;;  %v14379_v31 = vld [vmem:[#allocation3 + $0xa8] sm:$0xff] }
 0x501   : > { %18076 = vst [vmem:[#allocation326_spill] sm:$0xff] %v14379_v31  ;;  %v6605_v57 = vld [vmem:[#allocation5 + $0xa8] sm:$0xff] }
 0x502   : > { %18073 = vst [vmem:[#allocation323_spill] sm:$0xff] %v14361_v56  ;;  %6168 = vst.msk [vmem:[#allocation3 + $0x98] sm:$0xff] %vm6116_vm9, %v14361_v56  ;;  %4965 = vperm.xlu0 %8908, %v14361_v56  }
 0x503   : > { %7210 = vst.msk [vmem:[#allocation5 + $0x90] sm:$0xff] %vm6116_vm9, %v7178_v23  ;;  %v6604_v23 = vld [vmem:[#allocation5 + $0xa0] sm:$0xff] }
 0x509   : > { %v7051_v33 = vpop.xlane.xlu1 %7050 }
 0x50a   : > { %v4576_v9 = vpop.xlane.xlu0 %4575  ;;  %v7179_v29 = vadd.f32 %v7051_v33, %v6603_v5  ;;  %v14391_v5 = vld [vmem:[#allocation3 + $0xb0] sm:$0xff] }
 0x50b   : > { %v14372_v55 = vmax.f32 %v14369_v49, %v4576_v9  ;;  %18078 = vst [vmem:[#allocation328_spill] sm:$0xff] %v14391_v5  ;;  %v18082_v33 = vld [vmem:[#allocation66_spill] sm:$0xff] }
 0x50c   : > { %7211 = vst.msk [vmem:[#allocation5 + $0x98] sm:$0xff] %vm6116_vm9, %v7179_v29  ;;  %vm6514_vm12 = vcmp.eq.s32.totalorder %v18082_v33, %v13972_v42  ;;  %vm6554_vm15 = vcmp.eq.s32.totalorder %v18082_v33, %v14043_v15 }
 0x50d   : > { %18075 = vst [vmem:[#allocation325_spill] sm:$0xff] %v14372_v55  ;;  %6169 = vst.msk [vmem:[#allocation3 + $0xa0] sm:$0xff] %vm6116_vm9, %v14372_v55  ;;  %4970 = vperm.xlu1 %8909, %v14372_v55  }
 0x50e   : > { %v4585_v44 = vpop.xlane.xlu1 %4584  ;;  %v7060_v56 = vpop.xlane.xlu0 %7059 }
 0x50f   : > { %v14383_v39 = vmax.f32 %v14379_v31, %v4585_v44  ;;  %v7180_v9 = vadd.f32 %v7060_v56, %v6604_v23  ;;  %v18080_v44 = vld [vmem:[#allocation63_spill] sm:$0xff]  ;;  %v18081_v56 = vld [vmem:[#allocation64_spill] sm:$0xff] }
 0x510   : > { %vm6512_vm10 = vcmp.eq.s32.totalorder %v18080_v44, %v13972_v42  ;;  %vm6513_vm11 = vcmp.eq.s32.totalorder %v18081_v56, %v13972_v42  ;;  %vm6520_vm13 = vcmp.eq.s32.totalorder %v18080_v44, %v13963_v22  ;;  %vm6521_vm14 = vcmp.eq.s32.totalorder %v18081_v56, %v13963_v22  ;;  %v18085_v31 = vld [vmem:[#allocation176_spill] sm:$0xff] }
 0x511   : > { %18077 = vst [vmem:[#allocation327_spill] sm:$0xff] %v14383_v39  ;;  %6170 = vst.msk [vmem:[#allocation3 + $0xa8] sm:$0xff] %vm6116_vm9, %v14383_v39  ;;  %4975 = vperm.xlu0 %8908, %v14383_v39   ;;  %vm6528_vm0 = vcmp.eq.s32.totalorder %v18080_v44, %v14012_v27  ;;  %vm6529_vm1 = vcmp.eq.s32.totalorder %v18081_v56, %v14012_v27  ;;  %vm6536_vm4 = vcmp.eq.s32.totalorder %v18080_v44, %v13999_v13 }
 0x512   : > { %7212 = vst.msk [vmem:[#allocation5 + $0xa0] sm:$0xff] %vm6116_vm9, %v7180_v9  ;;  %vm6537_vm6 = vcmp.eq.s32.totalorder %v18081_v56, %v13999_v13  ;;  %vm6544_vm8 = vcmp.eq.s32.totalorder %v18080_v44, %v14053_v32  ;;  %vm6552_vm5 = vcmp.eq.s32.totalorder %v18080_v44, %v14043_v15  ;;  %vm6553_vm3 = vcmp.eq.s32.totalorder %v18081_v56, %v14043_v15 }
 0x513   : > { %v6816_v12 = vsel %vm6528_vm0, %v18091_v26, 0.0  ;;  %v6817_v10 = vsel %vm6529_vm1, %v18092_v62, 0.0  ;;  %v6824_v45 = vsel %vm6536_vm4, %v18093_v11, 0.0  ;;  %v14493_v62 = vld [vmem:[#allocation3 + $0xc8] sm:$0xff]  ;;  %v18097_v26 = vld [vmem:[#allocation204_spill] sm:$0xff]  ;;  %vm6568_vm0 = vcmp.eq.s32.totalorder %v18080_v44, %v14080_v14 }
 0x514   : > { %18096 = vst [vmem:[#allocation333_spill] sm:$0xff] %v14493_v62  ;;  %v7097_v53 = vadd.f32 %v6817_v10, %v6816_v12  ;;  %vm18106_vm1 = vcmp.eq.s32.totalorder %v18082_v33, %v13999_v13 }
 0x517   : > { %v4594_v29 = vpop.xlane.xlu0 %4593 }
 0x518   : > { %v14394_v55 = vmax.f32 %v14391_v5, %v4594_v29  ;;  %v6606_v29 = vld [vmem:[#allocation5 + $0xb0] sm:$0xff]  ;;  %v6801_v5 = vsel %vm6513_vm11, %v18085_v31, 0.0 }
 0x519   : > { %v7069_v23 = vpop.xlane.xlu1 %7068 }
 0x51a   : > { %18079 = vst [vmem:[#allocation329_spill] sm:$0xff] %v14394_v55  ;;  %v7181_v9 = vadd.f32 %v7069_v23, %v6605_v57  ;;  %6171 = vst.msk [vmem:[#allocation3 + $0xb0] sm:$0xff] %vm6116_vm9, %v14394_v55  ;;  %4980 = vperm.xlu1 %8909, %v14394_v55   ;;  %v14417_v57 = vld [vmem:[#allocation3 + $0xb8] sm:$0xff]  ;;  %v18084_v23 = vld [vmem:[#allocation173_spill] sm:$0xff] }
 0x51b   : > { %18083 = vst [vmem:[#allocation330_spill] sm:$0xff] %v14417_v57  ;;  %v6800_v39 = vsel %vm6512_vm10, %v18084_v23, 0.0  ;;  %v18086_v55 = vld [vmem:[#allocation67_spill] sm:$0xff]  ;;  %vm6545_vm10 = vcmp.eq.s32.totalorder %v18081_v56, %v14053_v32  ;;  %v18100_v23 = vld [vmem:[#allocation185_spill] sm:$0xff] }
 0x51c   : > { %7213 = vst.msk [vmem:[#allocation5 + $0xa8] sm:$0xff] %vm6116_vm9, %v7181_v9  ;;  %v7079_v21 = vadd.f32 %v6801_v5, %v6800_v39  ;;  %vm6531_vm2 = vcmp.eq.s32.totalorder %v18086_v55, %v14012_v27  ;;  %vm6539_vm7 = vcmp.eq.s32.totalorder %v18086_v55, %v13999_v13  ;;  %vm6555_vm11 = vcmp.eq.s32.totalorder %v18086_v55, %v14043_v15  ;;  %v18089_v39 = vld [vmem:[#allocation182_spill] sm:$0xff]  ;;  %v18090_v5 = vld [vmem:[#allocation184_spill] sm:$0xff] }
 0x51d   : > { %v7078_v49 = vpop.xlane.xlu0 %7077  ;;  %v6833_v11 = vsel %vm6545_vm10, %v18097_v26, 0.0  ;;  %vm18111_vm4 = vcmp.eq.s32.totalorder %v18086_v55, %v13972_v42  ;;  %vm6517_vm10 = vcmp.eq.s32.totalorder %v17685_v60, %v13972_v42 }
 0x51e   : > { %v4603_v35 = vpop.xlane.xlu1 %4602  ;;  %v7182_v51 = vadd.f32 %v7078_v49, %v6606_v29  ;;  %v6808_v49 = vsel %vm6520_vm13, %v18089_v39, 0.0  ;;  %v6809_v29 = vsel %vm6521_vm14, %v18090_v5, 0.0  ;;  %vm6547_vm13 = vcmp.eq.s32.totalorder %v18086_v55, %v14053_v32  ;;  %v18099_v39 = vld [vmem:[#allocation177_spill] sm:$0xff] }
 0x51f   : > { %v14443_v9 = vmax.f32 %v14417_v57, %v4603_v35  ;;  %v14456_v35 = vld [vmem:[#allocation3 + $0xc0] sm:$0xff]  ;;  %v18095_v57 = vld [vmem:[#allocation202_spill] sm:$0xff]  ;;  %v6802_v31 = vsel %vm6514_vm12, %v18099_v39, 0.0  ;;  %vm18101_vm14 = vcmp.eq.s32.totalorder %v18082_v33, %v13963_v22  ;;  %v7088_v20 = vadd.f32 %v6809_v29, %v6808_v49  ;;  %v18105_v29 = vld [vmem:[#allocation203_spill] sm:$0xff] }
 0x520   : > { %7214 = vst.msk [vmem:[#allocation5 + $0xb0] sm:$0xff] %vm6116_vm9, %v7182_v51  ;;  %18088 = vst [vmem:[#allocation332_spill] sm:$0xff] %v14456_v35  ;;  %v6825_v51 = vsel %vm6537_vm6, %v18094_v4, 0.0  ;;  %v6840_v4 = vsel %vm6552_vm5, %v17983_v28, 0.0  ;;  %v6810_v26 = vsel %vm18101_vm14, %v18100_v23, 0.0  ;;  %vm18104_vm12 = vcmp.eq.s32.totalorder %v18082_v33, %v14012_v27 }
 0x521   : > { %18087 = vst [vmem:[#allocation331_spill] sm:$0xff] %v14443_v9  ;;  %6172 = vst.msk [vmem:[#allocation3 + $0xb8] sm:$0xff] %vm6116_vm9, %v14443_v9  ;;  %4985 = vperm.xlu0 %8908, %v14443_v9   ;;  %v6832_v9 = vsel %vm6544_vm8, %v18095_v57, 0.0  ;;  %v6841_v57 = vsel %vm6553_vm3, %v17982_v50, 0.0  ;;  %v7106_v50 = vadd.f32 %v6825_v51, %v6824_v45  ;;  %v6818_v49 = vsel %vm18104_vm12, %v18103_v59, 0.0 }
 0x522   : > { %v4612_v43 = vpop.xlane.xlu0 %4611  ;;  %v6826_v45 = vsel %vm18106_vm1, %v18105_v29, 0.0  ;;  %v7115_v10 = vadd.f32 %v6833_v11, %v6832_v9  ;;  %v7124_v12 = vadd.f32 %v6841_v57, %v6840_v4  ;;  %v7080_v51 = vadd.f32 %v7079_v21, %v6802_v31  ;;  %v14549_v4 = vld [vmem:[#allocation3 + $0xd0] sm:$0xff]  ;;  %v14551_v11 = vld [vmem:[#allocation3 + $0xd8] sm:$0xff] }
 0x523   : > { %v14508_v5 = vmax.f32 %v14456_v35, %v4612_v43  ;;  %vm18107_vm3 = vcmp.eq.s32.totalorder %v18082_v33, %v14053_v32  ;;  %v6842_v43 = vsel %vm6554_vm15, %v18002_v38, 0.0  ;;  %18108 = vst [vmem:[#allocation336_spill] sm:$0xff] %v14549_v4  ;;  %18109 = vst [vmem:[#allocation337_spill] sm:$0xff] %v14551_v11  ;;  %v18110_v21 = vld [vmem:[#allocation178_spill] sm:$0xff]  ;;  %vm6569_vm15 = vcmp.eq.s32.totalorder %v18081_v56, %v14080_v14  ;;  %v18112_v9 = vld [vmem:[#allocation187_spill] sm:$0xff] }
 0x524   : > { %v6803_v31 = vsel %vm18111_vm4, %v18110_v21, 0.0  ;;  %vm6570_vm5 = vcmp.eq.s32.totalorder %v18082_v33, %v14080_v14  ;;  %vm6571_vm6 = vcmp.eq.s32.totalorder %v18086_v55, %v14080_v14  ;;  %v7089_v57 = vadd.f32 %v7088_v20, %v6810_v26  ;;  %v18127_v33 = vld [vmem:[#allocation234_spill] sm:$0xff] }
 0x525   : > { %18098 = vst [vmem:[#allocation334_spill] sm:$0xff] %v14508_v5  ;;  %v4621_v28 = vpop.xlane.xlu1 %4620  ;;  %6173 = vst.msk [vmem:[#allocation3 + $0xc0] sm:$0xff] %vm6116_vm9, %v14508_v5  ;;  %4990 = vperm.xlu1 %8909, %v14508_v5   ;;  %vm18113_vm8 = vcmp.eq.s32.totalorder %v18086_v55, %v13963_v22  ;;  %v7125_v29 = vadd.f32 %v7124_v12, %v6842_v43  ;;  %v7081_v21 = vadd.f32 %v7080_v51, %v6803_v31  ;;  %v14611_v51 = vld [vmem:[#allocation3 + $0xe8] sm:$0xff] }
 0x526   : > { %v14525_v39 = vmax.f32 %v14493_v62, %v4621_v28  ;;  %v6834_v28 = vsel %vm18107_vm3, %v17981_v40, 0.0  ;;  %v6811_v5 = vsel %vm18113_vm8, %v18112_v9, 0.0  ;;  %v7107_v62 = vadd.f32 %v7106_v50, %v6826_v45  ;;  %18117 = vst [vmem:[#allocation341_spill] sm:$0xff] %v14611_v51 }
 0x527   : > { %v7116_v40 = vadd.f32 %v7115_v10, %v6834_v28  ;;  %v6819_v20 = vsel %vm6531_vm2, %v17977_v54, 0.0  ;;  %v6827_v50 = vsel %vm6539_vm7, %v17978_v6, 0.0  ;;  %v6857_v26 = vsel %vm6569_vm15, %v17995_v8, 0.0  ;;  %v18133_v8 = vld [vmem:[#allocation30_spill] sm:$0xff] }
 0x528   : > { %18102 = vst [vmem:[#allocation335_spill] sm:$0xff] %v14525_v39  ;;  %6174 = vst.msk [vmem:[#allocation3 + $0xc8] sm:$0xff] %vm6116_vm9, %v14525_v39  ;;  %4995 = vperm.xlu0 %8908, %v14525_v39   ;;  %v7098_v39 = vadd.f32 %v7097_v53, %v6818_v49  ;;  %v6843_v53 = vsel %vm6555_vm11, %v18022_v48, 0.0  ;;  %v14603_v49 = vld [vmem:[#allocation3 + $0xe0] sm:$0xff]  ;;  %v7090_v45 = vadd.f32 %v7089_v57, %v6811_v5  ;;  %v6835_v12 = vsel %vm6547_vm13, %v18001_v47, 0.0 }
 0x529   : > { %18116 = vst [vmem:[#allocation340_spill] sm:$0xff] %v14603_v49  ;;  %vm6516_vm2 = vcmp.eq.s32.totalorder %v17680_v63, %v13972_v42  ;;  %v7108_v28 = vadd.f32 %v7107_v62, %v6827_v50  ;;  %v7117_v31 = vadd.f32 %v7116_v40, %v6835_v12  ;;  %v7126_v43 = vadd.f32 %v7125_v29, %v6843_v53  ;;  %v18119_v29 = vld [vmem:[#allocation235_spill] sm:$0xff]  ;;  %v14639_v53 = vld [vmem:[#allocation3 + $0xf0] sm:$0xff] }
 0x52a   : > { %v7099_v10 = vadd.f32 %v7098_v39, %v6819_v20  ;;  %v14618_v39 = vsel %vm6570_vm5, %v18012_v30, 0.0  ;;  %vm6524_vm7 = vcmp.eq.s32.totalorder %v17680_v63, %v13963_v22  ;;  %v14631_v40 = vsel %vm6571_vm6, %v18029_v7, 0.0  ;;  %18121 = vst [vmem:[#allocation344_spill] sm:$0xff] %v14639_v53  ;;  %v18132_v30 = vld [vmem:[#allocation29_spill] sm:$0xff] }
 0x52b   : > { %v4630_v35 = vpop.xlane.xlu0 %4629  ;;  %v6812_v20 = vsel %vm6524_vm7, %v18119_v29, 0.0  ;;  %vm6532_vm11 = vcmp.eq.s32.totalorder %v17680_v63, %v14012_v27  ;;  %vm6525_vm13 = vcmp.eq.s32.totalorder %v17685_v60, %v13963_v22  ;;  %vm6540_vm14 = vcmp.eq.s32.totalorder %v17680_v63, %v13999_v13 }
 0x52c   : > { %v4639_v38 = vpop.xlane.xlu1 %4638  ;;  %v14568_v59 = vmax.f32 %v14549_v4, %v4630_v35  ;;  %v6804_v35 = vsel %vm6516_vm2, %v13712_v41, 0.0  ;;  %v6813_v56 = vsel %vm6525_vm13, %v18127_v33, 0.0  ;;  %vm6556_vm12 = vcmp.eq.s32.totalorder %v17680_v63, %v14043_v15 }
 0x52d   : > { %v14571_v23 = vmax.f32 %v14551_v11, %v4639_v38  ;;  %v6856_v38 = vsel %vm6568_vm0, %v17996_v36, 0.0  ;;  %vm6548_vm0 = vcmp.eq.s32.totalorder %v17680_v63, %v14053_v32  ;;  %vm6533_vm1 = vcmp.eq.s32.totalorder %v17685_v60, %v14012_v27 }
 0x52e   : > { %18114 = vst [vmem:[#allocation338_spill] sm:$0xff] %v14568_v59  ;;  %6175 = vst.msk [vmem:[#allocation3 + $0xd0] sm:$0xff] %vm6116_vm9, %v14568_v59  ;;  %5000 = vperm.xlu1 %8909, %v14568_v59   ;;  %v14620_v5 = vadd.f32 %v6857_v26, %v6856_v38  ;;  %v14641_v38 = vadd.f32 %v7081_v21, %v6804_v35  ;;  %v18124_v21 = vld [vmem:[#allocation175_spill] sm:$0xff]  ;;  %v6836_v11 = vsel %vm6548_vm0, %v13970_v2, 0.0  ;;  %v18141_v2 = vld [vmem:[#allocation25_spill] sm:$0xff] }
 0x52f   : > { %18115 = vst [vmem:[#allocation339_spill] sm:$0xff] %v14571_v23  ;;  %6176 = vst.msk [vmem:[#allocation3 + $0xd8] sm:$0xff] %vm6116_vm9, %v14571_v23  ;;  %5005 = vperm.xlu0 %8908, %v14571_v23   ;;  %v6820_v35 = vsel %vm6532_vm11, %v18124_v21, 0.0  ;;  %vm6541_vm3 = vcmp.eq.s32.totalorder %v17685_v60, %v13999_v13  ;;  %vm6549_vm4 = vcmp.eq.s32.totalorder %v17685_v60, %v14053_v32 }
 0x530   : > { %vm6557_vm15 = vcmp.eq.s32.totalorder %v17685_v60, %v14043_v15 }
 0x531   : > { %v4648_v23 = vpop.xlane.xlu0 %4647 }
 0x532   : > { %v14625_v57 = vmax.f32 %v14603_v49, %v4648_v23  ;;  %v4657_v62 = vpop.xlane.xlu1 %4656  ;;  %v18122_v23 = vld [vmem:[#allocation181_spill] sm:$0xff]  ;;  %v18125_v49 = vld [vmem:[#allocation92_spill] sm:$0xff] }
 0x533   : > { %v14637_v50 = vmax.f32 %v14611_v51, %v4657_v62  ;;  %v14644_v26 = vsel %vm6517_vm10, %v18122_v23, 0.0  ;;  %v14653_v62 = vld [vmem:[#allocation3 + $0xf8] sm:$0xff]  ;;  %v6828_v59 = vsel %vm6540_vm14, %v18125_v49, 0.0  ;;  %v18129_v51 = vld [vmem:[#allocation269_spill] sm:$0xff] }
 0x534   : > { %18118 = vst [vmem:[#allocation342_spill] sm:$0xff] %v14625_v57  ;;  %6177 = vst.msk [vmem:[#allocation3 + $0xe0] sm:$0xff] %vm6116_vm9, %v14625_v57  ;;  %5010 = vperm.xlu1 %8909, %v14625_v57   ;;  %v7091_v57 = vadd.f32 %v7090_v45, %v6812_v20  ;;  %v14678_v45 = vadd.f32 %v7099_v10, %v6820_v35  ;;  %v6844_v20 = vsel %vm6556_vm12, %v14010_v37, 0.0  ;;  %v14689_v44 = vsel %vm6533_vm1, %v18129_v51, 0.0  ;;  %v18134_v37 = vld [vmem:[#allocation166_spill] sm:$0xff] }
 0x535   : > { %18120 = vst [vmem:[#allocation343_spill] sm:$0xff] %v14637_v50  ;;  %18123 = vst [vmem:[#allocation345_spill] sm:$0xff] %v14653_v62  ;;  %5015 = vperm.xlu0 %8908, %v14637_v50   ;;  %v4666_v12 = vpop.xlane.xlu0 %4665  ;;  %v6829_v10 = vsel %vm6541_vm3, %v13947_v19, 0.0  ;;  %v14698_v35 = vadd.f32 %v7117_v31, %v6836_v11  ;;  %v6845_v31 = vsel %vm6557_vm15, %v14022_v16, 0.0  ;;  %vm6526_vm5 = vcmp.eq.s32.totalorder %v18134_v37, %v13963_v22 }
 0x536   : > { %6178 = vst.msk [vmem:[#allocation3 + $0xe8] sm:$0xff] %vm6116_vm9, %v14637_v50  ;;  %v14669_v4 = vmax.f32 %v14639_v53, %v4666_v12  ;;  %v4675_v55 = vpop.xlane.xlu1 %4674  ;;  %v14701_v12 = vsel %vm6549_vm4, %v13981_v3, 0.0  ;;  %v18131_v53 = vld [vmem:[#allocation27_spill] sm:$0xff]  ;;  %v7092_v16 = vadd.f32 %v7091_v57, %v6813_v56  ;;  %v18140_v3 = vld [vmem:[#allocation24_spill] sm:$0xff]  ;;  %vm6542_vm8 = vcmp.eq.s32.totalorder %v18134_v37, %v13999_v13 }
 0x537   : > { %v14676_v50 = vmax.f32 %v14653_v62, %v4675_v55  ;;  %v7109_v55 = vadd.f32 %v7108_v28, %v6828_v59  ;;  %v7127_v28 = vadd.f32 %v7126_v43, %v6844_v20  ;;  %v18130_v62 = vsub.f32 %v14134_v61, %v14151_v18  ;;  %v18135_v43 = vld [vmem:[#allocation167_spill] sm:$0xff]  ;;  %v18143_v56 = vld [vmem:[#allocation28_spill] sm:$0xff] }
 0x538   : > { %18126 = vst [vmem:[#allocation346_spill] sm:$0xff] %v14669_v4  ;;  %6179 = vst.msk [vmem:[#allocation3 + $0xf0] sm:$0xff] %vm6116_vm9, %v14669_v4  ;;  %5020 = vperm.xlu1 %8909, %v14669_v4   ;;  %vm6527_vm6 = vcmp.eq.s32.totalorder %v18135_v43, %v13963_v22  ;;  %v18136_v61 = vsub.f32 %v14153_v0, %v14171_v1  ;;  %v18142_v22 = vld [vmem:[#allocation26_spill] sm:$0xff]  ;;  %vm6543_vm2 = vcmp.eq.s32.totalorder %v18135_v43, %v13999_v13  ;;  %v18147_v13 = vld [vmem:[#allocation239_spill] sm:$0xff] }
 0x539   : > { %18128 = vst [vmem:[#allocation347_spill] sm:$0xff] %v14676_v50  ;;  %6180 = vst.msk [vmem:[#allocation3 + $0xf8] sm:$0xff] %vm6116_vm9, %v14676_v50  ;;  %v4742_v4 = vmul.f32 1.442695, %v18130_v62  ;;  %vm6558_vm7 = vcmp.eq.s32.totalorder %v18134_v37, %v14043_v15  ;;  %vm6559_vm10 = vcmp.eq.s32.totalorder %v18135_v43, %v14043_v15  ;;  %vm6518_vm11 = vcmp.eq.s32.totalorder %v18134_v37, %v13972_v42 }
 0x53a   : > { %v14705_v59 = vpop.permute.xlu1 %4875  ;;  %v4744_v18 = vmul.f32 1.442695, %v18136_v61  ;;  %v7110_v61 = vadd.f32 %v7109_v55, %v6829_v10  ;;  %vm6519_vm13 = vcmp.eq.s32.totalorder %v18135_v43, %v13972_v42  ;;  %v7083_v42 = vadd.f32 %v14641_v38, %v14644_v26 }
 0x53b   : > { %v5036_v7 = vsub.f32 %v18131_v53, %v14705_v59  ;;  %v5037_v11 = vsub.f32 %v18132_v30, %v14705_v59  ;;  %v5038_v36 = vsub.f32 %v18133_v8, %v14705_v59  ;;  %v18138_v53 = vld [vmem:[#allocation236_spill] sm:$0xff]  ;;  %v18139_v30 = vld [vmem:[#allocation97_spill] sm:$0xff]  ;;  %8910 = vpow2.f32 %v4742_v4 }
 0x53c   : > { %v6814_v20 = vsel %vm6526_vm5, %v18138_v53, 0.0  ;;  %v6815_v48 = vsel %vm6527_vm6, %v18139_v30, 0.0  ;;  %8912 = vpow2.f32 %v4744_v18  ;;  %vm6534_vm14 = vcmp.eq.s32.totalorder %v18134_v37, %v14012_v27 }
 0x53d   : > { %v14724_v62 = vpop.permute.xlu0 %4870  ;;  %v5300_v19 = vmul.f32 1.442695, %v5036_v7  ;;  %v5302_v1 = vmul.f32 1.442695, %v5037_v11  ;;  %v5304_v30 = vmul.f32 1.442695, %v5038_v36  ;;  %v7093_v4 = vadd.f32 %v7092_v16, %v6814_v20 }
 0x53e   : > { %18137 = vst [vmem:[#allocation27_spill] sm:$0xff] %v14724_v62  ;;  %v5028_v8 = vsub.f32 %v18140_v3, %v14724_v62  ;;  %v5029_v47 = vsub.f32 %v18141_v2, %v14724_v62  ;;  %v14732_v49 = vpop.permute.xlu1 %4880  ;;  %v5030_v0 = vsub.f32 %v18142_v22, %v14724_v62  ;;  %v5031_v57 = vsub.f32 %v18143_v56, %v14724_v62  ;;  %v18144_v3 = vld [vmem:[#allocation82_spill] sm:$0xff]  ;;  %v18145_v22 = vld [vmem:[#allocation31_spill] sm:$0xff] }
 0x53f   : > { %v6830_v2 = vsel %vm6542_vm8, %v13955_v34, 0.0  ;;  %v5032_v7 = vsub.f32 %v18144_v3, %v14724_v62  ;;  %v5039_v11 = vsub.f32 %v18145_v22, %v14705_v59  ;;  %8914 = vpow2.f32 %v5300_v19 }
 0x540   : > { %v5284_v53 = vmul.f32 1.442695, %v5028_v8  ;;  %v5286_v6 = vmul.f32 1.442695, %v5029_v47  ;;  %v6831_v36 = vsel %vm6543_vm2, %v13961_v17, 0.0  ;;  %v5040_v56 = vsub.f32 %v18147_v13, %v14705_v59  ;;  %v18148_v8 = vld [vmem:[#allocation32_spill] sm:$0xff] }
 0x541   : > { %v5288_v10 = vmul.f32 1.442695, %v5030_v0  ;;  %8916 = vpow2.f32 %v5302_v1  ;;  %v7111_v18 = vadd.f32 %v7110_v61, %v6830_v2  ;;  %v5290_v34 = vmul.f32 1.442695, %v5031_v57  ;;  %v18149_v47 = vld [vmem:[#allocation33_spill] sm:$0xff]  ;;  %v18150_v1 = vld [vmem:[#allocation34_spill] sm:$0xff] }
 0x542   : > { %v14747_v55 = vpop.permute.xlu1 %4885  ;;  %8918 = vpow2.f32 %v5304_v30  ;;  %v5044_v16 = vsub.f32 %v18148_v8, %v14732_v49  ;;  %v5292_v19 = vmul.f32 1.442695, %v5032_v7  ;;  %v5045_v20 = vsub.f32 %v18149_v47, %v14732_v49  ;;  %v18151_v2 = vld [vmem:[#allocation36_spill] sm:$0xff]  ;;  %v18152_v7 = vld [vmem:[#allocation105_spill] sm:$0xff] }
 0x543   : > { %18146 = vst [vmem:[#allocation29_spill] sm:$0xff] %v14747_v55  ;;  %8920 = vpow2.f32 %v5284_v53  ;;  %v5306_v0 = vmul.f32 1.442695, %v5039_v11  ;;  %v5046_v61 = vsub.f32 %v18150_v1, %v14732_v49  ;;  %v7128_v30 = vadd.f32 %v7127_v28, %v6845_v31  ;;  %v18154_v31 = vld [vmem:[#allocation35_spill] sm:$0xff] }
 0x544   : > { %8922 = vpow2.f32 %v5286_v6  ;;  %v5308_v57 = vmul.f32 1.442695, %v5040_v56  ;;  %v5047_v3 = vsub.f32 %v18151_v2, %v14732_v49  ;;  %v14766_v53 = vadd.f32 %v7093_v4, %v6815_v48  ;;  %v18155_v4 = vld [vmem:[#allocation37_spill] sm:$0xff]  ;;  %v18158_v1 = vld [vmem:[#allocation39_spill] sm:$0xff] }
 0x545   : > { %8924 = vpow2.f32 %v5288_v10  ;;  %v5048_v13 = vsub.f32 %v18152_v7, %v14732_v49  ;;  %v5316_v8 = vmul.f32 1.442695, %v5044_v16  ;;  %v14770_v6 = vadd.f32 %v7111_v18, %v6831_v36  ;;  %v14772_v11 = vpop.eup %8910 }
 0x546   : > { %v14764_v22 = vpop.permute.xlu1 %4890  ;;  %8926 = vpow2.f32 %v5290_v34  ;;  %18153 = vst [vmem:[#allocation30_spill] sm:$0xff] %v14772_v11  ;;  %v5318_v28 = vmul.f32 1.442695, %v5045_v20  ;;  %v5052_v10 = vsub.f32 %v18154_v31, %v14747_v55  ;;  %v6846_v48 = vsel %vm6558_vm7, %v14029_v46, 0.0  ;;  %v14786_v18 = vpop.eup %8912 }
 0x547   : > { %8928 = vpow2.f32 %v5292_v19  ;;  %v5320_v34 = vmul.f32 1.442695, %v5046_v61  ;;  %v5053_v56 = vsub.f32 %v18155_v4, %v14747_v55  ;;  %v6847_v36 = vsel %vm6559_vm10, %v14033_v24, 0.0  ;;  %18156 = vst [vmem:[#allocation24_spill] sm:$0xff] %v14786_v18  ;;  %v18157_v19 = vld [vmem:[#allocation38_spill] sm:$0xff]  ;;  %v18165_v18 = vld [vmem:[#allocation273_spill] sm:$0xff] }
 0x548   : > { %8930 = vpow2.f32 %v5306_v0  ;;  %v5322_v16 = vmul.f32 1.442695, %v5047_v3  ;;  %v5054_v47 = vsub.f32 %v18157_v19, %v14747_v55  ;;  %v5324_v0 = vmul.f32 1.442695, %v5048_v13 }
 0x549   : > { %8932 = vpow2.f32 %v5308_v57  ;;  %v14792_v20 = vpop.eup %8914  ;;  %v5055_v61 = vsub.f32 %v18158_v1, %v14747_v55  ;;  %v7129_v2 = vadd.f32 %v7128_v30, %v6846_v48  ;;  %v18159_v57 = vld [vmem:[#allocation117_spill] sm:$0xff]  ;;  %v5332_v7 = vmul.f32 1.442695, %v5052_v10  ;;  %v18162_v30 = vld [vmem:[#allocation224_spill] sm:$0xff] }
 0x54a   : > { %8934 = vpow2.f32 %v5316_v8  ;;  %v5056_v3 = vsub.f32 %v18159_v57, %v14747_v55  ;;  %v14800_v31 = vpop.permute.xlu1 %4895  ;;  %v5334_v13 = vmul.f32 1.442695, %v5053_v56  ;;  %v18161_v8 = vld [vmem:[#allocation40_spill] sm:$0xff]  ;;  %v5336_v10 = vmul.f32 1.442695, %v5054_v47  ;;  %v18164_v1 = vld [vmem:[#allocation41_spill] sm:$0xff] }
 0x54b   : > { %v14796_v15 = vpop.eup %8916  ;;  %8936 = vpow2.f32 %v5318_v28  ;;  %18160 = vst [vmem:[#allocation25_spill] sm:$0xff] %v14800_v31  ;;  %v5060_v19 = vsub.f32 %v18161_v8, %v14764_v22  ;;  %v6806_v28 = vsel %vm6518_vm11, %v18162_v30, 0.0  ;;  %v5061_v57 = vsub.f32 %v18164_v1, %v14764_v22  ;;  %v18167_v56 = vld [vmem:[#allocation42_spill] sm:$0xff]  ;;  %v18169_v47 = vld [vmem:[#allocation44_spill] sm:$0xff] }
 0x54c   : > { %v14804_v4 = vpop.eup %8918  ;;  %8938 = vpow2.f32 %v5320_v34  ;;  %v6807_v11 = vsel %vm6519_vm13, %v18165_v18, 0.0  ;;  %v5338_v34 = vmul.f32 1.442695, %v5055_v61  ;;  %v5062_v8 = vsub.f32 %v18167_v56, %v14764_v22 }
 0x54d   : > { %v14812_v48 = vpop.eup %8920  ;;  %8940 = vpow2.f32 %v5322_v16  ;;  %v5340_v16 = vmul.f32 1.442695, %v5056_v3  ;;  %v5348_v56 = vmul.f32 1.442695, %v5060_v19  ;;  %vm6535_vm0 = vcmp.eq.s32.totalorder %v18135_v43, %v14012_v27  ;;  %v18173_v3 = vld [vmem:[#allocation43_spill] sm:$0xff]  ;;  %v18174_v19 = vld [vmem:[#allocation45_spill] sm:$0xff] }
 0x54e   : > { %18163 = vst [vmem:[#allocation26_spill] sm:$0xff] %v14812_v48  ;;  %v14817_v24 = vpop.eup %8922  ;;  %8942 = vpow2.f32 %v5324_v0  ;;  %v5063_v48 = vsub.f32 %v18169_v47, %v14764_v22  ;;  %v18171_v0 = vld [vmem:[#allocation103_spill] sm:$0xff]  ;;  %v5350_v26 = vmul.f32 1.442695, %v5061_v57  ;;  %v14839_v47 = vpop.permute.xlu1 %4900  ;;  %v7130_v18 = vadd.f32 %v7129_v2, %v6847_v36  ;;  %v18176_v36 = vld [vmem:[#allocation46_spill] sm:$0xff] }
 0x54f   : > { %18166 = vst [vmem:[#allocation28_spill] sm:$0xff] %v14817_v24  ;;  %v14823_v30 = vpop.eup %8924  ;;  %8944 = vpow2.f32 %v5332_v7  ;;  %v5064_v61 = vsub.f32 %v18171_v0, %v14764_v22  ;;  %v5068_v7 = vsub.f32 %v18173_v3, %v14800_v31  ;;  %v5069_v0 = vsub.f32 %v18174_v19, %v14800_v31 }
 0x550   : > { %18168 = vst [vmem:[#allocation82_spill] sm:$0xff] %v14823_v30  ;;  %v14829_v1 = vpop.eup %8926  ;;  %8946 = vpow2.f32 %v5334_v13  ;;  %v5352_v13 = vmul.f32 1.442695, %v5062_v8  ;;  %v5354_v3 = vmul.f32 1.442695, %v5063_v48  ;;  %v5070_v2 = vsub.f32 %v18176_v36, %v14800_v31  ;;  %v18177_v8 = vld [vmem:[#allocation47_spill] sm:$0xff] }
 0x551   : > { %18170 = vst [vmem:[#allocation31_spill] sm:$0xff] %v14829_v1  ;;  %v14835_v38 = vpop.eup %8928  ;;  %8948 = vpow2.f32 %v5336_v10  ;;  %v18175_v1 = vld [vmem:[#allocation210_spill] sm:$0xff]  ;;  %v5071_v19 = vsub.f32 %v18177_v8, %v14800_v31  ;;  %v7101_v24 = vadd.f32 %v14678_v45, %v14689_v44  ;;  %v18179_v44 = vld [vmem:[#allocation48_spill] sm:$0xff]  ;;  %v18180_v36 = vld [vmem:[#allocation49_spill] sm:$0xff]  ;;  %vm6550_vm12 = vcmp.eq.s32.totalorder %v18134_v37, %v14053_v32 }
 0x552   : > { %18172 = vst [vmem:[#allocation239_spill] sm:$0xff] %v14835_v38  ;;  %v14841_v30 = vpop.eup %8930  ;;  %8950 = vpow2.f32 %v5338_v34  ;;  %v6822_v10 = vsel %vm6534_vm14, %v18175_v1, 0.0  ;;  %v7084_v38 = vadd.f32 %v7083_v42, %v6806_v28  ;;  %v5364_v1 = vmul.f32 1.442695, %v5068_v7  ;;  %v14879_v8 = vpop.permute.xlu1 %4905 }
 0x553   : > { %v14850_v57 = vpop.eup %8932  ;;  %8952 = vpow2.f32 %v5340_v16  ;;  %v18178_v16 = vld [vmem:[#allocation242_spill] sm:$0xff]  ;;  %v6823_v28 = vsel %vm6535_vm0, %v13887_v52, 0.0  ;;  %v5076_v45 = vsub.f32 %v18179_v44, %v14839_v47  ;;  %v5368_v7 = vmul.f32 1.442695, %v5070_v2  ;;  %18181 = vst [vmem:[#allocation32_spill] sm:$0xff] %v14879_v8 }
 0x554   : > { %7095 = vadd.xlane.f32.xlu0 %v14766_v53  ;;  %v14854_v34 = vpop.eup %8934  ;;  %8954 = vpow2.f32 %v5348_v56  ;;  %v5356_v53 = vmul.f32 1.442695, %v5064_v61  ;;  %v5072_v48 = vsub.f32 %v18178_v16, %v14800_v31  ;;  %v5366_v61 = vmul.f32 1.442695, %v5069_v0  ;;  %v18182_v0 = vld [vmem:[#allocation50_spill] sm:$0xff] }
 0x555   : > { %v14860_v46 = vpop.eup %8936  ;;  %8956 = vpow2.f32 %v5350_v26  ;;  %v7119_v56 = vadd.f32 %v14698_v35, %v14701_v12  ;;  %v5077_v27 = vsub.f32 %v18180_v36, %v14839_v47  ;;  %v7085_v16 = vadd.f32 %v7084_v38, %v6807_v11  ;;  %v18184_v35 = vld [vmem:[#allocation52_spill] sm:$0xff] }
 0x556   : > { %v14868_v42 = vpop.eup %8938  ;;  %8958 = vpow2.f32 %v5352_v13  ;;  %v5078_v44 = vsub.f32 %v18182_v0, %v14839_v47  ;;  %v7102_v52 = vadd.f32 %v7101_v24, %v6822_v10  ;;  %v5372_v12 = vmul.f32 1.442695, %v5072_v48  ;;  %v18186_v11 = vld [vmem:[#allocation84_spill] sm:$0xff]  ;;  %v18187_v24 = vld [vmem:[#allocation282_spill] sm:$0xff]  ;;  %v18189_v48 = vld [vmem:[#allocation51_spill] sm:$0xff] }
 0x557   : > { %v14875_v26 = vpop.eup %8940  ;;  %8960 = vpow2.f32 %v5354_v3  ;;  %v5079_v3 = vsub.f32 %v18184_v35, %v14839_v47  ;;  %v5080_v38 = vsub.f32 %v18186_v11, %v14839_v47  ;;  %v6838_v10 = vsel %vm6550_vm12, %v18187_v24, 0.0 }
 0x558   : > { %7113 = vadd.xlane.f32.xlu0 %v14770_v6  ;;  %v14881_v13 = vpop.eup %8942  ;;  %8962 = vpow2.f32 %v5356_v53  ;;  %v5370_v6 = vmul.f32 1.442695, %v5071_v19  ;;  %v5380_v53 = vmul.f32 1.442695, %v5076_v45  ;;  %v5084_v36 = vsub.f32 %v18189_v48, %v14879_v8  ;;  %v14910_v48 = vpop.permute.xlu1 %4910 }
 0x559   : > { %v14885_v17 = vpop.eup %8944  ;;  %8964 = vpow2.f32 %v5364_v1  ;;  %v5382_v1 = vmul.f32 1.442695, %v5077_v27  ;;  %v7120_v0 = vadd.f32 %v7119_v56, %v6838_v10  ;;  %v7103_v45 = vadd.f32 %v7102_v52, %v6823_v28  ;;  %v18193_v27 = vld [vmem:[#allocation54_spill] sm:$0xff] }
 0x55a   : > { %18183 = vst [vmem:[#allocation33_spill] sm:$0xff] %v14885_v17  ;;  %v14891_v2 = vpop.eup %8946  ;;  %8966 = vpow2.f32 %v5366_v61  ;;  %v5384_v61 = vmul.f32 1.442695, %v5078_v44  ;;  %v5086_v24 = vsub.f32 %v18193_v27, %v14879_v8  ;;  %v18194_v44 = vld [vmem:[#allocation55_spill] sm:$0xff]  ;;  %vm6551_vm1 = vcmp.eq.s32.totalorder %v18135_v43, %v14053_v32 }
 0x55b   : > { %18185 = vst [vmem:[#allocation34_spill] sm:$0xff] %v14891_v2  ;;  %v14896_v19 = vpop.eup %8948  ;;  %8968 = vpow2.f32 %v5368_v7  ;;  %v18191_v2 = vld [vmem:[#allocation53_spill] sm:$0xff]  ;;  %v5386_v7 = vmul.f32 1.442695, %v5079_v3  ;;  %v5396_v28 = vmul.f32 1.442695, %v5084_v36  ;;  %vm6572_vm3 = vcmp.eq.s32.totalorder %v17680_v63, %v14080_v14 }
 0x55c   : > { %7131 = vadd.xlane.f32.xlu0 %v7130_v18  ;;  %7086 = vadd.xlane.f32.xlu1 %v7085_v16  ;;  %18188 = vst [vmem:[#allocation36_spill] sm:$0xff] %v14896_v19  ;;  %v14900_v35 = vpop.eup %8950  ;;  %8970 = vpow2.f32 %v5370_v6  ;;  %v5085_v11 = vsub.f32 %v18191_v2, %v14879_v8  ;;  %v7143_v16 = vadd.f32 %v14620_v5, %v14618_v39  ;;  %v5388_v6 = vmul.f32 1.442695, %v5080_v38  ;;  %v18195_v39 = vld [vmem:[#allocation247_spill] sm:$0xff] }
 0x55d   : > { %18190 = vst [vmem:[#allocation105_spill] sm:$0xff] %v14900_v35  ;;  %v14904_v18 = vpop.eup %8952  ;;  %8972 = vpow2.f32 %v5372_v12  ;;  %v5087_v2 = vsub.f32 %v18194_v44, %v14879_v8  ;;  %v5088_v5 = vsub.f32 %v18195_v39, %v14879_v8  ;;  %v6839_v12 = vsel %vm6551_vm1, %v13990_v25, 0.0 }
 0x55e   : > { %18192 = vst [vmem:[#allocation35_spill] sm:$0xff] %v14904_v18  ;;  %v14912_v56 = vpop.eup %8954  ;;  %8974 = vpow2.f32 %v5380_v53  ;;  %v5398_v38 = vmul.f32 1.442695, %v5085_v11  ;;  %v18196_v53 = vld [vmem:[#allocation58_spill] sm:$0xff]  ;;  %v5400_v32 = vmul.f32 1.442695, %v5086_v24  ;;  %vm6573_vm4 = vcmp.eq.s32.totalorder %v17685_v60, %v14080_v14 }
 0x55f   : > { %v14918_v52 = vpop.eup %8956  ;;  %8976 = vpow2.f32 %v5382_v1  ;;  %v5092_v10 = vsub.f32 %v18196_v53, %v14910_v48  ;;  %v18197_v1 = vld [vmem:[#allocation59_spill] sm:$0xff]  ;;  %v6860_v39 = vsel %vm6572_vm3, %v14085_v58, 0.0  ;;  %v18198_v11 = vld [vmem:[#allocation60_spill] sm:$0xff]  ;;  %v5404_v24 = vmul.f32 1.442695, %v5088_v5 }
 0x560   : > { %7104 = vadd.xlane.f32.xlu1 %v7103_v45  ;;  %v14923_v3 = vpop.eup %8958  ;;  %8978 = vpow2.f32 %v5384_v61  ;;  %v7121_v45 = vadd.f32 %v7120_v0, %v6839_v12  ;;  %v5093_v36 = vsub.f32 %v18197_v1, %v14910_v48  ;;  %v5402_v61 = vmul.f32 1.442695, %v5087_v2  ;;  %v14938_v0 = vpop.permute.xlu0 %4915  ;;  %v18201_v1 = vld [vmem:[#allocation62_spill] sm:$0xff] }
 0x561   : > { %v14927_v27 = vpop.eup %8960  ;;  %8980 = vpow2.f32 %v5386_v7  ;;  %v5094_v53 = vsub.f32 %v18198_v11, %v14910_v48  ;;  %18199 = vst [vmem:[#allocation37_spill] sm:$0xff] %v14938_v0  ;;  %v7144_v7 = vadd.f32 %v7143_v16, %v14631_v40  ;;  %v5095_v25 = vsub.f32 %v18201_v1, %v14910_v48  ;;  %v18205_v16 = vld [vmem:[#allocation61_spill] sm:$0xff] }
 0x562   : > { %v14933_v44 = vpop.eup %8962  ;;  %8982 = vpow2.f32 %v5388_v6  ;;  %v18203_v6 = vld [vmem:[#allocation131_spill] sm:$0xff]  ;;  %v5412_v11 = vmul.f32 1.442695, %v5092_v10  ;;  %v5414_v40 = vmul.f32 1.442695, %v5093_v36  ;;  %v5100_v5 = vsub.f32 %v18205_v16, %v14938_v0  ;;  %v18207_v1 = vld [vmem:[#allocation285_spill] sm:$0xff]  ;;  %v14964_v36 = vpop.permute.xlu1 %4920 }
 0x563   : > { %v14940_v12 = vpop.eup %8964  ;;  %8984 = vpow2.f32 %v5396_v28  ;;  %v5096_v2 = vsub.f32 %v18203_v6, %v14910_v48  ;;  %v7145_v35 = vadd.f32 %v7144_v7, %v6860_v39  ;;  %v6861_v19 = vsel %vm6573_vm4, %v18207_v1, 0.0  ;;  %v18210_v39 = vld [vmem:[#allocation69_spill] sm:$0xff]  ;;  %v18211_v16 = vld [vmem:[#allocation70_spill] sm:$0xff] }
 0x564   : > { %7122 = vadd.xlane.f32.xlu1 %v7121_v45  ;;  %18200 = vst [vmem:[#allocation38_spill] sm:$0xff] %v14940_v12  ;;  %v14945_v18 = vpop.eup %8966  ;;  %8986 = vpow2.f32 %v5398_v38  ;;  %v18208_v38 = vld [vmem:[#allocation68_spill] sm:$0xff]  ;;  %v5418_v10 = vmul.f32 1.442695, %v5095_v25  ;;  %vm6574_vm15 = vcmp.eq.s32.totalorder %v18134_v37, %v14080_v14  ;;  %v6229_v1 = vld [vmem:[%s10029_s8 + $0xe8] sm:$0xff]  ;;  %vm6575_vm5 = vcmp.eq.s32.totalorder %v18135_v43, %v14080_v14  ;;  %v6231_v14 = vld [vmem:[%s10029_s8 + $0xf8] sm:$0xff] }
 0x565   : > { %18202 = vst [vmem:[#allocation39_spill] sm:$0xff] %v14945_v18  ;;  %v14951_v45 = vpop.eup %8968  ;;  %8988 = vpow2.f32 %v5400_v32  ;;  %v5416_v18 = vmul.f32 1.442695, %v5094_v53  ;;  %v5101_v12 = vsub.f32 %v18208_v38, %v14938_v0  ;;  %v5102_v32 = vsub.f32 %v18210_v39, %v14938_v0  ;;  %v18212_v38 = vld [vmem:[#allocation98_spill] sm:$0xff]  ;;  %v18234_v43 = vld [vmem:[#allocation255_spill] sm:$0xff] }
 0x566   : > { %18204 = vst [vmem:[#allocation117_spill] sm:$0xff] %v14951_v45  ;;  %v14955_v28 = vpop.eup %8970  ;;  %8990 = vpow2.f32 %v5402_v61  ;;  %v5420_v6 = vmul.f32 1.442695, %v5096_v2  ;;  %v5103_v61 = vsub.f32 %v18211_v16, %v14938_v0  ;;  %v7146_v25 = vadd.f32 %v7145_v35, %v6861_v19  ;;  %v18213_v45 = vld [vmem:[#allocation73_spill] sm:$0xff]  ;;  %v18214_v16 = vld [vmem:[#allocation74_spill] sm:$0xff]  ;;  %v18215_v35 = vld [vmem:[#allocation75_spill] sm:$0xff] }
 0x567   : > { %18206 = vst [vmem:[#allocation40_spill] sm:$0xff] %v14955_v28  ;;  %v14960_v60 = vpop.eup %8972  ;;  %8992 = vpow2.f32 %v5404_v24  ;;  %v5428_v24 = vmul.f32 1.442695, %v5100_v5  ;;  %v5430_v39 = vmul.f32 1.442695, %v5101_v12  ;;  %v5108_v17 = vsub.f32 %v18213_v45, %v14964_v36  ;;  %v14988_v12 = vpop.permute.xlu0 %4925  ;;  %v18217_v45 = vld [vmem:[#allocation284_spill] sm:$0xff] }
 0x568   : > { %18209 = vst [vmem:[#allocation41_spill] sm:$0xff] %v14960_v60  ;;  %v14966_v7 = vpop.eup %8974  ;;  %8994 = vpow2.f32 %v5412_v11  ;;  %v5104_v60 = vsub.f32 %v18212_v38, %v14938_v0  ;;  %v5432_v11 = vmul.f32 1.442695, %v5102_v32  ;;  %v5434_v19 = vmul.f32 1.442695, %v5103_v61  ;;  %18216 = vst [vmem:[#allocation42_spill] sm:$0xff] %v14988_v12 }
 0x569   : > { %v14970_v53 = vpop.eup %8976  ;;  %8996 = vpow2.f32 %v5414_v40  ;;  %v5109_v40 = vsub.f32 %v18214_v16, %v14964_v36  ;;  %v6862_v38 = vsel %vm6574_vm15, %v18217_v45, 0.0  ;;  %v18219_v32 = vld [vmem:[#allocation77_spill] sm:$0xff]  ;;  %v18269_v0 = vld [vmem:[#allocation106_spill] sm:$0xff] }
 0x56a   : > { %v14974_v28 = vpop.eup %8978  ;;  %8998 = vpow2.f32 %v5416_v18  ;;  %v5110_v18 = vsub.f32 %v18215_v35, %v14964_v36  ;;  %v5111_v16 = vsub.f32 %v18219_v32, %v14964_v36  ;;  %v7147_v37 = vadd.f32 %v7146_v25, %v6862_v38 }
 0x56b   : > { %v14978_v2 = vpop.eup %8980  ;;  %9000 = vpow2.f32 %v5418_v10  ;;  %v5436_v10 = vmul.f32 1.442695, %v5104_v60  ;;  %v5444_v35 = vmul.f32 1.442695, %v5108_v17  ;;  %v5446_v45 = vmul.f32 1.442695, %v5109_v40  ;;  %v15050_v54 = vpop.permute.xlu0 %4935 }
 0x56c   : > { %v14984_v5 = vpop.eup %8982  ;;  %9002 = vpow2.f32 %v5420_v6  ;;  %v18221_v6 = vld [vmem:[#allocation138_spill] sm:$0xff]  ;;  %v5448_v25 = vmul.f32 1.442695, %v5110_v18  ;;  %v18228_v40 = vld [vmem:[#allocation80_spill] sm:$0xff]  ;;  %v18231_v18 = vld [vmem:[#allocation85_spill] sm:$0xff]  ;;  %18243 = vst [vmem:[#allocation50_spill] sm:$0xff] %v15050_v54 }
 0x56d   : > { %v14991_v63 = vpop.eup %8984  ;;  %9004 = vpow2.f32 %v5428_v24  ;;  %v5112_v61 = vsub.f32 %v18221_v6, %v14964_v36  ;;  %v18223_v24 = vld [vmem:[#allocation76_spill] sm:$0xff]  ;;  %v18226_v17 = vld [vmem:[#allocation286_spill] sm:$0xff] }
 0x56e   : > { %18218 = vst [vmem:[#allocation44_spill] sm:$0xff] %v14991_v63  ;;  %v14996_v58 = vpop.eup %8986  ;;  %9006 = vpow2.f32 %v5430_v39  ;;  %v5116_v60 = vsub.f32 %v18223_v24, %v14988_v12  ;;  %v18225_v39 = vld [vmem:[#allocation78_spill] sm:$0xff]  ;;  %v6863_v6 = vsel %vm6575_vm5, %v18226_v17, 0.0  ;;  %v5118_v24 = vsub.f32 %v18228_v40, %v14988_v12  ;;  %v18235_v17 = vld [vmem:[#allocation96_spill] sm:$0xff] }
 0x56f   : > { %18220 = vst [vmem:[#allocation103_spill] sm:$0xff] %v14996_v58  ;;  %v15000_v51 = vpop.eup %8988  ;;  %9008 = vpow2.f32 %v5432_v11  ;;  %v5117_v38 = vsub.f32 %v18225_v39, %v14988_v12  ;;  %v5450_v11 = vmul.f32 1.442695, %v5111_v16  ;;  %v15015_v58 = vpop.permute.xlu1 %4930  ;;  %v15018_v63 = vadd.f32 %v7147_v37, %v6863_v6  ;;  %v18241_v39 = vld [vmem:[#allocation111_spill] sm:$0xff] }
 0x570   : > { %18222 = vst [vmem:[#allocation43_spill] sm:$0xff] %v15000_v51  ;;  %v15006_v32 = vpop.eup %8990  ;;  %9010 = vpow2.f32 %v5434_v19  ;;  %18229 = vst [vmem:[#allocation47_spill] sm:$0xff] %v15015_v58  ;;  %v5120_v37 = vsub.f32 %v18234_v43, %v14988_v12  ;;  %v5460_v6 = vmul.f32 1.442695, %v5116_v60  ;;  %v5464_v16 = vmul.f32 1.442695, %v5118_v24 }
 0x571   : > { %18224 = vst [vmem:[#allocation45_spill] sm:$0xff] %v15006_v32  ;;  %v15011_v51 = vpop.eup %8992  ;;  %9012 = vpow2.f32 %v5436_v10  ;;  %18230 = vst [vmem:[#allocation242_spill] sm:$0xff] %v15018_v63  ;;  %v18232_v32 = vld [vmem:[#allocation81_spill] sm:$0xff]  ;;  %v18239_v43 = vld [vmem:[#allocation90_spill] sm:$0xff] }
 0x572   : > { %6320 = vperm.xlu0 %8908, %v6229_v1   ;;  %18227 = vst [vmem:[#allocation46_spill] sm:$0xff] %v15011_v51  ;;  %v15020_v19 = vpop.eup %8994  ;;  %9014 = vpow2.f32 %v5444_v35  ;;  %v5452_v1 = vmul.f32 1.442695, %v5112_v61  ;;  %v5119_v51 = vsub.f32 %v18232_v32, %v14988_v12  ;;  %v5462_v61 = vmul.f32 1.442695, %v5117_v38  ;;  %v18236_v35 = vld [vmem:[#allocation86_spill] sm:$0xff] }
 0x573   : > { %v15026_v10 = vpop.eup %8996  ;;  %9016 = vpow2.f32 %v5446_v45  ;;  %v5124_v32 = vsub.f32 %v18236_v35, %v15015_v58  ;;  %v5125_v60 = vsub.f32 %v18239_v43, %v15015_v58  ;;  %v18242_v35 = vld [vmem:[#allocation91_spill] sm:$0xff]  ;;  %v5468_v45 = vmul.f32 1.442695, %v5120_v37  ;;  %v18246_v43 = vld [vmem:[#allocation94_spill] sm:$0xff]  ;;  %v15077_v31 = vpop.permute.xlu1 %4940 }
 0x574   : > { %v15032_v63 = vpop.eup %8998  ;;  %9018 = vpow2.f32 %v5448_v25  ;;  %v5466_v38 = vmul.f32 1.442695, %v5119_v51  ;;  %v5127_v40 = vsub.f32 %v18246_v43, %v15015_v58  ;;  %v18252_v43 = vld [vmem:[#allocation93_spill] sm:$0xff]  ;;  %18256 = vst [vmem:[#allocation54_spill] sm:$0xff] %v15077_v31 }
 0x575   : > { %v15038_v21 = vpop.eup %9000  ;;  %9020 = vpow2.f32 %v5450_v11  ;;  %v5476_v29 = vmul.f32 1.442695, %v5124_v32  ;;  %v5478_v24 = vmul.f32 1.442695, %v5125_v60  ;;  %v18255_v32 = vld [vmem:[#allocation95_spill] sm:$0xff] }
 0x576   : > { %6326 = vperm.xlu0 %8908, %v6231_v14   ;;  %18237 = vst [vmem:[#allocation48_spill] sm:$0xff] %v15038_v21  ;;  %v15044_v62 = vpop.eup %9002  ;;  %9022 = vpow2.f32 %v5452_v1  ;;  %v5126_v14 = vsub.f32 %v18242_v35, %v15015_v58  ;;  %v18248_v1 = vld [vmem:[#allocation129_spill] sm:$0xff]  ;;  %v18249_v35 = vld [vmem:[#allocation147_spill] sm:$0xff] }
 0x577   : > { %18240 = vst [vmem:[#allocation49_spill] sm:$0xff] %v15044_v62  ;;  %v15052_v33 = vpop.eup %9004  ;;  %9024 = vpow2.f32 %v5460_v6  ;;  %v5128_v25 = vsub.f32 %v18249_v35, %v15015_v58  ;;  %v18258_v60 = vld [vmem:[#allocation99_spill] sm:$0xff] }
 0x578   : > { %18244 = vst [vmem:[#allocation52_spill] sm:$0xff] %v15052_v33  ;;  %v15058_v55 = vpop.eup %9006  ;;  %9026 = vpow2.f32 %v5462_v61  ;;  %v18254_v61 = vld [vmem:[#allocation136_spill] sm:$0xff]  ;;  %v5480_v35 = vmul.f32 1.442695, %v5126_v14  ;;  %v5134_v37 = vsub.f32 %v18258_v60, %v15050_v54  ;;  %v18271_v14 = vld [vmem:[#allocation107_spill] sm:$0xff] }
 0x579   : > { %18247 = vst [vmem:[#allocation84_spill] sm:$0xff] %v15058_v55  ;;  %v15065_v33 = vpop.eup %9008  ;;  %9028 = vpow2.f32 %v5464_v16  ;;  %v5132_v55 = vsub.f32 %v18252_v43, %v15050_v54  ;;  %v5482_v16 = vmul.f32 1.442695, %v5127_v40  ;;  %v18259_v43 = vld [vmem:[#allocation100_spill] sm:$0xff]  ;;  %v5484_v8 = vmul.f32 1.442695, %v5128_v25  ;;  %v15103_v25 = vpop.permute.xlu0 %4945 }
 0x57a   : > { %5025 = vperm.xlu0 %8908, %v14676_v50   ;;  %18250 = vst [vmem:[#allocation51_spill] sm:$0xff] %v15065_v33  ;;  %v15071_v11 = vpop.eup %9010  ;;  %9030 = vpow2.f32 %v5466_v38  ;;  %v5133_v50 = vsub.f32 %v18255_v32, %v15050_v54  ;;  %v18262_v40 = vld [vmem:[#allocation114_spill] sm:$0xff]  ;;  %18267 = vst [vmem:[#allocation58_spill] sm:$0xff] %v15103_v25  ;;  %v5142_v41 = vsub.f32 %v18271_v14, %v15077_v31 }
 0x57b   : > { %18253 = vst [vmem:[#allocation53_spill] sm:$0xff] %v15071_v11  ;;  %v15079_v33 = vpop.eup %9012  ;;  %9032 = vpow2.f32 %v5468_v45  ;;  %v5135_v11 = vsub.f32 %v18259_v43, %v15050_v54  ;;  %v5136_v45 = vsub.f32 %v18262_v40, %v15050_v54  ;;  %v5492_v60 = vmul.f32 1.442695, %v5132_v55  ;;  %v18272_v32 = vld [vmem:[#allocation110_spill] sm:$0xff] }
 0x57c   : > { %18257 = vst [vmem:[#allocation55_spill] sm:$0xff] %v15079_v33  ;;  %v15085_v6 = vpop.eup %9014  ;;  %9034 = vpow2.f32 %v5476_v29  ;;  %v18263_v33 = vld [vmem:[#allocation104_spill] sm:$0xff]  ;;  %v5494_v29 = vmul.f32 1.442695, %v5133_v50  ;;  %v5496_v40 = vmul.f32 1.442695, %v5134_v37 }
 0x57d   : > { %v15091_v9 = vpop.eup %9016  ;;  %9036 = vpow2.f32 %v5478_v24  ;;  %v5140_v43 = vsub.f32 %v18263_v33, %v15077_v31  ;;  %v5498_v55 = vmul.f32 1.442695, %v5135_v11  ;;  %v5141_v33 = vsub.f32 %v18269_v0, %v15077_v31  ;;  %v18273_v50 = vld [vmem:[#allocation119_spill] sm:$0xff] }
 0x57e   : > { %v15097_v23 = vpop.eup %9018  ;;  %9038 = vpow2.f32 %v5480_v35  ;;  %v5143_v35 = vsub.f32 %v18272_v32, %v15077_v31  ;;  %v5144_v12 = vsub.f32 %v18273_v50, %v15077_v31  ;;  %v5500_v37 = vmul.f32 1.442695, %v5136_v45 }
 0x57f   : > { %18264 = vst [vmem:[#allocation247_spill] sm:$0xff] %v15097_v23  ;;  %v15105_v24 = vpop.eup %9020  ;;  %9040 = vpow2.f32 %v5482_v16  ;;  %v5508_v11 = vmul.f32 1.442695, %v5140_v43  ;;  %v18275_v16 = vld [vmem:[#allocation109_spill] sm:$0xff]  ;;  %v18279_v23 = vld [vmem:[#allocation116_spill] sm:$0xff] }
 0x580   : > { %18268 = vst [vmem:[#allocation59_spill] sm:$0xff] %v15105_v24  ;;  %v15109_v62 = vpop.eup %9022  ;;  %9042 = vpow2.f32 %v5484_v8  ;;  %v5148_v0 = vsub.f32 %v18275_v16, %v15103_v25  ;;  %v18277_v8 = vld [vmem:[#allocation112_spill] sm:$0xff]  ;;  %v5151_v50 = vsub.f32 %v18279_v23, %v15103_v25  ;;  %v5516_v58 = vmul.f32 1.442695, %v5144_v12  ;;  %v18286_v23 = vld [vmem:[#allocation170_spill] sm:$0xff] }
 0x581   : > { %18270 = vst [vmem:[#allocation60_spill] sm:$0xff] %v15109_v62  ;;  %v15117_v38 = vpop.eup %9024  ;;  %9044 = vpow2.f32 %v5492_v60  ;;  %v5149_v14 = vsub.f32 %v18277_v8, %v15103_v25  ;;  %v18278_v62 = vld [vmem:[#allocation115_spill] sm:$0xff]  ;;  %v5512_v8 = vmul.f32 1.442695, %v5142_v41  ;;  %v18288_v12 = vld [vmem:[#allocation120_spill] sm:$0xff] }
 0x582   : > { %18274 = vst [vmem:[#allocation62_spill] sm:$0xff] %v15117_v38  ;;  %v15121_v24 = vpop.eup %9026  ;;  %9046 = vpow2.f32 %v5494_v29  ;;  %v5150_v32 = vsub.f32 %v18278_v62, %v15103_v25  ;;  %v5514_v38 = vmul.f32 1.442695, %v5143_v35  ;;  %v15137_v62 = vpop.permute.xlu1 %4950  ;;  %v5524_v45 = vmul.f32 1.442695, %v5148_v0 }
 0x583   : > { %18276 = vst [vmem:[#allocation131_spill] sm:$0xff] %v15121_v24  ;;  %v15129_v21 = vpop.eup %9028  ;;  %9048 = vpow2.f32 %v5496_v40  ;;  %v5510_v24 = vmul.f32 1.442695, %v5141_v33  ;;  %18284 = vst [vmem:[#allocation69_spill] sm:$0xff] %v15137_v62  ;;  %v5526_v33 = vmul.f32 1.442695, %v5149_v14 }
 0x584   : > { %18280 = vst [vmem:[#allocation61_spill] sm:$0xff] %v15129_v21  ;;  %v15135_v29 = vpop.eup %9030  ;;  %9050 = vpow2.f32 %v5498_v55  ;;  %v5152_v21 = vsub.f32 %v18286_v23, %v15103_v25  ;;  %v5528_v55 = vmul.f32 1.442695, %v5150_v32  ;;  %v5530_v41 = vmul.f32 1.442695, %v5151_v50  ;;  %v18290_v23 = vld [vmem:[#allocation125_spill] sm:$0xff] }
 0x585   : > { %18283 = vst [vmem:[#allocation68_spill] sm:$0xff] %v15135_v29  ;;  %v15139_v51 = vpop.eup %9032  ;;  %9052 = vpow2.f32 %v5500_v37  ;;  %v18289_v37 = vld [vmem:[#allocation124_spill] sm:$0xff]  ;;  %v5158_v54 = vsub.f32 %v18290_v23, %v15137_v62  ;;  %v5805_v23 = vadd.f32 %v14796_v15, %v14792_v20 }
 0x586   : > { %18285 = vst [vmem:[#allocation70_spill] sm:$0xff] %v15139_v51  ;;  %v15145_v16 = vpop.eup %9034  ;;  %9054 = vpow2.f32 %v5508_v11  ;;  %v5156_v51 = vsub.f32 %v18288_v12, %v15137_v62  ;;  %v5157_v29 = vsub.f32 %v18289_v37, %v15137_v62  ;;  %v18291_v11 = vld [vmem:[#allocation128_spill] sm:$0xff]  ;;  %v5532_v12 = vmul.f32 1.442695, %v5152_v21 }
 0x587   : > { %v15147_v35 = vpop.eup %9036  ;;  %9056 = vpow2.f32 %v5510_v24  ;;  %v5159_v0 = vsub.f32 %v18291_v11, %v15137_v62  ;;  %v18292_v14 = vld [vmem:[#allocation180_spill] sm:$0xff] }
 0x588   : > { %v15155_v60 = vpop.eup %9038  ;;  %9058 = vpow2.f32 %v5512_v8  ;;  %v5160_v32 = vsub.f32 %v18292_v14, %v15137_v62  ;;  %v18293_v24 = vld [vmem:[#allocation72_spill] sm:$0xff]  ;;  %v15173_v14 = vpop.permute.xlu0 %4955  ;;  %v5540_v20 = vmul.f32 1.442695, %v5156_v51  ;;  %v5542_v15 = vmul.f32 1.442695, %v5157_v29 }
 0x589   : > { %v5042_v50 = vsub.f32 %v18293_v24, %v14705_v59  ;;  %v15163_v40 = vpop.eup %9040  ;;  %9060 = vpow2.f32 %v5514_v38  ;;  %v18295_v37 = vld [vmem:[#allocation240_spill] sm:$0xff]  ;;  %18298 = vst [vmem:[#allocation74_spill] sm:$0xff] %v15173_v14  ;;  %v18299_v24 = vsub.f32 %v18231_v18, %v14705_v59  ;;  %v5546_v43 = vmul.f32 1.442695, %v5159_v0 }
 0x58a   : > { %18294 = vst [vmem:[#allocation98_spill] sm:$0xff] %v15163_v40  ;;  %v5043_v25 = vsub.f32 %v18295_v37, %v14705_v59  ;;  %v15169_v8 = vpop.eup %9042  ;;  %9062 = vpow2.f32 %v5516_v58  ;;  %v18300_v21 = vld [vmem:[#allocation108_spill] sm:$0xff]  ;;  %v5548_v11 = vmul.f32 1.442695, %v5160_v32  ;;  %v18304_v59 = vld [vmem:[#allocation127_spill] sm:$0xff]  ;;  %v5806_v51 = vadd.f32 %v14804_v4, %v5805_v23  ;;  %v18312_v4 = vld [vmem:[#allocation113_spill] sm:$0xff] }
 0x58b   : > { %18296 = vst [vmem:[#allocation73_spill] sm:$0xff] %v15169_v8  ;;  %v15178_v40 = vmul.f32 1.442695, %v18299_v24  ;;  %v5050_v38 = vsub.f32 %v18300_v21, %v14732_v49  ;;  %v15182_v37 = vpop.eup %9044  ;;  %9064 = vpow2.f32 %v5524_v45  ;;  %v5544_v8 = vmul.f32 1.442695, %v5158_v54  ;;  %v18305_v24 = vld [vmem:[#allocation130_spill] sm:$0xff] }
 0x58c   : > { %18301 = vst [vmem:[#allocation75_spill] sm:$0xff] %v15182_v37  ;;  %v15184_v58 = vpop.eup %9046  ;;  %9066 = vpow2.f32 %v5526_v33  ;;  %v15186_v62 = vmul.f32 1.442695, %v5042_v50  ;;  %v5164_v18 = vsub.f32 %v18304_v59, %v15173_v14  ;;  %v5165_v21 = vsub.f32 %v18305_v24, %v15173_v14  ;;  %v18307_v54 = vld [vmem:[#allocation132_spill] sm:$0xff]  ;;  %v18308_v33 = vld [vmem:[#allocation133_spill] sm:$0xff]  ;;  %v15207_v24 = vpop.permute.xlu1 %4960 }
 0x58d   : > { %18302 = vst [vmem:[#allocation77_spill] sm:$0xff] %v15184_v58  ;;  %v15188_v31 = vpop.eup %9048  ;;  %9068 = vpow2.f32 %v5528_v55  ;;  %v5166_v29 = vsub.f32 %v18307_v54, %v15173_v14  ;;  %v5167_v0 = vsub.f32 %v18308_v33, %v15173_v14  ;;  %v15201_v32 = vmul.f32 1.442695, %v5043_v25  ;;  %v18310_v50 = vld [vmem:[#allocation264_spill] sm:$0xff]  ;;  %18311 = vst [vmem:[#allocation80_spill] sm:$0xff] %v15207_v24  ;;  %v18315_v58 = vld [vmem:[#allocation137_spill] sm:$0xff] }
 0x58e   : > { %18303 = vst [vmem:[#allocation138_spill] sm:$0xff] %v15188_v31  ;;  %v15195_v45 = vpop.eup %9050  ;;  %9070 = vpow2.f32 %v5530_v41  ;;  %v5168_v59 = vsub.f32 %v18310_v50, %v15173_v14  ;;  %v5051_v23 = vsub.f32 %v18312_v4, %v14732_v49  ;;  %v18313_v41 = vsub.f32 %v18235_v17, %v14732_v49  ;;  %v18325_v14 = vld [vmem:[#allocation241_spill] sm:$0xff] }
 0x58f   : > { %18306 = vst [vmem:[#allocation76_spill] sm:$0xff] %v15195_v45  ;;  %v15203_v55 = vpop.eup %9052  ;;  %9072 = vpow2.f32 %v5532_v12  ;;  %v15220_v12 = vmul.f32 1.442695, %v5050_v38  ;;  %v5814_v50 = vadd.f32 %v14860_v46, %v14854_v34  ;;  %v5556_v4 = vmul.f32 1.442695, %v5164_v18  ;;  %v18316_v46 = vld [vmem:[#allocation139_spill] sm:$0xff] }
 0x590   : > { %18309 = vst [vmem:[#allocation78_spill] sm:$0xff] %v15203_v55  ;;  %v15214_v54 = vmul.f32 1.442695, %v18313_v41  ;;  %v15216_v45 = vpop.eup %9054  ;;  %9074 = vpow2.f32 %v5540_v20  ;;  %v5558_v31 = vmul.f32 1.442695, %v5165_v21  ;;  %v5807_v49 = vadd.f32 %v14841_v30, %v5806_v51  ;;  %v18318_v30 = vld [vmem:[#allocation140_spill] sm:$0xff] }
 0x591   : > { %v15224_v55 = vpop.eup %9056  ;;  %9076 = vpow2.f32 %v5542_v15  ;;  %v5560_v41 = vmul.f32 1.442695, %v5166_v29  ;;  %v5562_v20 = vmul.f32 1.442695, %v5167_v0  ;;  %v5172_v33 = vsub.f32 %v18315_v58, %v15207_v24  ;;  %v18319_v21 = vld [vmem:[#allocation143_spill] sm:$0xff]  ;;  %v15243_v29 = vpop.permute.xlu0 %4965  ;;  %v18322_v0 = vld [vmem:[#allocation188_spill] sm:$0xff] }
 0x592   : > { %v15227_v17 = vpop.eup %9058  ;;  %9078 = vpow2.f32 %v5544_v8  ;;  %v5564_v25 = vmul.f32 1.442695, %v5168_v59  ;;  %v5173_v34 = vsub.f32 %v18316_v46, %v15207_v24  ;;  %v15235_v15 = vmul.f32 1.442695, %v5051_v23  ;;  %18320 = vst [vmem:[#allocation81_spill] sm:$0xff] %v15243_v29 }
 0x593   : > { %v15231_v38 = vpop.eup %9060  ;;  %9080 = vpow2.f32 %v5546_v43  ;;  %v5174_v8 = vsub.f32 %v18318_v30, %v15207_v24  ;;  %v5175_v51 = vsub.f32 %v18319_v21, %v15207_v24  ;;  %v5815_v58 = vadd.f32 %v14868_v42, %v5814_v50 }
 0x594   : > { %v15237_v18 = vpop.eup %9062  ;;  %9082 = vpow2.f32 %v5548_v11  ;;  %v5176_v59 = vsub.f32 %v18322_v0, %v15207_v24  ;;  %v15251_v23 = vadd.f32 %v14850_v57, %v5807_v49  ;;  %v18323_v11 = vld [vmem:[#allocation79_spill] sm:$0xff]  ;;  %v5572_v21 = vmul.f32 1.442695, %v5172_v33  ;;  %v15280_v57 = vpop.permute.xlu1 %4970 }
 0x595   : > { %18317 = vst [vmem:[#allocation85_spill] sm:$0xff] %v15237_v18  ;;  %v15246_v43 = vpop.eup %9064  ;;  %9084 = vpow2.f32 %v5556_v4  ;;  %v5066_v46 = vsub.f32 %v18323_v11, %v14764_v22  ;;  %v5067_v37 = vsub.f32 %v18325_v14, %v14764_v22  ;;  %v18326_v42 = vsub.f32 %v18241_v39, %v14764_v22  ;;  %v18329_v11 = vld [vmem:[#allocation142_spill] sm:$0xff] }
 0x596   : > { %18321 = vst [vmem:[#allocation255_spill] sm:$0xff] %v15246_v43  ;;  %v15255_v30 = vpop.eup %9066  ;;  %9086 = vpow2.f32 %v5558_v31  ;;  %v5574_v0 = vmul.f32 1.442695, %v5173_v34  ;;  %v5576_v33 = vmul.f32 1.442695, %v5174_v8  ;;  %v18331_v43 = vld [vmem:[#allocation145_spill] sm:$0xff] }
 0x597   : > { %18324 = vst [vmem:[#allocation96_spill] sm:$0xff] %v15255_v30  ;;  %v15262_v50 = vmul.f32 1.442695, %v18326_v42  ;;  %v15264_v4 = vpop.eup %9068  ;;  %9088 = vpow2.f32 %v5560_v41  ;;  %v5180_v30 = vsub.f32 %v18329_v11, %v15243_v29  ;;  %v5578_v14 = vmul.f32 1.442695, %v5175_v51  ;;  %v18333_v41 = vld [vmem:[#allocation148_spill] sm:$0xff] }
 0x598   : > { %18327 = vst [vmem:[#allocation86_spill] sm:$0xff] %v15264_v4  ;;  %v15270_v31 = vpop.eup %9070  ;;  %9090 = vpow2.f32 %v5562_v20  ;;  %v5181_v22 = vsub.f32 %v18331_v43, %v15243_v29  ;;  %v5580_v42 = vmul.f32 1.442695, %v5176_v59  ;;  %v5182_v4 = vsub.f32 %v18333_v41, %v15243_v29  ;;  %v18334_v34 = vld [vmem:[#allocation149_spill] sm:$0xff]  ;;  %v18335_v20 = vld [vmem:[#allocation162_spill] sm:$0xff] }
 0x599   : > { %18330 = vst [vmem:[#allocation90_spill] sm:$0xff] %v15270_v31  ;;  %v15274_v39 = vpop.eup %9072  ;;  %9092 = vpow2.f32 %v5564_v25  ;;  %v5183_v49 = vsub.f32 %v18334_v34, %v15243_v29  ;;  %v5184_v8 = vsub.f32 %v18335_v20, %v15243_v29  ;;  %v5816_v51 = vadd.f32 %v14875_v26, %v5815_v58  ;;  %v18337_v26 = vld [vmem:[#allocation153_spill] sm:$0xff]  ;;  %v15309_v31 = vpop.permute.xlu0 %4975 }
 0x59a   : > { %18332 = vst [vmem:[#allocation111_spill] sm:$0xff] %v15274_v39  ;;  %v15282_v11 = vpop.eup %9074  ;;  %9094 = vpow2.f32 %v5572_v21  ;;  %v15287_v43 = vmul.f32 1.442695, %v5066_v46  ;;  %v5588_v59 = vmul.f32 1.442695, %v5180_v30  ;;  %v5832_v34 = vadd.f32 %v14918_v52, %v14912_v56  ;;  %v18339_v52 = vld [vmem:[#allocation155_spill] sm:$0xff] }
 0x59b   : > { %v15289_v25 = vpop.eup %9076  ;;  %9096 = vpow2.f32 %v5574_v0  ;;  %v15291_v41 = vmul.f32 1.442695, %v5067_v37  ;;  %v5590_v20 = vmul.f32 1.442695, %v5181_v22  ;;  %v5188_v58 = vsub.f32 %v18337_v26, %v15280_v57  ;;  %v18338_v37 = vld [vmem:[#allocation154_spill] sm:$0xff]  ;;  %18340 = vst [vmem:[#allocation91_spill] sm:$0xff] %v15309_v31 }
 0x59c   : > { %v15295_v39 = vpop.eup %9078  ;;  %9098 = vpow2.f32 %v5576_v33  ;;  %v5592_v0 = vmul.f32 1.442695, %v5182_v4  ;;  %v5594_v30 = vmul.f32 1.442695, %v5183_v49  ;;  %v5189_v24 = vsub.f32 %v18338_v37, %v15280_v57  ;;  %v18342_v4 = vld [vmem:[#allocation158_spill] sm:$0xff] }
 0x59d   : > { %v15301_v46 = vpop.eup %9080  ;;  %9100 = vpow2.f32 %v5578_v14  ;;  %v5596_v56 = vmul.f32 1.442695, %v5184_v8  ;;  %v5190_v33 = vsub.f32 %v18339_v52, %v15280_v57  ;;  %v15312_v22 = vadd.f32 %v14881_v13, %v5816_v51  ;;  %v18343_v37 = vld [vmem:[#allocation122_spill] sm:$0xff]  ;;  %v18345_v52 = vld [vmem:[#allocation168_spill] sm:$0xff] }
 0x59e   : > { %v15305_v18 = vpop.eup %9082  ;;  %9102 = vpow2.f32 %v5580_v42  ;;  %v5191_v49 = vsub.f32 %v18342_v4, %v15280_v57  ;;  %v5833_v14 = vadd.f32 %v14923_v3, %v5832_v34  ;;  %v5082_v42 = vsub.f32 %v18343_v37, %v14839_v47  ;;  %v18346_v13 = vld [vmem:[#allocation246_spill] sm:$0xff]  ;;  %v18348_v4 = vld [vmem:[#allocation157_spill] sm:$0xff] }
 0x59f   : > { %v15314_v26 = vpop.eup %9084  ;;  %9104 = vpow2.f32 %v5588_v59  ;;  %v5192_v21 = vsub.f32 %v18345_v52, %v15280_v57  ;;  %v5604_v29 = vmul.f32 1.442695, %v5188_v58  ;;  %v5083_v51 = vsub.f32 %v18346_v13, %v14839_v47  ;;  %v18350_v52 = vld [vmem:[#allocation160_spill] sm:$0xff] }
 0x5a0   : > { %18341 = vst [vmem:[#allocation94_spill] sm:$0xff] %v15314_v26  ;;  %v15321_v8 = vpop.eup %9086  ;;  %9106 = vpow2.f32 %v5590_v20  ;;  %v5606_v59 = vmul.f32 1.442695, %v5189_v24  ;;  %v5196_v3 = vsub.f32 %v18348_v4, %v15309_v31  ;;  %v5850_v34 = vadd.f32 %v14970_v53, %v14966_v7  ;;  %v18353_v7 = vld [vmem:[#allocation134_spill] sm:$0xff] }
 0x5a1   : > { %18344 = vst [vmem:[#allocation129_spill] sm:$0xff] %v15321_v8  ;;  %v15327_v26 = vpop.eup %9088  ;;  %9108 = vpow2.f32 %v5592_v0  ;;  %v5608_v20 = vmul.f32 1.442695, %v5190_v33  ;;  %v5197_v58 = vsub.f32 %v18350_v52, %v15309_v31  ;;  %v18351_v13 = vsub.f32 %v18248_v1, %v14839_v47  ;;  %v18354_v33 = vld [vmem:[#allocation163_spill] sm:$0xff] }
 0x5a2   : > { %18347 = vst [vmem:[#allocation147_spill] sm:$0xff] %v15327_v26  ;;  %v15333_v37 = vpop.eup %9090  ;;  %9110 = vpow2.f32 %v5594_v30  ;;  %v5610_v24 = vmul.f32 1.442695, %v5191_v49  ;;  %v5834_v4 = vadd.f32 %v14927_v27, %v5833_v14  ;;  %v5098_v53 = vsub.f32 %v18353_v7, %v14910_v48  ;;  %v18355_v14 = vld [vmem:[#allocation164_spill] sm:$0xff] }
 0x5a3   : > { %18349 = vst [vmem:[#allocation93_spill] sm:$0xff] %v15333_v37  ;;  %v15340_v8 = vmul.f32 1.442695, %v18351_v13  ;;  %v15342_v0 = vpop.eup %9092  ;;  %9112 = vpow2.f32 %v5596_v56  ;;  %v5612_v30 = vmul.f32 1.442695, %v5192_v21  ;;  %v5198_v52 = vsub.f32 %v18354_v33, %v15309_v31  ;;  %v15362_v13 = vpop.permute.xlu1 %4980 }
 0x5a4   : > { %18352 = vst [vmem:[#allocation136_spill] sm:$0xff] %v15342_v0  ;;  %v15347_v37 = vpop.eup %9094  ;;  %9114 = vpow2.f32 %v5604_v29  ;;  %v15351_v26 = vmul.f32 1.442695, %v5082_v42  ;;  %v5620_v1 = vmul.f32 1.442695, %v5196_v3  ;;  %v5851_v27 = vadd.f32 %v14974_v28, %v5850_v34  ;;  %v18356_v42 = vld [vmem:[#allocation146_spill] sm:$0xff] }
 0x5a5   : > { %v15353_v47 = vpop.eup %9096  ;;  %9116 = vpow2.f32 %v5606_v59  ;;  %v15355_v56 = vmul.f32 1.442695, %v5083_v51  ;;  %v5199_v29 = vsub.f32 %v18355_v14, %v15309_v31  ;;  %v5622_v21 = vmul.f32 1.442695, %v5197_v58  ;;  %v18358_v59 = vld [vmem:[#allocation89_spill] sm:$0xff] }
 0x5a6   : > { %v15358_v49 = vpop.eup %9098  ;;  %9118 = vpow2.f32 %v5608_v20  ;;  %v5099_v7 = vsub.f32 %v18356_v42, %v14910_v48  ;;  %v15371_v28 = vadd.f32 %v14933_v44, %v5834_v4  ;;  %v18359_v3 = vsub.f32 %v18254_v61, %v14910_v48  ;;  %v18361_v58 = vld [vmem:[#allocation213_spill] sm:$0xff] }
 0x5a7   : > { %v15366_v33 = vpop.eup %9100  ;;  %9120 = vpow2.f32 %v5610_v24  ;;  %v5200_v14 = vsub.f32 %v18361_v58, %v15309_v31  ;;  %v5624_v42 = vmul.f32 1.442695, %v5198_v52  ;;  %v5868_v0 = vadd.f32 %v15026_v10, %v15020_v19  ;;  %v18363_v44 = vld [vmem:[#allocation169_spill] sm:$0xff] }
 0x5a8   : > { %18357 = vst [vmem:[#allocation95_spill] sm:$0xff] %v15366_v33  ;;  %v15376_v34 = vmul.f32 1.442695, %v18359_v3  ;;  %v15378_v20 = vpop.eup %9102  ;;  %9122 = vpow2.f32 %v5612_v30  ;;  %v5204_v24 = vsub.f32 %v18363_v44, %v15362_v13  ;;  %v5852_v48 = vadd.f32 %v14978_v2, %v5851_v27  ;;  %v18365_v3 = vld [vmem:[#allocation171_spill] sm:$0xff]  ;;  %v18368_v2 = vld [vmem:[#allocation141_spill] sm:$0xff]  ;;  %v18369_v27 = vld [vmem:[#allocation254_spill] sm:$0xff] }
 0x5a9   : > { %18360 = vst [vmem:[#allocation99_spill] sm:$0xff] %v15378_v20  ;;  %v15384_v51 = vpop.eup %9104  ;;  %9124 = vpow2.f32 %v5620_v1  ;;  %v15389_v61 = vmul.f32 1.442695, %v5098_v53  ;;  %v5626_v30 = vmul.f32 1.442695, %v5199_v29  ;;  %v5205_v52 = vsub.f32 %v18365_v3, %v15362_v13  ;;  %v18388_v33 = vld [vmem:[#allocation150_spill] sm:$0xff] }
 0x5aa   : > { %18362 = vst [vmem:[#allocation100_spill] sm:$0xff] %v15384_v51  ;;  %v15391_v4 = vpop.eup %9106  ;;  %9126 = vpow2.f32 %v5622_v21  ;;  %v15395_v58 = vmul.f32 1.442695, %v5099_v7  ;;  %v5114_v53 = vsub.f32 %v18368_v2, %v14964_v36  ;;  %v5115_v44 = vsub.f32 %v18369_v27, %v14964_v36  ;;  %v18371_v7 = vld [vmem:[#allocation172_spill] sm:$0xff]  ;;  %v18385_v51 = vld [vmem:[#allocation159_spill] sm:$0xff] }
 0x5ab   : > { %18364 = vst [vmem:[#allocation114_spill] sm:$0xff] %v15391_v4  ;;  %v15397_v19 = vpop.eup %9108  ;;  %9128 = vpow2.f32 %v15178_v40  ;;  %v5628_v29 = vmul.f32 1.442695, %v5200_v14  ;;  %v5206_v3 = vsub.f32 %v18371_v7, %v15362_v13  ;;  %v5636_v40 = vmul.f32 1.442695, %v5204_v24  ;;  %v18373_v14 = vld [vmem:[#allocation174_spill] sm:$0xff] }
 0x5ac   : > { %18366 = vst [vmem:[#allocation104_spill] sm:$0xff] %v15397_v19  ;;  %v15406_v21 = vpop.eup %9110  ;;  %9130 = vpow2.f32 %v5624_v42  ;;  %v5869_v19 = vadd.f32 %v15032_v63, %v5868_v0  ;;  %v15415_v1 = vadd.f32 %v14984_v5, %v5852_v48  ;;  %v5886_v2 = vadd.f32 %v15091_v9, %v15085_v6  ;;  %v18375_v63 = vld [vmem:[#allocation102_spill] sm:$0xff]  ;;  %v18377_v6 = vld [vmem:[#allocation47_spill] sm:$0xff]  ;;  %v18378_v48 = vld [vmem:[#allocation152_spill] sm:$0xff] }
 0x5ad   : > { %18370 = vst [vmem:[#allocation106_spill] sm:$0xff] %v15406_v21  ;;  %v15411_v4 = vpop.eup %9112  ;;  %9132 = vpow2.f32 %v15186_v62  ;;  %v5207_v42 = vsub.f32 %v18373_v14, %v15362_v13  ;;  %v5638_v7 = vmul.f32 1.442695, %v5205_v52  ;;  %v15423_v21 = vpop.permute.xlu0 %4985  ;;  %v18376_v0 = vsub.f32 %v18375_v63, %v14964_v36  ;;  %v18380_v52 = vld [vmem:[#allocation238_spill] sm:$0xff]  ;;  %v18381_v63 = vld [vmem:[#allocation48_spill] sm:$0xff] }
 0x5ae   : > { %18372 = vst [vmem:[#allocation107_spill] sm:$0xff] %v15411_v4  ;;  %v15419_v27 = vpop.eup %9114  ;;  %9134 = vpow2.f32 %v5626_v30  ;;  %18374 = vst [vmem:[#allocation110_spill] sm:$0xff] %v15423_v21  ;;  %v15433_v5 = vmul.f32 1.442695, %v5114_v53  ;;  %v15435_v9 = vmul.f32 1.442695, %v5115_v44  ;;  %v5130_v30 = vsub.f32 %v18378_v48, %v18377_v6 }
 0x5af   : > { %v15428_v62 = vmul.f32 1.442695, %v18376_v0  ;;  %v15430_v24 = vpop.eup %9116  ;;  %9136 = vpow2.f32 %v15201_v32  ;;  %v5208_v4 = vsub.f32 %v18380_v52, %v15362_v13  ;;  %v5640_v36 = vmul.f32 1.442695, %v5206_v3  ;;  %v18383_v32 = vld [vmem:[#allocation173_spill] sm:$0xff]  ;;  %v18384_v44 = vld [vmem:[#allocation247_spill] sm:$0xff] }
 0x5b0   : > { %v15439_v14 = vpop.eup %9118  ;;  %9138 = vpow2.f32 %v5628_v29  ;;  %v5870_v0 = vadd.f32 %v18381_v63, %v5869_v19  ;;  %v5212_v53 = vsub.f32 %v18383_v32, %v15423_v21  ;;  %v5887_v31 = vadd.f32 %v18384_v44, %v5886_v2  ;;  %v18387_v52 = vld [vmem:[#allocation176_spill] sm:$0xff] }
 0x5b1   : > { %18379 = vst [vmem:[#allocation119_spill] sm:$0xff] %v15439_v14  ;;  %v15444_v10 = vpop.eup %9120  ;;  %9140 = vpow2.f32 %v5636_v40  ;;  %v5131_v48 = vsub.f32 %v18385_v51, %v18377_v6  ;;  %v5642_v29 = vmul.f32 1.442695, %v5207_v42  ;;  %v5213_v3 = vsub.f32 %v18387_v52, %v15423_v21  ;;  %v18394_v52 = vld [vmem:[#allocation49_spill] sm:$0xff] }
 0x5b2   : > { %18382 = vst [vmem:[#allocation109_spill] sm:$0xff] %v15444_v10  ;;  %v15451_v20 = vpop.eup %9122  ;;  %9142 = vpow2.f32 %v5638_v7  ;;  %v18389_v19 = vsub.f32 %v18388_v33, %v18377_v6  ;;  %v15465_v51 = vmul.f32 1.442695, %v5130_v30  ;;  %v5904_v42 = vadd.f32 %v15147_v35, %v15145_v16  ;;  %v18393_v33 = vld [vmem:[#allocation177_spill] sm:$0xff]  ;;  %v18397_v35 = vld [vmem:[#allocation178_spill] sm:$0xff] }
 0x5b3   : > { %18386 = vst [vmem:[#allocation112_spill] sm:$0xff] %v15451_v20  ;;  %v15460_v40 = vpop.eup %9124  ;;  %9144 = vpow2.f32 %v15214_v54  ;;  %v5644_v44 = vmul.f32 1.442695, %v5208_v4  ;;  %v5214_v6 = vsub.f32 %v18393_v33, %v15423_v21  ;;  %v5652_v2 = vmul.f32 1.442695, %v5212_v53  ;;  %v18395_v54 = vld [vmem:[#allocation59_spill] sm:$0xff]  ;;  %v15485_v33 = vpop.permute.xlu1 %4990 }
 0x5b4   : > { %v15458_v63 = vmul.f32 1.442695, %v18389_v19  ;;  %18390 = vst [vmem:[#allocation115_spill] sm:$0xff] %v15460_v40  ;;  %v15469_v7 = vpop.eup %9126  ;;  %9146 = vpow2.f32 %v5640_v36  ;;  %v15474_v19 = vadd.f32 %v18394_v52, %v5870_v0  ;;  %v5888_v30 = vadd.f32 %v18395_v54, %v5887_v31  ;;  %18398 = vst [vmem:[#allocation120_spill] sm:$0xff] %v15485_v33  ;;  %v18401_v52 = vld [vmem:[#allocation161_spill] sm:$0xff] }
 0x5b5   : > { %18392 = vst [vmem:[#allocation116_spill] sm:$0xff] %v15469_v7  ;;  %v9129_v40 = vpop.eup %9128  ;;  %9148 = vpow2.f32 %v15220_v12  ;;  %v15478_v20 = vmul.f32 1.442695, %v5131_v48  ;;  %v5215_v4 = vsub.f32 %v18397_v35, %v15423_v21  ;;  %v5654_v36 = vmul.f32 1.442695, %v5213_v3  ;;  %v18399_v12 = vld [vmem:[#allocation229_spill] sm:$0xff] }
 0x5b6   : > { %v15480_v10 = vpop.eup %9130  ;;  %v5809_v16 = vadd.f32 %v9129_v40, %v15251_v23  ;;  %9150 = vpow2.f32 %v5642_v29  ;;  %v5216_v53 = vsub.f32 %v18399_v12, %v15423_v21  ;;  %v15491_v31 = vadd.f32 %v15155_v60, %v5904_v42  ;;  %v18400_v48 = vld [vmem:[#allocation54_spill] sm:$0xff]  ;;  %v18403_v3 = vld [vmem:[#allocation135_spill] sm:$0xff]  ;;  %v18405_v12 = vld [vmem:[#allocation184_spill] sm:$0xff] }
 0x5b7   : > { %18396 = vst [vmem:[#allocation170_spill] sm:$0xff] %v15480_v10  ;;  %v9133_v0 = vpop.eup %9132  ;;  %9152 = vpow2.f32 %v15235_v15  ;;  %v5656_v40 = vmul.f32 1.442695, %v5214_v6  ;;  %v18404_v15 = vld [vmem:[#allocation182_spill] sm:$0xff]  ;;  %v5221_v60 = vsub.f32 %v18405_v12, %v15485_v33  ;;  %v18406_v42 = vld [vmem:[#allocation185_spill] sm:$0xff]  ;;  %v18412_v12 = vld [vmem:[#allocation187_spill] sm:$0xff] }
 0x5b8   : > { %v15495_v23 = vpop.eup %9134  ;;  %v5810_v29 = vadd.f32 %v9133_v0, %v5809_v16  ;;  %9154 = vpow2.f32 %v5644_v44  ;;  %v5220_v7 = vsub.f32 %v18404_v15, %v15485_v33  ;;  %v5222_v32 = vsub.f32 %v18406_v42, %v15485_v33  ;;  %v18408_v6 = vld [vmem:[#allocation165_spill] sm:$0xff] }
 0x5b9   : > { %18402 = vst [vmem:[#allocation124_spill] sm:$0xff] %v15495_v23  ;;  %v9137_v10 = vpop.eup %9136  ;;  %9156 = vpow2.f32 %v5652_v2  ;;  %v5658_v44 = vmul.f32 1.442695, %v5215_v4  ;;  %v18409_v16 = vsub.f32 %v18408_v6, %v18400_v48  ;;  %v5660_v14 = vmul.f32 1.442695, %v5216_v53  ;;  %v18415_v4 = vld [vmem:[#allocation235_spill] sm:$0xff] }
 0x5ba   : > { %v15505_v54 = vpop.eup %9138  ;;  %v5811_v23 = vadd.f32 %v9137_v10, %v5810_v29  ;;  %9158 = vpow2.f32 %v5654_v36  ;;  %v5223_v42 = vsub.f32 %v18412_v12, %v15485_v33  ;;  %v5224_v36 = vsub.f32 %v18415_v4, %v15485_v33  ;;  %v15538_v29 = vpop.permute.xlu1 %5000 }
 0x5bb   : > { %18407 = vst [vmem:[#allocation125_spill] sm:$0xff] %v15505_v54  ;;  %v15510_v0 = vmul.f32 1.442695, %v18409_v16  ;;  %v15512_v2 = vpop.eup %9140  ;;  %9160 = vpow2.f32 %v15262_v50  ;;  %v15519_v54 = vpop.permute.xlu0 %4995  ;;  %v18417_v16 = vld [vmem:[#allocation60_spill] sm:$0xff]  ;;  %v5668_v50 = vmul.f32 1.442695, %v5220_v7 }
 0x5bc   : > { %18413 = vst [vmem:[#allocation180_spill] sm:$0xff] %v15519_v54  ;;  %v15521_v10 = vpop.eup %9142  ;;  %5812 = vadd.xlane.f32.xlu0 %v5811_v23  ;;  %9162 = vpow2.f32 %v5656_v40  ;;  %v15528_v35 = vadd.f32 %v18417_v16, %v5888_v30  ;;  %v5670_v12 = vmul.f32 1.442695, %v5221_v60  ;;  %v5672_v15 = vmul.f32 1.442695, %v5222_v32  ;;  %v18420_v40 = vld [vmem:[#allocation186_spill] sm:$0xff] }
 0x5bd   : > { %18410 = vst [vmem:[#allocation128_spill] sm:$0xff] %v15510_v0  ;;  %18414 = vst [vmem:[#allocation72_spill] sm:$0xff] %v15521_v10  ;;  %v9145_v53 = vpop.eup %9144  ;;  %9164 = vpow2.f32 %v15287_v43  ;;  %v5228_v4 = vsub.f32 %v18420_v40, %v15519_v54  ;;  %v18421_v0 = vld [vmem:[#allocation189_spill] sm:$0xff]  ;;  %v5674_v43 = vmul.f32 1.442695, %v5223_v42  ;;  %v18423_v7 = vld [vmem:[#allocation190_spill] sm:$0xff] }
 0x5be   : > { %18418 = vst [vmem:[#allocation240_spill] sm:$0xff] %v15528_v35  ;;  %v15531_v21 = vpop.eup %9146  ;;  %v5818_v23 = vadd.f32 %v9145_v53, %v15312_v22  ;;  %9166 = vpow2.f32 %v5658_v44  ;;  %v5229_v6 = vsub.f32 %v18421_v0, %v15519_v54  ;;  %18422 = vst [vmem:[#allocation127_spill] sm:$0xff] %v15538_v29  ;;  %v5230_v32 = vsub.f32 %v18423_v7, %v15519_v54  ;;  %v18424_v60 = vld [vmem:[#allocation196_spill] sm:$0xff]  ;;  %v18426_v40 = vld [vmem:[#allocation175_spill] sm:$0xff] }
 0x5bf   : > { %18419 = vst [vmem:[#allocation108_spill] sm:$0xff] %v15531_v21  ;;  %v9149_v30 = vpop.eup %9148  ;;  %9168 = vpow2.f32 %v15291_v41  ;;  %v5231_v16 = vsub.f32 %v18424_v60, %v15519_v54  ;;  %v5676_v53 = vmul.f32 1.442695, %v5224_v36  ;;  %v5232_v0 = vsub.f32 %v18426_v40, %v15519_v54  ;;  %v18428_v42 = vld [vmem:[#allocation198_spill] sm:$0xff]  ;;  %v18429_v7 = vld [vmem:[#allocation199_spill] sm:$0xff]  ;;  %v15561_v21 = vpop.permute.xlu0 %5005 }
 0x5c0   : > { %v15545_v22 = vpop.eup %9150  ;;  %v5819_v44 = vadd.f32 %v9149_v30, %v5818_v23  ;;  %9170 = vpow2.f32 %v5660_v14  ;;  %v5236_v35 = vsub.f32 %v18428_v42, %v15538_v29  ;;  %v5237_v10 = vsub.f32 %v18429_v7, %v15538_v29  ;;  %v18432_v40 = vld [vmem:[#allocation203_spill] sm:$0xff]  ;;  %18433 = vst [vmem:[#allocation264_spill] sm:$0xff] %v15561_v21 }
 0x5c1   : > { %18425 = vst [vmem:[#allocation130_spill] sm:$0xff] %v15545_v22  ;;  %v9153_v33 = vpop.eup %9152  ;;  %9172 = vpow2.f32 %v5668_v50  ;;  %v5684_v14 = vmul.f32 1.442695, %v5228_v4  ;;  %v5686_v36 = vmul.f32 1.442695, %v5229_v6  ;;  %v5238_v41 = vsub.f32 %v18432_v40, %v15538_v29  ;;  %v18436_v6 = vld [vmem:[#allocation92_spill] sm:$0xff] }
 0x5c2   : > { %v15555_v60 = vpop.eup %9154  ;;  %v5820_v22 = vadd.f32 %v9153_v33, %v5819_v44  ;;  %9174 = vpow2.f32 %v5670_v12  ;;  %v5688_v30 = vmul.f32 1.442695, %v5230_v32  ;;  %v5690_v50 = vmul.f32 1.442695, %v5231_v16  ;;  %v18435_v33 = vld [vmem:[#allocation205_spill] sm:$0xff]  ;;  %v18441_v32 = vld [vmem:[#allocation206_spill] sm:$0xff] }
 0x5c3   : > { %18430 = vst [vmem:[#allocation132_spill] sm:$0xff] %v15555_v60  ;;  %v15557_v23 = vpop.eup %9156  ;;  %9176 = vpow2.f32 %v5672_v15  ;;  %v5692_v7 = vmul.f32 1.442695, %v5232_v0  ;;  %v5239_v12 = vsub.f32 %v18435_v33, %v15538_v29  ;;  %v5240_v4 = vsub.f32 %v18436_v6, %v15538_v29  ;;  %v18440_v33 = vld [vmem:[#allocation204_spill] sm:$0xff]  ;;  %v18446_v60 = vld [vmem:[#allocation98_spill] sm:$0xff] }
 0x5c4   : > { %18431 = vst [vmem:[#allocation133_spill] sm:$0xff] %v15557_v23  ;;  %v15563_v42 = vpop.eup %9158  ;;  %5821 = vadd.xlane.f32.xlu0 %v5820_v22  ;;  %9178 = vpow2.f32 %v5674_v43  ;;  %v5700_v16 = vmul.f32 1.442695, %v5236_v35  ;;  %v15571_v40 = vmul.f32 1.442695, %v5237_v10  ;;  %v18439_v43 = vld [vmem:[#allocation202_spill] sm:$0xff]  ;;  %v5246_v35 = vsub.f32 %v18441_v32, %v15561_v21 }
 0x5c5   : > { %18434 = vst [vmem:[#allocation113_spill] sm:$0xff] %v15563_v42  ;;  %v9161_v44 = vpop.eup %9160  ;;  %9180 = vpow2.f32 %v5676_v53  ;;  %v5244_v0 = vsub.f32 %v18439_v43, %v15561_v21  ;;  %v5245_v42 = vsub.f32 %v18440_v33, %v15561_v21  ;;  %v15580_v53 = vmul.f32 1.442695, %v5238_v41  ;;  %v18442_v10 = vld [vmem:[#allocation207_spill] sm:$0xff]  ;;  %v15591_v33 = vpop.permute.xlu1 %5010 }
 0x5c6   : > { %v15573_v54 = vpop.eup %9162  ;;  %v5836_v22 = vadd.f32 %v9161_v44, %v15371_v28  ;;  %9182 = vpow2.f32 %v5684_v14  ;;  %v5247_v23 = vsub.f32 %v18442_v10, %v15561_v21  ;;  %v5706_v14 = vmul.f32 1.442695, %v5239_v12  ;;  %v18444_v44 = vld [vmem:[#allocation280_spill] sm:$0xff] }
 0x5c7   : > { %18438 = vst [vmem:[#allocation137_spill] sm:$0xff] %v15573_v54  ;;  %v9165_v6 = vpop.eup %9164  ;;  %9184 = vpow2.f32 %v5686_v36  ;;  %v5248_v43 = vsub.f32 %v18444_v44, %v15561_v21  ;;  %v5708_v41 = vmul.f32 1.442695, %v5240_v4  ;;  %v5906_v10 = vadd.f32 %v18446_v60, %v15491_v31  ;;  %v18448_v44 = vld [vmem:[#allocation211_spill] sm:$0xff]  ;;  %v15611_v31 = vpop.permute.xlu0 %5015 }
 0x5c8   : > { %v15586_v54 = vpop.eup %9166  ;;  %v5837_v28 = vadd.f32 %v9165_v6, %v5836_v22  ;;  %9186 = vpow2.f32 %v15340_v8  ;;  %v5716_v8 = vmul.f32 1.442695, %v5244_v0  ;;  %v15600_v12 = vmul.f32 1.442695, %v5245_v42  ;;  %18449 = vst [vmem:[#allocation143_spill] sm:$0xff] %v15611_v31  ;;  %v18450_v42 = vld [vmem:[#allocation212_spill] sm:$0xff] }
 0x5c9   : > { %18443 = vst [vmem:[#allocation139_spill] sm:$0xff] %v15586_v54  ;;  %v9169_v36 = vpop.eup %9168  ;;  %9188 = vpow2.f32 %v5688_v30  ;;  %v15605_v30 = vmul.f32 1.442695, %v5246_v35  ;;  %v15607_v4 = vmul.f32 1.442695, %v5247_v23  ;;  %v5252_v32 = vsub.f32 %v18448_v44, %v15591_v33  ;;  %v18453_v44 = vld [vmem:[#allocation216_spill] sm:$0xff] }
 0x5ca   : > { %v15597_v29 = vpop.eup %9170  ;;  %v5838_v22 = vadd.f32 %v9169_v36, %v5837_v28  ;;  %9190 = vpow2.f32 %v15351_v26  ;;  %v15616_v26 = vmul.f32 1.442695, %v5248_v43  ;;  %v5253_v0 = vsub.f32 %v18450_v42, %v15591_v33  ;;  %v18452_v28 = vld [vmem:[#allocation73_spill] sm:$0xff] }
 0x5cb   : > { %18447 = vst [vmem:[#allocation140_spill] sm:$0xff] %v15597_v29  ;;  %v15602_v6 = vpop.eup %9172  ;;  %9192 = vpow2.f32 %v15376_v34  ;;  %v18451_v34 = vld [vmem:[#allocation215_spill] sm:$0xff]  ;;  %v15626_v36 = vadd.f32 %v18452_v28, %v5906_v10  ;;  %v15642_v28 = vmul.f32 1.442695, %v5252_v32  ;;  %v18459_v54 = vld [vmem:[#allocation221_spill] sm:$0xff] }
 0x5cc   : > { %v15613_v60 = vpop.eup %9174  ;;  %5839 = vadd.xlane.f32.xlu0 %v5838_v22  ;;  %9194 = vpow2.f32 %v15355_v56  ;;  %v5254_v35 = vsub.f32 %v18451_v34, %v15591_v33  ;;  %v5255_v22 = vsub.f32 %v18453_v44, %v15591_v33  ;;  %v18454_v56 = vld [vmem:[#allocation222_spill] sm:$0xff]  ;;  %v15651_v15 = vmul.f32 1.442695, %v5253_v0 }
 0x5cd   : > { %v15622_v23 = vpop.eup %9176  ;;  %9196 = vpow2.f32 %v15389_v61  ;;  %v5256_v43 = vsub.f32 %v18454_v56, %v15591_v33  ;;  %v18457_v34 = vld [vmem:[#allocation214_spill] sm:$0xff]  ;;  %v5922_v61 = vadd.f32 %v15224_v55, %v15216_v45  ;;  %v18462_v55 = vld [vmem:[#allocation276_spill] sm:$0xff] }
 0x5ce   : > { %v15632_v29 = vpop.eup %9178  ;;  %9198 = vpow2.f32 %v5690_v50  ;;  %v5260_v21 = vsub.f32 %v18457_v34, %v15611_v31  ;;  %v18458_v44 = vld [vmem:[#allocation218_spill] sm:$0xff]  ;;  %v5262_v50 = vsub.f32 %v18459_v54, %v15611_v31  ;;  %v18461_v34 = vld [vmem:[#allocation223_spill] sm:$0xff]  ;;  %v15659_v42 = vmul.f32 1.442695, %v5254_v35 }
 0x5cf   : > { %18455 = vst [vmem:[#allocation188_spill] sm:$0xff] %v15632_v29  ;;  %v15640_v10 = vpop.eup %9180  ;;  %9200 = vpow2.f32 %v5692_v7  ;;  %v5261_v56 = vsub.f32 %v18458_v44, %v15611_v31  ;;  %v5263_v45 = vsub.f32 %v18461_v34, %v15611_v31  ;;  %v5264_v7 = vsub.f32 %v18462_v55, %v15611_v31 }
 0x5d0   : > { %v15648_v29 = vpop.eup %9182  ;;  %9202 = vpow2.f32 %v15395_v58  ;;  %v15661_v44 = vmul.f32 1.442695, %v5255_v22  ;;  %v15666_v58 = vmul.f32 1.442695, %v5256_v43  ;;  %v15668_v0 = vmul.f32 1.442695, %v5260_v21 }
 0x5d1   : > { %18460 = vst [vmem:[#allocation79_spill] sm:$0xff] %v15648_v29  ;;  %v15657_v32 = vpop.eup %9184  ;;  %9204 = vpow2.f32 %v5700_v16  ;;  %v5940_v29 = vadd.f32 %v15289_v25, %v15282_v11  ;;  %v5923_v34 = vadd.f32 %v15227_v17, %v5922_v61  ;;  %v15675_v35 = vmul.f32 1.442695, %v5261_v56  ;;  %v18464_v21 = vld [vmem:[#allocation69_spill] sm:$0xff]  ;;  %v18465_v43 = vld [vmem:[#allocation144_spill] sm:$0xff]  ;;  %v15688_v56 = vpop.permute.xlu1 %5020 }
 0x5d2   : > { %18463 = vst [vmem:[#allocation241_spill] sm:$0xff] %v15657_v32  ;;  %v9187_v54 = vpop.eup %9186  ;;  %9206 = vpow2.f32 %v15571_v40  ;;  %v15677_v22 = vmul.f32 1.442695, %v5262_v50  ;;  %v15679_v25 = vmul.f32 1.442695, %v5263_v45  ;;  %v5162_v32 = vsub.f32 %v18465_v43, %v18464_v21 }
 0x5d3   : > { %v15671_v31 = vpop.eup %9188  ;;  %v5854_v16 = vadd.f32 %v9187_v54, %v15415_v1  ;;  %9208 = vpow2.f32 %v15580_v53  ;;  %v15681_v40 = vmul.f32 1.442695, %v5264_v7  ;;  %v18466_v1 = vld [vmem:[#allocation263_spill] sm:$0xff]  ;;  %v5941_v53 = vadd.f32 %v15295_v39, %v5940_v29 }
 0x5d4   : > { %v9191_v11 = vpop.eup %9190  ;;  %9210 = vpow2.f32 %v5706_v14  ;;  %v5163_v54 = vsub.f32 %v18466_v1, %v18464_v21  ;;  %v18467_v45 = vsub.f32 %v18401_v52, %v18400_v48  ;;  %v5924_v43 = vadd.f32 %v15231_v38, %v5923_v34  ;;  %v18472_v38 = vld [vmem:[#allocation225_spill] sm:$0xff] }
 0x5d5   : > { %v9193_v17 = vpop.eup %9192  ;;  %v5855_v61 = vadd.f32 %v9191_v11, %v5854_v16  ;;  %9212 = vpow2.f32 %v5708_v41  ;;  %v18468_v39 = vsub.f32 %v18403_v3, %v18400_v48  ;;  %v18469_v11 = vld [vmem:[#allocation183_spill] sm:$0xff]  ;;  %v5268_v34 = vsub.f32 %v18472_v38, %v15688_v56 }
 0x5d6   : > { %v9195_v50 = vpop.eup %9194  ;;  %v5872_v14 = vadd.f32 %v9193_v17, %v15474_v19  ;;  %9214 = vpow2.f32 %v5716_v8  ;;  %v15694_v7 = vmul.f32 1.442695, %v18467_v45  ;;  %v18470_v19 = vsub.f32 %v18469_v11, %v18464_v21  ;;  %v18476_v45 = vld [vmem:[#allocation226_spill] sm:$0xff] }
 0x5d7   : > { %v9197_v16 = vpop.eup %9196  ;;  %v5856_v41 = vadd.f32 %v9195_v50, %v5855_v61  ;;  %9216 = vpow2.f32 %v15600_v12  ;;  %v15701_v29 = vmul.f32 1.442695, %v18468_v39  ;;  %v18473_v12 = vld [vmem:[#allocation56_spill] sm:$0xff]  ;;  %v15718_v48 = vmul.f32 1.442695, %v5162_v32  ;;  %v18478_v32 = vld [vmem:[#allocation283_spill] sm:$0xff] }
 0x5d8   : > { %v15706_v8 = vmul.f32 1.442695, %v18470_v19  ;;  %v15708_v17 = vpop.eup %9198  ;;  %v5873_v52 = vadd.f32 %v9197_v16, %v5872_v14  ;;  %9218 = vpow2.f32 %v15428_v62  ;;  %v5269_v61 = vsub.f32 %v18473_v12, %v15688_v56  ;;  %v18475_v62 = vld [vmem:[#allocation85_spill] sm:$0xff]  ;;  %v18477_v39 = vld [vmem:[#allocation228_spill] sm:$0xff] }
 0x5d9   : > { %18471 = vst [vmem:[#allocation142_spill] sm:$0xff] %v15708_v17  ;;  %v15715_v1 = vpop.eup %9200  ;;  %5857 = vadd.xlane.f32.xlu0 %v5856_v41  ;;  %9220 = vpow2.f32 %v15605_v30  ;;  %v15720_v3 = vmul.f32 1.442695, %v5163_v54  ;;  %v5942_v21 = vadd.f32 %v15301_v46, %v5941_v53  ;;  %v15725_v14 = vadd.f32 %v18475_v62, %v5924_v43  ;;  %v18479_v54 = vld [vmem:[#allocation285_spill] sm:$0xff]  ;;  %v18480_v12 = vld [vmem:[#allocation80_spill] sm:$0xff] }
 0x5da   : > { %18474 = vst [vmem:[#allocation145_spill] sm:$0xff] %v15715_v1  ;;  %v9203_v50 = vpop.eup %9202  ;;  %9222 = vpow2.f32 %v15433_v5  ;;  %v5270_v16 = vsub.f32 %v18476_v45, %v15688_v56  ;;  %v5271_v41 = vsub.f32 %v18477_v39, %v15688_v56  ;;  %v5272_v46 = vsub.f32 %v18478_v32, %v15688_v56  ;;  %v6608_v45 = vld [vmem:[#allocation5 + $0xc0] sm:$0xff]  ;;  %v6610_v5 = vld [vmem:[#allocation5 + $0xd0] sm:$0xff] }
 0x5db   : > { %v15731_v11 = vpop.eup %9204  ;;  %v5874_v30 = vadd.f32 %v9203_v50, %v5873_v52  ;;  %9224 = vpow2.f32 %v15458_v63  ;;  %v15741_v43 = vmul.f32 1.442695, %v5268_v34  ;;  %v15743_v19 = vmul.f32 1.442695, %v5269_v61  ;;  %v18481_v50 = vld [vmem:[#allocation191_spill] sm:$0xff] }
 0x5dc   : > { %v15738_v53 = vpop.eup %9206  ;;  %9226 = vpow2.f32 %v15435_v9  ;;  %v5958_v38 = vadd.f32 %v15353_v47, %v15347_v37  ;;  %v15751_v63 = vadd.f32 %v15305_v18, %v5942_v21  ;;  %v5178_v62 = vsub.f32 %v18481_v50, %v18480_v12  ;;  %v18482_v9 = vld [vmem:[#allocation197_spill] sm:$0xff] }
 0x5dd   : > { %v15747_v52 = vpop.eup %9208  ;;  %5875 = vadd.xlane.f32.xlu0 %v5874_v30  ;;  %9228 = vpow2.f32 %v15465_v51  ;;  %v5179_v34 = vsub.f32 %v18482_v9, %v18480_v12  ;;  %v15760_v37 = vmul.f32 1.442695, %v5270_v16  ;;  %v15762_v47 = vmul.f32 1.442695, %v5271_v41  ;;  %v18483_v51 = vld [vmem:[#allocation201_spill] sm:$0xff]  ;;  %v18484_v30 = vld [vmem:[#allocation208_spill] sm:$0xff] }
 0x5de   : > { %v15757_v61 = vpop.eup %9210  ;;  %9230 = vpow2.f32 %v15607_v4  ;;  %v5194_v39 = vsub.f32 %v18483_v51, %v15280_v57  ;;  %v15769_v21 = vmul.f32 1.442695, %v5272_v46  ;;  %v5195_v32 = vsub.f32 %v18484_v30, %v15280_v57  ;;  %v18485_v41 = vld [vmem:[#allocation192_spill] sm:$0xff] }
 0x5df   : > { %v15766_v18 = vpop.eup %9212  ;;  %9232 = vpow2.f32 %v15616_v26  ;;  %v5976_v50 = vadd.f32 %v15430_v24, %v15419_v27  ;;  %v18486_v9 = vsub.f32 %v18485_v41, %v18480_v12  ;;  %v5959_v26 = vadd.f32 %v15358_v49, %v5958_v38  ;;  %v18488_v49 = vld [vmem:[#allocation179_spill] sm:$0xff] }
 0x5e0   : > { %v15775_v16 = vpop.eup %9214  ;;  %9234 = vpow2.f32 %v15478_v20  ;;  %v15787_v30 = vmul.f32 1.442695, %v5178_v62  ;;  %v15789_v27 = vmul.f32 1.442695, %v5179_v34  ;;  %v18487_v20 = vsub.f32 %v18358_v59, %v15280_v57  ;;  %v18491_v34 = vld [vmem:[#allocation240_spill] sm:$0xff]  ;;  %v18492_v59 = vld [vmem:[#allocation119_spill] sm:$0xff] }
 0x5e1   : > { %v7096_v4 = vpop.xlane.xlu0 %7095  ;;  %v15781_v51 = vmul.f32 1.442695, %v18486_v9  ;;  %v15784_v1 = vpop.eup %9216  ;;  %9236 = vpow2.f32 %v15642_v28  ;;  %v15797_v41 = vmul.f32 1.442695, %v5194_v39  ;;  %v5210_v38 = vsub.f32 %v18488_v49, %v15362_v13 }
 0x5e2   : > { %v7184_v46 = vadd.f32 %v7096_v4, %v6608_v45  ;;  %v15794_v24 = vmul.f32 1.442695, %v18487_v20  ;;  %v9219_v12 = vpop.eup %9218  ;;  %9238 = vpow2.f32 %v15651_v15  ;;  %v18489_v45 = vld [vmem:[#allocation72_spill] sm:$0xff]  ;;  %v15808_v57 = vmul.f32 1.442695, %v5195_v32  ;;  %v18493_v20 = vld [vmem:[#allocation95_spill] sm:$0xff] }
 0x5e3   : > { %v5994_v28 = vadd.f32 %v18489_v45, %v15512_v2  ;;  %v15804_v62 = vpop.eup %9220  ;;  %v5890_v4 = vadd.f32 %v9219_v12, %v18491_v34  ;;  %9240 = vpow2.f32 %v15659_v42  ;;  %v5977_v15 = vadd.f32 %v18492_v59, %v5976_v50  ;;  %v18494_v2 = vld [vmem:[#allocation217_spill] sm:$0xff]  ;;  %v18495_v12 = vld [vmem:[#allocation219_spill] sm:$0xff]  ;;  %v6612_v34 = vld [vmem:[#allocation5 + $0xe0] sm:$0xff] }
 0x5e4   : > { %7216 = vst.msk [vmem:[#allocation5 + $0xc0] sm:$0xff] %vm6116_vm9, %v7184_v46  ;;  %18490 = vst [vmem:[#allocation148_spill] sm:$0xff] %v15804_v62  ;;  %v9223_v9 = vpop.eup %9222  ;;  %9242 = vpow2.f32 %v15661_v44  ;;  %v5960_v49 = vadd.f32 %v18493_v20, %v5959_v26  ;;  %v5211_v45 = vsub.f32 %v18494_v2, %v15362_v13  ;;  %v18496_v42 = vsub.f32 %v18495_v12, %v15362_v13  ;;  %v6607_v44 = vld [vmem:[#allocation5 + $0xb8] sm:$0xff] }
 0x5e5   : > { %v7114_v39 = vpop.xlane.xlu0 %7113  ;;  %v9225_v17 = vpop.eup %9224  ;;  %v5891_v62 = vadd.f32 %v9223_v9, %v5890_v4  ;;  %9244 = vpow2.f32 %v15666_v58  ;;  %v6012_v50 = vadd.f32 %v15613_v60, %v15602_v6  ;;  %v18497_v4 = vld [vmem:[#allocation108_spill] sm:$0xff]  ;;  %v18498_v9 = vld [vmem:[#allocation109_spill] sm:$0xff] }
 0x5e6   : > { %v7186_v46 = vadd.f32 %v7114_v39, %v6610_v5  ;;  %v15819_v32 = vmul.f32 1.442695, %v18496_v42  ;;  %v9227_v59 = vpop.eup %9226  ;;  %v5908_v26 = vadd.f32 %v9225_v17, %v15626_v36  ;;  %9246 = vpow2.f32 %v15668_v0  ;;  %v18499_v6 = vld [vmem:[#allocation120_spill] sm:$0xff] }
 0x5e7   : > { %v15825_v5 = vmul.f32 1.442695, %v5210_v38  ;;  %v5995_v39 = vadd.f32 %v18497_v4, %v5994_v28  ;;  %v9229_v58 = vpop.eup %9228  ;;  %v5892_v13 = vadd.f32 %v9227_v59, %v5891_v62  ;;  %9248 = vpow2.f32 %v15675_v35  ;;  %v18500_v60 = vld [vmem:[#allocation236_spill] sm:$0xff]  ;;  %v18504_v35 = vld [vmem:[#allocation99_spill] sm:$0xff] }
 0x5e8   : > { %7218 = vst.msk [vmem:[#allocation5 + $0xd0] sm:$0xff] %vm6116_vm9, %v7186_v46  ;;  %v5978_v20 = vadd.f32 %v18498_v9, %v5977_v15  ;;  %v5226_v2 = vsub.f32 %v18500_v60, %v18499_v6  ;;  %v15833_v36 = vpop.eup %9230  ;;  %v5909_v0 = vadd.f32 %v9229_v58, %v5908_v26  ;;  %v18502_v17 = vld [vmem:[#allocation128_spill] sm:$0xff]  ;;  %v15840_v62 = vadd.f32 %v18504_v35, %v5960_v49  ;;  %v18505_v15 = vld [vmem:[#allocation97_spill] sm:$0xff]  ;;  %v18507_v58 = vld [vmem:[#allocation234_spill] sm:$0xff] }
 0x5e9   : > { %v7132_v12 = vpop.xlane.xlu0 %7131  ;;  %v7087_v42 = vpop.xlane.xlu1 %7086  ;;  %18501 = vst [vmem:[#allocation149_spill] sm:$0xff] %v15833_v36  ;;  %9250 = vpow2.f32 %v18502_v17  ;;  %5893 = vadd.xlane.f32.xlu0 %v5892_v13  ;;  %v5227_v46 = vsub.f32 %v18505_v15, %v18499_v6  ;;  %v6013_v59 = vadd.f32 %v15622_v23, %v6012_v50  ;;  %v6609_v9 = vld [vmem:[#allocation5 + $0xc8] sm:$0xff]  ;;  %v15846_v26 = vmul.f32 1.442695, %v5211_v45  ;;  %v18509_v50 = vld [vmem:[#allocation127_spill] sm:$0xff]  ;;  %v18513_v15 = vld [vmem:[#allocation188_spill] sm:$0xff] }
 0x5ea   : > { %v7188_v38 = vadd.f32 %v7132_v12, %v6612_v34  ;;  %v7183_v28 = vadd.f32 %v7087_v42, %v6607_v44  ;;  %v15836_v4 = vpop.eup %9232  ;;  %9252 = vpow2.f32 %v15677_v22  ;;  %v18506_v34 = vld [vmem:[#allocation130_spill] sm:$0xff]  ;;  %v18508_v13 = vsub.f32 %v18507_v58, %v18499_v6  ;;  %v18511_v12 = vld [vmem:[#allocation279_spill] sm:$0xff]  ;;  %v18512_v6 = vld [vmem:[#allocation112_spill] sm:$0xff] }
 0x5eb   : > { %18503 = vst [vmem:[#allocation162_spill] sm:$0xff] %v15836_v4  ;;  %v9235_v60 = vpop.eup %9234  ;;  %9254 = vpow2.f32 %v15694_v7  ;;  %v5996_v44 = vadd.f32 %v18506_v34, %v5995_v39  ;;  %v18510_v7 = vld [vmem:[#allocation237_spill] sm:$0xff]  ;;  %v5243_v39 = vsub.f32 %v18511_v12, %v18509_v50  ;;  %v18514_v34 = vld [vmem:[#allocation274_spill] sm:$0xff] }
 0x5ec   : > { %v15852_v22 = vmul.f32 1.442695, %v18508_v13  ;;  %7220 = vst.msk [vmem:[#allocation5 + $0xe0] sm:$0xff] %vm6116_vm9, %v7188_v38  ;;  %7215 = vst.msk [vmem:[#allocation5 + $0xb8] sm:$0xff] %vm6116_vm9, %v7183_v28  ;;  %v15856_v49 = vpop.eup %9236  ;;  %v5910_v23 = vadd.f32 %v9235_v60, %v5909_v0  ;;  %9256 = vpow2.f32 %v15706_v8  ;;  %v5242_v45 = vsub.f32 %v18510_v7, %v18509_v50  ;;  %v6611_v13 = vld [vmem:[#allocation5 + $0xd8] sm:$0xff] }
 0x5ed   : > { %v7105_v42 = vpop.xlane.xlu1 %7104  ;;  %v15863_v17 = vpop.eup %9238  ;;  %9258 = vpow2.f32 %v15701_v29  ;;  %v15867_v38 = vadd.f32 %v18512_v6, %v5978_v20  ;;  %v15869_v28 = vmul.f32 1.442695, %v5226_v2  ;;  %v15874_v8 = vmul.f32 1.442695, %v5227_v46  ;;  %v18515_v20 = vld [vmem:[#allocation132_spill] sm:$0xff] }
 0x5ee   : > { %v7185_v35 = vadd.f32 %v7105_v42, %v6609_v9  ;;  %v15871_v0 = vpop.eup %9240  ;;  %5911 = vadd.xlane.f32.xlu0 %v5910_v23  ;;  %9260 = vpow2.f32 %v15718_v48  ;;  %v6014_v60 = vadd.f32 %v18513_v15, %v6013_v59  ;;  %v5258_v58 = vsub.f32 %v18514_v34, %v15591_v33  ;;  %v18516_v9 = vld [vmem:[#allocation101_spill] sm:$0xff] }
 0x5ef   : > { %v15879_v29 = vpop.eup %9242  ;;  %9262 = vpow2.f32 %v15679_v25  ;;  %v15883_v2 = vadd.f32 %v18515_v20, %v5996_v44  ;;  %v18517_v23 = vsub.f32 %v18516_v9, %v18509_v50  ;;  %v18518_v48 = vld [vmem:[#allocation193_spill] sm:$0xff]  ;;  %v15896_v12 = vmul.f32 1.442695, %v5242_v45  ;;  %v18519_v44 = vld [vmem:[#allocation284_spill] sm:$0xff]  ;;  %v18521_v9 = vld [vmem:[#allocation275_spill] sm:$0xff] }
 0x5f0   : > { %v5259_v46 = vsub.f32 %v18518_v48, %v15591_v33  ;;  %7217 = vst.msk [vmem:[#allocation5 + $0xc8] sm:$0xff] %vm6116_vm9, %v7185_v35  ;;  %v15893_v59 = vpop.eup %9244  ;;  %9264 = vpow2.f32 %v15720_v3  ;;  %v15898_v25 = vmul.f32 1.442695, %v5243_v39  ;;  %v5274_v42 = vsub.f32 %v18519_v44, %v15688_v56  ;;  %v18520_v35 = vld [vmem:[#allocation286_spill] sm:$0xff] }
 0x5f1   : > { %v15888_v7 = vmul.f32 1.442695, %v18517_v23  ;;  %v7123_v6 = vpop.xlane.xlu1 %7122  ;;  %v15902_v50 = vpop.eup %9246  ;;  %9266 = vpow2.f32 %v15741_v43  ;;  %v6030_v15 = vadd.f32 %v15738_v53, %v15731_v11  ;;  %v5275_v34 = vsub.f32 %v18520_v35, %v15688_v56 }
 0x5f2   : > { %v15909_v20 = vpop.permute.xlu0 %6320  ;;  %v7187_v3 = vadd.f32 %v7123_v6, %v6611_v13  ;;  %v15911_v45 = vpop.eup %9248  ;;  %9268 = vpow2.f32 %v15743_v19  ;;  %v15915_v39 = vadd.f32 %v15640_v10, %v6014_v60  ;;  %v18522_v23 = vsub.f32 %v18521_v9, %v15591_v33  ;;  %v18524_v10 = vld [vmem:[#allocation27_spill] sm:$0xff]  ;;  %v18525_v19 = vld [vmem:[#allocation118_spill] sm:$0xff] }
 0x5f3   : > { %v15922_v48 = vmul.f32 1.442695, %v5258_v58  ;;  %v9251_v11 = vpop.eup %9250  ;;  %9270 = vpow2.f32 %v15760_v37  ;;  %v15925_v53 = vmul.f32 1.442695, %v5259_v46  ;;  %v18523_v13 = vsub.f32 %v18479_v54, %v15688_v56  ;;  %v18526_v37 = vld [vmem:[#allocation63_spill] sm:$0xff]  ;;  %v18527_v46 = vld [vmem:[#allocation64_spill] sm:$0xff] }
 0x5f4   : > { %v15920_v43 = vmul.f32 1.442695, %v18522_v23  ;;  %7219 = vst.msk [vmem:[#allocation5 + $0xd8] sm:$0xff] %vm6116_vm9, %v7187_v3  ;;  %v5034_v60 = vsub.f32 %v18525_v19, %v18524_v10  ;;  %v15935_v33 = vpop.eup %9252  ;;  %v5926_v58 = vadd.f32 %v9251_v11, %v15725_v14  ;;  %9272 = vpow2.f32 %v15781_v51  ;;  %v18528_v14 = vld [vmem:[#allocation121_spill] sm:$0xff]  ;;  %v18529_v23 = vld [vmem:[#allocation26_spill] sm:$0xff]  ;;  %v18530_v11 = vld [vmem:[#allocation28_spill] sm:$0xff] }
 0x5f5   : > { %v15930_v44 = vmul.f32 1.442695, %v18523_v13  ;;  %vm6560_vm6 = vcmp.eq.s32.totalorder %v18526_v37, %v15909_v20  ;;  %vm6561_vm8 = vcmp.eq.s32.totalorder %v18527_v46, %v15909_v20  ;;  %v9255_v56 = vpop.eup %9254  ;;  %9274 = vpow2.f32 %v15762_v47 }
 0x5f6   : > { %v6031_v54 = vadd.f32 %v15747_v52, %v6030_v15  ;;  %v15945_v6 = vmul.f32 1.442695, %v5274_v42  ;;  %v15947_v35 = vmul.f32 1.442695, %v5275_v34  ;;  %v9257_v3 = vpop.eup %9256  ;;  %v5927_v9 = vadd.f32 %v9255_v56, %v5926_v58  ;;  %v18531_v52 = vld [vmem:[#allocation214_spill] sm:$0xff] }
 0x5f7   : > { %9276 = vpow2.f32 %v15787_v30  ;;  %v5035_v51 = vsub.f32 %v18528_v14, %v18524_v10  ;;  %v5796_v13 = vadd.f32 %v18530_v11, %v18529_v23  ;;  %v9259_v19 = vpop.eup %9258  ;;  %v5944_v4 = vadd.f32 %v9257_v3, %v15751_v63  ;;  %v18532_v42 = vld [vmem:[#allocation218_spill] sm:$0xff]  ;;  %v18533_v30 = vld [vmem:[#allocation87_spill] sm:$0xff]  ;;  %v18535_v3 = vld [vmem:[#allocation29_spill] sm:$0xff] }
 0x5f8   : > { %9278 = vpow2.f32 %v15794_v24  ;;  %v6848_v47 = vsel %vm6560_vm6, %v18531_v52, 0.0  ;;  %v6849_v15 = vsel %vm6561_vm8, %v18532_v42, 0.0  ;;  %v9261_v34 = vpop.eup %9260  ;;  %v5928_v36 = vadd.f32 %v9259_v19, %v5927_v9  ;;  %v18536_v11 = vld [vmem:[#allocation123_spill] sm:$0xff] }
 0x5f9   : > { %9280 = vpow2.f32 %v15789_v27  ;;  %v18534_v58 = vsub.f32 %v18533_v30, %v18524_v10  ;;  %v15964_v14 = vmul.f32 1.442695, %v5034_v60  ;;  %v15966_v23 = vpop.eup %9262  ;;  %v5945_v63 = vadd.f32 %v9261_v34, %v5944_v4  ;;  %v18537_v27 = vld [vmem:[#allocation66_spill] sm:$0xff] }
 0x5fa   : > { %9282 = vpow2.f32 %v15797_v41  ;;  %v6032_v24 = vadd.f32 %v15757_v61, %v6031_v54  ;;  %v5058_v52 = vsub.f32 %v18536_v11, %v18535_v3  ;;  %v9265_v9 = vpop.eup %9264  ;;  %5929 = vadd.xlane.f32.xlu0 %v5928_v36  ;;  %vm6562_vm2 = vcmp.eq.s32.totalorder %v18537_v27, %v15909_v20  ;;  %v18538_v60 = vld [vmem:[#allocation82_spill] sm:$0xff]  ;;  %v18539_v61 = vld [vmem:[#allocation71_spill] sm:$0xff] }
 0x5fb   : > { %v15962_v56 = vmul.f32 1.442695, %v18534_v58  ;;  %9284 = vpow2.f32 %v15819_v32  ;;  %v7133_v10 = vadd.f32 %v6849_v15, %v6848_v47  ;;  %v5797_v19 = vadd.f32 %v18538_v60, %v5796_v13  ;;  %v9267_v42 = vpop.eup %9266  ;;  %v18540_v54 = vld [vmem:[#allocation126_spill] sm:$0xff]  ;;  %v18542_v47 = vld [vmem:[#allocation67_spill] sm:$0xff]  ;;  %v18543_v15 = vld [vmem:[#allocation221_spill] sm:$0xff] }
 0x5fc   : > { %9286 = vpow2.f32 %v15808_v57  ;;  %v15977_v4 = vmul.f32 1.442695, %v5035_v51  ;;  %v5059_v41 = vsub.f32 %v18539_v61, %v18535_v3  ;;  %v18541_v34 = vsub.f32 %v18540_v54, %v18535_v3  ;;  %v9269_v32 = vpop.eup %9268  ;;  %v18545_v11 = vld [vmem:[#allocation31_spill] sm:$0xff]  ;;  %v18548_v54 = vld [vmem:[#allocation34_spill] sm:$0xff] }
 0x5fd   : > { %v5946_v30 = vadd.f32 %v9265_v9, %v5945_v63  ;;  %9288 = vpow2.f32 %v15825_v5  ;;  %v6048_v13 = vadd.f32 %v15863_v17, %v15856_v49  ;;  %vm6563_vm7 = vcmp.eq.s32.totalorder %v18542_v47, %v15909_v20  ;;  %v9271_v57 = vpop.eup %9270  ;;  %v16002_v49 = vpop.permute.xlu0 %6326  ;;  %v18544_v17 = vld [vmem:[#allocation83_spill] sm:$0xff] }
 0x5fe   : > { %v15984_v36 = vmul.f32 1.442695, %v18541_v34  ;;  %9290 = vpow2.f32 %v15852_v22  ;;  %v15993_v51 = vadd.f32 %v15766_v18, %v6032_v24  ;;  %v6850_v58 = vsel %vm6562_vm2, %v18543_v15, 0.0  ;;  %v9273_v5 = vpop.eup %9272 }
 0x5ff   : > { %v15999_v63 = vmul.f32 1.442695, %v5058_v52  ;;  %5947 = vadd.xlane.f32.xlu0 %v5946_v30  ;;  %9292 = vpow2.f32 %v15846_v26  ;;  %vm6564_vm10 = vcmp.eq.s32.totalorder %v18544_v17, %v15909_v20  ;;  %v7134_v22 = vadd.f32 %v7133_v10, %v6850_v58  ;;  %v9275_v24 = vpop.eup %9274  ;;  %v18546_v52 = vld [vmem:[#allocation223_spill] sm:$0xff]  ;;  %v18547_v26 = vld [vmem:[#allocation33_spill] sm:$0xff] }
 0x600   : > { %v16007_v18 = vadd.f32 %v18545_v11, %v5797_v19  ;;  %v5962_v9 = vadd.f32 %v9273_v5, %v15840_v62  ;;  %9294 = vpow2.f32 %v15869_v28  ;;  %v6851_v60 = vsel %vm6563_vm7, %v18546_v52, 0.0  ;;  %v18549_v19 = vld [vmem:[#allocation57_spill] sm:$0xff] }
 0x601   : > { %v5823_v34 = vadd.f32 %v18548_v54, %v18547_v26  ;;  %v9277_v30 = vpop.eup %9276  ;;  %9296 = vpow2.f32 %v15888_v7  ;;  %v6049_v10 = vadd.f32 %v15871_v0, %v6048_v13  ;;  %vm6565_vm11 = vcmp.eq.s32.totalorder %v18549_v19, %v15909_v20  ;;  %v18550_v0 = vld [vmem:[#allocation166_spill] sm:$0xff] }
 0x602   : > { %v7135_v15 = vadd.f32 %v7134_v22, %v6851_v60  ;;  %v9279_v62 = vpop.eup %9278  ;;  %9298 = vpow2.f32 %v15769_v21  ;;  %v5963_v28 = vadd.f32 %v9277_v30, %v5962_v9  ;;  %v6066_v58 = vadd.f32 %v9269_v32, %v9267_v42  ;;  %v18551_v21 = vld [vmem:[#allocation277_spill] sm:$0xff]  ;;  %v18552_v32 = vld [vmem:[#allocation38_spill] sm:$0xff]  ;;  %v18553_v9 = vld [vmem:[#allocation39_spill] sm:$0xff] }
 0x603   : > { %v6852_v5 = vsel %vm6564_vm10, %v18462_v55, 0.0  ;;  %v9281_v11 = vpop.eup %9280  ;;  %v5980_v52 = vadd.f32 %v9279_v62, %v15867_v38  ;;  %9300 = vpow2.f32 %v15874_v8  ;;  %vm6566_vm13 = vcmp.eq.s32.totalorder %v18550_v0, %v15909_v20  ;;  %v16035_v38 = vpop.permute.xlu0 %5025  ;;  %v18554_v8 = vld [vmem:[#allocation167_spill] sm:$0xff]  ;;  %v18555_v62 = vld [vmem:[#allocation278_spill] sm:$0xff] }
 0x604   : > { %v7136_v7 = vadd.f32 %v7135_v15, %v6852_v5  ;;  %v9283_v13 = vpop.eup %9282  ;;  %v5964_v22 = vadd.f32 %v9281_v11, %v5963_v28  ;;  %9302 = vpow2.f32 %v15920_v43  ;;  %v6853_v42 = vsel %vm6565_vm11, %v18551_v21, 0.0 }
 0x605   : > { %v5841_v60 = vadd.f32 %v18553_v9, %v18552_v32  ;;  %v9285_v26 = vpop.eup %9284  ;;  %v5981_v55 = vadd.f32 %v9283_v13, %v5980_v52  ;;  %9304 = vpow2.f32 %v15896_v12  ;;  %vm6567_vm14 = vcmp.eq.s32.totalorder %v18554_v8, %v15909_v20  ;;  %v18556_v52 = vld [vmem:[#allocation36_spill] sm:$0xff]  ;;  %v18561_v20 = vld [vmem:[#allocation243_spill] sm:$0xff] }
 0x606   : > { %v7137_v54 = vadd.f32 %v7136_v7, %v6853_v42  ;;  %v9287_v30 = vpop.eup %9286  ;;  %5965 = vadd.xlane.f32.xlu0 %v5964_v22  ;;  %v5998_v15 = vadd.f32 %v9285_v26, %v15883_v2  ;;  %9306 = vpow2.f32 %v15922_v48  ;;  %v6067_v43 = vadd.f32 %v9271_v57, %v6066_v58  ;;  %v18557_v2 = vld [vmem:[#allocation227_spill] sm:$0xff] }
 0x607   : > { %v6854_v28 = vsel %vm6566_vm13, %v18555_v62, 0.0  ;;  %v9289_v5 = vpop.eup %9288  ;;  %v6050_v12 = vadd.f32 %v15879_v29, %v6049_v10  ;;  %9308 = vpow2.f32 %v15930_v44  ;;  %v5824_v7 = vadd.f32 %v18556_v52, %v5823_v34  ;;  %v18558_v57 = vld [vmem:[#allocation151_spill] sm:$0xff]  ;;  %v18559_v44 = vld [vmem:[#allocation117_spill] sm:$0xff] }
 0x608   : > { %v7138_v11 = vadd.f32 %v7137_v54, %v6854_v28  ;;  %v9291_v13 = vpop.eup %9290  ;;  %v5982_v22 = vadd.f32 %v9287_v30, %v5981_v55  ;;  %v5999_v42 = vadd.f32 %v9289_v5, %v5998_v15  ;;  %v5276_v48 = vsub.f32 %v18557_v2, %v16035_v38  ;;  %v18560_v54 = vld [vmem:[#allocation25_spill] sm:$0xff]  ;;  %v18563_v28 = vld [vmem:[#allocation244_spill] sm:$0xff] }
 0x609   : > { %v6855_v58 = vsel %vm6567_vm14, %v18558_v57, 0.0  ;;  %v9293_v32 = vpop.eup %9292  ;;  %v6016_v9 = vadd.f32 %v9291_v13, %v15915_v39  ;;  %9310 = vpow2.f32 %v15898_v25  ;;  %v5842_v10 = vadd.f32 %v18559_v44, %v5841_v60  ;;  %v18562_v25 = vld [vmem:[#allocation245_spill] sm:$0xff]  ;;  %v18567_v13 = vld [vmem:[#allocation40_spill] sm:$0xff] }
 0x60a   : > { %v7139_v29 = vadd.f32 %v7138_v11, %v6855_v58  ;;  %v9295_v34 = vpop.eup %9294  ;;  %5983 = vadd.xlane.f32.xlu0 %v5982_v22  ;;  %9312 = vpow2.f32 %v15925_v53  ;;  %v6068_v26 = vadd.f32 %v9275_v24, %v6067_v43  ;;  %v5346_v55 = vmul.f32 1.442695, %v5059_v41 }
 0x60b   : > { %v5074_v30 = vsub.f32 %v18561_v20, %v18560_v54  ;;  %v9297_v15 = vpop.eup %9296  ;;  %v6051_v39 = vadd.f32 %v15893_v59, %v6050_v12  ;;  %9314 = vpow2.f32 %v15945_v6  ;;  %v5075_v60 = vsub.f32 %v18562_v25, %v18560_v54  ;;  %v18565_v59 = vld [vmem:[#allocation239_spill] sm:$0xff]  ;;  %v18566_v12 = vld [vmem:[#allocation105_spill] sm:$0xff] }
 0x60c   : > { %7140 = vadd.xlane.f32.xlu1 %v7139_v29  ;;  %v18564_v53 = vsub.f32 %v18563_v28, %v18560_v54  ;;  %v9299_v43 = vpop.eup %9298  ;;  %v6000_v5 = vadd.f32 %v9293_v32, %v5999_v42  ;;  %v6017_v3 = vadd.f32 %v9295_v34, %v6016_v9  ;;  %v6034_v61 = vadd.f32 %v9297_v15, %v15993_v51  ;;  %v18568_v9 = vld [vmem:[#allocation44_spill] sm:$0xff]  ;;  %v18569_v51 = vld [vmem:[#allocation103_spill] sm:$0xff]  ;;  %v18571_v34 = vld [vmem:[#allocation249_spill] sm:$0xff] }
 0x60d   : > { %v5780_v41 = vmul.f32 1.442695, %v5276_v48  ;;  %v9301_v11 = vpop.eup %9300  ;;  %9316 = vpow2.f32 %v15681_v40  ;;  %v16074_v6 = vadd.f32 %v18565_v59, %v16007_v18  ;;  %v5825_v52 = vadd.f32 %v18566_v12, %v5824_v7  ;;  %v18570_v18 = vld [vmem:[#allocation32_spill] sm:$0xff]  ;;  %v18572_v15 = vld [vmem:[#allocation250_spill] sm:$0xff]  ;;  %v18574_v28 = vld [vmem:[#allocation41_spill] sm:$0xff] }
 0x60e   : > { %v5374_v24 = vmul.f32 1.442695, %v18564_v53  ;;  %v5843_v22 = vadd.f32 %v18567_v13, %v5842_v10  ;;  %v9303_v58 = vpop.eup %9302  ;;  %6001 = vadd.xlane.f32.xlu0 %v6000_v5  ;;  %9318 = vpow2.f32 %v15947_v35  ;;  %v6069_v42 = vadd.f32 %v9299_v43, %v6068_v26  ;;  %v18581_v13 = vld [vmem:[#allocation84_spill] sm:$0xff] }
 0x60f   : > { %v5376_v32 = vmul.f32 1.442695, %v5074_v30  ;;  %v5859_v48 = vadd.f32 %v18569_v51, %v18568_v9  ;;  %v9305_v29 = vpop.eup %9304  ;;  %v6052_v44 = vadd.f32 %v9303_v58, %v6051_v39  ;;  %9320 = vpow2.f32 %v15962_v56  ;;  %v18573_v30 = vld [vmem:[#allocation35_spill] sm:$0xff]  ;;  %v18575_v56 = vld [vmem:[#allocation37_spill] sm:$0xff]  ;;  %v18582_v51 = vld [vmem:[#allocation230_spill] sm:$0xff] }
 0x610   : > { %v5378_v40 = vmul.f32 1.442695, %v5075_v60  ;;  %v5090_v54 = vsub.f32 %v18571_v34, %v18570_v18  ;;  %v9307_v7 = vpop.eup %9306  ;;  %v6018_v20 = vadd.f32 %v9301_v11, %v6017_v3  ;;  %v6035_v10 = vadd.f32 %v9305_v29, %v6034_v61  ;;  %v18576_v60 = vld [vmem:[#allocation251_spill] sm:$0xff]  ;;  %v18578_v11 = vld [vmem:[#allocation248_spill] sm:$0xff] }
 0x611   : > { %9322 = vpow2.f32 %v5780_v41  ;;  %v5091_v35 = vsub.f32 %v18572_v15, %v18570_v18  ;;  %v9309_v26 = vpop.eup %9308  ;;  %v5826_v25 = vadd.f32 %v18573_v30, %v5825_v52  ;;  %v16089_v39 = vadd.f32 %v18574_v28, %v5843_v22  ;;  %v18577_v3 = vld [vmem:[#allocation43_spill] sm:$0xff]  ;;  %v18580_v52 = vld [vmem:[#allocation52_spill] sm:$0xff]  ;;  %v18588_v28 = vld [vmem:[#allocation233_spill] sm:$0xff] }
 0x612   : > { %9324 = vpow2.f32 %v15964_v14  ;;  %v5106_v53 = vsub.f32 %v18576_v60, %v18575_v56  ;;  %6019 = vadd.xlane.f32.xlu0 %v6018_v20  ;;  %v6053_v43 = vadd.f32 %v9307_v7, %v6052_v44  ;;  %v6070_v5 = vadd.f32 %v9309_v26, %v6069_v42  ;;  %v18584_v44 = vld [vmem:[#allocation252_spill] sm:$0xff] }
 0x613   : > { %9326 = vpow2.f32 %v15984_v36  ;;  %v5860_v61 = vadd.f32 %v18577_v3, %v5859_v48  ;;  %v9311_v41 = vpop.eup %9310  ;;  %v18579_v14 = vsub.f32 %v18578_v11, %v18570_v18  ;;  %v5408_v12 = vmul.f32 1.442695, %v5090_v54  ;;  %v18583_v36 = vld [vmem:[#allocation253_spill] sm:$0xff] }
 0x614   : > { %9328 = vpow2.f32 %v15977_v4  ;;  %v5877_v22 = vadd.f32 %v18581_v13, %v18580_v52  ;;  %v9313_v58 = vpop.eup %9312  ;;  %v6036_v9 = vadd.f32 %v9311_v41, %v6035_v10  ;;  %v5277_v42 = vsub.f32 %v18582_v51, %v16035_v38  ;;  %v18586_v10 = vld [vmem:[#allocation45_spill] sm:$0xff] }
 0x615   : > { %v5406_v59 = vmul.f32 1.442695, %v18579_v14  ;;  %9330 = vpow2.f32 %v15999_v63  ;;  %v5107_v48 = vsub.f32 %v18583_v36, %v18575_v56  ;;  %v9315_v29 = vpop.eup %9314  ;;  %v5410_v4 = vmul.f32 1.442695, %v5091_v35  ;;  %v18587_v63 = vld [vmem:[#allocation232_spill] sm:$0xff]  ;;  %v18589_v35 = vld [vmem:[#allocation51_spill] sm:$0xff] }
 0x616   : > { %9332 = vpow2.f32 %v5374_v24  ;;  %v18585_v18 = vsub.f32 %v18584_v44, %v18575_v56  ;;  %v5440_v54 = vmul.f32 1.442695, %v5106_v53  ;;  %6037 = vadd.xlane.f32.xlu0 %v6036_v9  ;;  %v6054_v7 = vadd.f32 %v9313_v58, %v6053_v43  ;;  %v18590_v43 = vld [vmem:[#allocation42_spill] sm:$0xff]  ;;  %v18593_v14 = vld [vmem:[#allocation257_spill] sm:$0xff] }
 0x617   : > { %v6071_v20 = vadd.f32 %v9315_v29, %v6070_v5  ;;  %9334 = vpow2.f32 %v5346_v55  ;;  %v5861_v15 = vadd.f32 %v18586_v10, %v5860_v61  ;;  %v16110_v26 = vpop.eup %9316  ;;  %v5278_v30 = vsub.f32 %v18587_v63, %v16035_v38  ;;  %v18591_v5 = vld [vmem:[#allocation256_spill] sm:$0xff]  ;;  %v18592_v61 = vld [vmem:[#allocation258_spill] sm:$0xff] }
 0x618   : > { %v5438_v34 = vmul.f32 1.442695, %v18585_v18  ;;  %v5279_v24 = vsub.f32 %v18588_v28, %v16035_v38  ;;  %9336 = vpow2.f32 %v5376_v32  ;;  %v5878_v60 = vadd.f32 %v18589_v35, %v5877_v22  ;;  %v9319_v56 = vpop.eup %9318  ;;  %v18595_v58 = vld [vmem:[#allocation62_spill] sm:$0xff]  ;;  %v18596_v32 = vld [vmem:[#allocation131_spill] sm:$0xff]  ;;  %v18598_v18 = vld [vmem:[#allocation53_spill] sm:$0xff] }
 0x619   : > { %v5782_v3 = vmul.f32 1.442695, %v5277_v42  ;;  %9338 = vpow2.f32 %v5406_v59  ;;  %v5442_v53 = vmul.f32 1.442695, %v5107_v48  ;;  %v5122_v55 = vsub.f32 %v18591_v5, %v18590_v43  ;;  %v9321_v41 = vpop.eup %9320  ;;  %v18597_v36 = vld [vmem:[#allocation46_spill] sm:$0xff] }
 0x61a   : > { %9340 = vpow2.f32 %v5378_v40  ;;  %v5123_v11 = vsub.f32 %v18592_v61, %v18590_v43  ;;  %v18594_v52 = vsub.f32 %v18593_v14, %v18590_v43  ;;  %v5895_v9 = vadd.f32 %v18596_v32, %v18595_v58  ;;  %6055 = vadd.xlane.f32.xlu0 %v6054_v7  ;;  %v18599_v61 = vld [vmem:[#allocation75_spill] sm:$0xff]  ;;  %v18600_v14 = vld [vmem:[#allocation77_spill] sm:$0xff] }
 0x61b   : > { %v16126_v22 = vpop.eup %9322  ;;  %v6072_v59 = vadd.f32 %v9319_v56, %v6071_v20  ;;  %v5800_v42 = vadd.f32 %v9321_v41, %v16074_v6  ;;  %9342 = vpow2.f32 %v5408_v12  ;;  %v5862_v48 = vadd.f32 %v18597_v36, %v5861_v15  ;;  %v18601_v6 = vld [vmem:[#allocation61_spill] sm:$0xff]  ;;  %v18602_v56 = vld [vmem:[#allocation50_spill] sm:$0xff]  ;;  %v18603_v15 = vld [vmem:[#allocation88_spill] sm:$0xff] }
 0x61c   : > { %v5470_v13 = vmul.f32 1.442695, %v18594_v52  ;;  %v9325_v40 = vpop.eup %9324  ;;  %v5784_v29 = vmul.f32 1.442695, %v5278_v30  ;;  %v5786_v44 = vmul.f32 1.442695, %v5279_v24  ;;  %9344 = vpow2.f32 %v5438_v34 }
 0x61d   : > { %v5879_v10 = vadd.f32 %v18598_v18, %v5878_v60  ;;  %v9327_v35 = vpop.eup %9326  ;;  %9346 = vpow2.f32 %v5782_v3  ;;  %v5801_v43 = vadd.f32 %v9325_v40, %v5800_v42  ;;  %v5472_v5 = vmul.f32 1.442695, %v5122_v55  ;;  %v18604_v60 = vld [vmem:[#allocation259_spill] sm:$0xff]  ;;  %v18608_v40 = vld [vmem:[#allocation138_spill] sm:$0xff]  ;;  %v18610_v18 = vld [vmem:[#allocation96_spill] sm:$0xff] }
 0x61e   : > { %v5913_v52 = vadd.f32 %v18600_v14, %v18599_v61  ;;  %v9329_v7 = vpop.eup %9328  ;;  %v5827_v20 = vadd.f32 %v9327_v35, %v5826_v25  ;;  %9348 = vpow2.f32 %v5410_v4  ;;  %v5896_v12 = vadd.f32 %v18601_v6, %v5895_v9  ;;  %6073 = vadd.xlane.f32.xlu0 %v6072_v59  ;;  %v18605_v32 = vld [vmem:[#allocation55_spill] sm:$0xff]  ;;  %v18606_v25 = vld [vmem:[#allocation156_spill] sm:$0xff] }
 0x61f   : > { %v5138_v41 = vsub.f32 %v18603_v15, %v18602_v56  ;;  %v9331_v30 = vpop.eup %9330  ;;  %v5802_v34 = vadd.f32 %v9329_v7, %v5801_v43  ;;  %9350 = vpow2.f32 %v5440_v54  ;;  %v5474_v24 = vmul.f32 1.442695, %v5123_v11  ;;  %v18609_v11 = vld [vmem:[#allocation255_spill] sm:$0xff]  ;;  %v18611_v61 = vld [vmem:[#allocation68_spill] sm:$0xff] }
 0x620   : > { %v5139_v3 = vsub.f32 %v18604_v60, %v18602_v56  ;;  %v9333_v55 = vpop.eup %9332  ;;  %v5828_v58 = vadd.f32 %v9331_v30, %v5827_v20  ;;  %v5880_v42 = vadd.f32 %v18605_v32, %v5879_v10  ;;  %9352 = vpow2.f32 %v5470_v13  ;;  %v18612_v13 = vld [vmem:[#allocation58_spill] sm:$0xff]  ;;  %v18613_v7 = vld [vmem:[#allocation260_spill] sm:$0xff] }
 0x621   : > { %v18607_v4 = vsub.f32 %v18606_v25, %v18602_v56  ;;  %v9335_v36 = vpop.eup %9334  ;;  %9354 = vpow2.f32 %v5784_v29  ;;  %5803 = vadd.xlane.f32.xlu1 %v5802_v34  ;;  %v5845_v59 = vadd.f32 %v9333_v55, %v16089_v39  ;;  %v5914_v54 = vadd.f32 %v18608_v40, %v5913_v52  ;;  %v18614_v56 = vld [vmem:[#allocation242_spill] sm:$0xff]  ;;  %v18618_v32 = vld [vmem:[#allocation76_spill] sm:$0xff] }
 0x622   : > { %v5931_v35 = vadd.f32 %v18610_v18, %v18609_v11  ;;  %v9337_v43 = vpop.eup %9336  ;;  %9356 = vpow2.f32 %v5442_v53  ;;  %v5897_v14 = vadd.f32 %v18611_v61, %v5896_v12  ;;  %v5504_v10 = vmul.f32 1.442695, %v5138_v41  ;;  %7149 = vadd.xlane.f32.xlu0 %v18614_v56  ;;  %v18615_v34 = vld [vmem:[#allocation262_spill] sm:$0xff]  ;;  %v18616_v53 = vld [vmem:[#allocation261_spill] sm:$0xff] }
 0x623   : > { %v5502_v9 = vmul.f32 1.442695, %v18607_v4  ;;  %v5154_v20 = vsub.f32 %v18613_v7, %v18612_v13  ;;  %v9339_v6 = vpop.eup %9338  ;;  %v5829_v29 = vadd.f32 %v9335_v36, %v5828_v58  ;;  %v5846_v15 = vadd.f32 %v9337_v43, %v5845_v59  ;;  %v18619_v4 = vld [vmem:[#allocation86_spill] sm:$0xff]  ;;  %v18624_v18 = vld [vmem:[#allocation265_spill] sm:$0xff] }
 0x624   : > { %9358 = vpow2.f32 %v5472_v5  ;;  %v5506_v39 = vmul.f32 1.442695, %v5139_v3  ;;  %v9341_v30 = vpop.eup %9340  ;;  %v5863_v52 = vadd.f32 %v9339_v6, %v5862_v48  ;;  %v5155_v60 = vsub.f32 %v18615_v34, %v18612_v13  ;;  %v18620_v36 = vld [vmem:[#allocation94_spill] sm:$0xff]  ;;  %v18621_v5 = vld [vmem:[#allocation129_spill] sm:$0xff]  ;;  %v18625_v6 = vld [vmem:[#allocation143_spill] sm:$0xff] }
 0x625   : > { %9360 = vpow2.f32 %v5502_v9  ;;  %v18617_v12 = vsub.f32 %v18616_v53, %v18612_v13  ;;  %v9343_v55 = vpop.eup %9342  ;;  %5830 = vadd.xlane.f32.xlu1 %v5829_v29  ;;  %v5915_v25 = vadd.f32 %v18618_v32, %v5914_v54  ;;  %v5932_v58 = vadd.f32 %v18619_v4, %v5931_v35  ;;  %v18622_v48 = vld [vmem:[#allocation70_spill] sm:$0xff] }
 0x626   : > { %9362 = vpow2.f32 %v5786_v44  ;;  %v5949_v3 = vadd.f32 %v18621_v5, %v18620_v36  ;;  %v9345_v59 = vpop.eup %9344  ;;  %v5898_v9 = vadd.f32 %v18622_v48, %v5897_v14  ;;  %v5536_v40 = vmul.f32 1.442695, %v5154_v20  ;;  %v18623_v11 = vld [vmem:[#allocation74_spill] sm:$0xff]  ;;  %v18634_v36 = vld [vmem:[#allocation100_spill] sm:$0xff] }
 0x627   : > { %v5534_v41 = vmul.f32 1.442695, %v18617_v12  ;;  %9364 = vpow2.f32 %v5474_v24  ;;  %v5170_v43 = vsub.f32 %v18624_v18, %v18623_v11  ;;  %v16162_v61 = vpop.eup %9346  ;;  %v5847_v13 = vadd.f32 %v9341_v30, %v5846_v15  ;;  %v18626_v29 = vld [vmem:[#allocation266_spill] sm:$0xff]  ;;  %v18630_v15 = vld [vmem:[#allocation267_spill] sm:$0xff] }
 0x628   : > { %v5864_v44 = vadd.f32 %v9343_v55, %v5863_v52  ;;  %v5881_v7 = vadd.f32 %v9345_v59, %v5880_v42  ;;  %9366 = vpow2.f32 %v5504_v10  ;;  %v9349_v54 = vpop.eup %9348  ;;  %v5538_v56 = vmul.f32 1.442695, %v5155_v60  ;;  %v18628_v34 = vld [vmem:[#allocation78_spill] sm:$0xff]  ;;  %v18631_v10 = vld [vmem:[#allocation147_spill] sm:$0xff] }
 0x629   : > { %9368 = vpow2.f32 %v5534_v41  ;;  %v18627_v24 = vsub.f32 %v18626_v29, %v18623_v11  ;;  %v9351_v20 = vpop.eup %9350  ;;  %5848 = vadd.xlane.f32.xlu1 %v5847_v13  ;;  %v5916_v53 = vadd.f32 %v18628_v34, %v5915_v25  ;;  %v18629_v12 = vld [vmem:[#allocation90_spill] sm:$0xff]  ;;  %v5171_v42 = vsub.f32 %v18630_v15, %v18623_v11  ;;  %v18632_v41 = vld [vmem:[#allocation81_spill] sm:$0xff]  ;;  %v18636_v11 = vld [vmem:[#allocation287_spill] sm:$0xff] }
 0x62a   : > { %v5933_v32 = vadd.f32 %v18629_v12, %v5932_v58  ;;  %v5950_v30 = vadd.f32 %v18631_v10, %v5949_v3  ;;  %v9353_v52 = vpop.eup %9352  ;;  %9370 = vpow2.f32 %v5506_v39  ;;  %v5568_v55 = vmul.f32 1.442695, %v5170_v43  ;;  %v18633_v60 = vld [vmem:[#allocation194_spill] sm:$0xff]  ;;  %v18637_v39 = vld [vmem:[#allocation268_spill] sm:$0xff]  ;;  %v18640_v15 = vld [vmem:[#allocation111_spill] sm:$0xff] }
 0x62b   : > { %v5566_v14 = vmul.f32 1.442695, %v18627_v24  ;;  %v5186_v4 = vsub.f32 %v18633_v60, %v18632_v41  ;;  %v18635_v5 = vld [vmem:[#allocation114_spill] sm:$0xff]  ;;  %v16178_v48 = vpop.eup %9354  ;;  %v5865_v18 = vadd.f32 %v9349_v54, %v5864_v44  ;;  %v5882_v25 = vadd.f32 %v9351_v20, %v5881_v7  ;;  %v18638_v43 = vld [vmem:[#allocation200_spill] sm:$0xff]  ;;  %v18641_v7 = vld [vmem:[#allocation93_spill] sm:$0xff] }
 0x62c   : > { %v5967_v59 = vadd.f32 %v18635_v5, %v18634_v36  ;;  %v5899_v13 = vadd.f32 %v9353_v52, %v5898_v9  ;;  %9372 = vpow2.f32 %v5536_v40  ;;  %v9357_v58 = vpop.eup %9356  ;;  %v5280_v29 = vsub.f32 %v18636_v11, %v16035_v38  ;;  %v18642_v40 = vld [vmem:[#allocation115_spill] sm:$0xff]  ;;  %v18643_v54 = vld [vmem:[#allocation116_spill] sm:$0xff] }
 0x62d   : > { %9374 = vpow2.f32 %v5566_v14  ;;  %v5187_v3 = vsub.f32 %v18637_v39, %v18632_v41  ;;  %v18639_v24 = vsub.f32 %v18638_v43, %v18632_v41  ;;  %5866 = vadd.xlane.f32.xlu1 %v5865_v18  ;;  %v5934_v10 = vadd.f32 %v18640_v15, %v5933_v32  ;;  %v18644_v60 = vld [vmem:[#allocation104_spill] sm:$0xff]  ;;  %v18645_v5 = vld [vmem:[#allocation91_spill] sm:$0xff]  ;;  %v18646_v39 = vld [vmem:[#allocation209_spill] sm:$0xff] }
 0x62e   : > { %v9359_v12 = vpop.eup %9358  ;;  %v5570_v44 = vmul.f32 1.442695, %v5171_v42  ;;  %v5951_v9 = vadd.f32 %v18641_v7, %v5950_v30  ;;  %v5985_v20 = vadd.f32 %v18643_v54, %v18642_v40  ;;  %9376 = vpow2.f32 %v5538_v56  ;;  %v18647_v15 = vld [vmem:[#allocation270_spill] sm:$0xff]  ;;  %v18650_v54 = vld [vmem:[#allocation271_spill] sm:$0xff] }
 0x62f   : > { %v5598_v34 = vmul.f32 1.442695, %v18639_v24  ;;  %v9361_v52 = vpop.eup %9360  ;;  %v5600_v14 = vmul.f32 1.442695, %v5186_v4  ;;  %v5968_v36 = vadd.f32 %v18644_v60, %v5967_v59  ;;  %v5202_v35 = vsub.f32 %v18646_v39, %v18645_v5  ;;  %v18649_v59 = vld [vmem:[#allocation136_spill] sm:$0xff]  ;;  %v18651_v39 = vld [vmem:[#allocation170_spill] sm:$0xff] }
 0x630   : > { %v16194_v41 = vpop.eup %9362  ;;  %v5883_v43 = vadd.f32 %v9357_v58, %v5882_v25  ;;  %v5900_v18 = vadd.f32 %v9359_v12, %v5899_v13  ;;  %v5917_v24 = vadd.f32 %v9361_v52, %v5916_v53  ;;  %9378 = vpow2.f32 %v5568_v55  ;;  %v18652_v13 = vld [vmem:[#allocation133_spill] sm:$0xff]  ;;  %v18655_v12 = vld [vmem:[#allocation110_spill] sm:$0xff]  ;;  %v18656_v52 = vld [vmem:[#allocation224_spill] sm:$0xff] }
 0x631   : > { %v9365_v32 = vpop.eup %9364  ;;  %v5788_v42 = vmul.f32 1.442695, %v5280_v29  ;;  %9380 = vpow2.f32 %v5598_v34  ;;  %v5602_v30 = vmul.f32 1.442695, %v5187_v3  ;;  %v18648_v7 = vsub.f32 %v18647_v15, %v18645_v5  ;;  %v18653_v53 = vld [vmem:[#allocation113_spill] sm:$0xff]  ;;  %v18654_v29 = vld [vmem:[#allocation106_spill] sm:$0xff] }
 0x632   : > { %v9367_v4 = vpop.eup %9366  ;;  %5884 = vadd.xlane.f32.xlu1 %v5883_v43  ;;  %v5952_v40 = vadd.f32 %v18649_v59, %v5951_v9  ;;  %v5203_v60 = vsub.f32 %v18650_v54, %v18645_v5  ;;  %v5986_v25 = vadd.f32 %v18651_v39, %v5985_v20  ;;  %v6003_v55 = vadd.f32 %v18653_v53, %v18652_v13  ;;  %v18657_v5 = vld [vmem:[#allocation273_spill] sm:$0xff]  ;;  %v18662_v53 = vld [vmem:[#allocation124_spill] sm:$0xff] }
 0x633   : > { %v5630_v56 = vmul.f32 1.442695, %v18648_v7  ;;  %v9369_v58 = vpop.eup %9368  ;;  %9382 = vpow2.f32 %v5570_v44  ;;  %v5969_v3 = vadd.f32 %v18654_v29, %v5968_v36  ;;  %v5632_v34 = vmul.f32 1.442695, %v5202_v35  ;;  %v18658_v59 = vld [vmem:[#allocation181_spill] sm:$0xff]  ;;  %v18660_v44 = vld [vmem:[#allocation79_spill] sm:$0xff] }
 0x634   : > { %v5218_v15 = vsub.f32 %v18656_v52, %v18655_v12  ;;  %v5901_v7 = vadd.f32 %v9365_v32, %v5900_v18  ;;  %v5918_v43 = vadd.f32 %v9367_v4, %v5917_v24  ;;  %v5935_v8 = vadd.f32 %v9369_v58, %v5934_v10  ;;  %v9371_v9 = vpop.eup %9370  ;;  %v18661_v13 = vld [vmem:[#allocation241_spill] sm:$0xff]  ;;  %v18665_v32 = vld [vmem:[#allocation210_spill] sm:$0xff]  ;;  %v18666_v58 = vld [vmem:[#allocation107_spill] sm:$0xff] }
 0x635   : > { %9384 = vpow2.f32 %v5600_v14  ;;  %v5219_v20 = vsub.f32 %v18657_v5, %v18655_v12  ;;  %v18659_v54 = vsub.f32 %v18658_v59, %v18655_v12  ;;  %v6021_v36 = vadd.f32 %v18661_v13, %v18660_v44  ;;  %v18663_v24 = vld [vmem:[#allocation137_spill] sm:$0xff]  ;;  %v18664_v14 = vld [vmem:[#allocation180_spill] sm:$0xff] }
 0x636   : > { %9386 = vpow2.f32 %v5630_v56  ;;  %v9373_v35 = vpop.eup %9372  ;;  %5902 = vadd.xlane.f32.xlu1 %v5901_v7  ;;  %v5987_v18 = vadd.f32 %v18662_v53, %v5986_v25  ;;  %v6004_v10 = vadd.f32 %v18663_v24, %v6003_v55  ;;  %v5234_v56 = vsub.f32 %v18665_v32, %v18664_v14  ;;  %v18667_v7 = vld [vmem:[#allocation269_spill] sm:$0xff] }
 0x637   : > { %v5662_v39 = vmul.f32 1.442695, %v18659_v54  ;;  %9388 = vpow2.f32 %v5788_v42  ;;  %v9375_v4 = vpop.eup %9374  ;;  %v5970_v29 = vadd.f32 %v18666_v58, %v5969_v3  ;;  %v5634_v52 = vmul.f32 1.442695, %v5203_v60  ;;  %v18670_v3 = vld [vmem:[#allocation139_spill] sm:$0xff] }
 0x638   : > { %9390 = vpow2.f32 %v5602_v30  ;;  %v5664_v12 = vmul.f32 1.442695, %v5218_v15  ;;  %v5919_v5 = vadd.f32 %v9371_v9, %v5918_v43  ;;  %v5936_v59 = vadd.f32 %v9373_v35, %v5935_v8  ;;  %v9377_v44 = vpop.eup %9376  ;;  %v18669_v30 = vld [vmem:[#allocation125_spill] sm:$0xff]  ;;  %v18671_v15 = vld [vmem:[#allocation272_spill] sm:$0xff]  ;;  %v18673_v9 = vld [vmem:[#allocation282_spill] sm:$0xff] }
 0x639   : > { %v5953_v54 = vadd.f32 %v9375_v4, %v5952_v40  ;;  %9392 = vpow2.f32 %v5632_v34  ;;  %v5666_v42 = vmul.f32 1.442695, %v5219_v20  ;;  %v18668_v25 = vsub.f32 %v18667_v7, %v18664_v14  ;;  %v18672_v43 = vld [vmem:[#allocation264_spill] sm:$0xff]  ;;  %v18675_v4 = vld [vmem:[#allocation65_spill] sm:$0xff] }
 0x63a   : > { %9394 = vpow2.f32 %v5662_v39  ;;  %v6022_v13 = vadd.f32 %v15671_v31, %v6021_v36  ;;  %v9379_v53 = vpop.eup %9378  ;;  %5920 = vadd.xlane.f32.xlu1 %v5919_v5  ;;  %v5988_v24 = vadd.f32 %v18669_v30, %v5987_v18  ;;  %v6005_v60 = vadd.f32 %v18670_v3, %v6004_v10  ;;  %v18674_v39 = vld [vmem:[#allocation220_spill] sm:$0xff] }
 0x63b   : > { %v5694_v55 = vmul.f32 1.442695, %v18668_v25  ;;  %v5235_v8 = vsub.f32 %v18671_v15, %v18664_v14  ;;  %v5696_v40 = vmul.f32 1.442695, %v5234_v56  ;;  %v9381_v34 = vpop.eup %9380  ;;  %9396 = vpow2.f32 %v5634_v52  ;;  %v18676_v56 = vld [vmem:[#allocation142_spill] sm:$0xff]  ;;  %v18677_v52 = vld [vmem:[#allocation281_spill] sm:$0xff] }
 0x63c   : > { %v5250_v20 = vsub.f32 %v18673_v9, %v18672_v43  ;;  %v5251_v35 = vsub.f32 %v18674_v39, %v18672_v43  ;;  %v6039_v31 = vadd.f32 %v15784_v1, %v15775_v16  ;;  %v5937_v36 = vadd.f32 %v9377_v44, %v5936_v59  ;;  %v18679_v30 = vld [vmem:[#allocation140_spill] sm:$0xff] }
 0x63d   : > { %v5954_v32 = vadd.f32 %v9379_v53, %v5953_v54  ;;  %v5971_v18 = vadd.f32 %v9381_v34, %v5970_v29  ;;  %9398 = vpow2.f32 %v5664_v12  ;;  %v9383_v10 = vpop.eup %9382  ;;  %v5281_v14 = vsub.f32 %v18675_v4, %v16035_v38  ;;  %v18680_v44 = vld [vmem:[#allocation148_spill] sm:$0xff] }
 0x63e   : > { %9400 = vpow2.f32 %v5694_v55  ;;  %v6023_v58 = vadd.f32 %v18676_v56, %v6022_v13  ;;  %v18678_v5 = vsub.f32 %v18677_v52, %v18672_v43  ;;  %5938 = vadd.xlane.f32.xlu1 %v5937_v36  ;;  %v6006_v3 = vadd.f32 %v18679_v30, %v6005_v60  ;;  %v4805_v52 = vld [vmem:[#allocation4 + $0x8] sm:$0xff]  ;;  %v18686_v30 = vld [vmem:[#allocation195_spill] sm:$0xff] }
 0x63f   : > { %v9385_v25 = vpop.eup %9384  ;;  %v5698_v1 = vmul.f32 1.442695, %v5235_v8  ;;  %v5266_v16 = vsub.f32 %v18555_v62, %v18625_v6  ;;  %v6057_v29 = vadd.f32 %v15911_v45, %v15902_v50  ;;  %9402 = vpow2.f32 %v5666_v42  ;;  %v18681_v8 = vld [vmem:[#allocation145_spill] sm:$0xff] }
 0x640   : > { %v5726_v7 = vmul.f32 1.442695, %v18678_v5  ;;  %v9387_v12 = vpop.eup %9386  ;;  %v5728_v59 = vmul.f32 1.442695, %v5250_v20  ;;  %v5730_v54 = vmul.f32 1.442695, %v5251_v35  ;;  %v6040_v55 = vadd.f32 %v18680_v44, %v6039_v31 }
 0x641   : > { %v16246_v13 = vpop.eup %9388  ;;  %v5955_v53 = vadd.f32 %v9383_v10, %v5954_v32  ;;  %v5972_v15 = vadd.f32 %v9385_v25, %v5971_v18  ;;  %v5989_v34 = vadd.f32 %v9387_v12, %v5988_v24  ;;  %9404 = vpow2.f32 %v5696_v40  ;;  %v18683_v40 = vld [vmem:[#allocation149_spill] sm:$0xff] }
 0x642   : > { %v9391_v60 = vpop.eup %9390  ;;  %v6024_v43 = vadd.f32 %v18681_v8, %v6023_v58  ;;  %9406 = vpow2.f32 %v5726_v7  ;;  %v5267_v62 = vsub.f32 %v18558_v57, %v18625_v6  ;;  %v18682_v50 = vsub.f32 %v18551_v21, %v18625_v6  ;;  %v18684_v57 = vld [vmem:[#allocation231_spill] sm:$0xff] }
 0x643   : > { %v9393_v42 = vpop.eup %9392  ;;  %5956 = vadd.xlane.f32.xlu1 %v5955_v53  ;;  %v5760_v9 = vmul.f32 1.442695, %v5266_v16  ;;  %v6058_v20 = vadd.f32 %v15935_v33, %v6057_v29  ;;  %vm6576_vm0 = vcmp.eq.s32.totalorder %v18526_v37, %v16002_v49  ;;  %vm6577_vm12 = vcmp.eq.s32.totalorder %v18527_v46, %v16002_v49  ;;  %v18687_v16 = vld [vmem:[#allocation292_spill] sm:$0xff]  ;;  %v18688_v29 = vld [vmem:[#allocation293_spill] sm:$0xff] }
 0x644   : > { %v5758_v45 = vmul.f32 1.442695, %v18682_v50  ;;  %v9395_v24 = vpop.eup %9394  ;;  %9408 = vpow2.f32 %v5698_v1  ;;  %v6041_v39 = vadd.f32 %v18683_v40, %v6040_v55  ;;  %v5282_v35 = vsub.f32 %v18684_v57, %v16035_v38 }
 0x645   : > { %v6075_v21 = vadd.f32 %v16162_v61, %v16126_v22  ;;  %v5973_v6 = vadd.f32 %v9391_v60, %v5972_v15  ;;  %v5990_v31 = vadd.f32 %v9393_v42, %v5989_v34  ;;  %v6007_v36 = vadd.f32 %v9395_v24, %v6006_v3  ;;  %v9397_v33 = vpop.eup %9396  ;;  %v18685_v22 = vld [vmem:[#allocation162_spill] sm:$0xff] }
 0x646   : > { %9410 = vpow2.f32 %v5728_v59  ;;  %v5790_v37 = vmul.f32 1.442695, %v5281_v14  ;;  %v6864_v32 = vsel %vm6576_vm0, %v18557_v2, 0.0  ;;  %v6865_v46 = vsel %vm6577_vm12, %v18582_v51, 0.0 }
 0x647   : > { %9412 = vpow2.f32 %v5758_v45  ;;  %v9399_v18 = vpop.eup %9398  ;;  %5974 = vadd.xlane.f32.xlu1 %v5973_v6  ;;  %v5762_v10 = vmul.f32 1.442695, %v5267_v62  ;;  %v6059_v56 = vadd.f32 %v15966_v23, %v6058_v20  ;;  %v6042_v61 = vadd.f32 %v18685_v22, %v6041_v39 }
 0x648   : > { %9414 = vpow2.f32 %v5730_v54  ;;  %v9401_v58 = vpop.eup %9400  ;;  %v6076_v5 = vadd.f32 %v16178_v48, %v6075_v21  ;;  %vm6578_vm1 = vcmp.eq.s32.totalorder %v18537_v27, %v16002_v49  ;;  %v5991_v14 = vadd.f32 %v9397_v33, %v5990_v31  ;;  %v18690_v54 = vld [vmem:[#allocation30_spill] sm:$0xff]  ;;  %v18691_v21 = vld [vmem:[#allocation24_spill] sm:$0xff] }
 0x649   : > { %9416 = vpow2.f32 %v5760_v9  ;;  %v6008_v2 = vadd.f32 %v9399_v18, %v6007_v36  ;;  %v6025_v7 = vadd.f32 %v9401_v58, %v6024_v43  ;;  %v7151_v51 = vadd.f32 %v6865_v46, %v6864_v32  ;;  %v9403_v25 = vpop.eup %9402  ;;  %v5813_v62 = vpop.xlane.xlu0 %5812  ;;  %v4806_v9 = vld [vmem:[#allocation4 + $0x10] sm:$0xff]  ;;  %v18692_v18 = vld [vmem:[#allocation296_spill] sm:$0xff] }
 0x64a   : > { %v5283_v3 = vsub.f32 %v18686_v30, %v16035_v38  ;;  %9418 = vpow2.f32 %v5790_v37  ;;  %v5792_v23 = vmul.f32 1.442695, %v5282_v35  ;;  %v18689_v12 = vsub.f32 %v18687_v16, %v18688_v29 }
 0x64b   : > { %v9405_v1 = vpop.eup %9404  ;;  %v4837_v48 = vmul.f32 %v18690_v54, %v4805_v52  ;;  %5992 = vadd.xlane.f32.xlu1 %v5991_v14  ;;  %v6060_v44 = vadd.f32 %v16110_v26, %v6059_v56  ;;  %9420 = vpow2.f32 %v5762_v10  ;;  %v6077_v53 = vadd.f32 %v16194_v41, %v6076_v5  ;;  %v18693_v10 = vld [vmem:[#allocation297_spill] sm:$0xff]  ;;  %v4808_v5 = vld [vmem:[#allocation4 + $0x20] sm:$0xff] }
 0x64c   : > { %v4748_v59 = vmul.f32 1.442695, %v18689_v12  ;;  %v9407_v55 = vpop.eup %9406  ;;  %vm6579_vm3 = vcmp.eq.s32.totalorder %v18542_v47, %v16002_v49  ;;  %v6866_v38 = vsel %vm6578_vm1, %v18587_v63, 0.0  ;;  %v6009_v15 = vadd.f32 %v9403_v25, %v6008_v2  ;;  %v18695_v2 = vld [vmem:[#allocation300_spill] sm:$0xff] }
 0x64d   : > { %v6026_v34 = vadd.f32 %v9405_v1, %v6025_v7  ;;  %v6043_v60 = vadd.f32 %v9407_v55, %v6042_v61  ;;  %v7152_v8 = vadd.f32 %v7151_v51, %v6866_v38  ;;  %9422 = vpow2.f32 %v5792_v23  ;;  %v18696_v7 = vld [vmem:[#allocation301_spill] sm:$0xff]  ;;  %v18698_v1 = vld [vmem:[#allocation167_spill] sm:$0xff] }
 0x64e   : > { %v9409_v43 = vpop.eup %9408  ;;  %v5794_v26 = vmul.f32 1.442695, %v5283_v3  ;;  %v6085_v45 = vadd.f32 %v5813_v62, %v4837_v48  ;;  %9424 = vpow2.f32 %v4748_v59  ;;  %v6078_v42 = vadd.f32 %v16246_v13, %v6077_v53  ;;  %v4810_v48 = vld [vmem:[#allocation4 + $0x30] sm:$0xff] }
 0x64f   : > { %6010 = vadd.xlane.f32.xlu1 %v6009_v15  ;;  %vm6580_vm4 = vcmp.eq.s32.totalorder %v18544_v17, %v16002_v49  ;;  %v6867_v27 = vsel %vm6579_vm3, %v18588_v28, 0.0  ;;  %v6027_v20 = vadd.f32 %v9409_v43, %v6026_v34  ;;  %v4838_v6 = vmul.f32 %v18691_v21, %v4806_v9  ;;  %v4812_v34 = vld [vmem:[#allocation4 + $0x40] sm:$0xff]  ;;  %v18703_v43 = vld [vmem:[#allocation309_spill] sm:$0xff] }
 0x650   : > { %v9411_v50 = vpop.eup %9410  ;;  %6118 = vst.msk [vmem:[#allocation4 + $0x8] sm:$0xff] %vm6116_vm9, %v6085_v45  ;;  %v7153_v39 = vadd.f32 %v7152_v8, %v6867_v27  ;;  %9426 = vpow2.f32 %v5794_v26  ;;  %vm6581_vm15 = vcmp.eq.s32.totalorder %v18549_v19, %v16002_v49  ;;  %v6868_v47 = vsel %vm6580_vm4, %v18636_v11, 0.0  ;;  %v18702_v8 = vld [vmem:[#allocation308_spill] sm:$0xff] }
 0x651   : > { %v9413_v41 = vpop.eup %9412  ;;  %v6044_v24 = vadd.f32 %v9411_v50, %v6043_v60  ;;  %v5822_v37 = vpop.xlane.xlu0 %5821  ;;  %v18694_v56 = vsub.f32 %v18692_v18, %v18693_v10  ;;  %v6869_v52 = vsel %vm6581_vm15, %v18675_v4, 0.0  ;;  %vm6582_vm5 = vcmp.eq.s32.totalorder %v18550_v0, %v16002_v49  ;;  %v18705_v27 = vld [vmem:[#allocation312_spill] sm:$0xff]  ;;  %v4818_v10 = vld [vmem:[#allocation4 + $0x70] sm:$0xff] }
 0x652   : > { %v9415_v63 = vpop.eup %9414  ;;  %v6061_v40 = vadd.f32 %v9413_v41, %v6060_v44  ;;  %v7154_v36 = vadd.f32 %v7153_v39, %v6868_v47  ;;  %v6086_v32 = vadd.f32 %v5822_v37, %v4838_v6  ;;  %v18697_v51 = vsub.f32 %v18695_v2, %v18696_v7  ;;  %v18699_v44 = vld [vmem:[#allocation304_spill] sm:$0xff]  ;;  %v18709_v6 = vld [vmem:[#allocation317_spill] sm:$0xff] }
 0x653   : > { %v9417_v35 = vpop.eup %9416  ;;  %6028 = vadd.xlane.f32.xlu1 %v6027_v20  ;;  %v6045_v17 = vadd.f32 %v9415_v63, %v6044_v24  ;;  %v4752_v58 = vmul.f32 1.442695, %v18694_v56  ;;  %v6870_v3 = vsel %vm6582_vm5, %v18684_v57, 0.0  ;;  %vm6583_vm6 = vcmp.eq.s32.totalorder %v18698_v1, %v16002_v49  ;;  %v18700_v57 = vld [vmem:[#allocation305_spill] sm:$0xff]  ;;  %v18708_v21 = vld [vmem:[#allocation316_spill] sm:$0xff]  ;;  %v18721_v1 = vld [vmem:[#allocation334_spill] sm:$0xff] }
 0x654   : > { %v9419_v13 = vpop.eup %9418  ;;  %v6062_v28 = vadd.f32 %v9417_v35, %v6061_v40  ;;  %6119 = vst.msk [vmem:[#allocation4 + $0x10] sm:$0xff] %vm6116_vm9, %v6086_v32  ;;  %v7155_v11 = vadd.f32 %v7154_v36, %v6869_v52  ;;  %v4756_v25 = vmul.f32 1.442695, %v18697_v51  ;;  %v6871_v12 = vsel %vm6583_vm6, %v18686_v30, 0.0  ;;  %v18706_v63 = vld [vmem:[#allocation313_spill] sm:$0xff]  ;;  %v4816_v35 = vld [vmem:[#allocation4 + $0x60] sm:$0xff] }
 0x655   : > { %v6079_v31 = vadd.f32 %v9419_v13, %v6078_v42  ;;  %v9421_v33 = vpop.eup %9420  ;;  %9428 = vpow2.f32 %v4752_v58  ;;  %v18701_v55 = vsub.f32 %v18699_v44, %v18700_v57  ;;  %v18704_v30 = vsub.f32 %v18702_v8, %v18703_v43  ;;  %v4814_v42 = vld [vmem:[#allocation4 + $0x50] sm:$0xff]  ;;  %v18712_v37 = vld [vmem:[#allocation321_spill] sm:$0xff]  ;;  %v18714_v56 = vld [vmem:[#allocation324_spill] sm:$0xff] }
 0x656   : > { %v6063_v19 = vadd.f32 %v9421_v33, %v6062_v28  ;;  %v7156_v16 = vadd.f32 %v7155_v11, %v6870_v3  ;;  %9430 = vpow2.f32 %v4756_v25  ;;  %v18707_v9 = vsub.f32 %v18705_v27, %v18706_v63  ;;  %v18711_v33 = vld [vmem:[#allocation320_spill] sm:$0xff]  ;;  %v18715_v58 = vld [vmem:[#allocation325_spill] sm:$0xff]  ;;  %v18730_v63 = vld [vmem:[#allocation346_spill] sm:$0xff] }
 0x657   : > { %6046 = vadd.xlane.f32.xlu1 %v6045_v17  ;;  %v9423_v46 = vpop.eup %9422  ;;  %v4760_v53 = vmul.f32 1.442695, %v18701_v55  ;;  %v4764_v62 = vmul.f32 1.442695, %v18704_v30  ;;  %v18710_v47 = vsub.f32 %v18708_v21, %v18709_v6  ;;  %v18713_v32 = vsub.f32 %v18711_v33, %v18712_v37  ;;  %v18718_v2 = vld [vmem:[#allocation329_spill] sm:$0xff]  ;;  %v18729_v27 = vld [vmem:[#allocation344_spill] sm:$0xff] }
 0x658   : > { %v6080_v22 = vadd.f32 %v9423_v46, %v6079_v31  ;;  %v9425_v61 = vpop.eup %9424  ;;  %v7157_v59 = vadd.f32 %v7156_v16, %v6871_v12  ;;  %v4768_v20 = vmul.f32 1.442695, %v18707_v9  ;;  %v18716_v52 = vsub.f32 %v18714_v56, %v18715_v58  ;;  %v18735_v33 = vld [vmem:[#allocation290_spill] sm:$0xff]  ;;  %v18736_v37 = vld [vmem:[#allocation291_spill] sm:$0xff] }
 0x659   : > { %v4840_v4 = vmul.f32 %v9425_v61, %v4808_v5  ;;  %v5840_v29 = vpop.xlane.xlu0 %5839  ;;  %9432 = vpow2.f32 %v4760_v53  ;;  %v4772_v17 = vmul.f32 1.442695, %v18710_v47  ;;  %v4776_v46 = vmul.f32 1.442695, %v18713_v32  ;;  %v4820_v5 = vld [vmem:[#allocation4 + $0x80] sm:$0xff] }
 0x65a   : > { %v9427_v14 = vpop.eup %9426  ;;  %9434 = vpow2.f32 %v4764_v62  ;;  %v6613_v62 = vld [vmem:[#allocation5 + $0xe8] sm:$0xff]  ;;  %v18731_v9 = vsub.f32 %v18729_v27, %v18730_v63  ;;  %v18737_v32 = vsub.f32 %v18735_v33, %v18736_v37 }
 0x65b   : > { %6064 = vadd.xlane.f32.xlu1 %v6063_v19  ;;  %v6081_v23 = vadd.f32 %v9427_v14, %v6080_v22  ;;  %v6088_v0 = vadd.f32 %v5840_v29, %v4840_v4  ;;  %9436 = vpow2.f32 %v4768_v20  ;;  %v4780_v19 = vmul.f32 1.442695, %v18716_v52  ;;  %v18717_v14 = vld [vmem:[#allocation328_spill] sm:$0xff]  ;;  %v4809_v63 = vld [vmem:[#allocation4 + $0x28] sm:$0xff] }
 0x65c   : > { %9438 = vpow2.f32 %v4772_v17  ;;  %v18719_v7 = vsub.f32 %v18717_v14, %v18718_v2  ;;  %v4800_v20 = vmul.f32 1.442695, %v18731_v9  ;;  %v4828_v17 = vld [vmem:[#allocation4 + $0xc0] sm:$0xff] }
 0x65d   : > { %6121 = vst.msk [vmem:[#allocation4 + $0x20] sm:$0xff] %vm6116_vm9, %v6088_v0  ;;  %9440 = vpow2.f32 %v4776_v46  ;;  %v4746_v46 = vmul.f32 1.442695, %v18737_v32  ;;  %v4832_v14 = vld [vmem:[#allocation4 + $0xe0] sm:$0xff] }
 0x65e   : > { %9442 = vpow2.f32 %v4780_v19  ;;  %v4784_v51 = vmul.f32 1.442695, %v18719_v7  ;;  %v18738_v19 = vld [vmem:[#allocation294_spill] sm:$0xff] }
 0x65f   : > { %6082 = vadd.xlane.f32.xlu1 %v6081_v23  ;;  %v9429_v54 = vpop.eup %9428  ;;  %v18720_v23 = vld [vmem:[#allocation332_spill] sm:$0xff] }
 0x660   : > { %v4842_v38 = vmul.f32 %v9429_v54, %v4810_v48  ;;  %v9431_v15 = vpop.eup %9430  ;;  %9444 = vpow2.f32 %v4784_v51  ;;  %v18722_v16 = vsub.f32 %v18720_v23, %v18721_v1  ;;  %v18723_v54 = vld [vmem:[#allocation336_spill] sm:$0xff]  ;;  %v18724_v48 = vld [vmem:[#allocation338_spill] sm:$0xff] }
 0x661   : > { %v4844_v26 = vmul.f32 %v9431_v15, %v4812_v34  ;;  %v18725_v44 = vsub.f32 %v18723_v54, %v18724_v48  ;;  %v4824_v15 = vld [vmem:[#allocation4 + $0xa0] sm:$0xff]  ;;  %v18744_v54 = vld [vmem:[#allocation302_spill] sm:$0xff]  ;;  %v18745_v48 = vld [vmem:[#allocation303_spill] sm:$0xff] }
 0x662   : > { %v4788_v29 = vmul.f32 1.442695, %v18722_v16  ;;  %v18726_v34 = vld [vmem:[#allocation340_spill] sm:$0xff]  ;;  %v4834_v16 = vld [vmem:[#allocation4 + $0xf0] sm:$0xff] }
 0x663   : > { %7158 = vadd.xlane.f32.xlu1 %v7157_v59  ;;  %v9433_v41 = vpop.eup %9432  ;;  %v4822_v59 = vld [vmem:[#allocation4 + $0x90] sm:$0xff]  ;;  %v4792_v57 = vmul.f32 1.442695, %v18725_v44  ;;  %v18746_v44 = vsub.f32 %v18744_v54, %v18745_v48 }
 0x664   : > { %v4846_v24 = vmul.f32 %v9433_v41, %v4814_v42  ;;  %v9435_v40 = vpop.eup %9434  ;;  %9446 = vpow2.f32 %v4788_v29 }
 0x665   : > { %v4848_v28 = vmul.f32 %v9435_v40, %v4816_v35  ;;  %v9437_v18 = vpop.eup %9436  ;;  %9448 = vpow2.f32 %v4792_v57  ;;  %v18732_v35 = vld [vmem:[#allocation288_spill] sm:$0xff]  ;;  %v4758_v57 = vmul.f32 1.442695, %v18746_v44  ;;  %v4819_v44 = vld [vmem:[#allocation4 + $0x78] sm:$0xff] }
 0x666   : > { %v5858_v49 = vpop.xlane.xlu0 %5857  ;;  %v4850_v22 = vmul.f32 %v9437_v18, %v4818_v10  ;;  %v9439_v11 = vpop.eup %9438  ;;  %v4830_v10 = vld [vmem:[#allocation4 + $0xd0] sm:$0xff] }
 0x667   : > { %v6090_v60 = vadd.f32 %v5858_v49, %v4842_v38  ;;  %v4852_v3 = vmul.f32 %v9439_v11, %v4820_v5  ;;  %v9441_v12 = vpop.eup %9440 }
 0x668   : > { %v4854_v55 = vmul.f32 %v9441_v12, %v4822_v59  ;;  %v9443_v53 = vpop.eup %9442  ;;  %v4804_v12 = vld [vmem:[#allocation4] sm:$0xff] }
 0x669   : > { %6123 = vst.msk [vmem:[#allocation4 + $0x30] sm:$0xff] %vm6116_vm9, %v6090_v60  ;;  %v18727_v60 = vld [vmem:[#allocation342_spill] sm:$0xff]  ;;  %v4856_v30 = vmul.f32 %v9443_v53, %v4824_v15 }
 0x66a   : > { %v5876_v50 = vpop.xlane.xlu0 %5875  ;;  %v18728_v8 = vsub.f32 %v18726_v34, %v18727_v60  ;;  %v4807_v60 = vld [vmem:[#allocation4 + $0x18] sm:$0xff] }
 0x66b   : > { %v6092_v45 = vadd.f32 %v5876_v50, %v4844_v26  ;;  %v9445_v26 = vpop.eup %9444 }
 0x66c   : > { %v4796_v43 = vmul.f32 1.442695, %v18728_v8 }
 0x66d   : > { %6125 = vst.msk [vmem:[#allocation4 + $0x40] sm:$0xff] %vm6116_vm9, %v6092_v45  ;;  %v4826_v45 = vld [vmem:[#allocation4 + $0xb0] sm:$0xff] }
 0x66e   : > { %9450 = vpow2.f32 %v4796_v43  ;;  %v4858_v40 = vmul.f32 %v9445_v26, %v4826_v45  ;;  %v18747_v43 = vld [vmem:[#allocation306_spill] sm:$0xff] }
 0x66f   : > { %9452 = vpow2.f32 %v4800_v20  ;;  %v18750_v20 = vld [vmem:[#allocation310_spill] sm:$0xff] }
 0x676   : > { %v5894_v39 = vpop.xlane.xlu0 %5893 }
 0x677   : > { %v6094_v13 = vadd.f32 %v5894_v39, %v4846_v24  ;;  %v9447_v39 = vpop.eup %9446 }
 0x679   : > { %6127 = vst.msk [vmem:[#allocation4 + $0x50] sm:$0xff] %vm6116_vm9, %v6094_v13  ;;  %v18733_v13 = vld [vmem:[#allocation289_spill] sm:$0xff] }
 0x67a   : > { %v18734_v21 = vsub.f32 %v18732_v35, %v18733_v13 }
 0x67b   : > { %v5912_v31 = vpop.xlane.xlu0 %5911 }
 0x67c   : > { %v6096_v36 = vadd.f32 %v5912_v31, %v4848_v28  ;;  %v4740_v6 = vmul.f32 1.442695, %v18734_v21  ;;  %v4860_v31 = vmul.f32 %v9447_v39, %v4828_v17  ;;  %v18753_v17 = vld [vmem:[#allocation314_spill] sm:$0xff] }
 0x67e   : > { %6129 = vst.msk [vmem:[#allocation4 + $0x60] sm:$0xff] %vm6116_vm9, %v6096_v36  ;;  %v9449_v36 = vpop.eup %9448  ;;  %9454 = vpow2.f32 %v4740_v6  ;;  %v4811_v6 = vld [vmem:[#allocation4 + $0x38] sm:$0xff] }
 0x67f   : > { %v4862_v58 = vmul.f32 %v9449_v36, %v4830_v10  ;;  %v9451_v52 = vpop.eup %9450  ;;  %9456 = vpow2.f32 %v4746_v46  ;;  %v4813_v46 = vld [vmem:[#allocation4 + $0x48] sm:$0xff]  ;;  %v18756_v10 = vld [vmem:[#allocation318_spill] sm:$0xff] }
 0x680   : > { %v4864_v7 = vmul.f32 %v9451_v52, %v4832_v14  ;;  %v9453_v51 = vpop.eup %9452  ;;  %v18759_v14 = vld [vmem:[#allocation322_spill] sm:$0xff] }
 0x681   : > { %v4866_v59 = vmul.f32 %v9453_v51, %v4834_v16  ;;  %v18762_v16 = vld [vmem:[#allocation326_spill] sm:$0xff] }
 0x687   : > { %v5930_v61 = vpop.xlane.xlu0 %5929 }
 0x688   : > { %v6098_v25 = vadd.f32 %v5930_v61, %v4850_v22  ;;  %v18739_v22 = vld [vmem:[#allocation295_spill] sm:$0xff] }
 0x689   : > { %v18740_v11 = vsub.f32 %v18738_v19, %v18739_v22 }
 0x68a   : > { %6131 = vst.msk [vmem:[#allocation4 + $0x70] sm:$0xff] %vm6116_vm9, %v6098_v25  ;;  %v18741_v25 = vld [vmem:[#allocation298_spill] sm:$0xff] }
 0x68b   : > { %v4750_v61 = vmul.f32 1.442695, %v18740_v11 }
 0x68c   : > { %v5948_v4 = vpop.xlane.xlu0 %5947 }
 0x68d   : > { %v6100_v0 = vadd.f32 %v5948_v4, %v4852_v3  ;;  %9458 = vpow2.f32 %v4750_v61  ;;  %v18742_v3 = vld [vmem:[#allocation299_spill] sm:$0xff] }
 0x68e   : > { %v18743_v4 = vsub.f32 %v18741_v25, %v18742_v3  ;;  %v4815_v61 = vld [vmem:[#allocation4 + $0x58] sm:$0xff] }
 0x68f   : > { %6133 = vst.msk [vmem:[#allocation4 + $0x80] sm:$0xff] %vm6116_vm9, %v6100_v0  ;;  %v9455_v0 = vpop.eup %9454 }
 0x690   : > { %v4754_v23 = vmul.f32 1.442695, %v18743_v4  ;;  %v9457_v15 = vpop.eup %9456 }
 0x692   : > { %9460 = vpow2.f32 %v4754_v23  ;;  %v4817_v23 = vld [vmem:[#allocation4 + $0x68] sm:$0xff] }
 0x693   : > { %v5966_v38 = vpop.xlane.xlu0 %5965  ;;  %9462 = vpow2.f32 %v4758_v57 }
 0x694   : > { %v6102_v49 = vadd.f32 %v5966_v38, %v4854_v55  ;;  %v4836_v38 = vmul.f32 %v9455_v0, %v4804_v12 }
 0x696   : > { %6135 = vst.msk [vmem:[#allocation4 + $0x90] sm:$0xff] %vm6116_vm9, %v6102_v49  ;;  %v6614_v49 = vld [vmem:[#allocation5 + $0xf0] sm:$0xff] }
 0x697   : > { %v5984_v50 = vpop.xlane.xlu0 %5983 }
 0x698   : > { %v6104_v41 = vadd.f32 %v5984_v50, %v4856_v30  ;;  %v18748_v30 = vld [vmem:[#allocation307_spill] sm:$0xff] }
 0x699   : > { %v7141_v42 = vpop.xlane.xlu1 %7140 }
 0x69a   : > { %v7189_v24 = vadd.f32 %v7141_v42, %v6613_v62  ;;  %6137 = vst.msk [vmem:[#allocation4 + $0xa0] sm:$0xff] %vm6116_vm9, %v6104_v41  ;;  %v18749_v62 = vsub.f32 %v18747_v43, %v18748_v30  ;;  %v4839_v41 = vmul.f32 %v9457_v15, %v4807_v60  ;;  %v9459_v42 = vpop.eup %9458  ;;  %v18768_v30 = vld [vmem:[#allocation333_spill] sm:$0xff] }
 0x69b   : > { %v6002_v47 = vpop.xlane.xlu0 %6001  ;;  %v4841_v35 = vmul.f32 %v9459_v42, %v4809_v63 }
 0x69c   : > { %7221 = vst.msk [vmem:[#allocation5 + $0xe8] sm:$0xff] %vm6116_vm9, %v7189_v24  ;;  %v6106_v28 = vadd.f32 %v6002_v47, %v4858_v40  ;;  %v4762_v26 = vmul.f32 1.442695, %v18749_v62  ;;  %v18751_v24 = vld [vmem:[#allocation311_spill] sm:$0xff]  ;;  %v9461_v13 = vpop.eup %9460 }
 0x69d   : > { %v18752_v40 = vsub.f32 %v18750_v20, %v18751_v24  ;;  %v4843_v33 = vmul.f32 %v9461_v13, %v4811_v6  ;;  %v9463_v37 = vpop.eup %9462  ;;  %v18769_v62 = vld [vmem:[#allocation335_spill] sm:$0xff] }
 0x69e   : > { %6139 = vst.msk [vmem:[#allocation4 + $0xb0] sm:$0xff] %vm6116_vm9, %v6106_v28  ;;  %9464 = vpow2.f32 %v4762_v26  ;;  %v18754_v28 = vld [vmem:[#allocation315_spill] sm:$0xff]  ;;  %v4845_v19 = vmul.f32 %v9463_v37, %v4813_v46  ;;  %v18770_v26 = vsub.f32 %v18768_v30, %v18769_v62  ;;  %v7268_v62 = vld [vmem:[#allocation4 + $0x40] sm:$0xff] (!%p8310_p3) }
 0x69f   : > { %v6020_v18 = vpop.xlane.xlu0 %6019  ;;  %v4766_v39 = vmul.f32 1.442695, %v18752_v40  ;;  %v18772_v20 = vld [vmem:[#allocation339_spill] sm:$0xff] }
 0x6a0   : > { %v6108_v56 = vadd.f32 %v6020_v18, %v4860_v31  ;;  %v18755_v31 = vsub.f32 %v18753_v17, %v18754_v28  ;;  %v18775_v17 = vld [vmem:[#allocation343_spill] sm:$0xff] }
 0x6a1   : > { %9466 = vpow2.f32 %v4766_v39 }
 0x6a2   : > { %6141 = vst.msk [vmem:[#allocation4 + $0xc0] sm:$0xff] %vm6116_vm9, %v6108_v56  ;;  %v4770_v36 = vmul.f32 1.442695, %v18755_v31  ;;  %v18757_v56 = vld [vmem:[#allocation319_spill] sm:$0xff] }
 0x6a3   : > { %v6038_v5 = vpop.xlane.xlu0 %6037 }
 0x6a4   : > { %v6110_v2 = vadd.f32 %v6038_v5, %v4862_v58  ;;  %9468 = vpow2.f32 %v4770_v36  ;;  %v18758_v58 = vsub.f32 %v18756_v10, %v18757_v56  ;;  %v18777_v36 = vld [vmem:[#allocation347_spill] sm:$0xff] }
 0x6a5   : > { %v4827_v10 = vld [vmem:[#allocation4 + $0xb8] sm:$0xff] }
 0x6a6   : > { %6143 = vst.msk [vmem:[#allocation4 + $0xd0] sm:$0xff] %vm6116_vm9, %v6110_v2  ;;  %v4774_v52 = vmul.f32 1.442695, %v18758_v58  ;;  %v18760_v2 = vld [vmem:[#allocation323_spill] sm:$0xff] }
 0x6a7   : > { %v6056_v1 = vpop.xlane.xlu0 %6055 }
 0x6a8   : > { %v6112_v29 = vadd.f32 %v6056_v1, %v4864_v7  ;;  %v9465_v22 = vpop.eup %9464  ;;  %9470 = vpow2.f32 %v4774_v52  ;;  %v18761_v7 = vsub.f32 %v18759_v14, %v18760_v2 }
 0x6a9   : > { %v4847_v25 = vmul.f32 %v9465_v22, %v4815_v61 }
 0x6aa   : > { %6145 = vst.msk [vmem:[#allocation4 + $0xe0] sm:$0xff] %vm6116_vm9, %v6112_v29  ;;  %v4778_v51 = vmul.f32 1.442695, %v18761_v7  ;;  %v18763_v29 = vld [vmem:[#allocation327_spill] sm:$0xff] }
 0x6ab   : > { %v6074_v55 = vpop.xlane.xlu0 %6073  ;;  %v9467_v3 = vpop.eup %9466  ;;  %v18764_v0 = vsub.f32 %v18762_v16, %v18763_v29  ;;  %v4831_v7 = vld [vmem:[#allocation4 + $0xd8] sm:$0xff] }
 0x6ac   : > { %v6114_v53 = vadd.f32 %v6074_v55, %v4866_v59  ;;  %9472 = vpow2.f32 %v4778_v51  ;;  %v4849_v59 = vmul.f32 %v9467_v3, %v4817_v23  ;;  %v18765_v55 = vld [vmem:[#allocation330_spill] sm:$0xff]  ;;  %v4833_v23 = vld [vmem:[#allocation4 + $0xe8] sm:$0xff] }
 0x6ad   : > { %v4782_v12 = vmul.f32 1.442695, %v18764_v0 }
 0x6ae   : > { %v5804_v34 = vpop.xlane.xlu1 %5803  ;;  %6147 = vst.msk [vmem:[#allocation4 + $0xf0] sm:$0xff] %vm6116_vm9, %v6114_v53  ;;  %v9469_v54 = vpop.eup %9468  ;;  %v18766_v53 = vld [vmem:[#allocation331_spill] sm:$0xff] }
 0x6af   : > { %v6084_v8 = vadd.f32 %v5804_v34, %v4836_v38  ;;  %v7150_v50 = vpop.xlane.xlu0 %7149  ;;  %9474 = vpow2.f32 %v4782_v12  ;;  %v18767_v38 = vsub.f32 %v18765_v55, %v18766_v53  ;;  %v4835_v12 = vld [vmem:[#allocation4 + $0xf8] sm:$0xff] }
 0x6b0   : > { %v7190_v45 = vadd.f32 %v7150_v50, %v6614_v49  ;;  %v4851_v49 = vmul.f32 %v9469_v54, %v4819_v44  ;;  %v4790_v50 = vmul.f32 1.442695, %v18770_v26 }
 0x6b1   : > { %6117 = vst.msk [vmem:[#allocation4] sm:$0xff] %vm6116_vm9, %v6084_v8  ;;  %v4786_v15 = vmul.f32 1.442695, %v18767_v38  ;;  %v4821_v8 = vld [vmem:[#allocation4 + $0x88] sm:$0xff] }
 0x6b2   : > { %v5831_v27 = vpop.xlane.xlu1 %5830  ;;  %7222 = vst.msk [vmem:[#allocation5 + $0xf0] sm:$0xff] %vm6116_vm9, %v7190_v45  ;;  %v9471_v34 = vpop.eup %9470 }
 0x6b3   : > { %v6087_v9 = vadd.f32 %v5831_v27, %v4839_v41  ;;  %9476 = vpow2.f32 %v4786_v15  ;;  %v4853_v45 = vmul.f32 %v9471_v34, %v4821_v8  ;;  %v4823_v27 = vld [vmem:[#allocation4 + $0x98] sm:$0xff]  ;;  %v7261_v15 = vld [vmem:[#allocation4 + $0x8] sm:$0xff] (!%p8310_p3) }
 0x6b4   : > { %9478 = vpow2.f32 %v4790_v50  ;;  %v7270_v50 = vld [vmem:[#allocation4 + $0x50] sm:$0xff] (!%p8310_p3) }
 0x6b5   : > { %6120 = vst.msk [vmem:[#allocation4 + $0x18] sm:$0xff] %vm6116_vm9, %v6087_v9  ;;  %v18771_v9 = vld [vmem:[#allocation337_spill] sm:$0xff] }
 0x6b6   : > { %v5849_v21 = vpop.xlane.xlu1 %5848  ;;  %v9473_v41 = vpop.eup %9472  ;;  %v18773_v24 = vsub.f32 %v18771_v9, %v18772_v20  ;;  %v7229_v9 = vld [vmem:[#allocation3 + $0x8] sm:$0xff] (!%p8310_p3)  ;;  %v7272_v20 = vld [vmem:[#allocation4 + $0x60] sm:$0xff] (!%p8310_p3) }
 0x6b7   : > { %v6089_v47 = vadd.f32 %v5849_v21, %v4841_v35  ;;  %v4855_v39 = vmul.f32 %v9473_v41, %v4823_v27  ;;  %v4825_v21 = vld [vmem:[#allocation4 + $0xa8] sm:$0xff]  ;;  %v7228_v41 = vld [vmem:[#allocation3] sm:$0xff] (!%p8310_p3) }
 0x6b8   : > { %v4794_v40 = vmul.f32 1.442695, %v18773_v24  ;;  %v7260_v38 = vld [vmem:[#allocation4] sm:$0xff] (!%p8310_p3) }
 0x6b9   : > { %6122 = vst.msk [vmem:[#allocation4 + $0x28] sm:$0xff] %vm6116_vm9, %v6089_v47  ;;  %v9475_v35 = vpop.eup %9474  ;;  %v18774_v47 = vld [vmem:[#allocation341_spill] sm:$0xff] }
 0x6ba   : > { %v5867_v32 = vpop.xlane.xlu1 %5866  ;;  %9480 = vpow2.f32 %v4794_v40  ;;  %v18776_v28 = vsub.f32 %v18774_v47, %v18775_v17  ;;  %v7388_v40 = vld [vmem:[#allocation5] sm:$0xff] (!%p8310_p3)  ;;  %v7389_v47 = vld [vmem:[#allocation5 + $0x8] sm:$0xff] (!%p8310_p3) }
 0x6bb   : > { %v6091_v18 = vadd.f32 %v5867_v32, %v4843_v33  ;;  %v18778_v33 = vld [vmem:[#allocation345_spill] sm:$0xff]  ;;  %v4857_v32 = vmul.f32 %v9475_v35, %v4825_v21  ;;  %v7230_v35 = vld [vmem:[#allocation3 + $0x10] sm:$0xff] (!%p8310_p3) }
 0x6bc   : > { %v4798_v31 = vmul.f32 1.442695, %v18776_v28  ;;  %v4739_v37 = vsub.f32 %v18778_v33, %v18777_v36  ;;  %v7263_v34 = vld [vmem:[#allocation4 + $0x18] sm:$0xff] (!%p8310_p3) }
 0x6bd   : > { %6124 = vst.msk [vmem:[#allocation4 + $0x38] sm:$0xff] %vm6116_vm9, %v6091_v18  ;;  %v9477_v46 = vpop.eup %9476  ;;  %v7231_v28 = vld [vmem:[#allocation3 + $0x18] sm:$0xff] (!%p8310_p3) }
 0x6be   : > { %9482 = vpow2.f32 %v4798_v31  ;;  %v4802_v58 = vmul.f32 1.442695, %v4739_v37  ;;  %v4859_v52 = vmul.f32 %v9477_v46, %v4827_v10  ;;  %v7274_v31 = vld [vmem:[#allocation4 + $0x70] sm:$0xff] (!%p8310_p3)  ;;  %v7232_v46 = vld [vmem:[#allocation3 + $0x20] sm:$0xff] (!%p8310_p3) }
 0x6bf   : > { %v5885_v11 = vpop.xlane.xlu1 %5884  ;;  %v7390_v37 = vld [vmem:[#allocation5 + $0x10] sm:$0xff] (!%p8310_p3) }
 0x6c0   : > { %v6093_v5 = vadd.f32 %v5885_v11, %v4845_v19  ;;  %v9479_v19 = vpop.eup %9478  ;;  %v4829_v11 = vld [vmem:[#allocation4 + $0xc8] sm:$0xff]  ;;  %9484 = vpow2.f32 %v4802_v58 }
 0x6c1   : > { %9486 = vlog2.f32 (!%p8310_p3), %v7260_v38  ;;  %v7265_v8 = vld [vmem:[#allocation4 + $0x28] sm:$0xff] (!%p8310_p3) }
 0x6c2   : > { %6126 = vst.msk [vmem:[#allocation4 + $0x48] sm:$0xff] %vm6116_vm9, %v6093_v5  ;;  %v4861_v5 = vmul.f32 %v9479_v19, %v4829_v11  ;;  %9488 = vlog2.f32 (!%p8310_p3), %v7261_v15  ;;  %v7276_v11 = vld [vmem:[#allocation4 + $0x80] sm:$0xff] (!%p8310_p3) }
 0x6c3   : > { %v5903_v4 = vpop.xlane.xlu1 %5902 }
 0x6c4   : > { %v6095_v1 = vadd.f32 %v5903_v4, %v4847_v25  ;;  %v9481_v14 = vpop.eup %9480  ;;  %v7267_v30 = vld [vmem:[#allocation4 + $0x38] sm:$0xff] (!%p8310_p3) }
 0x6c5   : > { %v4863_v25 = vmul.f32 %v9481_v14, %v4831_v7 }
 0x6c6   : > { %6128 = vst.msk [vmem:[#allocation4 + $0x58] sm:$0xff] %vm6116_vm9, %v6095_v1 }
 0x6c7   : > { %v5921_v48 = vpop.xlane.xlu1 %5920 }
 0x6c8   : > { %v6097_v57 = vadd.f32 %v5921_v48, %v4849_v59  ;;  %v9483_v3 = vpop.eup %9482 }
 0x6c9   : > { %v4865_v16 = vmul.f32 %v9483_v3, %v4833_v23  ;;  %v7269_v26 = vld [vmem:[#allocation4 + $0x48] sm:$0xff] (!%p8310_p3) }
 0x6ca   : > { %6130 = vst.msk [vmem:[#allocation4 + $0x68] sm:$0xff] %vm6116_vm9, %v6097_v57  ;;  %v9485_v29 = vpop.eup %9484  ;;  %v6615_v57 = vld [vmem:[#allocation5 + $0xf8] sm:$0xff] }
 0x6cb   : > { %v5939_v60 = vpop.xlane.xlu1 %5938  ;;  %v4867_v54 = vmul.f32 %v9485_v29, %v4835_v12  ;;  %v7235_v29 = vld [vmem:[#allocation3 + $0x38] sm:$0xff] (!%p8310_p3) }
 0x6cc   : > { %v6099_v43 = vadd.f32 %v5939_v60, %v4851_v49  ;;  %v7262_v49 = vld [vmem:[#allocation4 + $0x10] sm:$0xff] (!%p8310_p3)  ;;  %v7264_v60 = vld [vmem:[#allocation4 + $0x20] sm:$0xff] (!%p8310_p3) }
 0x6cd   : > { %9490 = vlog2.f32 (!%p8310_p3), %v7262_v49  ;;  %v7395_v49 = vld [vmem:[#allocation5 + $0x38] sm:$0xff] (!%p8310_p3) }
 0x6ce   : > { %6132 = vst.msk [vmem:[#allocation4 + $0x78] sm:$0xff] %vm6116_vm9, %v6099_v43  ;;  %9492 = vlog2.f32 (!%p8310_p3), %v7263_v34  ;;  %v7266_v43 = vld [vmem:[#allocation4 + $0x30] sm:$0xff] (!%p8310_p3) }
 0x6cf   : > { %9494 = vlog2.f32 (!%p8310_p3), %v7264_v60  ;;  %v7237_v60 = vld [vmem:[#allocation3 + $0x48] sm:$0xff] (!%p8310_p3) }
 0x6d0   : > { %v5957_v42 = vpop.xlane.xlu1 %5956  ;;  %9496 = vlog2.f32 (!%p8310_p3), %v7265_v8  ;;  %v7280_v8 = vld [vmem:[#allocation4 + $0xa0] sm:$0xff] (!%p8310_p3) }
 0x6d1   : > { %v6101_v63 = vadd.f32 %v5957_v42, %v4853_v45  ;;  %9498 = vlog2.f32 (!%p8310_p3), %v7266_v43  ;;  %v9487_v45 = vpop.eup (!%p8310_p3), %9486  ;;  %v7271_v42 = vld [vmem:[#allocation4 + $0x58] sm:$0xff] (!%p8310_p3) }
 0x6d2   : > { %9500 = vlog2.f32 (!%p8310_p3), %v7267_v30  ;;  %v9489_v27 = vpop.eup (!%p8310_p3), %9488 }
 0x6d3   : > { %6134 = vst.msk [vmem:[#allocation4 + $0x88] sm:$0xff] %vm6116_vm9, %v6101_v63  ;;  %9502 = vlog2.f32 (!%p8310_p3), %v7268_v62  ;;  %v7293_v63 = vmul.f32 (!%p8310_p3), 0.6931472, %v9487_v45  ;;  %v7238_v45 = vld [vmem:[#allocation3 + $0x50] sm:$0xff] (!%p8310_p3) }
 0x6d4   : > { %v5975_v13 = vpop.xlane.xlu1 %5974  ;;  %9504 = vlog2.f32 (!%p8310_p3), %v7269_v26  ;;  %v7396_v26 = vld [vmem:[#allocation5 + $0x40] sm:$0xff] (!%p8310_p3) }
 0x6d5   : > { %v6103_v6 = vadd.f32 %v5975_v13, %v4855_v39  ;;  %9506 = vlog2.f32 (!%p8310_p3), %v7270_v50  ;;  %v7295_v39 = vmul.f32 (!%p8310_p3), 0.6931472, %v9489_v27  ;;  %v7273_v13 = vld [vmem:[#allocation4 + $0x68] sm:$0xff] (!%p8310_p3) }
 0x6d6   : > { %9508 = vlog2.f32 (!%p8310_p3), %v7271_v42 }
 0x6d7   : > { %6136 = vst.msk [vmem:[#allocation4 + $0x98] sm:$0xff] %vm6116_vm9, %v6103_v6  ;;  %v9491_v24 = vpop.eup (!%p8310_p3), %9490  ;;  %9510 = vlog2.f32 (!%p8310_p3), %v7272_v20  ;;  %v7356_v6 = vadd.f32 (!%p8310_p3), %v7293_v63, %v7228_v41  ;;  %v7357_v33 = vadd.f32 (!%p8310_p3), %v7295_v39, %v7229_v9  ;;  %v7397_v9 = vld [vmem:[#allocation5 + $0x48] sm:$0xff] (!%p8310_p3) }
 0x6d8   : > { %v5993_v18 = vpop.xlane.xlu1 %5992  ;;  %v9493_v21 = vpop.eup (!%p8310_p3), %9492  ;;  %v7297_v17 = vmul.f32 (!%p8310_p3), 0.6931472, %v9491_v24  ;;  %9512 = vlog2.f32 (!%p8310_p3), %v7273_v13  ;;  %v7239_v24 = vld [vmem:[#allocation3 + $0x58] sm:$0xff] (!%p8310_p3) }
 0x6d9   : > { %v6105_v56 = vadd.f32 %v5993_v18, %v4857_v32  ;;  %v9495_v36 = vpop.eup (!%p8310_p3), %9494  ;;  %v7299_v32 = vmul.f32 (!%p8310_p3), 0.6931472, %v9493_v21  ;;  %9514 = vlog2.f32 (!%p8310_p3), %v7274_v31  ;;  %v7275_v18 = vld [vmem:[#allocation4 + $0x78] sm:$0xff] (!%p8310_p3)  ;;  %v7398_v21 = vld [vmem:[#allocation5 + $0x50] sm:$0xff] (!%p8310_p3) }
 0x6da   : > { %v9497_v10 = vpop.eup (!%p8310_p3), %9496  ;;  %v7358_v58 = vadd.f32 (!%p8310_p3), %v7297_v17, %v7230_v35  ;;  %v7301_v19 = vmul.f32 (!%p8310_p3), 0.6931472, %v9495_v36  ;;  %9516 = vlog2.f32 (!%p8310_p3), %v7275_v18 }
 0x6db   : > { %6138 = vst.msk [vmem:[#allocation4 + $0xa8] sm:$0xff] %vm6116_vm9, %v6105_v56  ;;  %v7420_v56 = vsub.f32 (!%p8310_p3), %v7356_v6, %v7388_v40  ;;  %v7359_v14 = vadd.f32 (!%p8310_p3), %v7299_v32, %v7231_v28  ;;  %v7303_v7 = vmul.f32 (!%p8310_p3), 0.6931472, %v9497_v10  ;;  %9518 = vlog2.f32 (!%p8310_p3), %v7276_v11  ;;  %v7282_v40 = vld [vmem:[#allocation4 + $0xb0] sm:$0xff] (!%p8310_p3)  ;;  %v7241_v32 = vld [vmem:[#allocation3 + $0x68] sm:$0xff] (!%p8310_p3) }
 0x6dc   : > { %v6011_v22 = vpop.xlane.xlu1 %6010  ;;  %v7360_v23 = vadd.f32 (!%p8310_p3), %v7301_v19, %v7232_v46  ;;  %v7284_v46 = vld [vmem:[#allocation4 + $0xc0] sm:$0xff] (!%p8310_p3)  ;;  %v7242_v19 = vld [vmem:[#allocation3 + $0x70] sm:$0xff] (!%p8310_p3) }
 0x6dd   : > { %v6107_v61 = vadd.f32 %v6011_v22, %v4859_v52  ;;  %v7391_v52 = vld [vmem:[#allocation5 + $0x18] sm:$0xff] (!%p8310_p3)  ;;  %v7233_v22 = vld [vmem:[#allocation3 + $0x28] sm:$0xff] (!%p8310_p3)  ;;  %7452 = vst.msk [vmem:[%s10034_s27] sm:$0xff] (!%p8310_p3), %vm6116_vm9, %v7420_v56 }
 0x6df   : > { %6140 = vst.msk [vmem:[#allocation4 + $0xb8] sm:$0xff] %vm6116_vm9, %v6107_v61  ;;  %v9499_v61 = vpop.eup (!%p8310_p3), %9498 }
 0x6e0   : > { %v6029_v2 = vpop.xlane.xlu1 %6028  ;;  %v9501_v3 = vpop.eup (!%p8310_p3), %9500 }
 0x6e1   : > { %v6109_v51 = vadd.f32 %v6029_v2, %v4861_v5  ;;  %v7421_v5 = vsub.f32 (!%p8310_p3), %v7357_v33, %v7389_v47  ;;  %v7392_v2 = vld [vmem:[#allocation5 + $0x20] sm:$0xff] (!%p8310_p3)  ;;  %v9503_v12 = vpop.eup (!%p8310_p3), %9502  ;;  %v7399_v33 = vld [vmem:[#allocation5 + $0x58] sm:$0xff] (!%p8310_p3) }
 0x6e2   : > { %v7424_v38 = vsub.f32 (!%p8310_p3), %v7360_v23, %v7392_v2  ;;  %v7309_v34 = vmul.f32 (!%p8310_p3), 0.6931472, %v9503_v12  ;;  %v7281_v41 = vld [vmem:[#allocation4 + $0xa8] sm:$0xff] (!%p8310_p3)  ;;  %v7240_v47 = vld [vmem:[#allocation3 + $0x60] sm:$0xff] (!%p8310_p3)  ;;  %v7402_v23 = vld [vmem:[#allocation5 + $0x70] sm:$0xff] (!%p8310_p3) }
 0x6e3   : > { %6142 = vst.msk [vmem:[#allocation4 + $0xc8] sm:$0xff] %vm6116_vm9, %v6109_v51  ;;  %v7234_v51 = vld [vmem:[#allocation3 + $0x30] sm:$0xff] (!%p8310_p3)  ;;  %7453 = vst.msk [vmem:[%s10034_s27 + $0x8] sm:$0xff] (!%p8310_p3), %vm6116_vm9, %v7421_v5 }
 0x6e4   : > { %v6047_v4 = vpop.xlane.xlu1 %6046  ;;  %7456 = vst.msk [vmem:[%s10034_s27 + $0x20] sm:$0xff] (!%p8310_p3), %vm6116_vm9, %v7424_v38 }
 0x6e5   : > { %v6111_v1 = vadd.f32 %v6047_v4, %v4863_v25  ;;  %v7277_v25 = vld [vmem:[#allocation4 + $0x88] sm:$0xff] (!%p8310_p3)  ;;  %v7422_v4 = vsub.f32 (!%p8310_p3), %v7358_v58, %v7390_v37  ;;  %v7400_v58 = vld [vmem:[#allocation5 + $0x60] sm:$0xff] (!%p8310_p3) }
 0x6e6   : > { %9520 = vlog2.f32 (!%p8310_p3), %v7277_v25  ;;  %v7283_v17 = vld [vmem:[#allocation4 + $0xb8] sm:$0xff] (!%p8310_p3) }
 0x6e7   : > { %6144 = vst.msk [vmem:[#allocation4 + $0xd8] sm:$0xff] %vm6116_vm9, %v6111_v1  ;;  %v7393_v1 = vld [vmem:[#allocation5 + $0x28] sm:$0xff] (!%p8310_p3)  ;;  %7454 = vst.msk [vmem:[%s10034_s27 + $0x10] sm:$0xff] (!%p8310_p3), %vm6116_vm9, %v7422_v4 }
 0x6e8   : > { %v6065_v0 = vpop.xlane.xlu1 %6064 }
 0x6e9   : > { %v6113_v59 = vadd.f32 %v6065_v0, %v4865_v16  ;;  %v7305_v16 = vmul.f32 (!%p8310_p3), 0.6931472, %v9499_v61  ;;  %v7278_v0 = vld [vmem:[#allocation4 + $0x90] sm:$0xff] (!%p8310_p3) }
 0x6ea   : > { %9522 = vlog2.f32 (!%p8310_p3), %v7278_v0 }
 0x6eb   : > { %6146 = vst.msk [vmem:[#allocation4 + $0xe8] sm:$0xff] %vm6116_vm9, %v6113_v59  ;;  %v7423_v59 = vsub.f32 (!%p8310_p3), %v7359_v14, %v7391_v52  ;;  %v7362_v15 = vadd.f32 (!%p8310_p3), %v7305_v16, %v7234_v51  ;;  %v7401_v14 = vld [vmem:[#allocation5 + $0x68] sm:$0xff] (!%p8310_p3)  ;;  %v7286_v51 = vld [vmem:[#allocation4 + $0xd0] sm:$0xff] (!%p8310_p3)  ;;  %v7244_v16 = vld [vmem:[#allocation3 + $0x80] sm:$0xff] (!%p8310_p3) }
 0x6ec   : > { %v6083_v48 = vpop.xlane.xlu1 %6082 }
 0x6ed   : > { %v6115_v44 = vadd.f32 %v6083_v48, %v4867_v54  ;;  %7227 = sbr.rel (%p8310_p3) target bundleno = 1809 (0x711), region = 75  ;;  %v7361_v54 = vadd.f32 (!%p8310_p3), %v7303_v7, %v7233_v22  ;;  %v7394_v48 = vld [vmem:[#allocation5 + $0x30] sm:$0xff] (!%p8310_p3)  ;;  %7455 = vst.msk [vmem:[%s10034_s27 + $0x18] sm:$0xff] (!%p8310_p3), %vm6116_vm9, %v7423_v59  ;;  %v7285_v22 = vld [vmem:[#allocation4 + $0xc8] sm:$0xff] (!%p8310_p3)  ;;  %v7243_v7 = vld [vmem:[#allocation3 + $0x78] sm:$0xff] (!%p8310_p3) }
 0x6ee   : > { %v7426_v27 = vsub.f32 (!%p8310_p3), %v7362_v15, %v7394_v48  ;;  %v7404_v15 = vld [vmem:[#allocation5 + $0x80] sm:$0xff] (!%p8310_p3) }
 0x6ef   : > { %6148 = vst.msk [vmem:[#allocation4 + $0xf8] sm:$0xff] %vm6116_vm9, %v6115_v44  ;;  %v7307_v44 = vmul.f32 (!%p8310_p3), 0.6931472, %v9501_v3  ;;  %v7425_v30 = vsub.f32 (!%p8310_p3), %v7361_v54, %v7393_v1  ;;  %v7403_v54 = vld [vmem:[#allocation5 + $0x78] sm:$0xff] (!%p8310_p3) }
 0x6f0   : > { %v7159_v55 = vpop.xlane.xlu1 %7158  ;;  %7458 = vst.msk [vmem:[%s10034_s27 + $0x30] sm:$0xff] (!%p8310_p3), %vm6116_vm9, %v7426_v27 }
 0x6f1   : > { %v7191_v53 = vadd.f32 %v7159_v55, %v6615_v57  ;;  %v7236_v57 = vld [vmem:[#allocation3 + $0x40] sm:$0xff] (!%p8310_p3)  ;;  %v7279_v55 = vld [vmem:[#allocation4 + $0x98] sm:$0xff] (!%p8310_p3)  ;;  %v7363_v62 = vadd.f32 (!%p8310_p3), %v7307_v44, %v7235_v29  ;;  %7457 = vst.msk [vmem:[%s10034_s27 + $0x28] sm:$0xff] (!%p8310_p3), %vm6116_vm9, %v7425_v30  ;;  %v7245_v44 = vld [vmem:[#allocation3 + $0x88] sm:$0xff] (!%p8310_p3) }
 0x6f2   : > { %9524 = vlog2.f32 (!%p8310_p3), %v7279_v55  ;;  %v7364_v63 = vadd.f32 (!%p8310_p3), %v7309_v34, %v7236_v57  ;;  %v7287_v29 = vld [vmem:[#allocation4 + $0xd8] sm:$0xff] (!%p8310_p3)  ;;  %v7288_v57 = vld [vmem:[#allocation4 + $0xe0] sm:$0xff] (!%p8310_p3)  ;;  %v7246_v34 = vld [vmem:[#allocation3 + $0x90] sm:$0xff] (!%p8310_p3) }
 0x6f3   : > { %7223 = vst.msk [vmem:[#allocation5 + $0xf8] sm:$0xff] %vm6116_vm9, %v7191_v53  ;;  %v9505_v53 = vpop.eup (!%p8310_p3), %9504  ;;  %9526 = vlog2.f32 (!%p8310_p3), %v7280_v8  ;;  %v7427_v35 = vsub.f32 (!%p8310_p3), %v7363_v62, %v7395_v49  ;;  %v7405_v62 = vld [vmem:[#allocation5 + $0x88] sm:$0xff] (!%p8310_p3) }
 0x6f4   : > { %v9507_v43 = vpop.eup %9506  ;;  %v7311_v50 = vmul.f32 0.6931472, %v9505_v53  ;;  %9528 = vlog2.f32 %v7281_v41  ;;  %v7428_v31 = vsub.f32 %v7364_v63, %v7396_v26  ;;  %v7406_v63 = vld [vmem:[#allocation5 + $0x90] sm:$0xff] }
 0x6f5   : > { %v9509_v42 = vpop.eup %9508  ;;  %v7313_v20 = vmul.f32 0.6931472, %v9507_v43  ;;  %9530 = vlog2.f32 %v7282_v40  ;;  %7459 = vst.msk [vmem:[%s10034_s27 + $0x38] sm:$0xff] %vm6116_vm9, %v7427_v35 }
 0x6f6   : > { %v9511_v39 = vpop.eup %9510  ;;  %v7365_v13 = vadd.f32 %v7311_v50, %v7237_v60  ;;  %v7315_v6 = vmul.f32 0.6931472, %v9509_v42  ;;  %9532 = vlog2.f32 %v7283_v17  ;;  %7460 = vst.msk [vmem:[%s10034_s27 + $0x40] sm:$0xff] %vm6116_vm9, %v7428_v31  ;;  %v7289_v60 = vld [vmem:[#allocation4 + $0xe8] sm:$0xff]  ;;  %v7247_v50 = vld [vmem:[#allocation3 + $0x98] sm:$0xff]  ;;  %v7408_v31 = vld [vmem:[#allocation5 + $0xa0] sm:$0xff] }
 0x6f7   : > { %v9513_v28 = vpop.eup %9512  ;;  %v7366_v36 = vadd.f32 %v7313_v20, %v7238_v45  ;;  %v7317_v37 = vmul.f32 0.6931472, %v9511_v39  ;;  %9534 = vlog2.f32 %v7284_v46  ;;  %v7290_v45 = vld [vmem:[#allocation4 + $0xf0] sm:$0xff]  ;;  %v7248_v20 = vld [vmem:[#allocation3 + $0xa0] sm:$0xff] }
 0x6f8   : > { %v9515_v18 = vpop.eup %9514  ;;  %v7429_v10 = vsub.f32 %v7365_v13, %v7397_v9  ;;  %v7367_v56 = vadd.f32 %v7315_v6, %v7239_v24  ;;  %v7319_v52 = vmul.f32 0.6931472, %v9513_v28  ;;  %9536 = vlog2.f32 %v7285_v22  ;;  %v7291_v24 = vld [vmem:[#allocation4 + $0xf8] sm:$0xff]  ;;  %v7249_v6 = vld [vmem:[#allocation3 + $0xa8] sm:$0xff]  ;;  %v7410_v22 = vld [vmem:[#allocation5 + $0xb0] sm:$0xff] }
 0x6f9   : > { %v9517_v11 = vpop.eup %9516  ;;  %v7430_v61 = vsub.f32 %v7366_v36, %v7398_v21  ;;  %v7368_v5 = vadd.f32 %v7317_v37, %v7240_v47  ;;  %v7321_v2 = vmul.f32 0.6931472, %v9515_v18  ;;  %9538 = vlog2.f32 %v7286_v51  ;;  %v7407_v13 = vld [vmem:[#allocation5 + $0x98] sm:$0xff]  ;;  %v7409_v18 = vld [vmem:[#allocation5 + $0xa8] sm:$0xff] }
 0x6fa   : > { %v9519_v25 = vpop.eup %9518  ;;  %7461 = vst.msk [vmem:[%s10034_s27 + $0x48] sm:$0xff] %vm6116_vm9, %v7429_v10  ;;  %v7431_v3 = vsub.f32 %v7367_v56, %v7399_v33  ;;  %v7369_v4 = vadd.f32 %v7319_v52, %v7241_v32  ;;  %v7323_v1 = vmul.f32 0.6931472, %v9517_v11  ;;  %9540 = vlog2.f32 %v7287_v29  ;;  %v7250_v33 = vld [vmem:[#allocation3 + $0xb0] sm:$0xff]  ;;  %v7251_v56 = vld [vmem:[#allocation3 + $0xb8] sm:$0xff] }
 0x6fb   : > { %v9521_v0 = vpop.eup %9520  ;;  %7462 = vst.msk [vmem:[%s10034_s27 + $0x50] sm:$0xff] %vm6116_vm9, %v7430_v61  ;;  %v7432_v12 = vsub.f32 %v7368_v5, %v7400_v58  ;;  %v7370_v59 = vadd.f32 %v7321_v2, %v7242_v19  ;;  %v7325_v48 = vmul.f32 0.6931472, %v9519_v25  ;;  %9542 = vlog2.f32 %v7288_v57  ;;  %v7252_v61 = vld [vmem:[#allocation3 + $0xc0] sm:$0xff]  ;;  %v7253_v25 = vld [vmem:[#allocation3 + $0xc8] sm:$0xff]  ;;  %v7254_v29 = vld [vmem:[#allocation3 + $0xd0] sm:$0xff] }
 0x6fc   : > { %v9523_v55 = vpop.eup %9522  ;;  %7463 = vst.msk [vmem:[%s10034_s27 + $0x58] sm:$0xff] %vm6116_vm9, %v7431_v3  ;;  %v7433_v53 = vsub.f32 %v7369_v4, %v7401_v14  ;;  %v7371_v38 = vadd.f32 %v7323_v1, %v7243_v7  ;;  %v7327_v49 = vmul.f32 0.6931472, %v9521_v0  ;;  %9544 = vlog2.f32 %v7289_v60  ;;  %v7411_v7 = vld [vmem:[#allocation5 + $0xb8] sm:$0xff]  ;;  %v7412_v1 = vld [vmem:[#allocation5 + $0xc0] sm:$0xff] }
 0x6fd   : > { %v9525_v8 = vpop.eup %9524  ;;  %7464 = vst.msk [vmem:[%s10034_s27 + $0x60] sm:$0xff] %vm6116_vm9, %v7432_v12  ;;  %v7434_v43 = vsub.f32 %v7370_v59, %v7402_v23  ;;  %v7372_v30 = vadd.f32 %v7325_v48, %v7244_v16  ;;  %v7329_v26 = vmul.f32 0.6931472, %v9523_v55  ;;  %9546 = vlog2.f32 %v7290_v45 }
 0x6fe   : > { %v9527_v41 = vpop.eup %9526  ;;  %7465 = vst.msk [vmem:[%s10034_s27 + $0x68] sm:$0xff] %vm6116_vm9, %v7433_v53  ;;  %v7435_v42 = vsub.f32 %v7371_v38, %v7403_v54  ;;  %v7373_v27 = vadd.f32 %v7327_v49, %v7245_v44  ;;  %v7331_v9 = vmul.f32 0.6931472, %v9525_v8  ;;  %9548 = vlog2.f32 %v7291_v24  ;;  %v7413_v54 = vld [vmem:[#allocation5 + $0xc8] sm:$0xff]  ;;  %v7255_v44 = vld [vmem:[#allocation3 + $0xd8] sm:$0xff]  ;;  %v7414_v38 = vld [vmem:[#allocation5 + $0xd0] sm:$0xff] }
 0x6ff   : > { %v9529_v40 = vpop.eup %9528  ;;  %7466 = vst.msk [vmem:[%s10034_s27 + $0x70] sm:$0xff] %vm6116_vm9, %v7434_v43  ;;  %v7436_v39 = vsub.f32 %v7372_v30, %v7404_v15  ;;  %v7374_v35 = vadd.f32 %v7329_v26, %v7246_v34  ;;  %v7333_v21 = vmul.f32 0.6931472, %v9527_v41  ;;  %v7256_v49 = vld [vmem:[#allocation3 + $0xe0] sm:$0xff]  ;;  %v7415_v43 = vld [vmem:[#allocation5 + $0xd8] sm:$0xff]  ;;  %v7417_v24 = vld [vmem:[#allocation5 + $0xe8] sm:$0xff] }
 0x700   : > { %v9531_v47 = vpop.eup %9530  ;;  %7467 = vst.msk [vmem:[%s10034_s27 + $0x78] sm:$0xff] %vm6116_vm9, %v7435_v42  ;;  %v7437_v17 = vsub.f32 %v7373_v27, %v7405_v62  ;;  %v7375_v28 = vadd.f32 %v7331_v9, %v7247_v50  ;;  %v7335_v36 = vmul.f32 0.6931472, %v9529_v40  ;;  %v7257_v62 = vld [vmem:[#allocation3 + $0xe8] sm:$0xff]  ;;  %v7416_v41 = vld [vmem:[#allocation5 + $0xe0] sm:$0xff]  ;;  %v7258_v27 = vld [vmem:[#allocation3 + $0xf0] sm:$0xff] }
 0x701   : > { %v9533_v37 = vpop.eup %9532  ;;  %7468 = vst.msk [vmem:[%s10034_s27 + $0x80] sm:$0xff] %vm6116_vm9, %v7436_v39  ;;  %v7438_v32 = vsub.f32 %v7374_v35, %v7406_v63  ;;  %v7376_v46 = vadd.f32 %v7333_v21, %v7248_v20  ;;  %v7337_v10 = vmul.f32 0.6931472, %v9531_v47  ;;  %v7259_v39 = vld [vmem:[#allocation3 + $0xf8] sm:$0xff]  ;;  %v7418_v21 = vld [vmem:[#allocation5 + $0xf0] sm:$0xff] }
 0x702   : > { %v9535_v58 = vpop.eup %9534  ;;  %7469 = vst.msk [vmem:[%s10034_s27 + $0x88] sm:$0xff] %vm6116_vm9, %v7437_v17  ;;  %v7439_v52 = vsub.f32 %v7375_v28, %v7407_v13  ;;  %v7377_v19 = vadd.f32 %v7335_v36, %v7249_v6  ;;  %v7339_v11 = vmul.f32 0.6931472, %v9533_v37  ;;  %v7419_v28 = vld [vmem:[#allocation5 + $0xf8] sm:$0xff] }
 0x703   : > { %v9537_v5 = vpop.eup %9536  ;;  %7470 = vst.msk [vmem:[%s10034_s27 + $0x90] sm:$0xff] %vm6116_vm9, %v7438_v32  ;;  %v7440_v14 = vsub.f32 %v7376_v46, %v7408_v31  ;;  %v7378_v2 = vadd.f32 %v7337_v10, %v7250_v33  ;;  %v7341_v51 = vmul.f32 0.6931472, %v9535_v58 }
 0x704   : > { %v9539_v3 = vpop.eup %9538  ;;  %7471 = vst.msk [vmem:[%s10034_s27 + $0x98] sm:$0xff] %vm6116_vm9, %v7439_v52  ;;  %v7441_v4 = vsub.f32 %v7377_v19, %v7409_v18  ;;  %v7379_v23 = vadd.f32 %v7339_v11, %v7251_v56  ;;  %v7343_v16 = vmul.f32 0.6931472, %v9537_v5 }
 0x705   : > { %v9541_v0 = vpop.eup %9540  ;;  %7472 = vst.msk [vmem:[%s10034_s27 + $0xa0] sm:$0xff] %vm6116_vm9, %v7440_v14  ;;  %v7442_v12 = vsub.f32 %v7378_v2, %v7410_v22  ;;  %v7380_v59 = vadd.f32 %v7341_v51, %v7252_v61  ;;  %v7345_v48 = vmul.f32 0.6931472, %v9539_v3 }
 0x706   : > { %v9543_v57 = vpop.eup %9542  ;;  %7473 = vst.msk [vmem:[%s10034_s27 + $0xa8] sm:$0xff] %vm6116_vm9, %v7441_v4  ;;  %v7443_v55 = vsub.f32 %v7379_v23, %v7411_v7  ;;  %v7381_v53 = vadd.f32 %v7343_v16, %v7253_v25  ;;  %v7347_v15 = vmul.f32 0.6931472, %v9541_v0 }
 0x707   : > { %v9545_v34 = vpop.eup %9544  ;;  %7474 = vst.msk [vmem:[%s10034_s27 + $0xb0] sm:$0xff] %vm6116_vm9, %v7442_v12  ;;  %v7444_v60 = vsub.f32 %v7380_v59, %v7412_v1  ;;  %v7382_v8 = vadd.f32 %v7345_v48, %v7254_v29  ;;  %v7349_v30 = vmul.f32 0.6931472, %v9543_v57 }
 0x708   : > { %v9547_v26 = vpop.eup %9546  ;;  %7475 = vst.msk [vmem:[%s10034_s27 + $0xb8] sm:$0xff] %vm6116_vm9, %v7443_v55  ;;  %v7445_v50 = vsub.f32 %v7381_v53, %v7413_v54  ;;  %v7383_v45 = vadd.f32 %v7347_v15, %v7255_v44  ;;  %v7351_v42 = vmul.f32 0.6931472, %v9545_v34 }
 0x709   : > { %v9549_v63 = vpop.eup %9548  ;;  %7476 = vst.msk [vmem:[%s10034_s27 + $0xc0] sm:$0xff] %vm6116_vm9, %v7444_v60  ;;  %v7446_v9 = vsub.f32 %v7382_v8, %v7414_v38  ;;  %v7384_v20 = vadd.f32 %v7349_v30, %v7256_v49  ;;  %v7353_v40 = vmul.f32 0.6931472, %v9547_v26 }
 0x70a   : > { %7477 = vst.msk [vmem:[%s10034_s27 + $0xc8] sm:$0xff] %vm6116_vm9, %v7445_v50  ;;  %v7447_v35 = vsub.f32 %v7383_v45, %v7415_v43  ;;  %v7385_v13 = vadd.f32 %v7351_v42, %v7257_v62  ;;  %v7355_v6 = vmul.f32 0.6931472, %v9549_v63 }
 0x70b   : > { %7478 = vst.msk [vmem:[%s10034_s27 + $0xd0] sm:$0xff] %vm6116_vm9, %v7446_v9  ;;  %v7448_v47 = vsub.f32 %v7384_v20, %v7416_v41  ;;  %v7386_v17 = vadd.f32 %v7353_v40, %v7258_v27 }
 0x70c   : > { %7479 = vst.msk [vmem:[%s10034_s27 + $0xd8] sm:$0xff] %vm6116_vm9, %v7447_v35  ;;  %v7449_v31 = vsub.f32 %v7385_v13, %v7417_v24  ;;  %v7387_v36 = vadd.f32 %v7355_v6, %v7259_v39 }
 0x70d   : > { %7480 = vst.msk [vmem:[%s10034_s27 + $0xe0] sm:$0xff] %vm6116_vm9, %v7448_v47  ;;  %v7450_v33 = vsub.f32 %v7386_v17, %v7418_v21 }
 0x70e   : > { %7481 = vst.msk [vmem:[%s10034_s27 + $0xe8] sm:$0xff] %vm6116_vm9, %v7449_v31  ;;  %v7451_v37 = vsub.f32 %v7387_v36, %v7419_v28 }
 0x70f   : > { %7482 = vst.msk [vmem:[%s10034_s27 + $0xf0] sm:$0xff] %vm6116_vm9, %v7450_v33 }
 0x710   : > { %7483 = vst.msk [vmem:[%s10034_s27 + $0xf8] sm:$0xff] %vm6116_vm9, %v7451_v37 }
 0x711 PF: > { %7495 = sbr.rel (!%p9732_p9) target bundleno = 1877 (0x755), region = 79  ;;  %s8448_s28 = sshll.u32 (%p9732_p9), %s9608_s29, 9  ;;  %v7514_v32 = vld [vmem:[%s10038_s20] sm:$0xff] (%p9732_p9)  ;;  %v7516_v46 = vld [vmem:[%s10038_s20 + $0x8] sm:$0xff] (%p9732_p9)  ;;  %v7518_v18 = vld [vmem:[%s10038_s20 + $0x10] sm:$0xff] (%p9732_p9) }
 0x712   : > { %s7499_s27 = sadd.s32 (%p9732_p9), %s8448_s28, %s10011_s22  ;;  %v7520_v10 = vld [vmem:[%s10038_s20 + $0x18] sm:$0xff] (%p9732_p9)  ;;  %v7522_v56 = vld [vmem:[%s10038_s20 + $0x20] sm:$0xff] (%p9732_p9)  ;;  %v7524_v58 = vld [vmem:[%s10038_s20 + $0x28] sm:$0xff] (%p9732_p9) }
 0x713   : > { %s8315_s8 = sshll.u32 (%p9732_p9), %s7499_s27, 2  ;;  %v7526_v52 = vld [vmem:[%s10038_s20 + $0x30] sm:$0xff] (%p9732_p9)  ;;  %v7528_v19 = vld [vmem:[%s10038_s20 + $0x38] sm:$0xff] (%p9732_p9)  ;;  %v7530_v22 = vld [vmem:[%s10038_s20 + $0x40] sm:$0xff] (%p9732_p9) }
 0x714   : > { %s16505_s10 = scalar_lea.vmem (%p9732_p9), %s16787_s6, %s8315_s8  ;;  %v7532_v11 = vld [vmem:[%s10038_s20 + $0x48] sm:$0xff] (%p9732_p9)  ;;  %v7534_v61 = vld [vmem:[%s10038_s20 + $0x50] sm:$0xff] (%p9732_p9)  ;;  %v7536_v5 = vld [vmem:[%s10038_s20 + $0x58] sm:$0xff] (%p9732_p9) }
 0x715   : > { %7515 = vst [vmem:[%s16505_s10] sm:$0xff] (%p9732_p9), %v7514_v32  ;;  %7517 = vst [vmem:[%s16505_s10 + $0x8] sm:$0xff] (%p9732_p9), %v7516_v46  ;;  %v7538_v14 = vld [vmem:[%s10038_s20 + $0x60] sm:$0xff] (%p9732_p9)  ;;  %v7540_v2 = vld [vmem:[%s10038_s20 + $0x68] sm:$0xff] (%p9732_p9) }
 0x716   : > { %7519 = vst [vmem:[%s16505_s10 + $0x10] sm:$0xff] (%p9732_p9), %v7518_v18  ;;  %7521 = vst [vmem:[%s16505_s10 + $0x18] sm:$0xff] (%p9732_p9), %v7520_v10  ;;  %v7542_v7 = vld [vmem:[%s10038_s20 + $0x70] sm:$0xff] (%p9732_p9)  ;;  %v7544_v51 = vld [vmem:[%s10038_s20 + $0x78] sm:$0xff] (%p9732_p9) }
 0x717   : > { %7523 = vst [vmem:[%s16505_s10 + $0x40] sm:$0xff] (%p9732_p9), %v7522_v56  ;;  %7525 = vst [vmem:[%s16505_s10 + $0x48] sm:$0xff] (%p9732_p9), %v7524_v58  ;;  %v7546_v25 = vld [vmem:[%s10038_s20 + $0x80] sm:$0xff] (%p9732_p9)  ;;  %v7548_v3 = vld [vmem:[%s10038_s20 + $0x88] sm:$0xff] (%p9732_p9) }
 0x718   : > { %7527 = vst [vmem:[%s16505_s10 + $0x50] sm:$0xff] %v7526_v52  ;;  %7529 = vst [vmem:[%s16505_s10 + $0x58] sm:$0xff] %v7528_v19  ;;  %v7550_v4 = vld [vmem:[%s10038_s20 + $0x90] sm:$0xff]  ;;  %v7552_v23 = vld [vmem:[%s10038_s20 + $0x98] sm:$0xff] }
 0x719   : > { %7531 = vst [vmem:[%s16505_s10 + $0x80] sm:$0xff] %v7530_v22  ;;  %7533 = vst [vmem:[%s16505_s10 + $0x88] sm:$0xff] %v7532_v11  ;;  %v7554_v1 = vld [vmem:[%s10038_s20 + $0xa0] sm:$0xff]  ;;  %v7556_v16 = vld [vmem:[%s10038_s20 + $0xa8] sm:$0xff] }
 0x71a   : > { %7535 = vst [vmem:[%s16505_s10 + $0x90] sm:$0xff] %v7534_v61  ;;  %7537 = vst [vmem:[%s16505_s10 + $0x98] sm:$0xff] %v7536_v5  ;;  %v7558_v29 = vld [vmem:[%s10038_s20 + $0xb0] sm:$0xff]  ;;  %v7560_v0 = vld [vmem:[%s10038_s20 + $0xb8] sm:$0xff] }
 0x71b   : > { %7539 = vst [vmem:[%s16505_s10 + $0xc0] sm:$0xff] %v7538_v14  ;;  %7541 = vst [vmem:[%s16505_s10 + $0xc8] sm:$0xff] %v7540_v2  ;;  %v7562_v12 = vld [vmem:[%s10038_s20 + $0xc0] sm:$0xff]  ;;  %v7564_v59 = vld [vmem:[%s10038_s20 + $0xc8] sm:$0xff] }
 0x71c   : > { %7543 = vst [vmem:[%s16505_s10 + $0xd0] sm:$0xff] %v7542_v7  ;;  %7545 = vst [vmem:[%s16505_s10 + $0xd8] sm:$0xff] %v7544_v51  ;;  %v7566_v54 = vld [vmem:[%s10038_s20 + $0xd0] sm:$0xff]  ;;  %v7568_v48 = vld [vmem:[%s10038_s20 + $0xd8] sm:$0xff] }
 0x71d   : > { %7547 = vst [vmem:[%s16505_s10 + $0x100] sm:$0xff] %v7546_v25  ;;  %7549 = vst [vmem:[%s16505_s10 + $0x108] sm:$0xff] %v7548_v3  ;;  %v7570_v44 = vld [vmem:[%s10038_s20 + $0xe0] sm:$0xff]  ;;  %v7572_v57 = vld [vmem:[%s10038_s20 + $0xe8] sm:$0xff] }
 0x71e   : > { %7551 = vst [vmem:[%s16505_s10 + $0x110] sm:$0xff] %v7550_v4  ;;  %7553 = vst [vmem:[%s16505_s10 + $0x118] sm:$0xff] %v7552_v23  ;;  %v7574_v55 = vld [vmem:[%s10038_s20 + $0xf0] sm:$0xff]  ;;  %v7576_v53 = vld [vmem:[%s10038_s20 + $0xf8] sm:$0xff] }
 0x71f   : > { %7555 = vst [vmem:[%s16505_s10 + $0x140] sm:$0xff] %v7554_v1  ;;  %7557 = vst [vmem:[%s16505_s10 + $0x148] sm:$0xff] %v7556_v16  ;;  %v7578_v38 = vld [vmem:[%s10038_s20 + $0x100] sm:$0xff]  ;;  %v7580_v15 = vld [vmem:[%s10038_s20 + $0x108] sm:$0xff] }
 0x720   : > { %7559 = vst [vmem:[%s16505_s10 + $0x150] sm:$0xff] %v7558_v29  ;;  %7561 = vst [vmem:[%s16505_s10 + $0x158] sm:$0xff] %v7560_v0  ;;  %v7582_v49 = vld [vmem:[%s10038_s20 + $0x110] sm:$0xff]  ;;  %v7584_v34 = vld [vmem:[%s10038_s20 + $0x118] sm:$0xff] }
 0x721   : > { %7563 = vst [vmem:[%s16505_s10 + $0x180] sm:$0xff] %v7562_v12  ;;  %7565 = vst [vmem:[%s16505_s10 + $0x188] sm:$0xff] %v7564_v59  ;;  %v7586_v60 = vld [vmem:[%s10038_s20 + $0x120] sm:$0xff]  ;;  %v7588_v8 = vld [vmem:[%s10038_s20 + $0x128] sm:$0xff] }
 0x722   : > { %7567 = vst [vmem:[%s16505_s10 + $0x190] sm:$0xff] %v7566_v54  ;;  %7569 = vst [vmem:[%s16505_s10 + $0x198] sm:$0xff] %v7568_v48  ;;  %v7590_v43 = vld [vmem:[%s10038_s20 + $0x130] sm:$0xff]  ;;  %v7592_v30 = vld [vmem:[%s10038_s20 + $0x138] sm:$0xff] }
 0x723   : > { %7571 = vst [vmem:[%s16505_s10 + $0x1c0] sm:$0xff] %v7570_v44  ;;  %7573 = vst [vmem:[%s16505_s10 + $0x1c8] sm:$0xff] %v7572_v57  ;;  %v7594_v62 = vld [vmem:[%s10038_s20 + $0x140] sm:$0xff]  ;;  %v7596_v26 = vld [vmem:[%s10038_s20 + $0x148] sm:$0xff] }
 0x724   : > { %7575 = vst [vmem:[%s16505_s10 + $0x1d0] sm:$0xff] %v7574_v55  ;;  %7577 = vst [vmem:[%s16505_s10 + $0x1d8] sm:$0xff] %v7576_v53  ;;  %v7598_v50 = vld [vmem:[%s10038_s20 + $0x150] sm:$0xff]  ;;  %v7600_v45 = vld [vmem:[%s10038_s20 + $0x158] sm:$0xff] }
 0x725   : > { %7579 = vst [vmem:[%s16505_s10 + $0x200] sm:$0xff] %v7578_v38  ;;  %7581 = vst [vmem:[%s16505_s10 + $0x208] sm:$0xff] %v7580_v15  ;;  %v7602_v41 = vld [vmem:[%s10038_s20 + $0x160] sm:$0xff]  ;;  %v7604_v42 = vld [vmem:[%s10038_s20 + $0x168] sm:$0xff] }
 0x726   : > { %7583 = vst [vmem:[%s16505_s10 + $0x210] sm:$0xff] %v7582_v49  ;;  %7585 = vst [vmem:[%s16505_s10 + $0x218] sm:$0xff] %v7584_v34  ;;  %v7606_v27 = vld [vmem:[%s10038_s20 + $0x170] sm:$0xff]  ;;  %v7608_v63 = vld [vmem:[%s10038_s20 + $0x178] sm:$0xff] }
 0x727   : > { %7587 = vst [vmem:[%s16505_s10 + $0x240] sm:$0xff] %v7586_v60  ;;  %7589 = vst [vmem:[%s16505_s10 + $0x248] sm:$0xff] %v7588_v8  ;;  %v7610_v9 = vld [vmem:[%s10038_s20 + $0x180] sm:$0xff]  ;;  %v7612_v20 = vld [vmem:[%s10038_s20 + $0x188] sm:$0xff] }
 0x728   : > { %7591 = vst [vmem:[%s16505_s10 + $0x250] sm:$0xff] %v7590_v43  ;;  %7593 = vst [vmem:[%s16505_s10 + $0x258] sm:$0xff] %v7592_v30  ;;  %v7614_v24 = vld [vmem:[%s10038_s20 + $0x190] sm:$0xff]  ;;  %v7616_v40 = vld [vmem:[%s10038_s20 + $0x198] sm:$0xff] }
 0x729   : > { %7595 = vst [vmem:[%s16505_s10 + $0x280] sm:$0xff] %v7594_v62  ;;  %7597 = vst [vmem:[%s16505_s10 + $0x288] sm:$0xff] %v7596_v26  ;;  %v7618_v39 = vld [vmem:[%s10038_s20 + $0x1a0] sm:$0xff]  ;;  %v7620_v35 = vld [vmem:[%s10038_s20 + $0x1a8] sm:$0xff] }
 0x72a   : > { %7599 = vst [vmem:[%s16505_s10 + $0x290] sm:$0xff] %v7598_v50  ;;  %7601 = vst [vmem:[%s16505_s10 + $0x298] sm:$0xff] %v7600_v45  ;;  %v7622_v13 = vld [vmem:[%s10038_s20 + $0x1b0] sm:$0xff]  ;;  %v7624_v21 = vld [vmem:[%s10038_s20 + $0x1b8] sm:$0xff] }
 0x72b   : > { %7603 = vst [vmem:[%s16505_s10 + $0x2c0] sm:$0xff] %v7602_v41  ;;  %7605 = vst [vmem:[%s16505_s10 + $0x2c8] sm:$0xff] %v7604_v42  ;;  %v7626_v6 = vld [vmem:[%s10038_s20 + $0x1c0] sm:$0xff]  ;;  %v7628_v47 = vld [vmem:[%s10038_s20 + $0x1c8] sm:$0xff] }
 0x72c   : > { %7607 = vst [vmem:[%s16505_s10 + $0x2d0] sm:$0xff] %v7606_v27  ;;  %7609 = vst [vmem:[%s16505_s10 + $0x2d8] sm:$0xff] %v7608_v63  ;;  %v7630_v17 = vld [vmem:[%s10038_s20 + $0x1d0] sm:$0xff]  ;;  %v7632_v28 = vld [vmem:[%s10038_s20 + $0x1d8] sm:$0xff] }
 0x72d   : > { %7611 = vst [vmem:[%s16505_s10 + $0x300] sm:$0xff] %v7610_v9  ;;  %7613 = vst [vmem:[%s16505_s10 + $0x308] sm:$0xff] %v7612_v20  ;;  %v7634_v31 = vld [vmem:[%s10038_s20 + $0x1e0] sm:$0xff]  ;;  %v7636_v36 = vld [vmem:[%s10038_s20 + $0x1e8] sm:$0xff] }
 0x72e   : > { %7615 = vst [vmem:[%s16505_s10 + $0x310] sm:$0xff] %v7614_v24  ;;  %7617 = vst [vmem:[%s16505_s10 + $0x318] sm:$0xff] %v7616_v40  ;;  %v7638_v33 = vld [vmem:[%s10038_s20 + $0x1f0] sm:$0xff]  ;;  %v7640_v37 = vld [vmem:[%s10038_s20 + $0x1f8] sm:$0xff] }
 0x72f   : > { %7619 = vst [vmem:[%s16505_s10 + $0x340] sm:$0xff] %v7618_v39  ;;  %7621 = vst [vmem:[%s16505_s10 + $0x348] sm:$0xff] %v7620_v35  ;;  %v7642_v32 = vld [vmem:[%s10038_s20 + $0x200] sm:$0xff]  ;;  %v7644_v46 = vld [vmem:[%s10038_s20 + $0x208] sm:$0xff] }
 0x730   : > { %7623 = vst [vmem:[%s16505_s10 + $0x350] sm:$0xff] %v7622_v13  ;;  %7625 = vst [vmem:[%s16505_s10 + $0x358] sm:$0xff] %v7624_v21  ;;  %v7646_v18 = vld [vmem:[%s10038_s20 + $0x210] sm:$0xff]  ;;  %v7648_v10 = vld [vmem:[%s10038_s20 + $0x218] sm:$0xff] }
 0x731   : > { %7627 = vst [vmem:[%s16505_s10 + $0x380] sm:$0xff] %v7626_v6  ;;  %7629 = vst [vmem:[%s16505_s10 + $0x388] sm:$0xff] %v7628_v47  ;;  %v7650_v56 = vld [vmem:[%s10038_s20 + $0x220] sm:$0xff]  ;;  %v7652_v58 = vld [vmem:[%s10038_s20 + $0x228] sm:$0xff] }
 0x732   : > { %7631 = vst [vmem:[%s16505_s10 + $0x390] sm:$0xff] %v7630_v17  ;;  %7633 = vst [vmem:[%s16505_s10 + $0x398] sm:$0xff] %v7632_v28  ;;  %v7654_v52 = vld [vmem:[%s10038_s20 + $0x230] sm:$0xff]  ;;  %v7656_v19 = vld [vmem:[%s10038_s20 + $0x238] sm:$0xff] }
 0x733   : > { %7635 = vst [vmem:[%s16505_s10 + $0x3c0] sm:$0xff] %v7634_v31  ;;  %7637 = vst [vmem:[%s16505_s10 + $0x3c8] sm:$0xff] %v7636_v36  ;;  %v7658_v22 = vld [vmem:[%s10038_s20 + $0x240] sm:$0xff]  ;;  %v7660_v11 = vld [vmem:[%s10038_s20 + $0x248] sm:$0xff] }
 0x734   : > { %7639 = vst [vmem:[%s16505_s10 + $0x3d0] sm:$0xff] %v7638_v33  ;;  %7641 = vst [vmem:[%s16505_s10 + $0x3d8] sm:$0xff] %v7640_v37  ;;  %v7662_v61 = vld [vmem:[%s10038_s20 + $0x250] sm:$0xff]  ;;  %v7664_v5 = vld [vmem:[%s10038_s20 + $0x258] sm:$0xff] }
 0x735   : > { %7643 = vst [vmem:[%s16505_s10 + $0x400] sm:$0xff] %v7642_v32  ;;  %7645 = vst [vmem:[%s16505_s10 + $0x408] sm:$0xff] %v7644_v46  ;;  %v7666_v14 = vld [vmem:[%s10038_s20 + $0x260] sm:$0xff]  ;;  %v7668_v2 = vld [vmem:[%s10038_s20 + $0x268] sm:$0xff] }
 0x736   : > { %7647 = vst [vmem:[%s16505_s10 + $0x410] sm:$0xff] %v7646_v18  ;;  %7649 = vst [vmem:[%s16505_s10 + $0x418] sm:$0xff] %v7648_v10  ;;  %v7670_v7 = vld [vmem:[%s10038_s20 + $0x270] sm:$0xff]  ;;  %v7672_v51 = vld [vmem:[%s10038_s20 + $0x278] sm:$0xff] }
 0x737   : > { %7651 = vst [vmem:[%s16505_s10 + $0x440] sm:$0xff] %v7650_v56  ;;  %7653 = vst [vmem:[%s16505_s10 + $0x448] sm:$0xff] %v7652_v58  ;;  %v7674_v25 = vld [vmem:[%s10038_s20 + $0x280] sm:$0xff]  ;;  %v7676_v3 = vld [vmem:[%s10038_s20 + $0x288] sm:$0xff] }
 0x738   : > { %7655 = vst [vmem:[%s16505_s10 + $0x450] sm:$0xff] %v7654_v52  ;;  %7657 = vst [vmem:[%s16505_s10 + $0x458] sm:$0xff] %v7656_v19  ;;  %v7678_v4 = vld [vmem:[%s10038_s20 + $0x290] sm:$0xff]  ;;  %v7680_v23 = vld [vmem:[%s10038_s20 + $0x298] sm:$0xff] }
 0x739   : > { %7659 = vst [vmem:[%s16505_s10 + $0x480] sm:$0xff] %v7658_v22  ;;  %7661 = vst [vmem:[%s16505_s10 + $0x488] sm:$0xff] %v7660_v11  ;;  %v7682_v1 = vld [vmem:[%s10038_s20 + $0x2a0] sm:$0xff]  ;;  %v7684_v16 = vld [vmem:[%s10038_s20 + $0x2a8] sm:$0xff] }
 0x73a   : > { %7663 = vst [vmem:[%s16505_s10 + $0x490] sm:$0xff] %v7662_v61  ;;  %7665 = vst [vmem:[%s16505_s10 + $0x498] sm:$0xff] %v7664_v5  ;;  %v7686_v29 = vld [vmem:[%s10038_s20 + $0x2b0] sm:$0xff]  ;;  %v7688_v0 = vld [vmem:[%s10038_s20 + $0x2b8] sm:$0xff] }
 0x73b   : > { %7667 = vst [vmem:[%s16505_s10 + $0x4c0] sm:$0xff] %v7666_v14  ;;  %7669 = vst [vmem:[%s16505_s10 + $0x4c8] sm:$0xff] %v7668_v2  ;;  %v7690_v12 = vld [vmem:[%s10038_s20 + $0x2c0] sm:$0xff]  ;;  %v7692_v59 = vld [vmem:[%s10038_s20 + $0x2c8] sm:$0xff] }
 0x73c   : > { %7671 = vst [vmem:[%s16505_s10 + $0x4d0] sm:$0xff] %v7670_v7  ;;  %7673 = vst [vmem:[%s16505_s10 + $0x4d8] sm:$0xff] %v7672_v51  ;;  %v7694_v54 = vld [vmem:[%s10038_s20 + $0x2d0] sm:$0xff]  ;;  %v7696_v48 = vld [vmem:[%s10038_s20 + $0x2d8] sm:$0xff] }
 0x73d   : > { %7675 = vst [vmem:[%s16505_s10 + $0x500] sm:$0xff] %v7674_v25  ;;  %7677 = vst [vmem:[%s16505_s10 + $0x508] sm:$0xff] %v7676_v3  ;;  %v7698_v44 = vld [vmem:[%s10038_s20 + $0x2e0] sm:$0xff]  ;;  %v7700_v57 = vld [vmem:[%s10038_s20 + $0x2e8] sm:$0xff] }
 0x73e   : > { %7679 = vst [vmem:[%s16505_s10 + $0x510] sm:$0xff] %v7678_v4  ;;  %7681 = vst [vmem:[%s16505_s10 + $0x518] sm:$0xff] %v7680_v23  ;;  %v7702_v55 = vld [vmem:[%s10038_s20 + $0x2f0] sm:$0xff]  ;;  %v7704_v53 = vld [vmem:[%s10038_s20 + $0x2f8] sm:$0xff] }
 0x73f   : > { %7683 = vst [vmem:[%s16505_s10 + $0x540] sm:$0xff] %v7682_v1  ;;  %7685 = vst [vmem:[%s16505_s10 + $0x548] sm:$0xff] %v7684_v16  ;;  %v7706_v38 = vld [vmem:[%s10038_s20 + $0x300] sm:$0xff]  ;;  %v7708_v15 = vld [vmem:[%s10038_s20 + $0x308] sm:$0xff] }
 0x740   : > { %7687 = vst [vmem:[%s16505_s10 + $0x550] sm:$0xff] %v7686_v29  ;;  %7689 = vst [vmem:[%s16505_s10 + $0x558] sm:$0xff] %v7688_v0  ;;  %v7710_v49 = vld [vmem:[%s10038_s20 + $0x310] sm:$0xff]  ;;  %v7712_v34 = vld [vmem:[%s10038_s20 + $0x318] sm:$0xff] }
 0x741   : > { %7691 = vst [vmem:[%s16505_s10 + $0x580] sm:$0xff] %v7690_v12  ;;  %7693 = vst [vmem:[%s16505_s10 + $0x588] sm:$0xff] %v7692_v59  ;;  %v7714_v60 = vld [vmem:[%s10038_s20 + $0x320] sm:$0xff]  ;;  %v7716_v8 = vld [vmem:[%s10038_s20 + $0x328] sm:$0xff] }
 0x742   : > { %7695 = vst [vmem:[%s16505_s10 + $0x590] sm:$0xff] %v7694_v54  ;;  %7697 = vst [vmem:[%s16505_s10 + $0x598] sm:$0xff] %v7696_v48  ;;  %v7718_v43 = vld [vmem:[%s10038_s20 + $0x330] sm:$0xff]  ;;  %v7720_v30 = vld [vmem:[%s10038_s20 + $0x338] sm:$0xff] }
 0x743   : > { %7699 = vst [vmem:[%s16505_s10 + $0x5c0] sm:$0xff] %v7698_v44  ;;  %7701 = vst [vmem:[%s16505_s10 + $0x5c8] sm:$0xff] %v7700_v57  ;;  %v7722_v62 = vld [vmem:[%s10038_s20 + $0x340] sm:$0xff]  ;;  %v7724_v26 = vld [vmem:[%s10038_s20 + $0x348] sm:$0xff] }
 0x744   : > { %7703 = vst [vmem:[%s16505_s10 + $0x5d0] sm:$0xff] %v7702_v55  ;;  %7705 = vst [vmem:[%s16505_s10 + $0x5d8] sm:$0xff] %v7704_v53  ;;  %v7726_v50 = vld [vmem:[%s10038_s20 + $0x350] sm:$0xff]  ;;  %v7728_v45 = vld [vmem:[%s10038_s20 + $0x358] sm:$0xff] }
 0x745   : > { %7707 = vst [vmem:[%s16505_s10 + $0x600] sm:$0xff] %v7706_v38  ;;  %7709 = vst [vmem:[%s16505_s10 + $0x608] sm:$0xff] %v7708_v15  ;;  %v7730_v41 = vld [vmem:[%s10038_s20 + $0x360] sm:$0xff]  ;;  %v7732_v42 = vld [vmem:[%s10038_s20 + $0x368] sm:$0xff] }
 0x746   : > { %7711 = vst [vmem:[%s16505_s10 + $0x610] sm:$0xff] %v7710_v49  ;;  %7713 = vst [vmem:[%s16505_s10 + $0x618] sm:$0xff] %v7712_v34  ;;  %v7734_v27 = vld [vmem:[%s10038_s20 + $0x370] sm:$0xff]  ;;  %v7736_v63 = vld [vmem:[%s10038_s20 + $0x378] sm:$0xff] }
 0x747   : > { %7715 = vst [vmem:[%s16505_s10 + $0x640] sm:$0xff] %v7714_v60  ;;  %7717 = vst [vmem:[%s16505_s10 + $0x648] sm:$0xff] %v7716_v8  ;;  %v7738_v9 = vld [vmem:[%s10038_s20 + $0x380] sm:$0xff]  ;;  %v7740_v20 = vld [vmem:[%s10038_s20 + $0x388] sm:$0xff] }
 0x748   : > { %7719 = vst [vmem:[%s16505_s10 + $0x650] sm:$0xff] %v7718_v43  ;;  %7721 = vst [vmem:[%s16505_s10 + $0x658] sm:$0xff] %v7720_v30  ;;  %v7742_v24 = vld [vmem:[%s10038_s20 + $0x390] sm:$0xff]  ;;  %v7744_v40 = vld [vmem:[%s10038_s20 + $0x398] sm:$0xff] }
 0x749   : > { %7723 = vst [vmem:[%s16505_s10 + $0x680] sm:$0xff] %v7722_v62  ;;  %7725 = vst [vmem:[%s16505_s10 + $0x688] sm:$0xff] %v7724_v26  ;;  %v7746_v39 = vld [vmem:[%s10038_s20 + $0x3a0] sm:$0xff]  ;;  %v7748_v35 = vld [vmem:[%s10038_s20 + $0x3a8] sm:$0xff] }
 0x74a   : > { %7727 = vst [vmem:[%s16505_s10 + $0x690] sm:$0xff] %v7726_v50  ;;  %7729 = vst [vmem:[%s16505_s10 + $0x698] sm:$0xff] %v7728_v45  ;;  %v7750_v13 = vld [vmem:[%s10038_s20 + $0x3b0] sm:$0xff]  ;;  %v7752_v21 = vld [vmem:[%s10038_s20 + $0x3b8] sm:$0xff] }
 0x74b   : > { %7731 = vst [vmem:[%s16505_s10 + $0x6c0] sm:$0xff] %v7730_v41  ;;  %7733 = vst [vmem:[%s16505_s10 + $0x6c8] sm:$0xff] %v7732_v42  ;;  %v7754_v6 = vld [vmem:[%s10038_s20 + $0x3c0] sm:$0xff]  ;;  %v7756_v47 = vld [vmem:[%s10038_s20 + $0x3c8] sm:$0xff] }
 0x74c   : > { %7735 = vst [vmem:[%s16505_s10 + $0x6d0] sm:$0xff] %v7734_v27  ;;  %7737 = vst [vmem:[%s16505_s10 + $0x6d8] sm:$0xff] %v7736_v63  ;;  %v7758_v17 = vld [vmem:[%s10038_s20 + $0x3d0] sm:$0xff]  ;;  %v7760_v28 = vld [vmem:[%s10038_s20 + $0x3d8] sm:$0xff] }
 0x74d   : > { %7739 = vst [vmem:[%s16505_s10 + $0x700] sm:$0xff] %v7738_v9  ;;  %7741 = vst [vmem:[%s16505_s10 + $0x708] sm:$0xff] %v7740_v20  ;;  %v7762_v31 = vld [vmem:[%s10038_s20 + $0x3e0] sm:$0xff]  ;;  %v7764_v36 = vld [vmem:[%s10038_s20 + $0x3e8] sm:$0xff] }
 0x74e   : > { %7743 = vst [vmem:[%s16505_s10 + $0x710] sm:$0xff] %v7742_v24  ;;  %7745 = vst [vmem:[%s16505_s10 + $0x718] sm:$0xff] %v7744_v40  ;;  %v7766_v33 = vld [vmem:[%s10038_s20 + $0x3f0] sm:$0xff]  ;;  %v7768_v37 = vld [vmem:[%s10038_s20 + $0x3f8] sm:$0xff] }
 0x74f   : > { %7747 = vst [vmem:[%s16505_s10 + $0x740] sm:$0xff] %v7746_v39  ;;  %7749 = vst [vmem:[%s16505_s10 + $0x748] sm:$0xff] %v7748_v35 }
 0x750   : > { %7751 = vst [vmem:[%s16505_s10 + $0x750] sm:$0xff] %v7750_v13  ;;  %7753 = vst [vmem:[%s16505_s10 + $0x758] sm:$0xff] %v7752_v21 }
 0x751   : > { %7755 = vst [vmem:[%s16505_s10 + $0x780] sm:$0xff] %v7754_v6  ;;  %7757 = vst [vmem:[%s16505_s10 + $0x788] sm:$0xff] %v7756_v47 }
 0x752   : > { %7759 = vst [vmem:[%s16505_s10 + $0x790] sm:$0xff] %v7758_v17  ;;  %7761 = vst [vmem:[%s16505_s10 + $0x798] sm:$0xff] %v7760_v28 }
 0x753   : > { %7763 = vst [vmem:[%s16505_s10 + $0x7c0] sm:$0xff] %v7762_v31  ;;  %7765 = vst [vmem:[%s16505_s10 + $0x7c8] sm:$0xff] %v7764_v36 }
 0x754   : > { %7767 = vst [vmem:[%s16505_s10 + $0x7d0] sm:$0xff] %v7766_v33  ;;  %7769 = vst [vmem:[%s16505_s10 + $0x7d8] sm:$0xff] %v7768_v37 }
 0x755 PF: > { %s18_s9 = sadd.s32 1, %s9620_s9   ;;  %s18779_s29 = sld [smem:[#allocation14_spill]] }
 0x756   : > { %p15_p4 = scmp.ge.s32.totalorder %s18_s9, 6   ;;  %s18780_s26 = sld [smem:[#allocation8_spill]] }
 0x757   : > { %s18781_s27 = sld [smem:[#allocation13_spill]]  ;;  %s18782_s28 = sld [smem:[#allocation9_spill]] }
 0x758   : > { %s18783_s22 = sld [smem:[#allocation10_spill]]  ;;  %s18784_s30 = sld [smem:[#allocation11_spill]] }
 0x759   : > { %s18785_s8 = sld [smem:[#allocation12_spill]]  ;;  %s18786_s24 = smov %s9592_s25 }
 0x75a   :  { %17 = sbr.rel (!%p15_p4) target bundleno = 7 (0x7), region = 154 }
 0x75b   : > { %s18787_s25 = smov %s18779_s29 }
 0x75e   : > { %s18788_s29 = smov %s18783_s22 }

</bundles_post_ra>
